<compile_context>
chip_gen: v7x
topology: tpu7x:2x2x1
jax: 0.10.0
libtpu: 0.0.40
codegen_flags: <defaults>
</compile_context>

<pallas_src>
import jax
import jax.numpy as jnp
from jax.experimental import pallas as pl
from jax.experimental.pallas import tpu as pltpu


# ----------------------------------------------------------------------------
# Parameter construction (host side)
# ----------------------------------------------------------------------------
def make_bn_fold(key, C, eps=1e-5):
    """Eval-mode BatchNorm folded to per-channel scale/bias (shape (1, C), f32)."""
    k1, k2, k3, k4 = jax.random.split(key, 4)
    gamma = 1.0 + 0.1 * jax.random.normal(k1, (C,), jnp.float32)
    beta = 0.1 * jax.random.normal(k2, (C,), jnp.float32)
    mean = 0.1 * jax.random.normal(k3, (C,), jnp.float32)
    var = 1.0 + 0.1 * jax.random.uniform(k4, (C,), jnp.float32)
    scale = gamma / jnp.sqrt(var + eps)
    bias = beta - mean * scale
    return scale.reshape(1, C), bias.reshape(1, C)


def build_block_cfgs(cfg, in_channels=32):
    cfgs = []
    for expansion, out_channels, num_blocks, kernel_size, stride in zip(
            cfg['expansion'], cfg['out_channels'], cfg['num_blocks'],
            cfg['kernel_size'], cfg['stride']):
        strides = [stride] + [1] * (num_blocks - 1)
        for s in strides:
            cfgs.append(dict(in_c=in_channels, out_c=out_channels,
                             k=kernel_size, stride=s, expansion=expansion))
            in_channels = out_channels
    return cfgs


def init_params(cfg, key, num_classes=10):
    keys = iter(jax.random.split(key, 256))
    bf16 = jnp.bfloat16
    params = {}
    # stem conv1 (3x3, 3->32), rows ordered (tap-major, then input channel), bf16 MXU operand
    params['conv1_w'] = (0.1 * jax.random.normal(next(keys), (3 * 3 * 3, 32), jnp.float32)).astype(bf16)
    params['bn1'] = make_bn_fold(next(keys), 32)

    block_cfgs = build_block_cfgs(cfg)
    bparams = []
    for bc in block_cfgs:
        in_c, out_c, k, expansion = bc['in_c'], bc['out_c'], bc['k'], bc['expansion']
        channels = expansion * in_c
        se_c = int(in_c * 0.25)
        p = {}
        if expansion != 1:
            p['expand_w'] = (0.1 * jax.random.normal(next(keys), (in_c, channels), jnp.float32)).astype(bf16)
            p['bn1'] = make_bn_fold(next(keys), channels)
        p['dw_w'] = 0.1 * jax.random.normal(next(keys), (k * k, channels), jnp.float32)   # VPU -> f32
        p['bn2'] = make_bn_fold(next(keys), channels)
        p['se1_w'] = (0.1 * jax.random.normal(next(keys), (channels, se_c), jnp.float32)).astype(bf16)
        p['se1_b'] = 0.1 * jax.random.normal(next(keys), (1, se_c), jnp.float32)
        p['se2_w'] = (0.1 * jax.random.normal(next(keys), (se_c, channels), jnp.float32)).astype(bf16)
        p['se2_b'] = 0.1 * jax.random.normal(next(keys), (1, channels), jnp.float32)
        p['proj_w'] = (0.1 * jax.random.normal(next(keys), (channels, out_c), jnp.float32)).astype(bf16)
        p['bn3'] = make_bn_fold(next(keys), out_c)
        bparams.append(p)
    params['blocks'] = bparams

    emb_dim = cfg['out_channels'][-1]
    params['linear_w'] = (0.1 * jax.random.normal(next(keys), (emb_dim, num_classes), jnp.float32)).astype(bf16)
    params['linear_b'] = 0.1 * jax.random.normal(next(keys), (1, num_classes), jnp.float32)
    return params, block_cfgs


# ----------------------------------------------------------------------------
# Fused forward-pass kernel builder
# ----------------------------------------------------------------------------
def _block_geometry(block_cfgs, H0, W0):
    """Static per-block geometry + the single shared VMEM scratch layout."""
    infos = []
    H, W = H0, W0
    Hp_max = Wp_max = ch_max = 0
    for bc in block_cfgs:
        in_c, out_c = bc['in_c'], bc['out_c']
        k, s, exp = bc['k'], bc['stride'], bc['expansion']
        ch = exp * in_c
        pad = 1 if k == 3 else 2
        Ho = (H + 2 * pad - k) // s + 1
        Wo = (W + 2 * pad - k) // s + 1
        Hp = max(H + 2 * pad, (k - 1) + s * Ho)   # padded rows cover strided tap over-reads
        Wp = W + 2 * pad
        assert W % 8 == 0 and Wo % 8 == 0, "spatial widths must stay multiples of 8"
        infos.append(dict(in_c=in_c, out_c=out_c, k=k, s=s, pad=pad, exp=exp, ch=ch,
                          Hi=H, Wi=W, Ho=Ho, Wo=Wo, Hp=Hp, Wp=Wp,
                          has_skip=(s == 1 and in_c == out_c)))
        Hp_max, Wp_max, ch_max = max(Hp_max, Hp), max(Wp_max, Wp), max(ch_max, ch)
        H, W = Ho, Wo
    # one shared padding buffer reused by every block (max-of-blocks footprint)
    scratch_shapes = [pltpu.VMEM((Hp_max, Wp_max, ch_max), jnp.float32)]
    return infos, scratch_shapes


def build_forward(params, block_cfgs, x_shape_nchw, num_classes):
    N, Cin, H0, W0 = x_shape_nchw
    assert W0 % 8 == 0, "input width must be a multiple of 8"
    k0, p0 = 3, 1                                  # stem conv geometry
    Hp0, Wp0 = H0 + 2 * p0, W0 + 2 * p0
    C_stem = params['conv1_w'].shape[1]
    emb_dim = params['linear_w'].shape[0]
    infos, scratch_shapes = _block_geometry(block_cfgs, H0, W0)

    # flat, fixed parameter order (mirrored exactly by the kernel body)
    flat = [params['conv1_w'], params['bn1'][0], params['bn1'][1]]
    for p, bc in zip(params['blocks'], block_cfgs):
        if bc['expansion'] != 1:
            flat += [p['expand_w'], p['bn1'][0], p['bn1'][1]]
        flat += [p['dw_w'], p['bn2'][0], p['bn2'][1],
                 p['se1_w'], p['se1_b'], p['se2_w'], p['se2_b'],
                 p['proj_w'], p['bn3'][0], p['bn3'][1]]
    flat += [params['linear_w'], params['linear_b']]
    n_params = len(flat)

    def kernel(*refs):
        x_ref = refs[0]
        prm_iter = iter(refs[1:1 + n_params])
        logits_ref = refs[1 + n_params]
        emb_ref = refs[2 + n_params]
        pad_ref = refs[3 + n_params]               # shared depthwise padding scratch
        nxt = lambda: next(prm_iter)

        # ---- stem: 3x3 conv via in-kernel tap accumulation + folded BN + swish ----
        w_stem, s0, b0 = nxt(), nxt(), nxt()
        M0 = H0 * W0
        acc = jnp.zeros((M0, C_stem), jnp.float32)
        for di in range(k0):
            for dj in range(k0):
                t = di * k0 + dj
                xs = x_ref[0, di:di + H0, dj:dj + W0, :].reshape(M0, Cin)
                acc = acc + jnp.dot(xs.astype(jnp.bfloat16),
                                    w_stem[t * Cin:(t + 1) * Cin, :],
                                    preferred_element_type=jnp.float32)
        y = acc * s0[0] + b0[0]
        cur = y * jax.nn.sigmoid(y)                       # (H0*W0, C_stem) f32

        # ---- MBConv blocks: expand -> depthwise -> SE -> project -> skip (all fused) ----
        for info in infos:
            ch, k, s, pad = info['ch'], info['k'], info['s'], info['pad']
            Hi, Wi, Hp, Wp = info['Hi'], info['Wi'], info['Hp'], info['Wp']
            Ho, Wo = info['Ho'], info['Wo']
            x_in = cur                                    # (Hi*Wi, in_c) f32

            if info['exp'] != 1:
                we, s1, b1 = nxt(), nxt(), nxt()
                z = jnp.dot(x_in.astype(jnp.bfloat16), we[...],
                            preferred_element_type=jnp.float32)
                z = z * s1[0] + b1[0]
                y2d = z * jax.nn.sigmoid(z)               # (Hi*Wi, ch)
            else:
                y2d = x_in

            dw, s2, b2 = nxt(), nxt(), nxt()
            se1w, se1b, se2w, se2b = nxt(), nxt(), nxt(), nxt()
            pw, s3, b3 = nxt(), nxt(), nxt()

            # depthwise kxk conv + folded BN + swish; both strides applied at tap-read
            # time directly against the shared padding buffer.
            pad_ref[0:Hp, 0:Wp, 0:ch] = jnp.zeros((Hp, Wp, ch), jnp.float32)
            pad_ref[pad:pad + Hi, pad:pad + Wi, 0:ch] = y2d.reshape(Hi, Wi, ch)
            acc = jnp.zeros((Ho, Wo, ch), jnp.float32)
            for di in range(k):
                for dj in range(k):
                    if s == 1:
                        xs = pad_ref[di:di + Ho, dj:dj + Wo, 0:ch]
                    else:
                        # columns: strided sublane read; rows: over-read s*Ho rows
                        # and keep every s-th (leading-dim split only, no tile cross)
                        xs = pad_ref[di:di + s * Ho, pl.ds(dj, Wo, stride=s), 0:ch]
                        xs = xs.reshape(Ho, s, Wo, ch)[:, 0]
                    acc = acc + xs * dw[di * k + dj]
            yd = acc * s2[0] + b2[0]
            yd = yd * jax.nn.sigmoid(yd)                  # (Ho, Wo, ch)
            y2d = yd.reshape(Ho * Wo, ch)

            # squeeze-and-excitation, fused into the block
            pooled = jnp.mean(y2d, axis=0, keepdims=True)             # (1, ch)
            h = jnp.dot(pooled.astype(jnp.bfloat16), se1w[...],
                        preferred_element_type=jnp.float32) + se1b[...]
            h = h * jax.nn.sigmoid(h)
            g = jnp.dot(h.astype(jnp.bfloat16), se2w[...],
                        preferred_element_type=jnp.float32) + se2b[...]
            y2d = y2d * jax.nn.sigmoid(g)                              # channel gate

            # projection 1x1 conv + folded BN; residual fused into the epilogue
            out = jnp.dot(y2d.astype(jnp.bfloat16), pw[...],
                          preferred_element_type=jnp.float32)
            out = out * s3[0] + b3[0]
            if info['has_skip']:
                out = out + x_in
            cur = out                                     # (Ho*Wo, out_c)

        # ---- head: global average pool + linear, fused into the same kernel ----
        lw, lb = nxt(), nxt()
        emb = jnp.mean(cur, axis=0, keepdims=True)        # (1, emb_dim) f32
        emb_ref[0] = emb
        logits_ref[0] = jnp.dot(emb.astype(jnp.bfloat16), lw[...],
                                preferred_element_type=jnp.float32) + lb[...]

    def const_map(nd):
        return lambda n, _nd=nd: (0,) * _nd

    in_specs = [pl.BlockSpec((1, Hp0, Wp0, Cin), lambda n: (n, 0, 0, 0))]
    in_specs += [pl.BlockSpec(a.shape, const_map(a.ndim)) for a in flat]
    out_specs = (pl.BlockSpec((1, 1, num_classes), lambda n: (n, 0, 0)),
                 pl.BlockSpec((1, 1, emb_dim), lambda n: (n, 0, 0)))
    out_shape = (jax.ShapeDtypeStruct((N, 1, num_classes), jnp.float32),
                 jax.ShapeDtypeStruct((N, 1, emb_dim), jnp.float32))

    call = pl.pallas_call(
        kernel,
        out_shape=out_shape,
        grid=(N,),
        in_specs=in_specs,
        out_specs=out_specs,
        scratch_shapes=scratch_shapes,
        compiler_params=pltpu.CompilerParams(
            dimension_semantics=("parallel",)),   # batch split across TCs on v7x
    )

    @jax.jit
    def forward(x_nchw):
        # boundary: NCHW (PyTorch) -> NHWC (kernel layout) + stem zero-padding
        x = jnp.transpose(x_nchw, (0, 2, 3, 1)).astype(jnp.float32)
        xp = jnp.pad(x, ((0, 0), (p0, p0), (p0, p0), (0, 0)))
        logits3, emb3 = call(xp, *flat)
        return logits3[:, 0, :], emb3[:, 0, :]

    return forward


# ----------------------------------------------------------------------------
# Pure-JAX (XLA) reference with identical math (f32, same bf16-rounded weights)
# ----------------------------------------------------------------------------
def ref_forward(params, block_cfgs, x_nchw):
    f32 = jnp.float32
    x = jnp.transpose(x_nchw, (0, 2, 3, 1)).astype(f32)
    N, H, W, _ = x.shape
    w = params['conv1_w'].astype(f32)
    s0, b0 = params['bn1']
    xp = jnp.pad(x, ((0, 0), (1, 1), (1, 1), (0, 0)))
    acc = jnp.zeros((N, H, W, w.shape[1]), f32)
    for di in range(3):
        for dj in range(3):
            t = di * 3 + dj
            acc = acc + jnp.einsum('nhwc,cd->nhwd',
                                   xp[:, di:di + H, dj:dj + W, :], w[t * 3:(t + 1) * 3])
    y = acc * s0.reshape(1, 1, 1, -1) + b0.reshape(1, 1, 1, -1)
    out = y * jax.nn.sigmoid(y)

    for p, bc in zip(params['blocks'], block_cfgs):
        inp = out
        k, s, exp = bc['k'], bc['stride'], bc['expansion']
        pad = 1 if k == 3 else 2
        if exp != 1:
            s1, b1 = p['bn1']
            z = jnp.einsum('nhwc,cd->nhwd', out, p['expand_w'].astype(f32))
            z = z * s1.reshape(1, 1, 1, -1) + b1.reshape(1, 1, 1, -1)
            out = z * jax.nn.sigmoid(z)
        _, H_, W_, C_ = out.shape
        xp = jnp.pad(out, ((0, 0), (pad, pad), (pad, pad), (0, 0)))
        Hs1, Ws1 = H_ + 2 * pad - k + 1, W_ + 2 * pad - k + 1
        acc = jnp.zeros((N, Hs1, Ws1, C_), f32)
        for di in range(k):
            for dj in range(k):
                acc = acc + xp[:, di:di + Hs1, dj:dj + Ws1, :] * p['dw_w'][di * k + dj].reshape(1, 1, 1, -1)
        s2, b2 = p['bn2']
        y = acc * s2.reshape(1, 1, 1, -1) + b2.reshape(1, 1, 1, -1)
        y = y * jax.nn.sigmoid(y)
        if s > 1:
            y = y[:, ::s, ::s, :]
        pooled = jnp.mean(y, axis=(1, 2))
        h = pooled @ p['se1_w'].astype(f32) + p['se1_b']
        h = h * jax.nn.sigmoid(h)
        g = jax.nn.sigmoid(h @ p['se2_w'].astype(f32) + p['se2_b'])
        y = y * g[:, None, None, :]
        o = jnp.einsum('nhwc,cd->nhwd', y, p['proj_w'].astype(f32))
        s3, b3 = p['bn3']
        o = o * s3.reshape(1, 1, 1, -1) + b3.reshape(1, 1, 1, -1)
        if s == 1 and bc['in_c'] == bc['out_c']:
            o = o + inp
        out = o

    e = jnp.mean(out, axis=(1, 2))
    logits = e @ params['linear_w'].astype(f32) + params['linear_b']
    return logits, e


# ----------------------------------------------------------------------------
if __name__ == "__main__":
    cfg = {
        'num_blocks': [1, 2],
        'expansion': [1, 2],
        'out_channels': [16, 24],
        'kernel_size': [3, 5],
        'stride': [1, 2],
        'dropout_rate': 0.2,
        'drop_connect_rate': 0.2,
    }
    key = jax.random.PRNGKey(0)
    kp, kx = jax.random.split(key)
    params, block_cfgs = init_params(cfg, kp, num_classes=10)

    x = jax.random.normal(kx, (2, 3, 16, 16), jnp.float32)   # NCHW, like PyTorch

    forward = build_forward(params, block_cfgs, x.shape, num_classes=10)
    logits, emb = forward(x)
    logits = jax.block_until_ready(logits)
    emb = jax.block_until_ready(emb)

    assert logits.shape == (2, 10), logits.shape
    assert emb.shape == (2, cfg['out_channels'][-1]), emb.shape
    assert bool(jnp.all(jnp.isfinite(logits)))

    ref_logits, ref_emb = ref_forward(params, block_cfgs, x)
    max_err = float(jnp.max(jnp.abs(logits - ref_logits)))
    assert max_err < 5e-2, f"kernel/reference mismatch: {max_err}"

    print("KERNEL_OK")
</pallas_src>

<mosaic_0001>
module attributes {stable_mosaic.version = 11 : i64} {
  func.func @kernel(%arg0: i32, %arg1: memref<1x18x18x3xf32, #tpu.memory_space<vmem>>, %arg2: memref<27x32xbf16, #tpu.memory_space<vmem>>, %arg3: memref<1x32xf32, #tpu.memory_space<vmem>>, %arg4: memref<1x32xf32, #tpu.memory_space<vmem>>, %arg5: memref<9x32xf32, #tpu.memory_space<vmem>>, %arg6: memref<1x32xf32, #tpu.memory_space<vmem>>, %arg7: memref<1x32xf32, #tpu.memory_space<vmem>>, %arg8: memref<32x8xbf16, #tpu.memory_space<vmem>>, %arg9: memref<1x8xf32, #tpu.memory_space<vmem>>, %arg10: memref<8x32xbf16, #tpu.memory_space<vmem>>, %arg11: memref<1x32xf32, #tpu.memory_space<vmem>>, %arg12: memref<32x16xbf16, #tpu.memory_space<vmem>>, %arg13: memref<1x16xf32, #tpu.memory_space<vmem>>, %arg14: memref<1x16xf32, #tpu.memory_space<vmem>>, %arg15: memref<16x32xbf16, #tpu.memory_space<vmem>>, %arg16: memref<1x32xf32, #tpu.memory_space<vmem>>, %arg17: memref<1x32xf32, #tpu.memory_space<vmem>>, %arg18: memref<25x32xf32, #tpu.memory_space<vmem>>, %arg19: memref<1x32xf32, #tpu.memory_space<vmem>>, %arg20: memref<1x32xf32, #tpu.memory_space<vmem>>, %arg21: memref<32x4xbf16, #tpu.memory_space<vmem>>, %arg22: memref<1x4xf32, #tpu.memory_space<vmem>>, %arg23: memref<4x32xbf16, #tpu.memory_space<vmem>>, %arg24: memref<1x32xf32, #tpu.memory_space<vmem>>, %arg25: memref<32x24xbf16, #tpu.memory_space<vmem>>, %arg26: memref<1x24xf32, #tpu.memory_space<vmem>>, %arg27: memref<1x24xf32, #tpu.memory_space<vmem>>, %arg28: memref<24x48xbf16, #tpu.memory_space<vmem>>, %arg29: memref<1x48xf32, #tpu.memory_space<vmem>>, %arg30: memref<1x48xf32, #tpu.memory_space<vmem>>, %arg31: memref<25x48xf32, #tpu.memory_space<vmem>>, %arg32: memref<1x48xf32, #tpu.memory_space<vmem>>, %arg33: memref<1x48xf32, #tpu.memory_space<vmem>>, %arg34: memref<48x6xbf16, #tpu.memory_space<vmem>>, %arg35: memref<1x6xf32, #tpu.memory_space<vmem>>, %arg36: memref<6x48xbf16, #tpu.memory_space<vmem>>, %arg37: memref<1x48xf32, #tpu.memory_space<vmem>>, %arg38: memref<48x24xbf16, #tpu.memory_space<vmem>>, %arg39: memref<1x24xf32, #tpu.memory_space<vmem>>, %arg40: memref<1x24xf32, #tpu.memory_space<vmem>>, %arg41: memref<24x10xbf16, #tpu.memory_space<vmem>>, %arg42: memref<1x10xf32, #tpu.memory_space<vmem>>, %arg43: memref<1x1x10xf32, #tpu.memory_space<vmem>>, %arg44: memref<1x1x24xf32, #tpu.memory_space<vmem>>, %arg45: memref<20x20x48xf32, #tpu.memory_space<vmem>>) attributes {dimension_semantics = [#tpu.dimension_semantics<parallel>], iteration_bounds = array<i64: 2>, scalar_prefetch = 0 : i64, scratch_operands = 1 : i64, tpu.core_type = #tpu.core_type<tc>, window_params = [{transform_indices = @transform_0, window_bounds = array<i64: 1, 18, 18, 3>}, {pipeline_mode = #tpu.pipeline_mode<synchronous>, transform_indices = @transform_1, window_bounds = array<i64: 27, 32>}, {pipeline_mode = #tpu.pipeline_mode<synchronous>, transform_indices = @transform_2, window_bounds = array<i64: 1, 32>}, {pipeline_mode = #tpu.pipeline_mode<synchronous>, transform_indices = @transform_3, window_bounds = array<i64: 1, 32>}, {pipeline_mode = #tpu.pipeline_mode<synchronous>, transform_indices = @transform_4, window_bounds = array<i64: 9, 32>}, {pipeline_mode = #tpu.pipeline_mode<synchronous>, transform_indices = @transform_5, window_bounds = array<i64: 1, 32>}, {pipeline_mode = #tpu.pipeline_mode<synchronous>, transform_indices = @transform_6, window_bounds = array<i64: 1, 32>}, {pipeline_mode = #tpu.pipeline_mode<synchronous>, transform_indices = @transform_7, window_bounds = array<i64: 32, 8>}, {pipeline_mode = #tpu.pipeline_mode<synchronous>, transform_indices = @transform_8, window_bounds = array<i64: 1, 8>}, {pipeline_mode = #tpu.pipeline_mode<synchronous>, transform_indices = @transform_9, window_bounds = array<i64: 8, 32>}, {pipeline_mode = #tpu.pipeline_mode<synchronous>, transform_indices = @transform_10, window_bounds = array<i64: 1, 32>}, {pipeline_mode = #tpu.pipeline_mode<synchronous>, transform_indices = @transform_11, window_bounds = array<i64: 32, 16>}, {pipeline_mode = #tpu.pipeline_mode<synchronous>, transform_indices = @transform_12, window_bounds = array<i64: 1, 16>}, {pipeline_mode = #tpu.pipeline_mode<synchronous>, transform_indices = @transform_13, window_bounds = array<i64: 1, 16>}, {pipeline_mode = #tpu.pipeline_mode<synchronous>, transform_indices = @transform_14, window_bounds = array<i64: 16, 32>}, {pipeline_mode = #tpu.pipeline_mode<synchronous>, transform_indices = @transform_15, window_bounds = array<i64: 1, 32>}, {pipeline_mode = #tpu.pipeline_mode<synchronous>, transform_indices = @transform_16, window_bounds = array<i64: 1, 32>}, {pipeline_mode = #tpu.pipeline_mode<synchronous>, transform_indices = @transform_17, window_bounds = array<i64: 25, 32>}, {pipeline_mode = #tpu.pipeline_mode<synchronous>, transform_indices = @transform_18, window_bounds = array<i64: 1, 32>}, {pipeline_mode = #tpu.pipeline_mode<synchronous>, transform_indices = @transform_19, window_bounds = array<i64: 1, 32>}, {pipeline_mode = #tpu.pipeline_mode<synchronous>, transform_indices = @transform_20, window_bounds = array<i64: 32, 4>}, {pipeline_mode = #tpu.pipeline_mode<synchronous>, transform_indices = @transform_21, window_bounds = array<i64: 1, 4>}, {pipeline_mode = #tpu.pipeline_mode<synchronous>, transform_indices = @transform_22, window_bounds = array<i64: 4, 32>}, {pipeline_mode = #tpu.pipeline_mode<synchronous>, transform_indices = @transform_23, window_bounds = array<i64: 1, 32>}, {pipeline_mode = #tpu.pipeline_mode<synchronous>, transform_indices = @transform_24, window_bounds = array<i64: 32, 24>}, {pipeline_mode = #tpu.pipeline_mode<synchronous>, transform_indices = @transform_25, window_bounds = array<i64: 1, 24>}, {pipeline_mode = #tpu.pipeline_mode<synchronous>, transform_indices = @transform_26, window_bounds = array<i64: 1, 24>}, {pipeline_mode = #tpu.pipeline_mode<synchronous>, transform_indices = @transform_27, window_bounds = array<i64: 24, 48>}, {pipeline_mode = #tpu.pipeline_mode<synchronous>, transform_indices = @transform_28, window_bounds = array<i64: 1, 48>}, {pipeline_mode = #tpu.pipeline_mode<synchronous>, transform_indices = @transform_29, window_bounds = array<i64: 1, 48>}, {pipeline_mode = #tpu.pipeline_mode<synchronous>, transform_indices = @transform_30, window_bounds = array<i64: 25, 48>}, {pipeline_mode = #tpu.pipeline_mode<synchronous>, transform_indices = @transform_31, window_bounds = array<i64: 1, 48>}, {pipeline_mode = #tpu.pipeline_mode<synchronous>, transform_indices = @transform_32, window_bounds = array<i64: 1, 48>}, {pipeline_mode = #tpu.pipeline_mode<synchronous>, transform_indices = @transform_33, window_bounds = array<i64: 48, 6>}, {pipeline_mode = #tpu.pipeline_mode<synchronous>, transform_indices = @transform_34, window_bounds = array<i64: 1, 6>}, {pipeline_mode = #tpu.pipeline_mode<synchronous>, transform_indices = @transform_35, window_bounds = array<i64: 6, 48>}, {pipeline_mode = #tpu.pipeline_mode<synchronous>, transform_indices = @transform_36, window_bounds = array<i64: 1, 48>}, {pipeline_mode = #tpu.pipeline_mode<synchronous>, transform_indices = @transform_37, window_bounds = array<i64: 48, 24>}, {pipeline_mode = #tpu.pipeline_mode<synchronous>, transform_indices = @transform_38, window_bounds = array<i64: 1, 24>}, {pipeline_mode = #tpu.pipeline_mode<synchronous>, transform_indices = @transform_39, window_bounds = array<i64: 1, 24>}, {pipeline_mode = #tpu.pipeline_mode<synchronous>, transform_indices = @transform_40, window_bounds = array<i64: 24, 10>}, {pipeline_mode = #tpu.pipeline_mode<synchronous>, transform_indices = @transform_41, window_bounds = array<i64: 1, 10>}, {transform_indices = @transform_42, window_bounds = array<i64: 1, 1, 10>}, {transform_indices = @transform_43, window_bounds = array<i64: 1, 1, 24>}]} {
    %cst = arith.constant 0.000000e+00 : f32
    %0 = vector.broadcast %cst : f32 to vector<256x32xf32>
    %c0 = arith.constant 0 : index
    %c0_0 = arith.constant 0 : index
    %c0_1 = arith.constant 0 : index
    %c0_2 = arith.constant 0 : index
    %1 = vector.load %arg1[%c0, %c0_0, %c0_1, %c0_2] : memref<1x18x18x3xf32, #tpu.memory_space<vmem>>, vector<1x16x16x3xf32>
    %2 = vector.shape_cast %1 : vector<1x16x16x3xf32> to vector<16x16x3xf32>
    %3 = vector.shape_cast %2 : vector<16x16x3xf32> to vector<256x3xf32>
    %4 = arith.truncf %3 : vector<256x3xf32> to vector<256x3xbf16>
    %c0_3 = arith.constant 0 : index
    %c0_4 = arith.constant 0 : index
    %5 = vector.load %arg2[%c0_3, %c0_4] : memref<27x32xbf16, #tpu.memory_space<vmem>>, vector<3x32xbf16>
    %cst_5 = arith.constant dense<0.000000e+00> : vector<256x32xf32>
    %6 = tpu.matmul %4, %5, %cst_5 {dimension_numbers = #tpu.dot_dimension_numbers<[1], [0], [0], [1], [0, 0, 1, 1], [], []>} : vector<256x3xbf16>, vector<3x32xbf16>, vector<256x32xf32> -> vector<256x32xf32>
    %7 = arith.addf %0, %6 : vector<256x32xf32>
    %c0_6 = arith.constant 0 : index
    %c0_7 = arith.constant 0 : index
    %c1 = arith.constant 1 : index
    %c0_8 = arith.constant 0 : index
    %8 = vector.load %arg1[%c0_6, %c0_7, %c1, %c0_8] : memref<1x18x18x3xf32, #tpu.memory_space<vmem>>, vector<1x16x16x3xf32>
    %9 = vector.shape_cast %8 : vector<1x16x16x3xf32> to vector<16x16x3xf32>
    %10 = vector.shape_cast %9 : vector<16x16x3xf32> to vector<256x3xf32>
    %11 = arith.truncf %10 : vector<256x3xf32> to vector<256x3xbf16>
    %c3 = arith.constant 3 : index
    %c0_9 = arith.constant 0 : index
    %12 = vector.load %arg2[%c3, %c0_9] : memref<27x32xbf16, #tpu.memory_space<vmem>>, vector<3x32xbf16>
    %cst_10 = arith.constant dense<0.000000e+00> : vector<256x32xf32>
    %13 = tpu.matmul %11, %12, %cst_10 {dimension_numbers = #tpu.dot_dimension_numbers<[1], [0], [0], [1], [0, 0, 1, 1], [], []>} : vector<256x3xbf16>, vector<3x32xbf16>, vector<256x32xf32> -> vector<256x32xf32>
    %14 = arith.addf %7, %13 : vector<256x32xf32>
    %c0_11 = arith.constant 0 : index
    %c0_12 = arith.constant 0 : index
    %c2 = arith.constant 2 : index
    %c0_13 = arith.constant 0 : index
    %15 = vector.load %arg1[%c0_11, %c0_12, %c2, %c0_13] : memref<1x18x18x3xf32, #tpu.memory_space<vmem>>, vector<1x16x16x3xf32>
    %16 = vector.shape_cast %15 : vector<1x16x16x3xf32> to vector<16x16x3xf32>
    %17 = vector.shape_cast %16 : vector<16x16x3xf32> to vector<256x3xf32>
    %18 = arith.truncf %17 : vector<256x3xf32> to vector<256x3xbf16>
    %c6 = arith.constant 6 : index
    %c0_14 = arith.constant 0 : index
    %19 = vector.load %arg2[%c6, %c0_14] : memref<27x32xbf16, #tpu.memory_space<vmem>>, vector<3x32xbf16>
    %cst_15 = arith.constant dense<0.000000e+00> : vector<256x32xf32>
    %20 = tpu.matmul %18, %19, %cst_15 {dimension_numbers = #tpu.dot_dimension_numbers<[1], [0], [0], [1], [0, 0, 1, 1], [], []>} : vector<256x3xbf16>, vector<3x32xbf16>, vector<256x32xf32> -> vector<256x32xf32>
    %21 = arith.addf %14, %20 : vector<256x32xf32>
    %c0_16 = arith.constant 0 : index
    %c1_17 = arith.constant 1 : index
    %c0_18 = arith.constant 0 : index
    %c0_19 = arith.constant 0 : index
    %22 = vector.load %arg1[%c0_16, %c1_17, %c0_18, %c0_19] : memref<1x18x18x3xf32, #tpu.memory_space<vmem>>, vector<1x16x16x3xf32>
    %23 = vector.shape_cast %22 : vector<1x16x16x3xf32> to vector<16x16x3xf32>
    %24 = vector.shape_cast %23 : vector<16x16x3xf32> to vector<256x3xf32>
    %25 = arith.truncf %24 : vector<256x3xf32> to vector<256x3xbf16>
    %c9 = arith.constant 9 : index
    %c0_20 = arith.constant 0 : index
    %26 = vector.load %arg2[%c9, %c0_20] : memref<27x32xbf16, #tpu.memory_space<vmem>>, vector<3x32xbf16>
    %cst_21 = arith.constant dense<0.000000e+00> : vector<256x32xf32>
    %27 = tpu.matmul %25, %26, %cst_21 {dimension_numbers = #tpu.dot_dimension_numbers<[1], [0], [0], [1], [0, 0, 1, 1], [], []>} : vector<256x3xbf16>, vector<3x32xbf16>, vector<256x32xf32> -> vector<256x32xf32>
    %28 = arith.addf %21, %27 : vector<256x32xf32>
    %c0_22 = arith.constant 0 : index
    %c1_23 = arith.constant 1 : index
    %c1_24 = arith.constant 1 : index
    %c0_25 = arith.constant 0 : index
    %29 = vector.load %arg1[%c0_22, %c1_23, %c1_24, %c0_25] : memref<1x18x18x3xf32, #tpu.memory_space<vmem>>, vector<1x16x16x3xf32>
    %30 = vector.shape_cast %29 : vector<1x16x16x3xf32> to vector<16x16x3xf32>
    %31 = vector.shape_cast %30 : vector<16x16x3xf32> to vector<256x3xf32>
    %32 = arith.truncf %31 : vector<256x3xf32> to vector<256x3xbf16>
    %c12 = arith.constant 12 : index
    %c0_26 = arith.constant 0 : index
    %33 = vector.load %arg2[%c12, %c0_26] : memref<27x32xbf16, #tpu.memory_space<vmem>>, vector<3x32xbf16>
    %cst_27 = arith.constant dense<0.000000e+00> : vector<256x32xf32>
    %34 = tpu.matmul %32, %33, %cst_27 {dimension_numbers = #tpu.dot_dimension_numbers<[1], [0], [0], [1], [0, 0, 1, 1], [], []>} : vector<256x3xbf16>, vector<3x32xbf16>, vector<256x32xf32> -> vector<256x32xf32>
    %35 = arith.addf %28, %34 : vector<256x32xf32>
    %c0_28 = arith.constant 0 : index
    %c1_29 = arith.constant 1 : index
    %c2_30 = arith.constant 2 : index
    %c0_31 = arith.constant 0 : index
    %36 = vector.load %arg1[%c0_28, %c1_29, %c2_30, %c0_31] : memref<1x18x18x3xf32, #tpu.memory_space<vmem>>, vector<1x16x16x3xf32>
    %37 = vector.shape_cast %36 : vector<1x16x16x3xf32> to vector<16x16x3xf32>
    %38 = vector.shape_cast %37 : vector<16x16x3xf32> to vector<256x3xf32>
    %39 = arith.truncf %38 : vector<256x3xf32> to vector<256x3xbf16>
    %c15 = arith.constant 15 : index
    %c0_32 = arith.constant 0 : index
    %40 = vector.load %arg2[%c15, %c0_32] : memref<27x32xbf16, #tpu.memory_space<vmem>>, vector<3x32xbf16>
    %cst_33 = arith.constant dense<0.000000e+00> : vector<256x32xf32>
    %41 = tpu.matmul %39, %40, %cst_33 {dimension_numbers = #tpu.dot_dimension_numbers<[1], [0], [0], [1], [0, 0, 1, 1], [], []>} : vector<256x3xbf16>, vector<3x32xbf16>, vector<256x32xf32> -> vector<256x32xf32>
    %42 = arith.addf %35, %41 : vector<256x32xf32>
    %c0_34 = arith.constant 0 : index
    %c2_35 = arith.constant 2 : index
    %c0_36 = arith.constant 0 : index
    %c0_37 = arith.constant 0 : index
    %43 = vector.load %arg1[%c0_34, %c2_35, %c0_36, %c0_37] : memref<1x18x18x3xf32, #tpu.memory_space<vmem>>, vector<1x16x16x3xf32>
    %44 = vector.shape_cast %43 : vector<1x16x16x3xf32> to vector<16x16x3xf32>
    %45 = vector.shape_cast %44 : vector<16x16x3xf32> to vector<256x3xf32>
    %46 = arith.truncf %45 : vector<256x3xf32> to vector<256x3xbf16>
    %c18 = arith.constant 18 : index
    %c0_38 = arith.constant 0 : index
    %47 = vector.load %arg2[%c18, %c0_38] : memref<27x32xbf16, #tpu.memory_space<vmem>>, vector<3x32xbf16>
    %cst_39 = arith.constant dense<0.000000e+00> : vector<256x32xf32>
    %48 = tpu.matmul %46, %47, %cst_39 {dimension_numbers = #tpu.dot_dimension_numbers<[1], [0], [0], [1], [0, 0, 1, 1], [], []>} : vector<256x3xbf16>, vector<3x32xbf16>, vector<256x32xf32> -> vector<256x32xf32>
    %49 = arith.addf %42, %48 : vector<256x32xf32>
    %c0_40 = arith.constant 0 : index
    %c2_41 = arith.constant 2 : index
    %c1_42 = arith.constant 1 : index
    %c0_43 = arith.constant 0 : index
    %50 = vector.load %arg1[%c0_40, %c2_41, %c1_42, %c0_43] : memref<1x18x18x3xf32, #tpu.memory_space<vmem>>, vector<1x16x16x3xf32>
    %51 = vector.shape_cast %50 : vector<1x16x16x3xf32> to vector<16x16x3xf32>
    %52 = vector.shape_cast %51 : vector<16x16x3xf32> to vector<256x3xf32>
    %53 = arith.truncf %52 : vector<256x3xf32> to vector<256x3xbf16>
    %c21 = arith.constant 21 : index
    %c0_44 = arith.constant 0 : index
    %54 = vector.load %arg2[%c21, %c0_44] : memref<27x32xbf16, #tpu.memory_space<vmem>>, vector<3x32xbf16>
    %cst_45 = arith.constant dense<0.000000e+00> : vector<256x32xf32>
    %55 = tpu.matmul %53, %54, %cst_45 {dimension_numbers = #tpu.dot_dimension_numbers<[1], [0], [0], [1], [0, 0, 1, 1], [], []>} : vector<256x3xbf16>, vector<3x32xbf16>, vector<256x32xf32> -> vector<256x32xf32>
    %56 = arith.addf %49, %55 : vector<256x32xf32>
    %c0_46 = arith.constant 0 : index
    %c2_47 = arith.constant 2 : index
    %c2_48 = arith.constant 2 : index
    %c0_49 = arith.constant 0 : index
    %57 = vector.load %arg1[%c0_46, %c2_47, %c2_48, %c0_49] : memref<1x18x18x3xf32, #tpu.memory_space<vmem>>, vector<1x16x16x3xf32>
    %58 = vector.shape_cast %57 : vector<1x16x16x3xf32> to vector<16x16x3xf32>
    %59 = vector.shape_cast %58 : vector<16x16x3xf32> to vector<256x3xf32>
    %60 = arith.truncf %59 : vector<256x3xf32> to vector<256x3xbf16>
    %c24 = arith.constant 24 : index
    %c0_50 = arith.constant 0 : index
    %61 = vector.load %arg2[%c24, %c0_50] : memref<27x32xbf16, #tpu.memory_space<vmem>>, vector<3x32xbf16>
    %cst_51 = arith.constant dense<0.000000e+00> : vector<256x32xf32>
    %62 = tpu.matmul %60, %61, %cst_51 {dimension_numbers = #tpu.dot_dimension_numbers<[1], [0], [0], [1], [0, 0, 1, 1], [], []>} : vector<256x3xbf16>, vector<3x32xbf16>, vector<256x32xf32> -> vector<256x32xf32>
    %63 = arith.addf %56, %62 : vector<256x32xf32>
    %c0_52 = arith.constant 0 : index
    %c0_53 = arith.constant 0 : index
    %64 = vector.load %arg3[%c0_52, %c0_53] : memref<1x32xf32, #tpu.memory_space<vmem>>, vector<1x32xf32>
    %65 = vector.shape_cast %64 : vector<1x32xf32> to vector<32xf32>
    %66 = vector.shape_cast %65 : vector<32xf32> to vector<1x32xf32>
    %67 = vector.broadcast %66 : vector<1x32xf32> to vector<256x32xf32>
    %68 = arith.mulf %63, %67 : vector<256x32xf32>
    %c0_54 = arith.constant 0 : index
    %c0_55 = arith.constant 0 : index
    %69 = vector.load %arg4[%c0_54, %c0_55] : memref<1x32xf32, #tpu.memory_space<vmem>>, vector<1x32xf32>
    %70 = vector.shape_cast %69 : vector<1x32xf32> to vector<32xf32>
    %71 = vector.shape_cast %70 : vector<32xf32> to vector<1x32xf32>
    %72 = vector.broadcast %71 : vector<1x32xf32> to vector<256x32xf32>
    %73 = arith.addf %68, %72 : vector<256x32xf32>
    %74 = arith.negf %73 : vector<256x32xf32>
    %75 = math.exp %74 : vector<256x32xf32>
    %cst_56 = arith.constant 1.000000e+00 : f32
    %76 = vector.broadcast %cst_56 : f32 to vector<256x32xf32>
    %77 = arith.addf %76, %75 : vector<256x32xf32>
    %78 = arith.divf %76, %77 : vector<256x32xf32>
    %79 = arith.mulf %73, %78 : vector<256x32xf32>
    %cst_57 = arith.constant 0.000000e+00 : f32
    %80 = vector.broadcast %cst_57 : f32 to vector<18x18x32xf32>
    %c0_58 = arith.constant 0 : index
    %c0_59 = arith.constant 0 : index
    %c0_60 = arith.constant 0 : index
    %81 = vector.load %arg45[%c0_58, %c0_59, %c0_60] : memref<20x20x48xf32, #tpu.memory_space<vmem>>, vector<18x18x32xf32>
    tpu.vector_store %arg45[%c0_58, %c0_59, %c0_60], %80 {strides = array<i32>} : memref<20x20x48xf32, #tpu.memory_space<vmem>>, vector<18x18x32xf32>,
    %82 = vector.shape_cast %79 : vector<256x32xf32> to vector<16x16x32xf32>
    %c1_61 = arith.constant 1 : index
    %c1_62 = arith.constant 1 : index
    %c0_63 = arith.constant 0 : index
    %83 = vector.load %arg45[%c1_61, %c1_62, %c0_63] : memref<20x20x48xf32, #tpu.memory_space<vmem>>, vector<16x16x32xf32>
    tpu.vector_store %arg45[%c1_61, %c1_62, %c0_63], %82 {strides = array<i32>} : memref<20x20x48xf32, #tpu.memory_space<vmem>>, vector<16x16x32xf32>,
    %cst_64 = arith.constant 0.000000e+00 : f32
    %84 = vector.broadcast %cst_64 : f32 to vector<16x16x32xf32>
    %c0_65 = arith.constant 0 : index
    %c0_66 = arith.constant 0 : index
    %c0_67 = arith.constant 0 : index
    %85 = vector.load %arg45[%c0_65, %c0_66, %c0_67] : memref<20x20x48xf32, #tpu.memory_space<vmem>>, vector<16x16x32xf32>
    %c0_68 = arith.constant 0 : index
    %c0_69 = arith.constant 0 : index
    %86 = vector.load %arg5[%c0_68, %c0_69] : memref<9x32xf32, #tpu.memory_space<vmem>>, vector<1x32xf32>
    %87 = vector.shape_cast %86 : vector<1x32xf32> to vector<32xf32>
    %88 = vector.shape_cast %87 : vector<32xf32> to vector<1x1x32xf32>
    %89 = vector.broadcast %88 : vector<1x1x32xf32> to vector<16x16x32xf32>
    %90 = arith.mulf %85, %89 : vector<16x16x32xf32>
    %91 = arith.addf %84, %90 : vector<16x16x32xf32>
    %c0_70 = arith.constant 0 : index
    %c1_71 = arith.constant 1 : index
    %c0_72 = arith.constant 0 : index
    %92 = vector.load %arg45[%c0_70, %c1_71, %c0_72] : memref<20x20x48xf32, #tpu.memory_space<vmem>>, vector<16x16x32xf32>
    %c1_73 = arith.constant 1 : index
    %c0_74 = arith.constant 0 : index
    %93 = vector.load %arg5[%c1_73, %c0_74] : memref<9x32xf32, #tpu.memory_space<vmem>>, vector<1x32xf32>
    %94 = vector.shape_cast %93 : vector<1x32xf32> to vector<32xf32>
    %95 = vector.shape_cast %94 : vector<32xf32> to vector<1x1x32xf32>
    %96 = vector.broadcast %95 : vector<1x1x32xf32> to vector<16x16x32xf32>
    %97 = arith.mulf %92, %96 : vector<16x16x32xf32>
    %98 = arith.addf %91, %97 : vector<16x16x32xf32>
    %c0_75 = arith.constant 0 : index
    %c2_76 = arith.constant 2 : index
    %c0_77 = arith.constant 0 : index
    %99 = vector.load %arg45[%c0_75, %c2_76, %c0_77] : memref<20x20x48xf32, #tpu.memory_space<vmem>>, vector<16x16x32xf32>
    %c2_78 = arith.constant 2 : index
    %c0_79 = arith.constant 0 : index
    %100 = vector.load %arg5[%c2_78, %c0_79] : memref<9x32xf32, #tpu.memory_space<vmem>>, vector<1x32xf32>
    %101 = vector.shape_cast %100 : vector<1x32xf32> to vector<32xf32>
    %102 = vector.shape_cast %101 : vector<32xf32> to vector<1x1x32xf32>
    %103 = vector.broadcast %102 : vector<1x1x32xf32> to vector<16x16x32xf32>
    %104 = arith.mulf %99, %103 : vector<16x16x32xf32>
    %105 = arith.addf %98, %104 : vector<16x16x32xf32>
    %c1_80 = arith.constant 1 : index
    %c0_81 = arith.constant 0 : index
    %c0_82 = arith.constant 0 : index
    %106 = vector.load %arg45[%c1_80, %c0_81, %c0_82] : memref<20x20x48xf32, #tpu.memory_space<vmem>>, vector<16x16x32xf32>
    %c3_83 = arith.constant 3 : index
    %c0_84 = arith.constant 0 : index
    %107 = vector.load %arg5[%c3_83, %c0_84] : memref<9x32xf32, #tpu.memory_space<vmem>>, vector<1x32xf32>
    %108 = vector.shape_cast %107 : vector<1x32xf32> to vector<32xf32>
    %109 = vector.shape_cast %108 : vector<32xf32> to vector<1x1x32xf32>
    %110 = vector.broadcast %109 : vector<1x1x32xf32> to vector<16x16x32xf32>
    %111 = arith.mulf %106, %110 : vector<16x16x32xf32>
    %112 = arith.addf %105, %111 : vector<16x16x32xf32>
    %c1_85 = arith.constant 1 : index
    %c1_86 = arith.constant 1 : index
    %c0_87 = arith.constant 0 : index
    %113 = vector.load %arg45[%c1_85, %c1_86, %c0_87] : memref<20x20x48xf32, #tpu.memory_space<vmem>>, vector<16x16x32xf32>
    %c4 = arith.constant 4 : index
    %c0_88 = arith.constant 0 : index
    %114 = vector.load %arg5[%c4, %c0_88] : memref<9x32xf32, #tpu.memory_space<vmem>>, vector<1x32xf32>
    %115 = vector.shape_cast %114 : vector<1x32xf32> to vector<32xf32>
    %116 = vector.shape_cast %115 : vector<32xf32> to vector<1x1x32xf32>
    %117 = vector.broadcast %116 : vector<1x1x32xf32> to vector<16x16x32xf32>
    %118 = arith.mulf %113, %117 : vector<16x16x32xf32>
    %119 = arith.addf %112, %118 : vector<16x16x32xf32>
    %c1_89 = arith.constant 1 : index
    %c2_90 = arith.constant 2 : index
    %c0_91 = arith.constant 0 : index
    %120 = vector.load %arg45[%c1_89, %c2_90, %c0_91] : memref<20x20x48xf32, #tpu.memory_space<vmem>>, vector<16x16x32xf32>
    %c5 = arith.constant 5 : index
    %c0_92 = arith.constant 0 : index
    %121 = vector.load %arg5[%c5, %c0_92] : memref<9x32xf32, #tpu.memory_space<vmem>>, vector<1x32xf32>
    %122 = vector.shape_cast %121 : vector<1x32xf32> to vector<32xf32>
    %123 = vector.shape_cast %122 : vector<32xf32> to vector<1x1x32xf32>
    %124 = vector.broadcast %123 : vector<1x1x32xf32> to vector<16x16x32xf32>
    %125 = arith.mulf %120, %124 : vector<16x16x32xf32>
    %126 = arith.addf %119, %125 : vector<16x16x32xf32>
    %c2_93 = arith.constant 2 : index
    %c0_94 = arith.constant 0 : index
    %c0_95 = arith.constant 0 : index
    %127 = vector.load %arg45[%c2_93, %c0_94, %c0_95] : memref<20x20x48xf32, #tpu.memory_space<vmem>>, vector<16x16x32xf32>
    %c6_96 = arith.constant 6 : index
    %c0_97 = arith.constant 0 : index
    %128 = vector.load %arg5[%c6_96, %c0_97] : memref<9x32xf32, #tpu.memory_space<vmem>>, vector<1x32xf32>
    %129 = vector.shape_cast %128 : vector<1x32xf32> to vector<32xf32>
    %130 = vector.shape_cast %129 : vector<32xf32> to vector<1x1x32xf32>
    %131 = vector.broadcast %130 : vector<1x1x32xf32> to vector<16x16x32xf32>
    %132 = arith.mulf %127, %131 : vector<16x16x32xf32>
    %133 = arith.addf %126, %132 : vector<16x16x32xf32>
    %c2_98 = arith.constant 2 : index
    %c1_99 = arith.constant 1 : index
    %c0_100 = arith.constant 0 : index
    %134 = vector.load %arg45[%c2_98, %c1_99, %c0_100] : memref<20x20x48xf32, #tpu.memory_space<vmem>>, vector<16x16x32xf32>
    %c7 = arith.constant 7 : index
    %c0_101 = arith.constant 0 : index
    %135 = vector.load %arg5[%c7, %c0_101] : memref<9x32xf32, #tpu.memory_space<vmem>>, vector<1x32xf32>
    %136 = vector.shape_cast %135 : vector<1x32xf32> to vector<32xf32>
    %137 = vector.shape_cast %136 : vector<32xf32> to vector<1x1x32xf32>
    %138 = vector.broadcast %137 : vector<1x1x32xf32> to vector<16x16x32xf32>
    %139 = arith.mulf %134, %138 : vector<16x16x32xf32>
    %140 = arith.addf %133, %139 : vector<16x16x32xf32>
    %c2_102 = arith.constant 2 : index
    %c2_103 = arith.constant 2 : index
    %c0_104 = arith.constant 0 : index
    %141 = vector.load %arg45[%c2_102, %c2_103, %c0_104] : memref<20x20x48xf32, #tpu.memory_space<vmem>>, vector<16x16x32xf32>
    %c8 = arith.constant 8 : index
    %c0_105 = arith.constant 0 : index
    %142 = vector.load %arg5[%c8, %c0_105] : memref<9x32xf32, #tpu.memory_space<vmem>>, vector<1x32xf32>
    %143 = vector.shape_cast %142 : vector<1x32xf32> to vector<32xf32>
    %144 = vector.shape_cast %143 : vector<32xf32> to vector<1x1x32xf32>
    %145 = vector.broadcast %144 : vector<1x1x32xf32> to vector<16x16x32xf32>
    %146 = arith.mulf %141, %145 : vector<16x16x32xf32>
    %147 = arith.addf %140, %146 : vector<16x16x32xf32>
    %c0_106 = arith.constant 0 : index
    %c0_107 = arith.constant 0 : index
    %148 = vector.load %arg6[%c0_106, %c0_107] : memref<1x32xf32, #tpu.memory_space<vmem>>, vector<1x32xf32>
    %149 = vector.shape_cast %148 : vector<1x32xf32> to vector<32xf32>
    %150 = vector.shape_cast %149 : vector<32xf32> to vector<1x1x32xf32>
    %151 = vector.broadcast %150 : vector<1x1x32xf32> to vector<16x16x32xf32>
    %152 = arith.mulf %147, %151 : vector<16x16x32xf32>
    %c0_108 = arith.constant 0 : index
    %c0_109 = arith.constant 0 : index
    %153 = vector.load %arg7[%c0_108, %c0_109] : memref<1x32xf32, #tpu.memory_space<vmem>>, vector<1x32xf32>
    %154 = vector.shape_cast %153 : vector<1x32xf32> to vector<32xf32>
    %155 = vector.shape_cast %154 : vector<32xf32> to vector<1x1x32xf32>
    %156 = vector.broadcast %155 : vector<1x1x32xf32> to vector<16x16x32xf32>
    %157 = arith.addf %152, %156 : vector<16x16x32xf32>
    %158 = arith.negf %157 : vector<16x16x32xf32>
    %159 = math.exp %158 : vector<16x16x32xf32>
    %cst_110 = arith.constant 1.000000e+00 : f32
    %160 = vector.broadcast %cst_110 : f32 to vector<16x16x32xf32>
    %161 = arith.addf %160, %159 : vector<16x16x32xf32>
    %162 = arith.divf %160, %161 : vector<16x16x32xf32>
    %163 = arith.mulf %157, %162 : vector<16x16x32xf32>
    %164 = vector.shape_cast %163 : vector<16x16x32xf32> to vector<256x32xf32>
    %cst_111 = arith.constant dense<0.000000e+00> : vector<32xf32>
    %165 = vector.multi_reduction <add>, %164, %cst_111 [0] : vector<256x32xf32> to vector<32xf32>
    %166 = vector.shape_cast %165 : vector<32xf32> to vector<1x32xf32>
    %cst_112 = arith.constant 2.560000e+02 : f32
    %167 = vector.broadcast %cst_112 : f32 to vector<1x32xf32>
    %168 = arith.divf %166, %167 : vector<1x32xf32>
    %169 = arith.truncf %168 : vector<1x32xf32> to vector<1x32xbf16>
    %c0_113 = arith.constant 0 : index
    %c0_114 = arith.constant 0 : index
    %170 = vector.load %arg8[%c0_113, %c0_114] : memref<32x8xbf16, #tpu.memory_space<vmem>>, vector<32x8xbf16>
    %cst_115 = arith.constant dense<0.000000e+00> : vector<1x8xf32>
    %171 = tpu.matmul %169, %170, %cst_115 {dimension_numbers = #tpu.dot_dimension_numbers<[1], [0], [0], [1], [0, 0, 1, 1], [], []>} : vector<1x32xbf16>, vector<32x8xbf16>, vector<1x8xf32> -> vector<1x8xf32>
    %c0_116 = arith.constant 0 : index
    %c0_117 = arith.constant 0 : index
    %172 = vector.load %arg9[%c0_116, %c0_117] : memref<1x8xf32, #tpu.memory_space<vmem>>, vector<1x8xf32>
    %173 = arith.addf %171, %172 : vector<1x8xf32>
    %174 = arith.negf %173 : vector<1x8xf32>
    %175 = math.exp %174 : vector<1x8xf32>
    %cst_118 = arith.constant 1.000000e+00 : f32
    %176 = vector.broadcast %cst_118 : f32 to vector<1x8xf32>
    %177 = arith.addf %176, %175 : vector<1x8xf32>
    %178 = arith.divf %176, %177 : vector<1x8xf32>
    %179 = arith.mulf %173, %178 : vector<1x8xf32>
    %180 = arith.truncf %179 : vector<1x8xf32> to vector<1x8xbf16>
    %c0_119 = arith.constant 0 : index
    %c0_120 = arith.constant 0 : index
    %181 = vector.load %arg10[%c0_119, %c0_120] : memref<8x32xbf16, #tpu.memory_space<vmem>>, vector<8x32xbf16>
    %cst_121 = arith.constant dense<0.000000e+00> : vector<1x32xf32>
    %182 = tpu.matmul %180, %181, %cst_121 {dimension_numbers = #tpu.dot_dimension_numbers<[1], [0], [0], [1], [0, 0, 1, 1], [], []>} : vector<1x8xbf16>, vector<8x32xbf16>, vector<1x32xf32> -> vector<1x32xf32>
    %c0_122 = arith.constant 0 : index
    %c0_123 = arith.constant 0 : index
    %183 = vector.load %arg11[%c0_122, %c0_123] : memref<1x32xf32, #tpu.memory_space<vmem>>, vector<1x32xf32>
    %184 = arith.addf %182, %183 : vector<1x32xf32>
    %185 = arith.negf %184 : vector<1x32xf32>
    %186 = math.exp %185 : vector<1x32xf32>
    %cst_124 = arith.constant 1.000000e+00 : f32
    %187 = vector.broadcast %cst_124 : f32 to vector<1x32xf32>
    %188 = arith.addf %187, %186 : vector<1x32xf32>
    %189 = arith.divf %187, %188 : vector<1x32xf32>
    %190 = vector.broadcast %189 : vector<1x32xf32> to vector<256x32xf32>
    %191 = arith.mulf %164, %190 : vector<256x32xf32>
    %192 = arith.truncf %191 : vector<256x32xf32> to vector<256x32xbf16>
    %c0_125 = arith.constant 0 : index
    %c0_126 = arith.constant 0 : index
    %193 = vector.load %arg12[%c0_125, %c0_126] : memref<32x16xbf16, #tpu.memory_space<vmem>>, vector<32x16xbf16>
    %cst_127 = arith.constant dense<0.000000e+00> : vector<256x16xf32>
    %194 = tpu.matmul %192, %193, %cst_127 {dimension_numbers = #tpu.dot_dimension_numbers<[1], [0], [0], [1], [0, 0, 1, 1], [], []>} : vector<256x32xbf16>, vector<32x16xbf16>, vector<256x16xf32> -> vector<256x16xf32>
    %c0_128 = arith.constant 0 : index
    %c0_129 = arith.constant 0 : index
    %195 = vector.load %arg13[%c0_128, %c0_129] : memref<1x16xf32, #tpu.memory_space<vmem>>, vector<1x16xf32>
    %196 = vector.shape_cast %195 : vector<1x16xf32> to vector<16xf32>
    %197 = vector.shape_cast %196 : vector<16xf32> to vector<1x16xf32>
    %198 = vector.broadcast %197 : vector<1x16xf32> to vector<256x16xf32>
    %199 = arith.mulf %194, %198 : vector<256x16xf32>
    %c0_130 = arith.constant 0 : index
    %c0_131 = arith.constant 0 : index
    %200 = vector.load %arg14[%c0_130, %c0_131] : memref<1x16xf32, #tpu.memory_space<vmem>>, vector<1x16xf32>
    %201 = vector.shape_cast %200 : vector<1x16xf32> to vector<16xf32>
    %202 = vector.shape_cast %201 : vector<16xf32> to vector<1x16xf32>
    %203 = vector.broadcast %202 : vector<1x16xf32> to vector<256x16xf32>
    %204 = arith.addf %199, %203 : vector<256x16xf32>
    %205 = arith.truncf %204 : vector<256x16xf32> to vector<256x16xbf16>
    %c0_132 = arith.constant 0 : index
    %c0_133 = arith.constant 0 : index
    %206 = vector.load %arg15[%c0_132, %c0_133] : memref<16x32xbf16, #tpu.memory_space<vmem>>, vector<16x32xbf16>
    %cst_134 = arith.constant dense<0.000000e+00> : vector<256x32xf32>
    %207 = tpu.matmul %205, %206, %cst_134 {dimension_numbers = #tpu.dot_dimension_numbers<[1], [0], [0], [1], [0, 0, 1, 1], [], []>} : vector<256x16xbf16>, vector<16x32xbf16>, vector<256x32xf32> -> vector<256x32xf32>
    %c0_135 = arith.constant 0 : index
    %c0_136 = arith.constant 0 : index
    %208 = vector.load %arg16[%c0_135, %c0_136] : memref<1x32xf32, #tpu.memory_space<vmem>>, vector<1x32xf32>
    %209 = vector.shape_cast %208 : vector<1x32xf32> to vector<32xf32>
    %210 = vector.shape_cast %209 : vector<32xf32> to vector<1x32xf32>
    %211 = vector.broadcast %210 : vector<1x32xf32> to vector<256x32xf32>
    %212 = arith.mulf %207, %211 : vector<256x32xf32>
    %c0_137 = arith.constant 0 : index
    %c0_138 = arith.constant 0 : index
    %213 = vector.load %arg17[%c0_137, %c0_138] : memref<1x32xf32, #tpu.memory_space<vmem>>, vector<1x32xf32>
    %214 = vector.shape_cast %213 : vector<1x32xf32> to vector<32xf32>
    %215 = vector.shape_cast %214 : vector<32xf32> to vector<1x32xf32>
    %216 = vector.broadcast %215 : vector<1x32xf32> to vector<256x32xf32>
    %217 = arith.addf %212, %216 : vector<256x32xf32>
    %218 = arith.negf %217 : vector<256x32xf32>
    %219 = math.exp %218 : vector<256x32xf32>
    %cst_139 = arith.constant 1.000000e+00 : f32
    %220 = vector.broadcast %cst_139 : f32 to vector<256x32xf32>
    %221 = arith.addf %220, %219 : vector<256x32xf32>
    %222 = arith.divf %220, %221 : vector<256x32xf32>
    %223 = arith.mulf %217, %222 : vector<256x32xf32>
    %cst_140 = arith.constant 0.000000e+00 : f32
    %224 = vector.broadcast %cst_140 : f32 to vector<20x20x32xf32>
    %c0_141 = arith.constant 0 : index
    %c0_142 = arith.constant 0 : index
    %c0_143 = arith.constant 0 : index
    %225 = vector.load %arg45[%c0_141, %c0_142, %c0_143] : memref<20x20x48xf32, #tpu.memory_space<vmem>>, vector<20x20x32xf32>
    tpu.vector_store %arg45[%c0_141, %c0_142, %c0_143], %224 {strides = array<i32>} : memref<20x20x48xf32, #tpu.memory_space<vmem>>, vector<20x20x32xf32>,
    %226 = vector.shape_cast %223 : vector<256x32xf32> to vector<16x16x32xf32>
    %c2_144 = arith.constant 2 : index
    %c2_145 = arith.constant 2 : index
    %c0_146 = arith.constant 0 : index
    %227 = vector.load %arg45[%c2_144, %c2_145, %c0_146] : memref<20x20x48xf32, #tpu.memory_space<vmem>>, vector<16x16x32xf32>
    tpu.vector_store %arg45[%c2_144, %c2_145, %c0_146], %226 {strides = array<i32>} : memref<20x20x48xf32, #tpu.memory_space<vmem>>, vector<16x16x32xf32>,
    %cst_147 = arith.constant 0.000000e+00 : f32
    %228 = vector.broadcast %cst_147 : f32 to vector<8x8x32xf32>
    %c0_148 = arith.constant 0 : index
    %c0_149 = arith.constant 0 : index
    %c0_150 = arith.constant 0 : index
    %229 = tpu.strided_load %arg45[%c0_148, %c0_149, %c0_150] {strides = array<i32: 1, 2, 1>} : memref<20x20x48xf32, #tpu.memory_space<vmem>>, vector<16x8x32xf32>
    %230 = vector.shape_cast %229 : vector<16x8x32xf32> to vector<8x2x8x32xf32>
    %231 = vector.extract_strided_slice %230 {offsets = [0, 0, 0, 0], sizes = [8, 1, 8, 32], strides = [1, 1, 1, 1]} : vector<8x2x8x32xf32> to vector<8x1x8x32xf32>
    %232 = vector.shape_cast %231 : vector<8x1x8x32xf32> to vector<8x8x32xf32>
    %c0_151 = arith.constant 0 : index
    %c0_152 = arith.constant 0 : index
    %233 = vector.load %arg18[%c0_151, %c0_152] : memref<25x32xf32, #tpu.memory_space<vmem>>, vector<1x32xf32>
    %234 = vector.shape_cast %233 : vector<1x32xf32> to vector<32xf32>
    %235 = vector.shape_cast %234 : vector<32xf32> to vector<1x1x32xf32>
    %236 = vector.broadcast %235 : vector<1x1x32xf32> to vector<8x8x32xf32>
    %237 = arith.mulf %232, %236 : vector<8x8x32xf32>
    %238 = arith.addf %228, %237 : vector<8x8x32xf32>
    %c0_153 = arith.constant 0 : index
    %c1_154 = arith.constant 1 : index
    %c0_155 = arith.constant 0 : index
    %239 = tpu.strided_load %arg45[%c0_153, %c1_154, %c0_155] {strides = array<i32: 1, 2, 1>} : memref<20x20x48xf32, #tpu.memory_space<vmem>>, vector<16x8x32xf32>
    %240 = vector.shape_cast %239 : vector<16x8x32xf32> to vector<8x2x8x32xf32>
    %241 = vector.extract_strided_slice %240 {offsets = [0, 0, 0, 0], sizes = [8, 1, 8, 32], strides = [1, 1, 1, 1]} : vector<8x2x8x32xf32> to vector<8x1x8x32xf32>
    %242 = vector.shape_cast %241 : vector<8x1x8x32xf32> to vector<8x8x32xf32>
    %c1_156 = arith.constant 1 : index
    %c0_157 = arith.constant 0 : index
    %243 = vector.load %arg18[%c1_156, %c0_157] : memref<25x32xf32, #tpu.memory_space<vmem>>, vector<1x32xf32>
    %244 = vector.shape_cast %243 : vector<1x32xf32> to vector<32xf32>
    %245 = vector.shape_cast %244 : vector<32xf32> to vector<1x1x32xf32>
    %246 = vector.broadcast %245 : vector<1x1x32xf32> to vector<8x8x32xf32>
    %247 = arith.mulf %242, %246 : vector<8x8x32xf32>
    %248 = arith.addf %238, %247 : vector<8x8x32xf32>
    %c0_158 = arith.constant 0 : index
    %c2_159 = arith.constant 2 : index
    %c0_160 = arith.constant 0 : index
    %249 = tpu.strided_load %arg45[%c0_158, %c2_159, %c0_160] {strides = array<i32: 1, 2, 1>} : memref<20x20x48xf32, #tpu.memory_space<vmem>>, vector<16x8x32xf32>
    %250 = vector.shape_cast %249 : vector<16x8x32xf32> to vector<8x2x8x32xf32>
    %251 = vector.extract_strided_slice %250 {offsets = [0, 0, 0, 0], sizes = [8, 1, 8, 32], strides = [1, 1, 1, 1]} : vector<8x2x8x32xf32> to vector<8x1x8x32xf32>
    %252 = vector.shape_cast %251 : vector<8x1x8x32xf32> to vector<8x8x32xf32>
    %c2_161 = arith.constant 2 : index
    %c0_162 = arith.constant 0 : index
    %253 = vector.load %arg18[%c2_161, %c0_162] : memref<25x32xf32, #tpu.memory_space<vmem>>, vector<1x32xf32>
    %254 = vector.shape_cast %253 : vector<1x32xf32> to vector<32xf32>
    %255 = vector.shape_cast %254 : vector<32xf32> to vector<1x1x32xf32>
    %256 = vector.broadcast %255 : vector<1x1x32xf32> to vector<8x8x32xf32>
    %257 = arith.mulf %252, %256 : vector<8x8x32xf32>
    %258 = arith.addf %248, %257 : vector<8x8x32xf32>
    %c0_163 = arith.constant 0 : index
    %c3_164 = arith.constant 3 : index
    %c0_165 = arith.constant 0 : index
    %259 = tpu.strided_load %arg45[%c0_163, %c3_164, %c0_165] {strides = array<i32: 1, 2, 1>} : memref<20x20x48xf32, #tpu.memory_space<vmem>>, vector<16x8x32xf32>
    %260 = vector.shape_cast %259 : vector<16x8x32xf32> to vector<8x2x8x32xf32>
    %261 = vector.extract_strided_slice %260 {offsets = [0, 0, 0, 0], sizes = [8, 1, 8, 32], strides = [1, 1, 1, 1]} : vector<8x2x8x32xf32> to vector<8x1x8x32xf32>
    %262 = vector.shape_cast %261 : vector<8x1x8x32xf32> to vector<8x8x32xf32>
    %c3_166 = arith.constant 3 : index
    %c0_167 = arith.constant 0 : index
    %263 = vector.load %arg18[%c3_166, %c0_167] : memref<25x32xf32, #tpu.memory_space<vmem>>, vector<1x32xf32>
    %264 = vector.shape_cast %263 : vector<1x32xf32> to vector<32xf32>
    %265 = vector.shape_cast %264 : vector<32xf32> to vector<1x1x32xf32>
    %266 = vector.broadcast %265 : vector<1x1x32xf32> to vector<8x8x32xf32>
    %267 = arith.mulf %262, %266 : vector<8x8x32xf32>
    %268 = arith.addf %258, %267 : vector<8x8x32xf32>
    %c0_168 = arith.constant 0 : index
    %c4_169 = arith.constant 4 : index
    %c0_170 = arith.constant 0 : index
    %269 = tpu.strided_load %arg45[%c0_168, %c4_169, %c0_170] {strides = array<i32: 1, 2, 1>} : memref<20x20x48xf32, #tpu.memory_space<vmem>>, vector<16x8x32xf32>
    %270 = vector.shape_cast %269 : vector<16x8x32xf32> to vector<8x2x8x32xf32>
    %271 = vector.extract_strided_slice %270 {offsets = [0, 0, 0, 0], sizes = [8, 1, 8, 32], strides = [1, 1, 1, 1]} : vector<8x2x8x32xf32> to vector<8x1x8x32xf32>
    %272 = vector.shape_cast %271 : vector<8x1x8x32xf32> to vector<8x8x32xf32>
    %c4_171 = arith.constant 4 : index
    %c0_172 = arith.constant 0 : index
    %273 = vector.load %arg18[%c4_171, %c0_172] : memref<25x32xf32, #tpu.memory_space<vmem>>, vector<1x32xf32>
    %274 = vector.shape_cast %273 : vector<1x32xf32> to vector<32xf32>
    %275 = vector.shape_cast %274 : vector<32xf32> to vector<1x1x32xf32>
    %276 = vector.broadcast %275 : vector<1x1x32xf32> to vector<8x8x32xf32>
    %277 = arith.mulf %272, %276 : vector<8x8x32xf32>
    %278 = arith.addf %268, %277 : vector<8x8x32xf32>
    %c1_173 = arith.constant 1 : index
    %c0_174 = arith.constant 0 : index
    %c0_175 = arith.constant 0 : index
    %279 = tpu.strided_load %arg45[%c1_173, %c0_174, %c0_175] {strides = array<i32: 1, 2, 1>} : memref<20x20x48xf32, #tpu.memory_space<vmem>>, vector<16x8x32xf32>
    %280 = vector.shape_cast %279 : vector<16x8x32xf32> to vector<8x2x8x32xf32>
    %281 = vector.extract_strided_slice %280 {offsets = [0, 0, 0, 0], sizes = [8, 1, 8, 32], strides = [1, 1, 1, 1]} : vector<8x2x8x32xf32> to vector<8x1x8x32xf32>
    %282 = vector.shape_cast %281 : vector<8x1x8x32xf32> to vector<8x8x32xf32>
    %c5_176 = arith.constant 5 : index
    %c0_177 = arith.constant 0 : index
    %283 = vector.load %arg18[%c5_176, %c0_177] : memref<25x32xf32, #tpu.memory_space<vmem>>, vector<1x32xf32>
    %284 = vector.shape_cast %283 : vector<1x32xf32> to vector<32xf32>
    %285 = vector.shape_cast %284 : vector<32xf32> to vector<1x1x32xf32>
    %286 = vector.broadcast %285 : vector<1x1x32xf32> to vector<8x8x32xf32>
    %287 = arith.mulf %282, %286 : vector<8x8x32xf32>
    %288 = arith.addf %278, %287 : vector<8x8x32xf32>
    %c1_178 = arith.constant 1 : index
    %c1_179 = arith.constant 1 : index
    %c0_180 = arith.constant 0 : index
    %289 = tpu.strided_load %arg45[%c1_178, %c1_179, %c0_180] {strides = array<i32: 1, 2, 1>} : memref<20x20x48xf32, #tpu.memory_space<vmem>>, vector<16x8x32xf32>
    %290 = vector.shape_cast %289 : vector<16x8x32xf32> to vector<8x2x8x32xf32>
    %291 = vector.extract_strided_slice %290 {offsets = [0, 0, 0, 0], sizes = [8, 1, 8, 32], strides = [1, 1, 1, 1]} : vector<8x2x8x32xf32> to vector<8x1x8x32xf32>
    %292 = vector.shape_cast %291 : vector<8x1x8x32xf32> to vector<8x8x32xf32>
    %c6_181 = arith.constant 6 : index
    %c0_182 = arith.constant 0 : index
    %293 = vector.load %arg18[%c6_181, %c0_182] : memref<25x32xf32, #tpu.memory_space<vmem>>, vector<1x32xf32>
    %294 = vector.shape_cast %293 : vector<1x32xf32> to vector<32xf32>
    %295 = vector.shape_cast %294 : vector<32xf32> to vector<1x1x32xf32>
    %296 = vector.broadcast %295 : vector<1x1x32xf32> to vector<8x8x32xf32>
    %297 = arith.mulf %292, %296 : vector<8x8x32xf32>
    %298 = arith.addf %288, %297 : vector<8x8x32xf32>
    %c1_183 = arith.constant 1 : index
    %c2_184 = arith.constant 2 : index
    %c0_185 = arith.constant 0 : index
    %299 = tpu.strided_load %arg45[%c1_183, %c2_184, %c0_185] {strides = array<i32: 1, 2, 1>} : memref<20x20x48xf32, #tpu.memory_space<vmem>>, vector<16x8x32xf32>
    %300 = vector.shape_cast %299 : vector<16x8x32xf32> to vector<8x2x8x32xf32>
    %301 = vector.extract_strided_slice %300 {offsets = [0, 0, 0, 0], sizes = [8, 1, 8, 32], strides = [1, 1, 1, 1]} : vector<8x2x8x32xf32> to vector<8x1x8x32xf32>
    %302 = vector.shape_cast %301 : vector<8x1x8x32xf32> to vector<8x8x32xf32>
    %c7_186 = arith.constant 7 : index
    %c0_187 = arith.constant 0 : index
    %303 = vector.load %arg18[%c7_186, %c0_187] : memref<25x32xf32, #tpu.memory_space<vmem>>, vector<1x32xf32>
    %304 = vector.shape_cast %303 : vector<1x32xf32> to vector<32xf32>
    %305 = vector.shape_cast %304 : vector<32xf32> to vector<1x1x32xf32>
    %306 = vector.broadcast %305 : vector<1x1x32xf32> to vector<8x8x32xf32>
    %307 = arith.mulf %302, %306 : vector<8x8x32xf32>
    %308 = arith.addf %298, %307 : vector<8x8x32xf32>
    %c1_188 = arith.constant 1 : index
    %c3_189 = arith.constant 3 : index
    %c0_190 = arith.constant 0 : index
    %309 = tpu.strided_load %arg45[%c1_188, %c3_189, %c0_190] {strides = array<i32: 1, 2, 1>} : memref<20x20x48xf32, #tpu.memory_space<vmem>>, vector<16x8x32xf32>
    %310 = vector.shape_cast %309 : vector<16x8x32xf32> to vector<8x2x8x32xf32>
    %311 = vector.extract_strided_slice %310 {offsets = [0, 0, 0, 0], sizes = [8, 1, 8, 32], strides = [1, 1, 1, 1]} : vector<8x2x8x32xf32> to vector<8x1x8x32xf32>
    %312 = vector.shape_cast %311 : vector<8x1x8x32xf32> to vector<8x8x32xf32>
    %c8_191 = arith.constant 8 : index
    %c0_192 = arith.constant 0 : index
    %313 = vector.load %arg18[%c8_191, %c0_192] : memref<25x32xf32, #tpu.memory_space<vmem>>, vector<1x32xf32>
    %314 = vector.shape_cast %313 : vector<1x32xf32> to vector<32xf32>
    %315 = vector.shape_cast %314 : vector<32xf32> to vector<1x1x32xf32>
    %316 = vector.broadcast %315 : vector<1x1x32xf32> to vector<8x8x32xf32>
    %317 = arith.mulf %312, %316 : vector<8x8x32xf32>
    %318 = arith.addf %308, %317 : vector<8x8x32xf32>
    %c1_193 = arith.constant 1 : index
    %c4_194 = arith.constant 4 : index
    %c0_195 = arith.constant 0 : index
    %319 = tpu.strided_load %arg45[%c1_193, %c4_194, %c0_195] {strides = array<i32: 1, 2, 1>} : memref<20x20x48xf32, #tpu.memory_space<vmem>>, vector<16x8x32xf32>
    %320 = vector.shape_cast %319 : vector<16x8x32xf32> to vector<8x2x8x32xf32>
    %321 = vector.extract_strided_slice %320 {offsets = [0, 0, 0, 0], sizes = [8, 1, 8, 32], strides = [1, 1, 1, 1]} : vector<8x2x8x32xf32> to vector<8x1x8x32xf32>
    %322 = vector.shape_cast %321 : vector<8x1x8x32xf32> to vector<8x8x32xf32>
    %c9_196 = arith.constant 9 : index
    %c0_197 = arith.constant 0 : index
    %323 = vector.load %arg18[%c9_196, %c0_197] : memref<25x32xf32, #tpu.memory_space<vmem>>, vector<1x32xf32>
    %324 = vector.shape_cast %323 : vector<1x32xf32> to vector<32xf32>
    %325 = vector.shape_cast %324 : vector<32xf32> to vector<1x1x32xf32>
    %326 = vector.broadcast %325 : vector<1x1x32xf32> to vector<8x8x32xf32>
    %327 = arith.mulf %322, %326 : vector<8x8x32xf32>
    %328 = arith.addf %318, %327 : vector<8x8x32xf32>
    %c2_198 = arith.constant 2 : index
    %c0_199 = arith.constant 0 : index
    %c0_200 = arith.constant 0 : index
    %329 = tpu.strided_load %arg45[%c2_198, %c0_199, %c0_200] {strides = array<i32: 1, 2, 1>} : memref<20x20x48xf32, #tpu.memory_space<vmem>>, vector<16x8x32xf32>
    %330 = vector.shape_cast %329 : vector<16x8x32xf32> to vector<8x2x8x32xf32>
    %331 = vector.extract_strided_slice %330 {offsets = [0, 0, 0, 0], sizes = [8, 1, 8, 32], strides = [1, 1, 1, 1]} : vector<8x2x8x32xf32> to vector<8x1x8x32xf32>
    %332 = vector.shape_cast %331 : vector<8x1x8x32xf32> to vector<8x8x32xf32>
    %c10 = arith.constant 10 : index
    %c0_201 = arith.constant 0 : index
    %333 = vector.load %arg18[%c10, %c0_201] : memref<25x32xf32, #tpu.memory_space<vmem>>, vector<1x32xf32>
    %334 = vector.shape_cast %333 : vector<1x32xf32> to vector<32xf32>
    %335 = vector.shape_cast %334 : vector<32xf32> to vector<1x1x32xf32>
    %336 = vector.broadcast %335 : vector<1x1x32xf32> to vector<8x8x32xf32>
    %337 = arith.mulf %332, %336 : vector<8x8x32xf32>
    %338 = arith.addf %328, %337 : vector<8x8x32xf32>
    %c2_202 = arith.constant 2 : index
    %c1_203 = arith.constant 1 : index
    %c0_204 = arith.constant 0 : index
    %339 = tpu.strided_load %arg45[%c2_202, %c1_203, %c0_204] {strides = array<i32: 1, 2, 1>} : memref<20x20x48xf32, #tpu.memory_space<vmem>>, vector<16x8x32xf32>
    %340 = vector.shape_cast %339 : vector<16x8x32xf32> to vector<8x2x8x32xf32>
    %341 = vector.extract_strided_slice %340 {offsets = [0, 0, 0, 0], sizes = [8, 1, 8, 32], strides = [1, 1, 1, 1]} : vector<8x2x8x32xf32> to vector<8x1x8x32xf32>
    %342 = vector.shape_cast %341 : vector<8x1x8x32xf32> to vector<8x8x32xf32>
    %c11 = arith.constant 11 : index
    %c0_205 = arith.constant 0 : index
    %343 = vector.load %arg18[%c11, %c0_205] : memref<25x32xf32, #tpu.memory_space<vmem>>, vector<1x32xf32>
    %344 = vector.shape_cast %343 : vector<1x32xf32> to vector<32xf32>
    %345 = vector.shape_cast %344 : vector<32xf32> to vector<1x1x32xf32>
    %346 = vector.broadcast %345 : vector<1x1x32xf32> to vector<8x8x32xf32>
    %347 = arith.mulf %342, %346 : vector<8x8x32xf32>
    %348 = arith.addf %338, %347 : vector<8x8x32xf32>
    %c2_206 = arith.constant 2 : index
    %c2_207 = arith.constant 2 : index
    %c0_208 = arith.constant 0 : index
    %349 = tpu.strided_load %arg45[%c2_206, %c2_207, %c0_208] {strides = array<i32: 1, 2, 1>} : memref<20x20x48xf32, #tpu.memory_space<vmem>>, vector<16x8x32xf32>
    %350 = vector.shape_cast %349 : vector<16x8x32xf32> to vector<8x2x8x32xf32>
    %351 = vector.extract_strided_slice %350 {offsets = [0, 0, 0, 0], sizes = [8, 1, 8, 32], strides = [1, 1, 1, 1]} : vector<8x2x8x32xf32> to vector<8x1x8x32xf32>
    %352 = vector.shape_cast %351 : vector<8x1x8x32xf32> to vector<8x8x32xf32>
    %c12_209 = arith.constant 12 : index
    %c0_210 = arith.constant 0 : index
    %353 = vector.load %arg18[%c12_209, %c0_210] : memref<25x32xf32, #tpu.memory_space<vmem>>, vector<1x32xf32>
    %354 = vector.shape_cast %353 : vector<1x32xf32> to vector<32xf32>
    %355 = vector.shape_cast %354 : vector<32xf32> to vector<1x1x32xf32>
    %356 = vector.broadcast %355 : vector<1x1x32xf32> to vector<8x8x32xf32>
    %357 = arith.mulf %352, %356 : vector<8x8x32xf32>
    %358 = arith.addf %348, %357 : vector<8x8x32xf32>
    %c2_211 = arith.constant 2 : index
    %c3_212 = arith.constant 3 : index
    %c0_213 = arith.constant 0 : index
    %359 = tpu.strided_load %arg45[%c2_211, %c3_212, %c0_213] {strides = array<i32: 1, 2, 1>} : memref<20x20x48xf32, #tpu.memory_space<vmem>>, vector<16x8x32xf32>
    %360 = vector.shape_cast %359 : vector<16x8x32xf32> to vector<8x2x8x32xf32>
    %361 = vector.extract_strided_slice %360 {offsets = [0, 0, 0, 0], sizes = [8, 1, 8, 32], strides = [1, 1, 1, 1]} : vector<8x2x8x32xf32> to vector<8x1x8x32xf32>
    %362 = vector.shape_cast %361 : vector<8x1x8x32xf32> to vector<8x8x32xf32>
    %c13 = arith.constant 13 : index
    %c0_214 = arith.constant 0 : index
    %363 = vector.load %arg18[%c13, %c0_214] : memref<25x32xf32, #tpu.memory_space<vmem>>, vector<1x32xf32>
    %364 = vector.shape_cast %363 : vector<1x32xf32> to vector<32xf32>
    %365 = vector.shape_cast %364 : vector<32xf32> to vector<1x1x32xf32>
    %366 = vector.broadcast %365 : vector<1x1x32xf32> to vector<8x8x32xf32>
    %367 = arith.mulf %362, %366 : vector<8x8x32xf32>
    %368 = arith.addf %358, %367 : vector<8x8x32xf32>
    %c2_215 = arith.constant 2 : index
    %c4_216 = arith.constant 4 : index
    %c0_217 = arith.constant 0 : index
    %369 = tpu.strided_load %arg45[%c2_215, %c4_216, %c0_217] {strides = array<i32: 1, 2, 1>} : memref<20x20x48xf32, #tpu.memory_space<vmem>>, vector<16x8x32xf32>
    %370 = vector.shape_cast %369 : vector<16x8x32xf32> to vector<8x2x8x32xf32>
    %371 = vector.extract_strided_slice %370 {offsets = [0, 0, 0, 0], sizes = [8, 1, 8, 32], strides = [1, 1, 1, 1]} : vector<8x2x8x32xf32> to vector<8x1x8x32xf32>
    %372 = vector.shape_cast %371 : vector<8x1x8x32xf32> to vector<8x8x32xf32>
    %c14 = arith.constant 14 : index
    %c0_218 = arith.constant 0 : index
    %373 = vector.load %arg18[%c14, %c0_218] : memref<25x32xf32, #tpu.memory_space<vmem>>, vector<1x32xf32>
    %374 = vector.shape_cast %373 : vector<1x32xf32> to vector<32xf32>
    %375 = vector.shape_cast %374 : vector<32xf32> to vector<1x1x32xf32>
    %376 = vector.broadcast %375 : vector<1x1x32xf32> to vector<8x8x32xf32>
    %377 = arith.mulf %372, %376 : vector<8x8x32xf32>
    %378 = arith.addf %368, %377 : vector<8x8x32xf32>
    %c3_219 = arith.constant 3 : index
    %c0_220 = arith.constant 0 : index
    %c0_221 = arith.constant 0 : index
    %379 = tpu.strided_load %arg45[%c3_219, %c0_220, %c0_221] {strides = array<i32: 1, 2, 1>} : memref<20x20x48xf32, #tpu.memory_space<vmem>>, vector<16x8x32xf32>
    %380 = vector.shape_cast %379 : vector<16x8x32xf32> to vector<8x2x8x32xf32>
    %381 = vector.extract_strided_slice %380 {offsets = [0, 0, 0, 0], sizes = [8, 1, 8, 32], strides = [1, 1, 1, 1]} : vector<8x2x8x32xf32> to vector<8x1x8x32xf32>
    %382 = vector.shape_cast %381 : vector<8x1x8x32xf32> to vector<8x8x32xf32>
    %c15_222 = arith.constant 15 : index
    %c0_223 = arith.constant 0 : index
    %383 = vector.load %arg18[%c15_222, %c0_223] : memref<25x32xf32, #tpu.memory_space<vmem>>, vector<1x32xf32>
    %384 = vector.shape_cast %383 : vector<1x32xf32> to vector<32xf32>
    %385 = vector.shape_cast %384 : vector<32xf32> to vector<1x1x32xf32>
    %386 = vector.broadcast %385 : vector<1x1x32xf32> to vector<8x8x32xf32>
    %387 = arith.mulf %382, %386 : vector<8x8x32xf32>
    %388 = arith.addf %378, %387 : vector<8x8x32xf32>
    %c3_224 = arith.constant 3 : index
    %c1_225 = arith.constant 1 : index
    %c0_226 = arith.constant 0 : index
    %389 = tpu.strided_load %arg45[%c3_224, %c1_225, %c0_226] {strides = array<i32: 1, 2, 1>} : memref<20x20x48xf32, #tpu.memory_space<vmem>>, vector<16x8x32xf32>
    %390 = vector.shape_cast %389 : vector<16x8x32xf32> to vector<8x2x8x32xf32>
    %391 = vector.extract_strided_slice %390 {offsets = [0, 0, 0, 0], sizes = [8, 1, 8, 32], strides = [1, 1, 1, 1]} : vector<8x2x8x32xf32> to vector<8x1x8x32xf32>
    %392 = vector.shape_cast %391 : vector<8x1x8x32xf32> to vector<8x8x32xf32>
    %c16 = arith.constant 16 : index
    %c0_227 = arith.constant 0 : index
    %393 = vector.load %arg18[%c16, %c0_227] : memref<25x32xf32, #tpu.memory_space<vmem>>, vector<1x32xf32>
    %394 = vector.shape_cast %393 : vector<1x32xf32> to vector<32xf32>
    %395 = vector.shape_cast %394 : vector<32xf32> to vector<1x1x32xf32>
    %396 = vector.broadcast %395 : vector<1x1x32xf32> to vector<8x8x32xf32>
    %397 = arith.mulf %392, %396 : vector<8x8x32xf32>
    %398 = arith.addf %388, %397 : vector<8x8x32xf32>
    %c3_228 = arith.constant 3 : index
    %c2_229 = arith.constant 2 : index
    %c0_230 = arith.constant 0 : index
    %399 = tpu.strided_load %arg45[%c3_228, %c2_229, %c0_230] {strides = array<i32: 1, 2, 1>} : memref<20x20x48xf32, #tpu.memory_space<vmem>>, vector<16x8x32xf32>
    %400 = vector.shape_cast %399 : vector<16x8x32xf32> to vector<8x2x8x32xf32>
    %401 = vector.extract_strided_slice %400 {offsets = [0, 0, 0, 0], sizes = [8, 1, 8, 32], strides = [1, 1, 1, 1]} : vector<8x2x8x32xf32> to vector<8x1x8x32xf32>
    %402 = vector.shape_cast %401 : vector<8x1x8x32xf32> to vector<8x8x32xf32>
    %c17 = arith.constant 17 : index
    %c0_231 = arith.constant 0 : index
    %403 = vector.load %arg18[%c17, %c0_231] : memref<25x32xf32, #tpu.memory_space<vmem>>, vector<1x32xf32>
    %404 = vector.shape_cast %403 : vector<1x32xf32> to vector<32xf32>
    %405 = vector.shape_cast %404 : vector<32xf32> to vector<1x1x32xf32>
    %406 = vector.broadcast %405 : vector<1x1x32xf32> to vector<8x8x32xf32>
    %407 = arith.mulf %402, %406 : vector<8x8x32xf32>
    %408 = arith.addf %398, %407 : vector<8x8x32xf32>
    %c3_232 = arith.constant 3 : index
    %c3_233 = arith.constant 3 : index
    %c0_234 = arith.constant 0 : index
    %409 = tpu.strided_load %arg45[%c3_232, %c3_233, %c0_234] {strides = array<i32: 1, 2, 1>} : memref<20x20x48xf32, #tpu.memory_space<vmem>>, vector<16x8x32xf32>
    %410 = vector.shape_cast %409 : vector<16x8x32xf32> to vector<8x2x8x32xf32>
    %411 = vector.extract_strided_slice %410 {offsets = [0, 0, 0, 0], sizes = [8, 1, 8, 32], strides = [1, 1, 1, 1]} : vector<8x2x8x32xf32> to vector<8x1x8x32xf32>
    %412 = vector.shape_cast %411 : vector<8x1x8x32xf32> to vector<8x8x32xf32>
    %c18_235 = arith.constant 18 : index
    %c0_236 = arith.constant 0 : index
    %413 = vector.load %arg18[%c18_235, %c0_236] : memref<25x32xf32, #tpu.memory_space<vmem>>, vector<1x32xf32>
    %414 = vector.shape_cast %413 : vector<1x32xf32> to vector<32xf32>
    %415 = vector.shape_cast %414 : vector<32xf32> to vector<1x1x32xf32>
    %416 = vector.broadcast %415 : vector<1x1x32xf32> to vector<8x8x32xf32>
    %417 = arith.mulf %412, %416 : vector<8x8x32xf32>
    %418 = arith.addf %408, %417 : vector<8x8x32xf32>
    %c3_237 = arith.constant 3 : index
    %c4_238 = arith.constant 4 : index
    %c0_239 = arith.constant 0 : index
    %419 = tpu.strided_load %arg45[%c3_237, %c4_238, %c0_239] {strides = array<i32: 1, 2, 1>} : memref<20x20x48xf32, #tpu.memory_space<vmem>>, vector<16x8x32xf32>
    %420 = vector.shape_cast %419 : vector<16x8x32xf32> to vector<8x2x8x32xf32>
    %421 = vector.extract_strided_slice %420 {offsets = [0, 0, 0, 0], sizes = [8, 1, 8, 32], strides = [1, 1, 1, 1]} : vector<8x2x8x32xf32> to vector<8x1x8x32xf32>
    %422 = vector.shape_cast %421 : vector<8x1x8x32xf32> to vector<8x8x32xf32>
    %c19 = arith.constant 19 : index
    %c0_240 = arith.constant 0 : index
    %423 = vector.load %arg18[%c19, %c0_240] : memref<25x32xf32, #tpu.memory_space<vmem>>, vector<1x32xf32>
    %424 = vector.shape_cast %423 : vector<1x32xf32> to vector<32xf32>
    %425 = vector.shape_cast %424 : vector<32xf32> to vector<1x1x32xf32>
    %426 = vector.broadcast %425 : vector<1x1x32xf32> to vector<8x8x32xf32>
    %427 = arith.mulf %422, %426 : vector<8x8x32xf32>
    %428 = arith.addf %418, %427 : vector<8x8x32xf32>
    %c4_241 = arith.constant 4 : index
    %c0_242 = arith.constant 0 : index
    %c0_243 = arith.constant 0 : index
    %429 = tpu.strided_load %arg45[%c4_241, %c0_242, %c0_243] {strides = array<i32: 1, 2, 1>} : memref<20x20x48xf32, #tpu.memory_space<vmem>>, vector<16x8x32xf32>
    %430 = vector.shape_cast %429 : vector<16x8x32xf32> to vector<8x2x8x32xf32>
    %431 = vector.extract_strided_slice %430 {offsets = [0, 0, 0, 0], sizes = [8, 1, 8, 32], strides = [1, 1, 1, 1]} : vector<8x2x8x32xf32> to vector<8x1x8x32xf32>
    %432 = vector.shape_cast %431 : vector<8x1x8x32xf32> to vector<8x8x32xf32>
    %c20 = arith.constant 20 : index
    %c0_244 = arith.constant 0 : index
    %433 = vector.load %arg18[%c20, %c0_244] : memref<25x32xf32, #tpu.memory_space<vmem>>, vector<1x32xf32>
    %434 = vector.shape_cast %433 : vector<1x32xf32> to vector<32xf32>
    %435 = vector.shape_cast %434 : vector<32xf32> to vector<1x1x32xf32>
    %436 = vector.broadcast %435 : vector<1x1x32xf32> to vector<8x8x32xf32>
    %437 = arith.mulf %432, %436 : vector<8x8x32xf32>
    %438 = arith.addf %428, %437 : vector<8x8x32xf32>
    %c4_245 = arith.constant 4 : index
    %c1_246 = arith.constant 1 : index
    %c0_247 = arith.constant 0 : index
    %439 = tpu.strided_load %arg45[%c4_245, %c1_246, %c0_247] {strides = array<i32: 1, 2, 1>} : memref<20x20x48xf32, #tpu.memory_space<vmem>>, vector<16x8x32xf32>
    %440 = vector.shape_cast %439 : vector<16x8x32xf32> to vector<8x2x8x32xf32>
    %441 = vector.extract_strided_slice %440 {offsets = [0, 0, 0, 0], sizes = [8, 1, 8, 32], strides = [1, 1, 1, 1]} : vector<8x2x8x32xf32> to vector<8x1x8x32xf32>
    %442 = vector.shape_cast %441 : vector<8x1x8x32xf32> to vector<8x8x32xf32>
    %c21_248 = arith.constant 21 : index
    %c0_249 = arith.constant 0 : index
    %443 = vector.load %arg18[%c21_248, %c0_249] : memref<25x32xf32, #tpu.memory_space<vmem>>, vector<1x32xf32>
    %444 = vector.shape_cast %443 : vector<1x32xf32> to vector<32xf32>
    %445 = vector.shape_cast %444 : vector<32xf32> to vector<1x1x32xf32>
    %446 = vector.broadcast %445 : vector<1x1x32xf32> to vector<8x8x32xf32>
    %447 = arith.mulf %442, %446 : vector<8x8x32xf32>
    %448 = arith.addf %438, %447 : vector<8x8x32xf32>
    %c4_250 = arith.constant 4 : index
    %c2_251 = arith.constant 2 : index
    %c0_252 = arith.constant 0 : index
    %449 = tpu.strided_load %arg45[%c4_250, %c2_251, %c0_252] {strides = array<i32: 1, 2, 1>} : memref<20x20x48xf32, #tpu.memory_space<vmem>>, vector<16x8x32xf32>
    %450 = vector.shape_cast %449 : vector<16x8x32xf32> to vector<8x2x8x32xf32>
    %451 = vector.extract_strided_slice %450 {offsets = [0, 0, 0, 0], sizes = [8, 1, 8, 32], strides = [1, 1, 1, 1]} : vector<8x2x8x32xf32> to vector<8x1x8x32xf32>
    %452 = vector.shape_cast %451 : vector<8x1x8x32xf32> to vector<8x8x32xf32>
    %c22 = arith.constant 22 : index
    %c0_253 = arith.constant 0 : index
    %453 = vector.load %arg18[%c22, %c0_253] : memref<25x32xf32, #tpu.memory_space<vmem>>, vector<1x32xf32>
    %454 = vector.shape_cast %453 : vector<1x32xf32> to vector<32xf32>
    %455 = vector.shape_cast %454 : vector<32xf32> to vector<1x1x32xf32>
    %456 = vector.broadcast %455 : vector<1x1x32xf32> to vector<8x8x32xf32>
    %457 = arith.mulf %452, %456 : vector<8x8x32xf32>
    %458 = arith.addf %448, %457 : vector<8x8x32xf32>
    %c4_254 = arith.constant 4 : index
    %c3_255 = arith.constant 3 : index
    %c0_256 = arith.constant 0 : index
    %459 = tpu.strided_load %arg45[%c4_254, %c3_255, %c0_256] {strides = array<i32: 1, 2, 1>} : memref<20x20x48xf32, #tpu.memory_space<vmem>>, vector<16x8x32xf32>
    %460 = vector.shape_cast %459 : vector<16x8x32xf32> to vector<8x2x8x32xf32>
    %461 = vector.extract_strided_slice %460 {offsets = [0, 0, 0, 0], sizes = [8, 1, 8, 32], strides = [1, 1, 1, 1]} : vector<8x2x8x32xf32> to vector<8x1x8x32xf32>
    %462 = vector.shape_cast %461 : vector<8x1x8x32xf32> to vector<8x8x32xf32>
    %c23 = arith.constant 23 : index
    %c0_257 = arith.constant 0 : index
    %463 = vector.load %arg18[%c23, %c0_257] : memref<25x32xf32, #tpu.memory_space<vmem>>, vector<1x32xf32>
    %464 = vector.shape_cast %463 : vector<1x32xf32> to vector<32xf32>
    %465 = vector.shape_cast %464 : vector<32xf32> to vector<1x1x32xf32>
    %466 = vector.broadcast %465 : vector<1x1x32xf32> to vector<8x8x32xf32>
    %467 = arith.mulf %462, %466 : vector<8x8x32xf32>
    %468 = arith.addf %458, %467 : vector<8x8x32xf32>
    %c4_258 = arith.constant 4 : index
    %c4_259 = arith.constant 4 : index
    %c0_260 = arith.constant 0 : index
    %469 = tpu.strided_load %arg45[%c4_258, %c4_259, %c0_260] {strides = array<i32: 1, 2, 1>} : memref<20x20x48xf32, #tpu.memory_space<vmem>>, vector<16x8x32xf32>
    %470 = vector.shape_cast %469 : vector<16x8x32xf32> to vector<8x2x8x32xf32>
    %471 = vector.extract_strided_slice %470 {offsets = [0, 0, 0, 0], sizes = [8, 1, 8, 32], strides = [1, 1, 1, 1]} : vector<8x2x8x32xf32> to vector<8x1x8x32xf32>
    %472 = vector.shape_cast %471 : vector<8x1x8x32xf32> to vector<8x8x32xf32>
    %c24_261 = arith.constant 24 : index
    %c0_262 = arith.constant 0 : index
    %473 = vector.load %arg18[%c24_261, %c0_262] : memref<25x32xf32, #tpu.memory_space<vmem>>, vector<1x32xf32>
    %474 = vector.shape_cast %473 : vector<1x32xf32> to vector<32xf32>
    %475 = vector.shape_cast %474 : vector<32xf32> to vector<1x1x32xf32>
    %476 = vector.broadcast %475 : vector<1x1x32xf32> to vector<8x8x32xf32>
    %477 = arith.mulf %472, %476 : vector<8x8x32xf32>
    %478 = arith.addf %468, %477 : vector<8x8x32xf32>
    %c0_263 = arith.constant 0 : index
    %c0_264 = arith.constant 0 : index
    %479 = vector.load %arg19[%c0_263, %c0_264] : memref<1x32xf32, #tpu.memory_space<vmem>>, vector<1x32xf32>
    %480 = vector.shape_cast %479 : vector<1x32xf32> to vector<32xf32>
    %481 = vector.shape_cast %480 : vector<32xf32> to vector<1x1x32xf32>
    %482 = vector.broadcast %481 : vector<1x1x32xf32> to vector<8x8x32xf32>
    %483 = arith.mulf %478, %482 : vector<8x8x32xf32>
    %c0_265 = arith.constant 0 : index
    %c0_266 = arith.constant 0 : index
    %484 = vector.load %arg20[%c0_265, %c0_266] : memref<1x32xf32, #tpu.memory_space<vmem>>, vector<1x32xf32>
    %485 = vector.shape_cast %484 : vector<1x32xf32> to vector<32xf32>
    %486 = vector.shape_cast %485 : vector<32xf32> to vector<1x1x32xf32>
    %487 = vector.broadcast %486 : vector<1x1x32xf32> to vector<8x8x32xf32>
    %488 = arith.addf %483, %487 : vector<8x8x32xf32>
    %489 = arith.negf %488 : vector<8x8x32xf32>
    %490 = math.exp %489 : vector<8x8x32xf32>
    %cst_267 = arith.constant 1.000000e+00 : f32
    %491 = vector.broadcast %cst_267 : f32 to vector<8x8x32xf32>
    %492 = arith.addf %491, %490 : vector<8x8x32xf32>
    %493 = arith.divf %491, %492 : vector<8x8x32xf32>
    %494 = arith.mulf %488, %493 : vector<8x8x32xf32>
    %495 = vector.shape_cast %494 : vector<8x8x32xf32> to vector<64x32xf32>
    %cst_268 = arith.constant dense<0.000000e+00> : vector<32xf32>
    %496 = vector.multi_reduction <add>, %495, %cst_268 [0] : vector<64x32xf32> to vector<32xf32>
    %497 = vector.shape_cast %496 : vector<32xf32> to vector<1x32xf32>
    %cst_269 = arith.constant 6.400000e+01 : f32
    %498 = vector.broadcast %cst_269 : f32 to vector<1x32xf32>
    %499 = arith.divf %497, %498 : vector<1x32xf32>
    %500 = arith.truncf %499 : vector<1x32xf32> to vector<1x32xbf16>
    %c0_270 = arith.constant 0 : index
    %c0_271 = arith.constant 0 : index
    %501 = vector.load %arg21[%c0_270, %c0_271] : memref<32x4xbf16, #tpu.memory_space<vmem>>, vector<32x4xbf16>
    %cst_272 = arith.constant dense<0.000000e+00> : vector<1x4xf32>
    %502 = tpu.matmul %500, %501, %cst_272 {dimension_numbers = #tpu.dot_dimension_numbers<[1], [0], [0], [1], [0, 0, 1, 1], [], []>} : vector<1x32xbf16>, vector<32x4xbf16>, vector<1x4xf32> -> vector<1x4xf32>
    %c0_273 = arith.constant 0 : index
    %c0_274 = arith.constant 0 : index
    %503 = vector.load %arg22[%c0_273, %c0_274] : memref<1x4xf32, #tpu.memory_space<vmem>>, vector<1x4xf32>
    %504 = arith.addf %502, %503 : vector<1x4xf32>
    %505 = arith.negf %504 : vector<1x4xf32>
    %506 = math.exp %505 : vector<1x4xf32>
    %cst_275 = arith.constant 1.000000e+00 : f32
    %507 = vector.broadcast %cst_275 : f32 to vector<1x4xf32>
    %508 = arith.addf %507, %506 : vector<1x4xf32>
    %509 = arith.divf %507, %508 : vector<1x4xf32>
    %510 = arith.mulf %504, %509 : vector<1x4xf32>
    %511 = arith.truncf %510 : vector<1x4xf32> to vector<1x4xbf16>
    %c0_276 = arith.constant 0 : index
    %c0_277 = arith.constant 0 : index
    %512 = vector.load %arg23[%c0_276, %c0_277] : memref<4x32xbf16, #tpu.memory_space<vmem>>, vector<4x32xbf16>
    %cst_278 = arith.constant dense<0.000000e+00> : vector<1x32xf32>
    %513 = tpu.matmul %511, %512, %cst_278 {dimension_numbers = #tpu.dot_dimension_numbers<[1], [0], [0], [1], [0, 0, 1, 1], [], []>} : vector<1x4xbf16>, vector<4x32xbf16>, vector<1x32xf32> -> vector<1x32xf32>
    %c0_279 = arith.constant 0 : index
    %c0_280 = arith.constant 0 : index
    %514 = vector.load %arg24[%c0_279, %c0_280] : memref<1x32xf32, #tpu.memory_space<vmem>>, vector<1x32xf32>
    %515 = arith.addf %513, %514 : vector<1x32xf32>
    %516 = arith.negf %515 : vector<1x32xf32>
    %517 = math.exp %516 : vector<1x32xf32>
    %cst_281 = arith.constant 1.000000e+00 : f32
    %518 = vector.broadcast %cst_281 : f32 to vector<1x32xf32>
    %519 = arith.addf %518, %517 : vector<1x32xf32>
    %520 = arith.divf %518, %519 : vector<1x32xf32>
    %521 = vector.broadcast %520 : vector<1x32xf32> to vector<64x32xf32>
    %522 = arith.mulf %495, %521 : vector<64x32xf32>
    %523 = arith.truncf %522 : vector<64x32xf32> to vector<64x32xbf16>
    %c0_282 = arith.constant 0 : index
    %c0_283 = arith.constant 0 : index
    %524 = vector.load %arg25[%c0_282, %c0_283] : memref<32x24xbf16, #tpu.memory_space<vmem>>, vector<32x24xbf16>
    %cst_284 = arith.constant dense<0.000000e+00> : vector<64x24xf32>
    %525 = tpu.matmul %523, %524, %cst_284 {dimension_numbers = #tpu.dot_dimension_numbers<[1], [0], [0], [1], [0, 0, 1, 1], [], []>} : vector<64x32xbf16>, vector<32x24xbf16>, vector<64x24xf32> -> vector<64x24xf32>
    %c0_285 = arith.constant 0 : index
    %c0_286 = arith.constant 0 : index
    %526 = vector.load %arg26[%c0_285, %c0_286] : memref<1x24xf32, #tpu.memory_space<vmem>>, vector<1x24xf32>
    %527 = vector.shape_cast %526 : vector<1x24xf32> to vector<24xf32>
    %528 = vector.shape_cast %527 : vector<24xf32> to vector<1x24xf32>
    %529 = vector.broadcast %528 : vector<1x24xf32> to vector<64x24xf32>
    %530 = arith.mulf %525, %529 : vector<64x24xf32>
    %c0_287 = arith.constant 0 : index
    %c0_288 = arith.constant 0 : index
    %531 = vector.load %arg27[%c0_287, %c0_288] : memref<1x24xf32, #tpu.memory_space<vmem>>, vector<1x24xf32>
    %532 = vector.shape_cast %531 : vector<1x24xf32> to vector<24xf32>
    %533 = vector.shape_cast %532 : vector<24xf32> to vector<1x24xf32>
    %534 = vector.broadcast %533 : vector<1x24xf32> to vector<64x24xf32>
    %535 = arith.addf %530, %534 : vector<64x24xf32>
    %536 = arith.truncf %535 : vector<64x24xf32> to vector<64x24xbf16>
    %c0_289 = arith.constant 0 : index
    %c0_290 = arith.constant 0 : index
    %537 = vector.load %arg28[%c0_289, %c0_290] : memref<24x48xbf16, #tpu.memory_space<vmem>>, vector<24x48xbf16>
    %cst_291 = arith.constant dense<0.000000e+00> : vector<64x48xf32>
    %538 = tpu.matmul %536, %537, %cst_291 {dimension_numbers = #tpu.dot_dimension_numbers<[1], [0], [0], [1], [0, 0, 1, 1], [], []>} : vector<64x24xbf16>, vector<24x48xbf16>, vector<64x48xf32> -> vector<64x48xf32>
    %c0_292 = arith.constant 0 : index
    %c0_293 = arith.constant 0 : index
    %539 = vector.load %arg29[%c0_292, %c0_293] : memref<1x48xf32, #tpu.memory_space<vmem>>, vector<1x48xf32>
    %540 = vector.shape_cast %539 : vector<1x48xf32> to vector<48xf32>
    %541 = vector.shape_cast %540 : vector<48xf32> to vector<1x48xf32>
    %542 = vector.broadcast %541 : vector<1x48xf32> to vector<64x48xf32>
    %543 = arith.mulf %538, %542 : vector<64x48xf32>
    %c0_294 = arith.constant 0 : index
    %c0_295 = arith.constant 0 : index
    %544 = vector.load %arg30[%c0_294, %c0_295] : memref<1x48xf32, #tpu.memory_space<vmem>>, vector<1x48xf32>
    %545 = vector.shape_cast %544 : vector<1x48xf32> to vector<48xf32>
    %546 = vector.shape_cast %545 : vector<48xf32> to vector<1x48xf32>
    %547 = vector.broadcast %546 : vector<1x48xf32> to vector<64x48xf32>
    %548 = arith.addf %543, %547 : vector<64x48xf32>
    %549 = arith.negf %548 : vector<64x48xf32>
    %550 = math.exp %549 : vector<64x48xf32>
    %cst_296 = arith.constant 1.000000e+00 : f32
    %551 = vector.broadcast %cst_296 : f32 to vector<64x48xf32>
    %552 = arith.addf %551, %550 : vector<64x48xf32>
    %553 = arith.divf %551, %552 : vector<64x48xf32>
    %554 = arith.mulf %548, %553 : vector<64x48xf32>
    %cst_297 = arith.constant 0.000000e+00 : f32
    %555 = vector.broadcast %cst_297 : f32 to vector<12x12x48xf32>
    %c0_298 = arith.constant 0 : index
    %c0_299 = arith.constant 0 : index
    %c0_300 = arith.constant 0 : index
    %556 = vector.load %arg45[%c0_298, %c0_299, %c0_300] : memref<20x20x48xf32, #tpu.memory_space<vmem>>, vector<12x12x48xf32>
    tpu.vector_store %arg45[%c0_298, %c0_299, %c0_300], %555 {strides = array<i32>} : memref<20x20x48xf32, #tpu.memory_space<vmem>>, vector<12x12x48xf32>,
    %557 = vector.shape_cast %554 : vector<64x48xf32> to vector<8x8x48xf32>
    %c2_301 = arith.constant 2 : index
    %c2_302 = arith.constant 2 : index
    %c0_303 = arith.constant 0 : index
    %558 = vector.load %arg45[%c2_301, %c2_302, %c0_303] : memref<20x20x48xf32, #tpu.memory_space<vmem>>, vector<8x8x48xf32>
    tpu.vector_store %arg45[%c2_301, %c2_302, %c0_303], %557 {strides = array<i32>} : memref<20x20x48xf32, #tpu.memory_space<vmem>>, vector<8x8x48xf32>,
    %cst_304 = arith.constant 0.000000e+00 : f32
    %559 = vector.broadcast %cst_304 : f32 to vector<8x8x48xf32>
    %c0_305 = arith.constant 0 : index
    %c0_306 = arith.constant 0 : index
    %c0_307 = arith.constant 0 : index
    %560 = vector.load %arg45[%c0_305, %c0_306, %c0_307] : memref<20x20x48xf32, #tpu.memory_space<vmem>>, vector<8x8x48xf32>
    %c0_308 = arith.constant 0 : index
    %c0_309 = arith.constant 0 : index
    %561 = vector.load %arg31[%c0_308, %c0_309] : memref<25x48xf32, #tpu.memory_space<vmem>>, vector<1x48xf32>
    %562 = vector.shape_cast %561 : vector<1x48xf32> to vector<48xf32>
    %563 = vector.shape_cast %562 : vector<48xf32> to vector<1x1x48xf32>
    %564 = vector.broadcast %563 : vector<1x1x48xf32> to vector<8x8x48xf32>
    %565 = arith.mulf %560, %564 : vector<8x8x48xf32>
    %566 = arith.addf %559, %565 : vector<8x8x48xf32>
    %c0_310 = arith.constant 0 : index
    %c1_311 = arith.constant 1 : index
    %c0_312 = arith.constant 0 : index
    %567 = vector.load %arg45[%c0_310, %c1_311, %c0_312] : memref<20x20x48xf32, #tpu.memory_space<vmem>>, vector<8x8x48xf32>
    %c1_313 = arith.constant 1 : index
    %c0_314 = arith.constant 0 : index
    %568 = vector.load %arg31[%c1_313, %c0_314] : memref<25x48xf32, #tpu.memory_space<vmem>>, vector<1x48xf32>
    %569 = vector.shape_cast %568 : vector<1x48xf32> to vector<48xf32>
    %570 = vector.shape_cast %569 : vector<48xf32> to vector<1x1x48xf32>
    %571 = vector.broadcast %570 : vector<1x1x48xf32> to vector<8x8x48xf32>
    %572 = arith.mulf %567, %571 : vector<8x8x48xf32>
    %573 = arith.addf %566, %572 : vector<8x8x48xf32>
    %c0_315 = arith.constant 0 : index
    %c2_316 = arith.constant 2 : index
    %c0_317 = arith.constant 0 : index
    %574 = vector.load %arg45[%c0_315, %c2_316, %c0_317] : memref<20x20x48xf32, #tpu.memory_space<vmem>>, vector<8x8x48xf32>
    %c2_318 = arith.constant 2 : index
    %c0_319 = arith.constant 0 : index
    %575 = vector.load %arg31[%c2_318, %c0_319] : memref<25x48xf32, #tpu.memory_space<vmem>>, vector<1x48xf32>
    %576 = vector.shape_cast %575 : vector<1x48xf32> to vector<48xf32>
    %577 = vector.shape_cast %576 : vector<48xf32> to vector<1x1x48xf32>
    %578 = vector.broadcast %577 : vector<1x1x48xf32> to vector<8x8x48xf32>
    %579 = arith.mulf %574, %578 : vector<8x8x48xf32>
    %580 = arith.addf %573, %579 : vector<8x8x48xf32>
    %c0_320 = arith.constant 0 : index
    %c3_321 = arith.constant 3 : index
    %c0_322 = arith.constant 0 : index
    %581 = vector.load %arg45[%c0_320, %c3_321, %c0_322] : memref<20x20x48xf32, #tpu.memory_space<vmem>>, vector<8x8x48xf32>
    %c3_323 = arith.constant 3 : index
    %c0_324 = arith.constant 0 : index
    %582 = vector.load %arg31[%c3_323, %c0_324] : memref<25x48xf32, #tpu.memory_space<vmem>>, vector<1x48xf32>
    %583 = vector.shape_cast %582 : vector<1x48xf32> to vector<48xf32>
    %584 = vector.shape_cast %583 : vector<48xf32> to vector<1x1x48xf32>
    %585 = vector.broadcast %584 : vector<1x1x48xf32> to vector<8x8x48xf32>
    %586 = arith.mulf %581, %585 : vector<8x8x48xf32>
    %587 = arith.addf %580, %586 : vector<8x8x48xf32>
    %c0_325 = arith.constant 0 : index
    %c4_326 = arith.constant 4 : index
    %c0_327 = arith.constant 0 : index
    %588 = vector.load %arg45[%c0_325, %c4_326, %c0_327] : memref<20x20x48xf32, #tpu.memory_space<vmem>>, vector<8x8x48xf32>
    %c4_328 = arith.constant 4 : index
    %c0_329 = arith.constant 0 : index
    %589 = vector.load %arg31[%c4_328, %c0_329] : memref<25x48xf32, #tpu.memory_space<vmem>>, vector<1x48xf32>
    %590 = vector.shape_cast %589 : vector<1x48xf32> to vector<48xf32>
    %591 = vector.shape_cast %590 : vector<48xf32> to vector<1x1x48xf32>
    %592 = vector.broadcast %591 : vector<1x1x48xf32> to vector<8x8x48xf32>
    %593 = arith.mulf %588, %592 : vector<8x8x48xf32>
    %594 = arith.addf %587, %593 : vector<8x8x48xf32>
    %c1_330 = arith.constant 1 : index
    %c0_331 = arith.constant 0 : index
    %c0_332 = arith.constant 0 : index
    %595 = vector.load %arg45[%c1_330, %c0_331, %c0_332] : memref<20x20x48xf32, #tpu.memory_space<vmem>>, vector<8x8x48xf32>
    %c5_333 = arith.constant 5 : index
    %c0_334 = arith.constant 0 : index
    %596 = vector.load %arg31[%c5_333, %c0_334] : memref<25x48xf32, #tpu.memory_space<vmem>>, vector<1x48xf32>
    %597 = vector.shape_cast %596 : vector<1x48xf32> to vector<48xf32>
    %598 = vector.shape_cast %597 : vector<48xf32> to vector<1x1x48xf32>
    %599 = vector.broadcast %598 : vector<1x1x48xf32> to vector<8x8x48xf32>
    %600 = arith.mulf %595, %599 : vector<8x8x48xf32>
    %601 = arith.addf %594, %600 : vector<8x8x48xf32>
    %c1_335 = arith.constant 1 : index
    %c1_336 = arith.constant 1 : index
    %c0_337 = arith.constant 0 : index
    %602 = vector.load %arg45[%c1_335, %c1_336, %c0_337] : memref<20x20x48xf32, #tpu.memory_space<vmem>>, vector<8x8x48xf32>
    %c6_338 = arith.constant 6 : index
    %c0_339 = arith.constant 0 : index
    %603 = vector.load %arg31[%c6_338, %c0_339] : memref<25x48xf32, #tpu.memory_space<vmem>>, vector<1x48xf32>
    %604 = vector.shape_cast %603 : vector<1x48xf32> to vector<48xf32>
    %605 = vector.shape_cast %604 : vector<48xf32> to vector<1x1x48xf32>
    %606 = vector.broadcast %605 : vector<1x1x48xf32> to vector<8x8x48xf32>
    %607 = arith.mulf %602, %606 : vector<8x8x48xf32>
    %608 = arith.addf %601, %607 : vector<8x8x48xf32>
    %c1_340 = arith.constant 1 : index
    %c2_341 = arith.constant 2 : index
    %c0_342 = arith.constant 0 : index
    %609 = vector.load %arg45[%c1_340, %c2_341, %c0_342] : memref<20x20x48xf32, #tpu.memory_space<vmem>>, vector<8x8x48xf32>
    %c7_343 = arith.constant 7 : index
    %c0_344 = arith.constant 0 : index
    %610 = vector.load %arg31[%c7_343, %c0_344] : memref<25x48xf32, #tpu.memory_space<vmem>>, vector<1x48xf32>
    %611 = vector.shape_cast %610 : vector<1x48xf32> to vector<48xf32>
    %612 = vector.shape_cast %611 : vector<48xf32> to vector<1x1x48xf32>
    %613 = vector.broadcast %612 : vector<1x1x48xf32> to vector<8x8x48xf32>
    %614 = arith.mulf %609, %613 : vector<8x8x48xf32>
    %615 = arith.addf %608, %614 : vector<8x8x48xf32>
    %c1_345 = arith.constant 1 : index
    %c3_346 = arith.constant 3 : index
    %c0_347 = arith.constant 0 : index
    %616 = vector.load %arg45[%c1_345, %c3_346, %c0_347] : memref<20x20x48xf32, #tpu.memory_space<vmem>>, vector<8x8x48xf32>
    %c8_348 = arith.constant 8 : index
    %c0_349 = arith.constant 0 : index
    %617 = vector.load %arg31[%c8_348, %c0_349] : memref<25x48xf32, #tpu.memory_space<vmem>>, vector<1x48xf32>
    %618 = vector.shape_cast %617 : vector<1x48xf32> to vector<48xf32>
    %619 = vector.shape_cast %618 : vector<48xf32> to vector<1x1x48xf32>
    %620 = vector.broadcast %619 : vector<1x1x48xf32> to vector<8x8x48xf32>
    %621 = arith.mulf %616, %620 : vector<8x8x48xf32>
    %622 = arith.addf %615, %621 : vector<8x8x48xf32>
    %c1_350 = arith.constant 1 : index
    %c4_351 = arith.constant 4 : index
    %c0_352 = arith.constant 0 : index
    %623 = vector.load %arg45[%c1_350, %c4_351, %c0_352] : memref<20x20x48xf32, #tpu.memory_space<vmem>>, vector<8x8x48xf32>
    %c9_353 = arith.constant 9 : index
    %c0_354 = arith.constant 0 : index
    %624 = vector.load %arg31[%c9_353, %c0_354] : memref<25x48xf32, #tpu.memory_space<vmem>>, vector<1x48xf32>
    %625 = vector.shape_cast %624 : vector<1x48xf32> to vector<48xf32>
    %626 = vector.shape_cast %625 : vector<48xf32> to vector<1x1x48xf32>
    %627 = vector.broadcast %626 : vector<1x1x48xf32> to vector<8x8x48xf32>
    %628 = arith.mulf %623, %627 : vector<8x8x48xf32>
    %629 = arith.addf %622, %628 : vector<8x8x48xf32>
    %c2_355 = arith.constant 2 : index
    %c0_356 = arith.constant 0 : index
    %c0_357 = arith.constant 0 : index
    %630 = vector.load %arg45[%c2_355, %c0_356, %c0_357] : memref<20x20x48xf32, #tpu.memory_space<vmem>>, vector<8x8x48xf32>
    %c10_358 = arith.constant 10 : index
    %c0_359 = arith.constant 0 : index
    %631 = vector.load %arg31[%c10_358, %c0_359] : memref<25x48xf32, #tpu.memory_space<vmem>>, vector<1x48xf32>
    %632 = vector.shape_cast %631 : vector<1x48xf32> to vector<48xf32>
    %633 = vector.shape_cast %632 : vector<48xf32> to vector<1x1x48xf32>
    %634 = vector.broadcast %633 : vector<1x1x48xf32> to vector<8x8x48xf32>
    %635 = arith.mulf %630, %634 : vector<8x8x48xf32>
    %636 = arith.addf %629, %635 : vector<8x8x48xf32>
    %c2_360 = arith.constant 2 : index
    %c1_361 = arith.constant 1 : index
    %c0_362 = arith.constant 0 : index
    %637 = vector.load %arg45[%c2_360, %c1_361, %c0_362] : memref<20x20x48xf32, #tpu.memory_space<vmem>>, vector<8x8x48xf32>
    %c11_363 = arith.constant 11 : index
    %c0_364 = arith.constant 0 : index
    %638 = vector.load %arg31[%c11_363, %c0_364] : memref<25x48xf32, #tpu.memory_space<vmem>>, vector<1x48xf32>
    %639 = vector.shape_cast %638 : vector<1x48xf32> to vector<48xf32>
    %640 = vector.shape_cast %639 : vector<48xf32> to vector<1x1x48xf32>
    %641 = vector.broadcast %640 : vector<1x1x48xf32> to vector<8x8x48xf32>
    %642 = arith.mulf %637, %641 : vector<8x8x48xf32>
    %643 = arith.addf %636, %642 : vector<8x8x48xf32>
    %c2_365 = arith.constant 2 : index
    %c2_366 = arith.constant 2 : index
    %c0_367 = arith.constant 0 : index
    %644 = vector.load %arg45[%c2_365, %c2_366, %c0_367] : memref<20x20x48xf32, #tpu.memory_space<vmem>>, vector<8x8x48xf32>
    %c12_368 = arith.constant 12 : index
    %c0_369 = arith.constant 0 : index
    %645 = vector.load %arg31[%c12_368, %c0_369] : memref<25x48xf32, #tpu.memory_space<vmem>>, vector<1x48xf32>
    %646 = vector.shape_cast %645 : vector<1x48xf32> to vector<48xf32>
    %647 = vector.shape_cast %646 : vector<48xf32> to vector<1x1x48xf32>
    %648 = vector.broadcast %647 : vector<1x1x48xf32> to vector<8x8x48xf32>
    %649 = arith.mulf %644, %648 : vector<8x8x48xf32>
    %650 = arith.addf %643, %649 : vector<8x8x48xf32>
    %c2_370 = arith.constant 2 : index
    %c3_371 = arith.constant 3 : index
    %c0_372 = arith.constant 0 : index
    %651 = vector.load %arg45[%c2_370, %c3_371, %c0_372] : memref<20x20x48xf32, #tpu.memory_space<vmem>>, vector<8x8x48xf32>
    %c13_373 = arith.constant 13 : index
    %c0_374 = arith.constant 0 : index
    %652 = vector.load %arg31[%c13_373, %c0_374] : memref<25x48xf32, #tpu.memory_space<vmem>>, vector<1x48xf32>
    %653 = vector.shape_cast %652 : vector<1x48xf32> to vector<48xf32>
    %654 = vector.shape_cast %653 : vector<48xf32> to vector<1x1x48xf32>
    %655 = vector.broadcast %654 : vector<1x1x48xf32> to vector<8x8x48xf32>
    %656 = arith.mulf %651, %655 : vector<8x8x48xf32>
    %657 = arith.addf %650, %656 : vector<8x8x48xf32>
    %c2_375 = arith.constant 2 : index
    %c4_376 = arith.constant 4 : index
    %c0_377 = arith.constant 0 : index
    %658 = vector.load %arg45[%c2_375, %c4_376, %c0_377] : memref<20x20x48xf32, #tpu.memory_space<vmem>>, vector<8x8x48xf32>
    %c14_378 = arith.constant 14 : index
    %c0_379 = arith.constant 0 : index
    %659 = vector.load %arg31[%c14_378, %c0_379] : memref<25x48xf32, #tpu.memory_space<vmem>>, vector<1x48xf32>
    %660 = vector.shape_cast %659 : vector<1x48xf32> to vector<48xf32>
    %661 = vector.shape_cast %660 : vector<48xf32> to vector<1x1x48xf32>
    %662 = vector.broadcast %661 : vector<1x1x48xf32> to vector<8x8x48xf32>
    %663 = arith.mulf %658, %662 : vector<8x8x48xf32>
    %664 = arith.addf %657, %663 : vector<8x8x48xf32>
    %c3_380 = arith.constant 3 : index
    %c0_381 = arith.constant 0 : index
    %c0_382 = arith.constant 0 : index
    %665 = vector.load %arg45[%c3_380, %c0_381, %c0_382] : memref<20x20x48xf32, #tpu.memory_space<vmem>>, vector<8x8x48xf32>
    %c15_383 = arith.constant 15 : index
    %c0_384 = arith.constant 0 : index
    %666 = vector.load %arg31[%c15_383, %c0_384] : memref<25x48xf32, #tpu.memory_space<vmem>>, vector<1x48xf32>
    %667 = vector.shape_cast %666 : vector<1x48xf32> to vector<48xf32>
    %668 = vector.shape_cast %667 : vector<48xf32> to vector<1x1x48xf32>
    %669 = vector.broadcast %668 : vector<1x1x48xf32> to vector<8x8x48xf32>
    %670 = arith.mulf %665, %669 : vector<8x8x48xf32>
    %671 = arith.addf %664, %670 : vector<8x8x48xf32>
    %c3_385 = arith.constant 3 : index
    %c1_386 = arith.constant 1 : index
    %c0_387 = arith.constant 0 : index
    %672 = vector.load %arg45[%c3_385, %c1_386, %c0_387] : memref<20x20x48xf32, #tpu.memory_space<vmem>>, vector<8x8x48xf32>
    %c16_388 = arith.constant 16 : index
    %c0_389 = arith.constant 0 : index
    %673 = vector.load %arg31[%c16_388, %c0_389] : memref<25x48xf32, #tpu.memory_space<vmem>>, vector<1x48xf32>
    %674 = vector.shape_cast %673 : vector<1x48xf32> to vector<48xf32>
    %675 = vector.shape_cast %674 : vector<48xf32> to vector<1x1x48xf32>
    %676 = vector.broadcast %675 : vector<1x1x48xf32> to vector<8x8x48xf32>
    %677 = arith.mulf %672, %676 : vector<8x8x48xf32>
    %678 = arith.addf %671, %677 : vector<8x8x48xf32>
    %c3_390 = arith.constant 3 : index
    %c2_391 = arith.constant 2 : index
    %c0_392 = arith.constant 0 : index
    %679 = vector.load %arg45[%c3_390, %c2_391, %c0_392] : memref<20x20x48xf32, #tpu.memory_space<vmem>>, vector<8x8x48xf32>
    %c17_393 = arith.constant 17 : index
    %c0_394 = arith.constant 0 : index
    %680 = vector.load %arg31[%c17_393, %c0_394] : memref<25x48xf32, #tpu.memory_space<vmem>>, vector<1x48xf32>
    %681 = vector.shape_cast %680 : vector<1x48xf32> to vector<48xf32>
    %682 = vector.shape_cast %681 : vector<48xf32> to vector<1x1x48xf32>
    %683 = vector.broadcast %682 : vector<1x1x48xf32> to vector<8x8x48xf32>
    %684 = arith.mulf %679, %683 : vector<8x8x48xf32>
    %685 = arith.addf %678, %684 : vector<8x8x48xf32>
    %c3_395 = arith.constant 3 : index
    %c3_396 = arith.constant 3 : index
    %c0_397 = arith.constant 0 : index
    %686 = vector.load %arg45[%c3_395, %c3_396, %c0_397] : memref<20x20x48xf32, #tpu.memory_space<vmem>>, vector<8x8x48xf32>
    %c18_398 = arith.constant 18 : index
    %c0_399 = arith.constant 0 : index
    %687 = vector.load %arg31[%c18_398, %c0_399] : memref<25x48xf32, #tpu.memory_space<vmem>>, vector<1x48xf32>
    %688 = vector.shape_cast %687 : vector<1x48xf32> to vector<48xf32>
    %689 = vector.shape_cast %688 : vector<48xf32> to vector<1x1x48xf32>
    %690 = vector.broadcast %689 : vector<1x1x48xf32> to vector<8x8x48xf32>
    %691 = arith.mulf %686, %690 : vector<8x8x48xf32>
    %692 = arith.addf %685, %691 : vector<8x8x48xf32>
    %c3_400 = arith.constant 3 : index
    %c4_401 = arith.constant 4 : index
    %c0_402 = arith.constant 0 : index
    %693 = vector.load %arg45[%c3_400, %c4_401, %c0_402] : memref<20x20x48xf32, #tpu.memory_space<vmem>>, vector<8x8x48xf32>
    %c19_403 = arith.constant 19 : index
    %c0_404 = arith.constant 0 : index
    %694 = vector.load %arg31[%c19_403, %c0_404] : memref<25x48xf32, #tpu.memory_space<vmem>>, vector<1x48xf32>
    %695 = vector.shape_cast %694 : vector<1x48xf32> to vector<48xf32>
    %696 = vector.shape_cast %695 : vector<48xf32> to vector<1x1x48xf32>
    %697 = vector.broadcast %696 : vector<1x1x48xf32> to vector<8x8x48xf32>
    %698 = arith.mulf %693, %697 : vector<8x8x48xf32>
    %699 = arith.addf %692, %698 : vector<8x8x48xf32>
    %c4_405 = arith.constant 4 : index
    %c0_406 = arith.constant 0 : index
    %c0_407 = arith.constant 0 : index
    %700 = vector.load %arg45[%c4_405, %c0_406, %c0_407] : memref<20x20x48xf32, #tpu.memory_space<vmem>>, vector<8x8x48xf32>
    %c20_408 = arith.constant 20 : index
    %c0_409 = arith.constant 0 : index
    %701 = vector.load %arg31[%c20_408, %c0_409] : memref<25x48xf32, #tpu.memory_space<vmem>>, vector<1x48xf32>
    %702 = vector.shape_cast %701 : vector<1x48xf32> to vector<48xf32>
    %703 = vector.shape_cast %702 : vector<48xf32> to vector<1x1x48xf32>
    %704 = vector.broadcast %703 : vector<1x1x48xf32> to vector<8x8x48xf32>
    %705 = arith.mulf %700, %704 : vector<8x8x48xf32>
    %706 = arith.addf %699, %705 : vector<8x8x48xf32>
    %c4_410 = arith.constant 4 : index
    %c1_411 = arith.constant 1 : index
    %c0_412 = arith.constant 0 : index
    %707 = vector.load %arg45[%c4_410, %c1_411, %c0_412] : memref<20x20x48xf32, #tpu.memory_space<vmem>>, vector<8x8x48xf32>
    %c21_413 = arith.constant 21 : index
    %c0_414 = arith.constant 0 : index
    %708 = vector.load %arg31[%c21_413, %c0_414] : memref<25x48xf32, #tpu.memory_space<vmem>>, vector<1x48xf32>
    %709 = vector.shape_cast %708 : vector<1x48xf32> to vector<48xf32>
    %710 = vector.shape_cast %709 : vector<48xf32> to vector<1x1x48xf32>
    %711 = vector.broadcast %710 : vector<1x1x48xf32> to vector<8x8x48xf32>
    %712 = arith.mulf %707, %711 : vector<8x8x48xf32>
    %713 = arith.addf %706, %712 : vector<8x8x48xf32>
    %c4_415 = arith.constant 4 : index
    %c2_416 = arith.constant 2 : index
    %c0_417 = arith.constant 0 : index
    %714 = vector.load %arg45[%c4_415, %c2_416, %c0_417] : memref<20x20x48xf32, #tpu.memory_space<vmem>>, vector<8x8x48xf32>
    %c22_418 = arith.constant 22 : index
    %c0_419 = arith.constant 0 : index
    %715 = vector.load %arg31[%c22_418, %c0_419] : memref<25x48xf32, #tpu.memory_space<vmem>>, vector<1x48xf32>
    %716 = vector.shape_cast %715 : vector<1x48xf32> to vector<48xf32>
    %717 = vector.shape_cast %716 : vector<48xf32> to vector<1x1x48xf32>
    %718 = vector.broadcast %717 : vector<1x1x48xf32> to vector<8x8x48xf32>
    %719 = arith.mulf %714, %718 : vector<8x8x48xf32>
    %720 = arith.addf %713, %719 : vector<8x8x48xf32>
    %c4_420 = arith.constant 4 : index
    %c3_421 = arith.constant 3 : index
    %c0_422 = arith.constant 0 : index
    %721 = vector.load %arg45[%c4_420, %c3_421, %c0_422] : memref<20x20x48xf32, #tpu.memory_space<vmem>>, vector<8x8x48xf32>
    %c23_423 = arith.constant 23 : index
    %c0_424 = arith.constant 0 : index
    %722 = vector.load %arg31[%c23_423, %c0_424] : memref<25x48xf32, #tpu.memory_space<vmem>>, vector<1x48xf32>
    %723 = vector.shape_cast %722 : vector<1x48xf32> to vector<48xf32>
    %724 = vector.shape_cast %723 : vector<48xf32> to vector<1x1x48xf32>
    %725 = vector.broadcast %724 : vector<1x1x48xf32> to vector<8x8x48xf32>
    %726 = arith.mulf %721, %725 : vector<8x8x48xf32>
    %727 = arith.addf %720, %726 : vector<8x8x48xf32>
    %c4_425 = arith.constant 4 : index
    %c4_426 = arith.constant 4 : index
    %c0_427 = arith.constant 0 : index
    %728 = vector.load %arg45[%c4_425, %c4_426, %c0_427] : memref<20x20x48xf32, #tpu.memory_space<vmem>>, vector<8x8x48xf32>
    %c24_428 = arith.constant 24 : index
    %c0_429 = arith.constant 0 : index
    %729 = vector.load %arg31[%c24_428, %c0_429] : memref<25x48xf32, #tpu.memory_space<vmem>>, vector<1x48xf32>
    %730 = vector.shape_cast %729 : vector<1x48xf32> to vector<48xf32>
    %731 = vector.shape_cast %730 : vector<48xf32> to vector<1x1x48xf32>
    %732 = vector.broadcast %731 : vector<1x1x48xf32> to vector<8x8x48xf32>
    %733 = arith.mulf %728, %732 : vector<8x8x48xf32>
    %734 = arith.addf %727, %733 : vector<8x8x48xf32>
    %c0_430 = arith.constant 0 : index
    %c0_431 = arith.constant 0 : index
    %735 = vector.load %arg32[%c0_430, %c0_431] : memref<1x48xf32, #tpu.memory_space<vmem>>, vector<1x48xf32>
    %736 = vector.shape_cast %735 : vector<1x48xf32> to vector<48xf32>
    %737 = vector.shape_cast %736 : vector<48xf32> to vector<1x1x48xf32>
    %738 = vector.broadcast %737 : vector<1x1x48xf32> to vector<8x8x48xf32>
    %739 = arith.mulf %734, %738 : vector<8x8x48xf32>
    %c0_432 = arith.constant 0 : index
    %c0_433 = arith.constant 0 : index
    %740 = vector.load %arg33[%c0_432, %c0_433] : memref<1x48xf32, #tpu.memory_space<vmem>>, vector<1x48xf32>
    %741 = vector.shape_cast %740 : vector<1x48xf32> to vector<48xf32>
    %742 = vector.shape_cast %741 : vector<48xf32> to vector<1x1x48xf32>
    %743 = vector.broadcast %742 : vector<1x1x48xf32> to vector<8x8x48xf32>
    %744 = arith.addf %739, %743 : vector<8x8x48xf32>
    %745 = arith.negf %744 : vector<8x8x48xf32>
    %746 = math.exp %745 : vector<8x8x48xf32>
    %cst_434 = arith.constant 1.000000e+00 : f32
    %747 = vector.broadcast %cst_434 : f32 to vector<8x8x48xf32>
    %748 = arith.addf %747, %746 : vector<8x8x48xf32>
    %749 = arith.divf %747, %748 : vector<8x8x48xf32>
    %750 = arith.mulf %744, %749 : vector<8x8x48xf32>
    %751 = vector.shape_cast %750 : vector<8x8x48xf32> to vector<64x48xf32>
    %cst_435 = arith.constant dense<0.000000e+00> : vector<48xf32>
    %752 = vector.multi_reduction <add>, %751, %cst_435 [0] : vector<64x48xf32> to vector<48xf32>
    %753 = vector.shape_cast %752 : vector<48xf32> to vector<1x48xf32>
    %cst_436 = arith.constant 6.400000e+01 : f32
    %754 = vector.broadcast %cst_436 : f32 to vector<1x48xf32>
    %755 = arith.divf %753, %754 : vector<1x48xf32>
    %756 = arith.truncf %755 : vector<1x48xf32> to vector<1x48xbf16>
    %c0_437 = arith.constant 0 : index
    %c0_438 = arith.constant 0 : index
    %757 = vector.load %arg34[%c0_437, %c0_438] : memref<48x6xbf16, #tpu.memory_space<vmem>>, vector<48x6xbf16>
    %cst_439 = arith.constant dense<0.000000e+00> : vector<1x6xf32>
    %758 = tpu.matmul %756, %757, %cst_439 {dimension_numbers = #tpu.dot_dimension_numbers<[1], [0], [0], [1], [0, 0, 1, 1], [], []>} : vector<1x48xbf16>, vector<48x6xbf16>, vector<1x6xf32> -> vector<1x6xf32>
    %c0_440 = arith.constant 0 : index
    %c0_441 = arith.constant 0 : index
    %759 = vector.load %arg35[%c0_440, %c0_441] : memref<1x6xf32, #tpu.memory_space<vmem>>, vector<1x6xf32>
    %760 = arith.addf %758, %759 : vector<1x6xf32>
    %761 = arith.negf %760 : vector<1x6xf32>
    %762 = math.exp %761 : vector<1x6xf32>
    %cst_442 = arith.constant 1.000000e+00 : f32
    %763 = vector.broadcast %cst_442 : f32 to vector<1x6xf32>
    %764 = arith.addf %763, %762 : vector<1x6xf32>
    %765 = arith.divf %763, %764 : vector<1x6xf32>
    %766 = arith.mulf %760, %765 : vector<1x6xf32>
    %767 = arith.truncf %766 : vector<1x6xf32> to vector<1x6xbf16>
    %c0_443 = arith.constant 0 : index
    %c0_444 = arith.constant 0 : index
    %768 = vector.load %arg36[%c0_443, %c0_444] : memref<6x48xbf16, #tpu.memory_space<vmem>>, vector<6x48xbf16>
    %cst_445 = arith.constant dense<0.000000e+00> : vector<1x48xf32>
    %769 = tpu.matmul %767, %768, %cst_445 {dimension_numbers = #tpu.dot_dimension_numbers<[1], [0], [0], [1], [0, 0, 1, 1], [], []>} : vector<1x6xbf16>, vector<6x48xbf16>, vector<1x48xf32> -> vector<1x48xf32>
    %c0_446 = arith.constant 0 : index
    %c0_447 = arith.constant 0 : index
    %770 = vector.load %arg37[%c0_446, %c0_447] : memref<1x48xf32, #tpu.memory_space<vmem>>, vector<1x48xf32>
    %771 = arith.addf %769, %770 : vector<1x48xf32>
    %772 = arith.negf %771 : vector<1x48xf32>
    %773 = math.exp %772 : vector<1x48xf32>
    %cst_448 = arith.constant 1.000000e+00 : f32
    %774 = vector.broadcast %cst_448 : f32 to vector<1x48xf32>
    %775 = arith.addf %774, %773 : vector<1x48xf32>
    %776 = arith.divf %774, %775 : vector<1x48xf32>
    %777 = vector.broadcast %776 : vector<1x48xf32> to vector<64x48xf32>
    %778 = arith.mulf %751, %777 : vector<64x48xf32>
    %779 = arith.truncf %778 : vector<64x48xf32> to vector<64x48xbf16>
    %c0_449 = arith.constant 0 : index
    %c0_450 = arith.constant 0 : index
    %780 = vector.load %arg38[%c0_449, %c0_450] : memref<48x24xbf16, #tpu.memory_space<vmem>>, vector<48x24xbf16>
    %cst_451 = arith.constant dense<0.000000e+00> : vector<64x24xf32>
    %781 = tpu.matmul %779, %780, %cst_451 {dimension_numbers = #tpu.dot_dimension_numbers<[1], [0], [0], [1], [0, 0, 1, 1], [], []>} : vector<64x48xbf16>, vector<48x24xbf16>, vector<64x24xf32> -> vector<64x24xf32>
    %c0_452 = arith.constant 0 : index
    %c0_453 = arith.constant 0 : index
    %782 = vector.load %arg39[%c0_452, %c0_453] : memref<1x24xf32, #tpu.memory_space<vmem>>, vector<1x24xf32>
    %783 = vector.shape_cast %782 : vector<1x24xf32> to vector<24xf32>
    %784 = vector.shape_cast %783 : vector<24xf32> to vector<1x24xf32>
    %785 = vector.broadcast %784 : vector<1x24xf32> to vector<64x24xf32>
    %786 = arith.mulf %781, %785 : vector<64x24xf32>
    %c0_454 = arith.constant 0 : index
    %c0_455 = arith.constant 0 : index
    %787 = vector.load %arg40[%c0_454, %c0_455] : memref<1x24xf32, #tpu.memory_space<vmem>>, vector<1x24xf32>
    %788 = vector.shape_cast %787 : vector<1x24xf32> to vector<24xf32>
    %789 = vector.shape_cast %788 : vector<24xf32> to vector<1x24xf32>
    %790 = vector.broadcast %789 : vector<1x24xf32> to vector<64x24xf32>
    %791 = arith.addf %786, %790 : vector<64x24xf32>
    %792 = arith.addf %791, %535 : vector<64x24xf32>
    %cst_456 = arith.constant dense<0.000000e+00> : vector<24xf32>
    %793 = vector.multi_reduction <add>, %792, %cst_456 [0] : vector<64x24xf32> to vector<24xf32>
    %794 = vector.shape_cast %793 : vector<24xf32> to vector<1x24xf32>
    %cst_457 = arith.constant 6.400000e+01 : f32
    %795 = vector.broadcast %cst_457 : f32 to vector<1x24xf32>
    %796 = arith.divf %794, %795 : vector<1x24xf32>
    %c0_458 = arith.constant 0 : index
    %c0_459 = arith.constant 0 : index
    %c0_460 = arith.constant 0 : index
    %797 = vector.load %arg44[%c0_458, %c0_459, %c0_460] : memref<1x1x24xf32, #tpu.memory_space<vmem>>, vector<1x1x24xf32>
    %798 = vector.shape_cast %797 : vector<1x1x24xf32> to vector<1x24xf32>
    %799 = vector.shape_cast %796 : vector<1x24xf32> to vector<1x1x24xf32>
    tpu.vector_store %arg44[%c0_458, %c0_459, %c0_460], %799 {strides = array<i32>} : memref<1x1x24xf32, #tpu.memory_space<vmem>>, vector<1x1x24xf32>,
    %800 = arith.truncf %796 : vector<1x24xf32> to vector<1x24xbf16>
    %c0_461 = arith.constant 0 : index
    %c0_462 = arith.constant 0 : index
    %801 = vector.load %arg41[%c0_461, %c0_462] : memref<24x10xbf16, #tpu.memory_space<vmem>>, vector<24x10xbf16>
    %cst_463 = arith.constant dense<0.000000e+00> : vector<1x10xf32>
    %802 = tpu.matmul %800, %801, %cst_463 {dimension_numbers = #tpu.dot_dimension_numbers<[1], [0], [0], [1], [0, 0, 1, 1], [], []>} : vector<1x24xbf16>, vector<24x10xbf16>, vector<1x10xf32> -> vector<1x10xf32>
    %c0_464 = arith.constant 0 : index
    %c0_465 = arith.constant 0 : index
    %803 = vector.load %arg42[%c0_464, %c0_465] : memref<1x10xf32, #tpu.memory_space<vmem>>, vector<1x10xf32>
    %804 = arith.addf %802, %803 : vector<1x10xf32>
    %c0_466 = arith.constant 0 : index
    %c0_467 = arith.constant 0 : index
    %c0_468 = arith.constant 0 : index
    %805 = vector.load %arg43[%c0_466, %c0_467, %c0_468] : memref<1x1x10xf32, #tpu.memory_space<vmem>>, vector<1x1x10xf32>
    %806 = vector.shape_cast %805 : vector<1x1x10xf32> to vector<1x10xf32>
    %807 = vector.shape_cast %804 : vector<1x10xf32> to vector<1x1x10xf32>
    tpu.vector_store %arg43[%c0_466, %c0_467, %c0_468], %807 {strides = array<i32>} : memref<1x1x10xf32, #tpu.memory_space<vmem>>, vector<1x1x10xf32>,
    return
  }
  func.func @transform_0(%arg0: i32) -> (i32, i32, i32, i32) {
    %c0_i32 = arith.constant 0 : i32
    %c0_i32_0 = arith.constant 0 : i32
    %c0_i32_1 = arith.constant 0 : i32
    %c0_i32_2 = arith.constant 0 : i32
    return %arg0, %c0_i32, %c0_i32_0, %c0_i32_1 : i32, i32, i32, i32
  }
  func.func @transform_1(%arg0: i32) -> (i32, i32) {
    %c0_i32 = arith.constant 0 : i32
    %c0_i32_0 = arith.constant 0 : i32
    %c0_i32_1 = arith.constant 0 : i32
    return %c0_i32, %c0_i32_0 : i32, i32
  }
  func.func @transform_2(%arg0: i32) -> (i32, i32) {
    %c0_i32 = arith.constant 0 : i32
    %c0_i32_0 = arith.constant 0 : i32
    %c0_i32_1 = arith.constant 0 : i32
    return %c0_i32, %c0_i32_0 : i32, i32
  }
  func.func @transform_3(%arg0: i32) -> (i32, i32) {
    %c0_i32 = arith.constant 0 : i32
    %c0_i32_0 = arith.constant 0 : i32
    %c0_i32_1 = arith.constant 0 : i32
    return %c0_i32, %c0_i32_0 : i32, i32
  }
  func.func @transform_4(%arg0: i32) -> (i32, i32) {
    %c0_i32 = arith.constant 0 : i32
    %c0_i32_0 = arith.constant 0 : i32
    %c0_i32_1 = arith.constant 0 : i32
    return %c0_i32, %c0_i32_0 : i32, i32
  }
  func.func @transform_5(%arg0: i32) -> (i32, i32) {
    %c0_i32 = arith.constant 0 : i32
    %c0_i32_0 = arith.constant 0 : i32
    %c0_i32_1 = arith.constant 0 : i32
    return %c0_i32, %c0_i32_0 : i32, i32
  }
  func.func @transform_6(%arg0: i32) -> (i32, i32) {
    %c0_i32 = arith.constant 0 : i32
    %c0_i32_0 = arith.constant 0 : i32
    %c0_i32_1 = arith.constant 0 : i32
    return %c0_i32, %c0_i32_0 : i32, i32
  }
  func.func @transform_7(%arg0: i32) -> (i32, i32) {
    %c0_i32 = arith.constant 0 : i32
    %c0_i32_0 = arith.constant 0 : i32
    %c0_i32_1 = arith.constant 0 : i32
    return %c0_i32, %c0_i32_0 : i32, i32
  }
  func.func @transform_8(%arg0: i32) -> (i32, i32) {
    %c0_i32 = arith.constant 0 : i32
    %c0_i32_0 = arith.constant 0 : i32
    %c0_i32_1 = arith.constant 0 : i32
    return %c0_i32, %c0_i32_0 : i32, i32
  }
  func.func @transform_9(%arg0: i32) -> (i32, i32) {
    %c0_i32 = arith.constant 0 : i32
    %c0_i32_0 = arith.constant 0 : i32
    %c0_i32_1 = arith.constant 0 : i32
    return %c0_i32, %c0_i32_0 : i32, i32
  }
  func.func @transform_10(%arg0: i32) -> (i32, i32) {
    %c0_i32 = arith.constant 0 : i32
    %c0_i32_0 = arith.constant 0 : i32
    %c0_i32_1 = arith.constant 0 : i32
    return %c0_i32, %c0_i32_0 : i32, i32
  }
  func.func @transform_11(%arg0: i32) -> (i32, i32) {
    %c0_i32 = arith.constant 0 : i32
    %c0_i32_0 = arith.constant 0 : i32
    %c0_i32_1 = arith.constant 0 : i32
    return %c0_i32, %c0_i32_0 : i32, i32
  }
  func.func @transform_12(%arg0: i32) -> (i32, i32) {
    %c0_i32 = arith.constant 0 : i32
    %c0_i32_0 = arith.constant 0 : i32
    %c0_i32_1 = arith.constant 0 : i32
    return %c0_i32, %c0_i32_0 : i32, i32
  }
  func.func @transform_13(%arg0: i32) -> (i32, i32) {
    %c0_i32 = arith.constant 0 : i32
    %c0_i32_0 = arith.constant 0 : i32
    %c0_i32_1 = arith.constant 0 : i32
    return %c0_i32, %c0_i32_0 : i32, i32
  }
  func.func @transform_14(%arg0: i32) -> (i32, i32) {
    %c0_i32 = arith.constant 0 : i32
    %c0_i32_0 = arith.constant 0 : i32
    %c0_i32_1 = arith.constant 0 : i32
    return %c0_i32, %c0_i32_0 : i32, i32
  }
  func.func @transform_15(%arg0: i32) -> (i32, i32) {
    %c0_i32 = arith.constant 0 : i32
    %c0_i32_0 = arith.constant 0 : i32
    %c0_i32_1 = arith.constant 0 : i32
    return %c0_i32, %c0_i32_0 : i32, i32
  }
  func.func @transform_16(%arg0: i32) -> (i32, i32) {
    %c0_i32 = arith.constant 0 : i32
    %c0_i32_0 = arith.constant 0 : i32
    %c0_i32_1 = arith.constant 0 : i32
    return %c0_i32, %c0_i32_0 : i32, i32
  }
  func.func @transform_17(%arg0: i32) -> (i32, i32) {
    %c0_i32 = arith.constant 0 : i32
    %c0_i32_0 = arith.constant 0 : i32
    %c0_i32_1 = arith.constant 0 : i32
    return %c0_i32, %c0_i32_0 : i32, i32
  }
  func.func @transform_18(%arg0: i32) -> (i32, i32) {
    %c0_i32 = arith.constant 0 : i32
    %c0_i32_0 = arith.constant 0 : i32
    %c0_i32_1 = arith.constant 0 : i32
    return %c0_i32, %c0_i32_0 : i32, i32
  }
  func.func @transform_19(%arg0: i32) -> (i32, i32) {
    %c0_i32 = arith.constant 0 : i32
    %c0_i32_0 = arith.constant 0 : i32
    %c0_i32_1 = arith.constant 0 : i32
    return %c0_i32, %c0_i32_0 : i32, i32
  }
  func.func @transform_20(%arg0: i32) -> (i32, i32) {
    %c0_i32 = arith.constant 0 : i32
    %c0_i32_0 = arith.constant 0 : i32
    %c0_i32_1 = arith.constant 0 : i32
    return %c0_i32, %c0_i32_0 : i32, i32
  }
  func.func @transform_21(%arg0: i32) -> (i32, i32) {
    %c0_i32 = arith.constant 0 : i32
    %c0_i32_0 = arith.constant 0 : i32
    %c0_i32_1 = arith.constant 0 : i32
    return %c0_i32, %c0_i32_0 : i32, i32
  }
  func.func @transform_22(%arg0: i32) -> (i32, i32) {
    %c0_i32 = arith.constant 0 : i32
    %c0_i32_0 = arith.constant 0 : i32
    %c0_i32_1 = arith.constant 0 : i32
    return %c0_i32, %c0_i32_0 : i32, i32
  }
  func.func @transform_23(%arg0: i32) -> (i32, i32) {
    %c0_i32 = arith.constant 0 : i32
    %c0_i32_0 = arith.constant 0 : i32
    %c0_i32_1 = arith.constant 0 : i32
    return %c0_i32, %c0_i32_0 : i32, i32
  }
  func.func @transform_24(%arg0: i32) -> (i32, i32) {
    %c0_i32 = arith.constant 0 : i32
    %c0_i32_0 = arith.constant 0 : i32
    %c0_i32_1 = arith.constant 0 : i32
    return %c0_i32, %c0_i32_0 : i32, i32
  }
  func.func @transform_25(%arg0: i32) -> (i32, i32) {
    %c0_i32 = arith.constant 0 : i32
    %c0_i32_0 = arith.constant 0 : i32
    %c0_i32_1 = arith.constant 0 : i32
    return %c0_i32, %c0_i32_0 : i32, i32
  }
  func.func @transform_26(%arg0: i32) -> (i32, i32) {
    %c0_i32 = arith.constant 0 : i32
    %c0_i32_0 = arith.constant 0 : i32
    %c0_i32_1 = arith.constant 0 : i32
    return %c0_i32, %c0_i32_0 : i32, i32
  }
  func.func @transform_27(%arg0: i32) -> (i32, i32) {
    %c0_i32 = arith.constant 0 : i32
    %c0_i32_0 = arith.constant 0 : i32
    %c0_i32_1 = arith.constant 0 : i32
    return %c0_i32, %c0_i32_0 : i32, i32
  }
  func.func @transform_28(%arg0: i32) -> (i32, i32) {
    %c0_i32 = arith.constant 0 : i32
    %c0_i32_0 = arith.constant 0 : i32
    %c0_i32_1 = arith.constant 0 : i32
    return %c0_i32, %c0_i32_0 : i32, i32
  }
  func.func @transform_29(%arg0: i32) -> (i32, i32) {
    %c0_i32 = arith.constant 0 : i32
    %c0_i32_0 = arith.constant 0 : i32
    %c0_i32_1 = arith.constant 0 : i32
    return %c0_i32, %c0_i32_0 : i32, i32
  }
  func.func @transform_30(%arg0: i32) -> (i32, i32) {
    %c0_i32 = arith.constant 0 : i32
    %c0_i32_0 = arith.constant 0 : i32
    %c0_i32_1 = arith.constant 0 : i32
    return %c0_i32, %c0_i32_0 : i32, i32
  }
  func.func @transform_31(%arg0: i32) -> (i32, i32) {
    %c0_i32 = arith.constant 0 : i32
    %c0_i32_0 = arith.constant 0 : i32
    %c0_i32_1 = arith.constant 0 : i32
    return %c0_i32, %c0_i32_0 : i32, i32
  }
  func.func @transform_32(%arg0: i32) -> (i32, i32) {
    %c0_i32 = arith.constant 0 : i32
    %c0_i32_0 = arith.constant 0 : i32
    %c0_i32_1 = arith.constant 0 : i32
    return %c0_i32, %c0_i32_0 : i32, i32
  }
  func.func @transform_33(%arg0: i32) -> (i32, i32) {
    %c0_i32 = arith.constant 0 : i32
    %c0_i32_0 = arith.constant 0 : i32
    %c0_i32_1 = arith.constant 0 : i32
    return %c0_i32, %c0_i32_0 : i32, i32
  }
  func.func @transform_34(%arg0: i32) -> (i32, i32) {
    %c0_i32 = arith.constant 0 : i32
    %c0_i32_0 = arith.constant 0 : i32
    %c0_i32_1 = arith.constant 0 : i32
    return %c0_i32, %c0_i32_0 : i32, i32
  }
  func.func @transform_35(%arg0: i32) -> (i32, i32) {
    %c0_i32 = arith.constant 0 : i32
    %c0_i32_0 = arith.constant 0 : i32
    %c0_i32_1 = arith.constant 0 : i32
    return %c0_i32, %c0_i32_0 : i32, i32
  }
  func.func @transform_36(%arg0: i32) -> (i32, i32) {
    %c0_i32 = arith.constant 0 : i32
    %c0_i32_0 = arith.constant 0 : i32
    %c0_i32_1 = arith.constant 0 : i32
    return %c0_i32, %c0_i32_0 : i32, i32
  }
  func.func @transform_37(%arg0: i32) -> (i32, i32) {
    %c0_i32 = arith.constant 0 : i32
    %c0_i32_0 = arith.constant 0 : i32
    %c0_i32_1 = arith.constant 0 : i32
    return %c0_i32, %c0_i32_0 : i32, i32
  }
  func.func @transform_38(%arg0: i32) -> (i32, i32) {
    %c0_i32 = arith.constant 0 : i32
    %c0_i32_0 = arith.constant 0 : i32
    %c0_i32_1 = arith.constant 0 : i32
    return %c0_i32, %c0_i32_0 : i32, i32
  }
  func.func @transform_39(%arg0: i32) -> (i32, i32) {
    %c0_i32 = arith.constant 0 : i32
    %c0_i32_0 = arith.constant 0 : i32
    %c0_i32_1 = arith.constant 0 : i32
    return %c0_i32, %c0_i32_0 : i32, i32
  }
  func.func @transform_40(%arg0: i32) -> (i32, i32) {
    %c0_i32 = arith.constant 0 : i32
    %c0_i32_0 = arith.constant 0 : i32
    %c0_i32_1 = arith.constant 0 : i32
    return %c0_i32, %c0_i32_0 : i32, i32
  }
  func.func @transform_41(%arg0: i32) -> (i32, i32) {
    %c0_i32 = arith.constant 0 : i32
    %c0_i32_0 = arith.constant 0 : i32
    %c0_i32_1 = arith.constant 0 : i32
    return %c0_i32, %c0_i32_0 : i32, i32
  }
  func.func @transform_42(%arg0: i32) -> (i32, i32, i32) {
    %c0_i32 = arith.constant 0 : i32
    %c0_i32_0 = arith.constant 0 : i32
    %c0_i32_1 = arith.constant 0 : i32
    return %arg0, %c0_i32, %c0_i32_0 : i32, i32, i32
  }
  func.func @transform_43(%arg0: i32) -> (i32, i32, i32) {
    %c0_i32 = arith.constant 0 : i32
    %c0_i32_0 = arith.constant 0 : i32
    %c0_i32_1 = arith.constant 0 : i32
    return %arg0, %c0_i32, %c0_i32_0 : i32, i32, i32
  }
}

</mosaic_0001>

<bundles_post_ra>
// kernel: forward.1
= control target key start
LH: loop header
LB: loop body
LE: loop exit
PB: predicated region body
PF: predicated region fallthrough
CT: control target
= control target key end

     0   :  { %s12152_s6 = smov 1   ;;  %s12153_s10 = smov 2   ;;  %s16452_s0 = inlined_call_operand.smem [shape: u32[44], index: -1, kind: input, shape index: {}] }
   0x1   :  { %s12209_s5 = sld [smem:[%s16452_s0]]   ;;  %s12154_s14 = smov 3  }
   0x2   :  { %s12214_s9 = sld [smem:[%s16452_s0 + %s12152_s6]]   ;;  %s12155_s18 = smov 4  }
   0x3   :  { %s12219_s13 = sld [smem:[%s16452_s0 + %s12153_s10]]   ;;  %s12156_s22 = smov 5  }
   0x4   :  { %s12224_s17 = sld [smem:[%s16452_s0 + %s12154_s14]]   ;;  %s12157_s26 = smov 6  }
   0x5   :  { %s12229_s21 = sld [smem:[%s16452_s0 + %s12155_s18]]   ;;  %s12158_s30 = smov 7  }
   0x6   :  { %s12234_s25 = sld [smem:[%s16452_s0 + %s12156_s22]]   ;;  %s12159_s4 = smov 8  }
   0x7   :  { %16559 = sst [smem:[#allocation12_spill]] %s12209_s5  ;;  %s12160_s10 = smov 9  }
   0x8   :  { %16560 = sst [smem:[#allocation13_spill]] %s12214_s9  ;;  %s12161_s15 = smov 10  }
   0x9   :  { %s12239_s29 = sld [smem:[%s16452_s0 + %s12157_s26]]   ;;  %s12162_s20 = smov 11  }
   0xa   :  { %s12244_s3 = sld [smem:[%s16452_s0 + %s12158_s30]]   ;;  %s12163_s26 = smov 12  }
   0xb   :  { %s12249_s8 = sld [smem:[%s16452_s0 + %s12159_s4]]   ;;  %s12164_s1 = smov 13  }
   0xc   :  { %s12254_s14 = sld [smem:[%s16452_s0 + %s12160_s10]]   ;;  %s12165_s7 = smov 14  }
   0xd   :  { %s12259_s19 = sld [smem:[%s16452_s0 + %s12161_s15]]   ;;  %s12166_s15 = smov 15  }
   0xe   :  { %s12264_s24 = sld [smem:[%s16452_s0 + %s12162_s20]]   ;;  %s12167_s22 = smov 16  }
   0xf   :  { %s12269_s30 = sld [smem:[%s16452_s0 + %s12163_s26]]   ;;  %s12168_s28 = smov 17  }
  0x10   :  { %16561 = sst [smem:[#allocation14_spill]] %s12244_s3 }
  0x11   :  { %16562 = sst [smem:[#allocation15_spill]] %s12249_s8 }
  0x12   :  { %s12274_s6 = sld [smem:[%s16452_s0 + %s12164_s1]]  }
  0x13   :  { %s12279_s12 = sld [smem:[%s16452_s0 + %s12165_s7]]   ;;  %s12169_s7 = smov 18  }
  0x14   :  { %s12284_s20 = sld [smem:[%s16452_s0 + %s12166_s15]]   ;;  %s12170_s15 = smov 19  }
  0x15   :  { %s12289_s27 = sld [smem:[%s16452_s0 + %s12167_s22]]   ;;  %s12171_s22 = smov 20  }
  0x16   :  { %s12294_s4 = sld [smem:[%s16452_s0 + %s12168_s28]]   ;;  %s12172_s28 = smov 21  }
  0x18   :  { %16563 = sst [smem:[#allocation16_spill]] %s12274_s6 }
  0x19   :  { %16564 = sst [smem:[#allocation17_spill]] %s12279_s12 }
  0x1a   :  { %16565 = sst [smem:[#allocation18_spill]] %s12284_s20 }
  0x1b   :  { %16566 = sst [smem:[#allocation19_spill]] %s12289_s27 }
  0x1c   :  { %16567 = sst [smem:[#allocation20_spill]] %s12294_s4 }
  0x1d   :  { %s12299_s6 = sld [smem:[%s16452_s0 + %s12169_s7]]   ;;  %s12173_s7 = smov 22  }
  0x1e   :  { %s12304_s20 = sld [smem:[%s16452_s0 + %s12170_s15]]   ;;  %s12174_s15 = smov 23  }
  0x1f   :  { %s12309_s27 = sld [smem:[%s16452_s0 + %s12171_s22]]   ;;  %s12175_s22 = smov 24  }
  0x20   :  { %s12314_s4 = sld [smem:[%s16452_s0 + %s12172_s28]]   ;;  %s12176_s28 = smov 25  }
  0x23   :  { %16568 = sst [smem:[#allocation21_spill]] %s12299_s6 }
  0x24   :  { %16569 = sst [smem:[#allocation22_spill]] %s12304_s20 }
  0x25   :  { %16570 = sst [smem:[#allocation23_spill]] %s12309_s27 }
  0x26   :  { %16571 = sst [smem:[#allocation24_spill]] %s12314_s4 }
  0x27   :  { %s12319_s6 = sld [smem:[%s16452_s0 + %s12173_s7]]   ;;  %s12177_s7 = smov 26  }
  0x28   :  { %s12324_s20 = sld [smem:[%s16452_s0 + %s12174_s15]]   ;;  %s12178_s15 = smov 27  }
  0x29   :  { %s12329_s27 = sld [smem:[%s16452_s0 + %s12175_s22]]   ;;  %s12179_s22 = smov 28  }
  0x2a   :  { %s12334_s4 = sld [smem:[%s16452_s0 + %s12176_s28]]   ;;  %s12180_s28 = smov 29  }
  0x2d   :  { %16572 = sst [smem:[#allocation25_spill]] %s12319_s6 }
  0x2e   :  { %16573 = sst [smem:[#allocation26_spill]] %s12324_s20 }
  0x2f   :  { %16574 = sst [smem:[#allocation27_spill]] %s12329_s27 }
  0x30   :  { %16575 = sst [smem:[#allocation28_spill]] %s12334_s4 }
  0x31   :  { %s12339_s6 = sld [smem:[%s16452_s0 + %s12177_s7]]   ;;  %s12181_s7 = smov 30  }
  0x32   :  { %s12344_s20 = sld [smem:[%s16452_s0 + %s12178_s15]]   ;;  %s12182_s15 = smov 31  }
  0x33   :  { %s12349_s27 = sld [smem:[%s16452_s0 + %s12179_s22]]   ;;  %s12183_s22 = smov 32  }
  0x34   :  { %s12354_s4 = sld [smem:[%s16452_s0 + %s12180_s28]]   ;;  %s12184_s28 = smov 33  }
  0x37   :  { %16576 = sst [smem:[#allocation29_spill]] %s12339_s6 }
  0x38   :  { %16577 = sst [smem:[#allocation30_spill]] %s12344_s20 }
  0x39   :  { %16578 = sst [smem:[#allocation31_spill]] %s12349_s27 }
  0x3a   :  { %16579 = sst [smem:[#allocation32_spill]] %s12354_s4 }
  0x3b   :  { %s12359_s6 = sld [smem:[%s16452_s0 + %s12181_s7]]   ;;  %s12185_s7 = smov 34  }
  0x3c   :  { %s12364_s20 = sld [smem:[%s16452_s0 + %s12182_s15]]   ;;  %s12186_s15 = smov 35  }
  0x3d   :  { %s12369_s27 = sld [smem:[%s16452_s0 + %s12183_s22]]   ;;  %s12187_s22 = smov 36  }
  0x3e   :  { %s12374_s4 = sld [smem:[%s16452_s0 + %s12184_s28]]   ;;  %s12188_s28 = smov 37  }
  0x41   :  { %16580 = sst [smem:[#allocation33_spill]] %s12359_s6 }
  0x42   :  { %16581 = sst [smem:[#allocation34_spill]] %s12364_s20 }
  0x43   :  { %16582 = sst [smem:[#allocation35_spill]] %s12369_s27 }
  0x44   :  { %16583 = sst [smem:[#allocation36_spill]] %s12374_s4 }
  0x45   :  { %s12379_s6 = sld [smem:[%s16452_s0 + %s12185_s7]]   ;;  %s12189_s7 = smov 38  }
  0x46   :  { %s12384_s20 = sld [smem:[%s16452_s0 + %s12186_s15]]   ;;  %s12190_s15 = smov 39  }
  0x47   :  { %s12389_s27 = sld [smem:[%s16452_s0 + %s12187_s22]]   ;;  %s12191_s22 = smov 40  }
  0x48   :  { %s12394_s4 = sld [smem:[%s16452_s0 + %s12188_s28]]   ;;  %s12192_s28 = smov 41  }
  0x4b   :  { %16584 = sst [smem:[#allocation37_spill]] %s12379_s6 }
  0x4c   :  { %16585 = sst [smem:[#allocation38_spill]] %s12384_s20 }
  0x4d   :  { %16586 = sst [smem:[#allocation39_spill]] %s12389_s27 }
  0x4e   :  { %16587 = sst [smem:[#allocation40_spill]] %s12394_s4 }
  0x4f   :  { %s12399_s6 = sld [smem:[%s16452_s0 + %s12189_s7]]   ;;  %s12193_s7 = smov 42  }
  0x50   :  { %s12404_s20 = sld [smem:[%s16452_s0 + %s12190_s15]]   ;;  %s12194_s15 = smov 43  }
  0x51   :  { %s12409_s27 = sld [smem:[%s16452_s0 + %s12191_s22]]  }
  0x52   :  { %s12414_s4 = sld [smem:[%s16452_s0 + %s12192_s28]]  }
  0x55   :  { %16588 = sst [smem:[#allocation41_spill]] %s12399_s6 }
  0x56   :  { %16589 = sst [smem:[#allocation42_spill]] %s12404_s20 }
  0x57   :  { %s12419_s6 = sld [smem:[%s16452_s0 + %s12193_s7]]  }
  0x58   :  { %s12424_s20 = sld [smem:[%s16452_s0 + %s12194_s15]]  }
  0x59   :  { %93 = vsyncpa [#allocation4], 0 }
  0x5a   :  { %94 = vsyncpa [#allocation5], 0 }
  0x5b   :  { %96 = vsyncpa [#allocation5 + $0x1], 0 }
  0x5c   :  { %97 = vsyncpa [#allocation8], 0 }
  0x5d   :  { %99 = vsyncpa [#allocation8 + $0x1], 0  ;;  %s12426_s22 = smov 0   ;;  %s12428_s23 = smov 0  }
  0x5e   :  { %s12430_s26 = smov 0   ;;  %s12432_s28 = smov 0  }
  0x5f LB: > { %s16590_s9 = sld [smem:[#allocation13_spill]]  ;;  %s16591_s3 = sld [smem:[#allocation14_spill]]  ;;  %s12142_s23 = sphi %s12428_s23, %s16880_s23   ;;  %s12138_s22 = sphi %s12426_s22, %s16879_s22   ;;  %s12150_s28 = sphi %s12432_s28, %s16881_s28   ;;  %s12146_s26 = sphi %s12430_s26, %s16878_s26  }
  0x60   : > { %16592 = sst [smem:[#allocation43_spill]] %s12146_s26  ;;  %s12447_s0 = sadd.s32 4294967295, %s12150_s28  }
  0x61   : > { %s9782_s1 = sadd.s32 4294967294, %s12150_s28   ;;  %s12451_s2 = sadd.s32 1, %s12150_s28  }
  0x62   : > { %s999_s7 = sadd.s32 1, %s12146_s26  ;;  %s996_s10 = ssub.s32 %s12150_s28, %s12451_s2 }
  0x63   : > { %p1009_p0 = scmp.ne.s32.totalorder %s12146_s26, %s12142_s23  ;;  %p997_p1 = scmp.eq.s32.totalorder %s996_s10, 0 }
  0x64   : > { %p1010_p2 = scmp.eq.s32.totalorder %s12447_s0, 1  ;;  %p1015_p3 = scmp.ne.s32.totalorder %s12142_s23, %s12138_s22 }
  0x65   : > { %p1016_p4 = scmp.eq.s32.totalorder %s9782_s1, 1  ;;  %p9783_p7 = scmp.ge.s32.totalorder %s12150_s28, 1 }
  0x66   : > { %s12462_s11 = scalar_select %p997_p1, %s12146_s26, %s999_s7  }
  0x67   : > { %p12464_p5 = por %p1010_p2, %p1009_p0  ;;  %p12468_p6 = por %p1016_p4, %p1015_p3 }
  0x68   : > { %16593 = sst [smem:[#allocation44_spill]] %s12462_s11  ;;  %p1049_p8 = scmp.lt.s32.totalorder %s12150_s28, 3 }
  0x69   : > { %s16594_s15 = scalar_select %p12464_p5, 1, 0 }
  0x6a   : > { %s16595_s16 = scalar_select %p12468_p6, 1, 0 }
  0x6b   : > { %p16462_p9 = scmp.eq.s32.totalorder %s12447_s0, 0  ;;  %p12475_p10 = pnand %p9783_p7, %p1049_p8 }
  0x6c   : > { %s12195_s1 = smov [#allocation3]   ;;  %s12024_s11 = scalar_lea.hbm %s12219_s13, 16 }
  0x6d   : > { %s16596_s18 = scalar_select %p12475_p10, 1, 0 }
  0x6e   : > { %s1065_s7 = sshll.u32 %s12195_s1, 4  ;;  %p11369_p11 = pneg %p12475_p10  ;;  %s1066_s7 = int_to_ptr.vmem [resolvable:$true] %s1065_s7 }
  0x6f   : > { %p12025_p13 = scmp.ne.s32.totalorder %s12219_s13, %s12024_s11  ;;  %p12031_p3 = scmp.lt.u32.totalorder %s12024_s11, %s12219_s13 }
  0x70   : > { %p12483_p12 = pnand %p16462_p9, %p11369_p11 }
  0x72   : > { %p12026_p0 = pneg %p12483_p12 }
  0x74   : > { %p12027_p1 = pnand %p12026_p0, %p12025_p13 }
  0x76   : > { %p12028_p2 = pneg %p12027_p1 }
  0x78   : > { %p12033_p4 = pnand %p12031_p3, %p12028_p2 }
  0x7a   : > { %12036 = shalt.err (!%p12033_p4)
}
  0x7b   : > { %s12037_s26 = scalar_lea.vmem %s1066_s7, 16  ;;  %s12044_s1 = scalar_lea.vmem %s1066_s7, 32 }
  0x7c   : > { %p12038_p7 = scmp.ne.s32.totalorder %s1066_s7, %s12037_s26  ;;  %p12045_p5 = scmp.lt.s32.totalorder %s1066_s7, %s1066_s7 }
  0x7d   : > { %p12046_p11 = scmp.lt.s32.totalorder %s12044_s1, %s12037_s26 }
  0x7e   : > { %p12040_p8 = pnand %p12038_p7, %p12026_p0 }
  0x7f   : > { %p12047_p9 = por %p12046_p11, %p12045_p5 }
  0x80   : > { %p12041_p6 = pneg %p12040_p8 }
  0x82   : > { %p12048_p10 = pnand %p12047_p9, %p12041_p6 }
  0x84   : > { %12051 = shalt.err (!%p12048_p10)
}
  0x85   : > { %11372 = dma.hbm_to_vmem [thread:$0]  (!%p12483_p12), %s12219_s13, 16, %s1066_s7, [#allocation4]  }
  0x86   : > { %p16598_p13 = scmp.ne.s32.totalorder %s16596_s18, 0 }
  0x88   : > { %1203 = sbr.rel (%p16598_p13) target bundleno = 4287 (0x10bf), region = 188 }
  0x8f   : > { %p16599_p1 = scmp.eq.s32.totalorder %s12447_s0, 0 }
  0x91   : > { %12125 = dma.done.wait (%p16599_p1), [#allocation4], 16   ;;  %p16600_p2 = pmov %p16599_p1 }
  0x92   : > { %vm4259_vm0 = vcmask 261120   ;;  %vm6649_vm1 = vcmask 257024   ;;  %v16464_v0 = vmov 0.0   ;;  %s16601_s5 = sld [smem:[#allocation12_spill]]  ;;  %p1310_p5 = scmp.lt.s32.totalorder %s12447_s0, 1  ;;  %vm1474_vm2 = vcmask 1040384  }
  0x93   : > { %12127 = vsyncadd (%p16600_p2), [#allocation4], 4294967280  ;;  %4260 = vst.msk [vmem:[#allocation2] sm:$0xff] %vm4259_vm0, %v16464_v0  ;;  %vm1475_vm3 = vcmask 1041408   ;;  %v12197_v1 = vmov 65535   ;;  %vm1425_vm4 = vcmask 23552  }
  0x94   : > { %4261 = vst.msk [vmem:[#allocation2 + $0x8] sm:$0xff] %vm4259_vm0, %v16464_v0  ;;  %4264 = vst.msk [vmem:[#allocation2 + $0x18] sm:$0xff] %vm4259_vm0, %v16464_v0  ;;  %s1311_s26 = scalar_select %p1310_p5, %s12447_s0, 1  ;;  %v1476_v2 = vsel %vm1474_vm2, 4294967295, %v12197_v1  ;;  %v11462_v3 = vld [vmem:[%s16590_s9] sm:$0x18]  }
  0x95   : > { %4265 = vst.msk [vmem:[#allocation2 + $0x20] sm:$0xff] %vm4259_vm0, %v16464_v0  ;;  %4267 = vst.msk [vmem:[#allocation2 + $0x30] sm:$0xff] %vm4259_vm0, %v16464_v0  ;;  %v12586_v4 = vsel %vm1475_vm3, %v1476_v2, 0  ;;  %v1909_v7 = vrot.slane %v11462_v3, 3  ;;  %v11465_v33 = vld [vmem:[%s16590_s9 + $0x4] sm:$0x18]  }
  0x96   : > { %4268 = vst.msk [vmem:[#allocation2 + $0x38] sm:$0xff] %vm4259_vm0, %v16464_v0  ;;  %4270 = vst.msk [vmem:[#allocation2 + $0x48] sm:$0xff] %vm4259_vm0, %v16464_v0  ;;  %s11360_s11 = smul.u32 432, %s1311_s26  ;;  %v11463_v11 = vld [vmem:[%s16590_s9 + $0x4] ss:$0 sps:$4 sm:$0x33]  }
  0x97   : > { %4271 = vst.msk [vmem:[#allocation2 + $0x50] sm:$0xff] %vm4259_vm0, %v16464_v0  ;;  %4273 = vst.msk [vmem:[#allocation2 + $0x60] sm:$0xff] %vm4259_vm0, %v16464_v0  ;;  %v12594_v12 = vand.u32 %v1909_v7, %v12586_v4  ;;  %v2208_v15 = vshrl.u32 %v11463_v11, 16  ;;  %v2210_v16 = vshll.u32 %v11463_v11, 16  ;;  %v2811_v36 = vshrl.u32 %v11465_v33, 16  ;;  %s16757_s8 = sld [smem:[#allocation15_spill]] }
  0x98   : > { %4274 = vst.msk [vmem:[#allocation2 + $0x68] sm:$0xff] %vm4259_vm0, %v16464_v0  ;;  %4276 = vst.msk [vmem:[#allocation2 + $0x78] sm:$0xff] %vm4259_vm0, %v16464_v0  ;;  %s12583_s18 = scalar_lea.vmem %s16601_s5, %s11360_s11  ;;  %v11464_v20 = vld [vmem:[%s16590_s9 + $0x4] ss:$0 sps:$4 sm:$0xcc]   ;;  %v2814_v37 = vshll.u32 %v11465_v33, 16 }
  0x99   : > { %4277 = vst.msk [vmem:[#allocation2 + $0x80] sm:$0xff] %vm4259_vm0, %v16464_v0  ;;  %4279 = vst.msk [vmem:[#allocation2 + $0x90] sm:$0xff] %vm4259_vm0, %v16464_v0  ;;  %v1854_v5 = vld [vmem:[%s12583_s18 + $0x2] sm:$0xff]  ;;  %v1855_v6 = vld [vmem:[%s12583_s18 + $0xa] sm:$0xff]  ;;  %10703 = vmatprep.subr.bf16.mxu0 %v12594_v12  ;;  %v2212_v18 = vrot.slane %v2210_v16, 1  ;;  %v2510_v22 = vrot.slane %v11464_v20, 2 }
  0x9a   : > { %4280 = vst.msk [vmem:[#allocation2 + $0x98] sm:$0xff] %vm4259_vm0, %v16464_v0  ;;  %4282 = vst.msk [vmem:[#allocation2 + $0xa8] sm:$0xff] %vm4259_vm0, %v16464_v0  ;;  %v1886_v8 = vpack.c.bf16 %v1855_v6, %v1854_v5  ;;  %v1856_v9 = vld [vmem:[%s12583_s18 + $0x1a] sm:$0xff]  ;;  %v1857_v10 = vld [vmem:[%s12583_s18 + $0x22] sm:$0xff]  ;;  %10704 = vmatpush3.bf16.msra.mxu0 %v12594_v12  ;;  %v2813_v40 = vrot.slane %v2811_v36, 3  ;;  %v2816_v41 = vrot.slane %v2814_v37, 4 }
  0x9b   : > { %4283 = vst.msk [vmem:[#allocation2 + $0xb0] sm:$0xff] %vm4259_vm0, %v16464_v0  ;;  %4285 = vst.msk [vmem:[#allocation2 + $0xc0] sm:$0xff] %vm4259_vm0, %v16464_v0  ;;  %v1858_v13 = vld [vmem:[%s12583_s18 + $0x32] sm:$0xff]  ;;  %v1859_v14 = vld [vmem:[%s12583_s18 + $0x3a] sm:$0xff]  ;;  %v12600_v17 = vpack.c.bf16 %v1857_v10, %v1856_v9  ;;  %v2213_v21 = vor.u32 %v2212_v18, %v2208_v15  ;;  %v2560_v26 = vand.u32 %v2510_v22, %v12586_v4  ;;  %vm4262_vm5 = vcmask 254976   ;;  %s16758_s12 = sld [smem:[#allocation17_spill]] }
  0x9c   : > { %4286 = vst.msk [vmem:[#allocation2 + $0xc8] sm:$0xff] %vm4259_vm0, %v16464_v0  ;;  %4288 = vst.msk [vmem:[#allocation2 + $0xd8] sm:$0xff] %vm4259_vm0, %v16464_v0  ;;  %10705 = vmatprep.mubr.msk.bf16.mxu0 %vm1425_vm4, %v1886_v8  ;;  %v12603_v19 = vpack.c.bf16 %v1859_v14, %v1858_v13  ;;  %v1860_v24 = vld [vmem:[%s12583_s18 + $0x4a] sm:$0xff]  ;;  %v1861_v25 = vld [vmem:[%s12583_s18 + $0x52] sm:$0xff]  ;;  %v2817_v49 = vor.u32 %v2816_v41, %v2813_v40  ;;  %vm12198_vm6 = vmmov 0   ;;  %vm5706_vm7 = vcmask 1043456  }
  0x9d   : > { %4289 = vst.msk [vmem:[#allocation2 + $0xe0] sm:$0xff] %vm4259_vm0, %v16464_v0  ;;  %4291 = vst.msk [vmem:[#allocation2 + $0xf0] sm:$0xff] %vm4259_vm0, %v16464_v0  ;;  %10706 = vmatmul.mubr.msk.bf16.vlgmr.msra.gmra.mrb[0].mxu0 %vm1425_vm4, %v12600_v17  ;;  %v2263_v23 = vand.u32 %v2213_v21, %v12586_v4  ;;  %v1862_v27 = vld [vmem:[%s12583_s18 + $0x62] sm:$0xff]  ;;  %v1863_v28 = vld [vmem:[%s12583_s18 + $0x6a] sm:$0xff]  ;;  %v12616_v29 = vpack.c.bf16 %v1861_v25, %v1860_v24  ;;  %vm5702_vm8 = vcmask 64512   ;;  %s16770_s7 = sld [smem:[#allocation16_spill]] }
  0x9e   : > { %4292 = vst.msk [vmem:[#allocation2 + $0xf8] sm:$0xff] %vm4259_vm0, %v16464_v0  ;;  %4294 = vst.msk [vmem:[#allocation2 + $0x108] sm:$0xff] %vm4259_vm0, %v16464_v0  ;;  %10709 = vmatprep.mubr.msk.bf16.mxu0 %vm1425_vm4, %v12603_v19  ;;  %v12618_v30 = vpack.c.bf16 %v1863_v28, %v1862_v27  ;;  %v1864_v31 = vld [vmem:[%s12583_s18 + $0x7a] sm:$0xff]  ;;  %v1865_v32 = vld [vmem:[%s12583_s18 + $0x82] sm:$0xff]  ;;  %v12650_v57 = vand.u32 %v2817_v49, %v12586_v4  ;;  %vm6135_vm9 = vcmask 130048   ;;  %s16771_s10 = sld [smem:[#allocation23_spill]] }
  0x9f   : > { %4295 = vst.msk [vmem:[#allocation2 + $0x110] sm:$0xff] %vm4259_vm0, %v16464_v0  ;;  %4297 = vst.msk [vmem:[#allocation2 + $0x120] sm:$0xff] %vm4259_vm0, %v16464_v0  ;;  %10737 = vmatprep.subr.bf16.mxu0 %v2263_v23  ;;  %v9839_v34 = vld [vmem:[%s12583_s18 + $0x18] sm:$0xff]  ;;  %v9840_v35 = vld [vmem:[%s12583_s18 + $0x20] sm:$0xff]  ;;  %v12629_v38 = vpack.c.bf16 %v1865_v32, %v1864_v31  ;;  %s16772_s1 = sld [smem:[#allocation20_spill]]  ;;  %s16773_s26 = sld [smem:[#allocation18_spill]] }
  0xa0   : > { %4298 = vst.msk [vmem:[#allocation2 + $0x128] sm:$0xff] %vm4259_vm0, %v16464_v0  ;;  %4300 = vst.msk [vmem:[#allocation2 + $0x138] sm:$0xff] %vm4259_vm0, %v16464_v0  ;;  %10738 = vmatpush3.bf16.msra.mxu0 %v2263_v23  ;;  %v12631_v39 = vpack.c.bf16 %v9840_v35, %v9839_v34  ;;  %v9841_v42 = vld [vmem:[%s12583_s18 + $0x30] sm:$0xff]  ;;  %v11466_v43 = vld [vmem:[%s16590_s9] ss:$0 sps:$4 sm:$0x66]  }
  0xa1   : > { %4301 = vst.msk [vmem:[#allocation2 + $0x140] sm:$0xff] %vm4259_vm0, %v16464_v0  ;;  %4303 = vst.msk [vmem:[#allocation2 + $0x150] sm:$0xff] %vm4259_vm0, %v16464_v0  ;;  %10771 = vmatprep.subr.bf16.mxu0 %v2560_v26  ;;  %v9842_v44 = vld [vmem:[%s12583_s18 + $0x38] sm:$0xff]  ;;  %v1365_v45 = vld [vmem:[%s12583_s18 + $0x1] sm:$0xff]  ;;  %v1418_v50 = vshrl.u32 %v11466_v43, 16  ;;  %v1421_v51 = vshll.u32 %v11466_v43, 16 }
  0xa2   : > { %4304 = vst.msk [vmem:[#allocation2 + $0x158] sm:$0xff] %vm4259_vm0, %v16464_v0  ;;  %4306 = vst.msk [vmem:[#allocation2 + $0x168] sm:$0xff] %vm4259_vm0, %v16464_v0  ;;  %v1366_v46 = vld [vmem:[%s12583_s18 + $0x9] sm:$0xff]  ;;  %v12644_v53 = vpack.c.bf16 %v9842_v44, %v9841_v42  ;;  %v9845_v59 = vld [vmem:[%s12583_s18 + $0x60] sm:$0xff]  ;;  %s16774_s11 = sld [smem:[#allocation19_spill]]  ;;  %vm8217_vm10 = vcmask 392192  }
  0xa3   : > { %4307 = vst.msk [vmem:[#allocation2 + $0x170] sm:$0xff] %vm4259_vm0, %v16464_v0  ;;  %4309 = vst.msk [vmem:[#allocation2 + $0x180] sm:$0xff] %vm4259_vm0, %v16464_v0  ;;  %v9843_v47 = vld [vmem:[%s12583_s18 + $0x48] sm:$0xff]  ;;  %v9844_v48 = vld [vmem:[%s12583_s18 + $0x50] sm:$0xff]  ;;  %v1397_v52 = vpack.c.bf16 %v1366_v46, %v1365_v45  ;;  %v1420_v54 = vrot.slane %v1418_v50, 1  ;;  %v1423_v55 = vrot.slane %v1421_v51, 2 }
  0xa4   : > { %4310 = vst.msk [vmem:[#allocation2 + $0x188] sm:$0xff] %vm4259_vm0, %v16464_v0  ;;  %4312 = vst.msk [vmem:[#allocation2 + $0x198] sm:$0xff] %vm4259_vm0, %v16464_v0  ;;  %v12647_v56 = vpack.c.bf16 %v9844_v48, %v9843_v47  ;;  %v9846_v60 = vld [vmem:[%s12583_s18 + $0x68] sm:$0xff]  ;;  %v9888_v61 = vld [vmem:[%s12583_s18 + $0x19] sm:$0xff]  ;;  %vm7842_vm11 = vcmask 31744   ;;  %vm8050_vm12 = vcmask 195584  }
  0xa5   : > { %4313 = vst.msk [vmem:[#allocation2 + $0x1a0] sm:$0xff] %vm4259_vm0, %v16464_v0  ;;  %6702 = vst.msk [vmem:[#allocation2 + $0x1b0] sm:$0xff] %vm4259_vm0, %v16464_v0  ;;  %10710 = vmatmul.mubr.msk.bf16.gmra.mrb[4].mxu0 %vm1425_vm4, %v12616_v29  ;;  %10637 = vmatprep.mubr.msk.bf16.mxu1 %vm1425_vm4, %v1397_v52  ;;  %v1424_v58 = vor.u32 %v1423_v55, %v1420_v54  ;;  %v9847_v62 = vld [vmem:[%s12583_s18 + $0x78] sm:$0xff]  ;;  %v9848_v63 = vld [vmem:[%s12583_s18 + $0x80] sm:$0xff]  ;;  %v12666_v6 = vpack.c.bf16 %v9846_v60, %v9845_v59  ;;  %vm8219_vm13 = vcmask 388096   ;;  %vm9167_vm14 = vcmask 1042432  }
  0xa6   : > { %6703 = vst.msk [vmem:[#allocation2 + $0x1b8] sm:$0xff] %vm4259_vm0, %v16464_v0  ;;  %10713 = vmatprep.mubr.msk.bf16.mxu0 %vm1425_vm4, %v12618_v30  ;;  %v9889_v1 = vld [vmem:[%s12583_s18 + $0x21] sm:$0xff]  ;;  %v9890_v2 = vld [vmem:[%s12583_s18 + $0x31] sm:$0xff]  ;;  %v9891_v5 = vld [vmem:[%s12583_s18 + $0x39] sm:$0xff]  ;;  %v12670_v8 = vpack.c.bf16 %v9848_v63, %v9847_v62  ;;  %s16863_s5 = sld [smem:[#allocation39_spill]]  ;;  %vm9163_vm15 = vcmask 48128  }
  0xa7   : > { %6704 = vst.msk [vmem:[#allocation2 + $0x1c0] sm:$0xf] %vm6649_vm1, %v16464_v0  ;;  %v1479_v3 = vand.u32 %v12586_v4, %v1424_v58  ;;  %v12668_v7 = vpack.c.bf16 %v9889_v1, %v9888_v61  ;;  %v12672_v9 = vpack.c.bf16 %v9891_v5, %v9890_v2  ;;  %v9849_v10 = vld [vmem:[%s12583_s18 + $0x90] sm:$0xff]  ;;  %v9850_v11 = vld [vmem:[%s12583_s18 + $0x98] sm:$0xff]  ;;  %v9851_v15 = vld [vmem:[%s12583_s18 + $0xa8] sm:$0xff]  ;;  %p16875_p9 = scmp.ne.s32.totalorder %s16594_s15, 0 }
  0xa8   : > { %v9892_v13 = vld [vmem:[%s12583_s18 + $0x49] sm:$0xff]  ;;  %v9893_v14 = vld [vmem:[%s12583_s18 + $0x51] sm:$0xff]  ;;  %v9894_v18 = vld [vmem:[%s12583_s18 + $0x61] sm:$0xff]  ;;  %v12690_v21 = vpack.c.bf16 %v9850_v11, %v9849_v10  ;;  %4269 = vst.msk [vmem:[#allocation2 + $0x40] sm:$0x3] %vm4262_vm5, %v16464_v0 }
  0xa9   : > { %10635 = vmatprep.subr.bf16.mxu1 %v1479_v3  ;;  %v9852_v16 = vld [vmem:[%s12583_s18 + $0xb0] sm:$0xff]  ;;  %v12692_v22 = vpack.c.bf16 %v9893_v14, %v9892_v13  ;;  %v9853_v25 = vld [vmem:[%s12583_s18 + $0xc0] sm:$0xff]  ;;  %v9855_v27 = vld [vmem:[%s12583_s18 + $0xd8] sm:$0xff]  ;;  %4263 = vst.msk [vmem:[#allocation2 + $0x10] sm:$0x3] %vm4262_vm5, %v16464_v0 }
  0xaa   : > { %10636 = vmatpush3.bf16.msra.mxu1 %v1479_v3  ;;  %v9895_v20 = vld [vmem:[%s12583_s18 + $0x69] sm:$0xff]  ;;  %v12694_v23 = vpack.c.bf16 %v9852_v16, %v9851_v15  ;;  %v9896_v28 = vld [vmem:[%s12583_s18 + $0x79] sm:$0xff]  ;;  %v9897_v31 = vld [vmem:[%s12583_s18 + $0x81] sm:$0xff]  ;;  %4266 = vst.msk [vmem:[#allocation2 + $0x28] sm:$0x3] %vm4262_vm5, %v16464_v0 }
  0xab   : > { %v12696_v24 = vpack.c.bf16 %v9895_v20, %v9894_v18  ;;  %v9856_v32 = vld [vmem:[%s12583_s18 + $0xe0] sm:$0xff]  ;;  %v9898_v33 = vld [vmem:[%s12583_s18 + $0x91] sm:$0xff]  ;;  %v12716_v36 = vpack.c.bf16 %v9897_v31, %v9896_v28  ;;  %v9859_v43 = vld [vmem:[%s12583_s18 + $0x108] sm:$0xff]  ;;  %4272 = vst.msk [vmem:[#allocation2 + $0x58] sm:$0x3] %vm4262_vm5, %v16464_v0 }
  0xac   : > { %v9899_v34 = vld [vmem:[%s12583_s18 + $0x99] sm:$0xff]  ;;  %v12718_v37 = vpack.c.bf16 %v9856_v32, %v9855_v27  ;;  %v9857_v41 = vld [vmem:[%s12583_s18 + $0xf0] sm:$0xff]  ;;  %v9902_v47 = vld [vmem:[%s12583_s18 + $0xc1] sm:$0xff]  ;;  %4275 = vst.msk [vmem:[#allocation2 + $0x70] sm:$0x3] %vm4262_vm5, %v16464_v0 }
  0xad   : > { %10714 = vmatmul.mubr.msk.bf16.gmra.mrb[8].mxu0 %vm1425_vm4, %v12629_v38  ;;  %10638 = vmatmul.mubr.msk.bf16.vlgmr.msra.gmra.mrb[0].mxu1 %vm1425_vm4, %v12668_v7  ;;  %v12720_v40 = vpack.c.bf16 %v9899_v34, %v9898_v33  ;;  %v9858_v42 = vld [vmem:[%s12583_s18 + $0xf8] sm:$0xff]  ;;  %v9900_v44 = vld [vmem:[%s12583_s18 + $0xa9] sm:$0xff]  ;;  %v9861_v54 = vld [vmem:[%s12583_s18 + $0x120] sm:$0xff]  ;;  %4278 = vst.msk [vmem:[#allocation2 + $0x88] sm:$0x3] %vm4262_vm5, %v16464_v0 }
  0xae   : > { %10739 = vmatprep.mubr.msk.bf16.mxu0 %vm1425_vm4, %v12631_v39  ;;  %10641 = vmatprep.mubr.msk.bf16.mxu1 %vm1425_vm4, %v12672_v9  ;;  %v9901_v45 = vld [vmem:[%s12583_s18 + $0xb1] sm:$0xff]  ;;  %v9903_v48 = vld [vmem:[%s12583_s18 + $0xc9] sm:$0xff]  ;;  %v12738_v49 = vpack.c.bf16 %v9858_v42, %v9857_v41  ;;  %v9904_v59 = vld [vmem:[%s12583_s18 + $0xd9] sm:$0xff]  ;;  %4281 = vst.msk [vmem:[#allocation2 + $0xa0] sm:$0x3] %vm4262_vm5, %v16464_v0 }
  0xaf   : > { %v9860_v46 = vld [vmem:[%s12583_s18 + $0x110] sm:$0xff]  ;;  %v12740_v50 = vpack.c.bf16 %v9901_v45, %v9900_v44  ;;  %v12744_v52 = vpack.c.bf16 %v9903_v48, %v9902_v47  ;;  %v9862_v55 = vld [vmem:[%s12583_s18 + $0x128] sm:$0xff]  ;;  %v9863_v58 = vld [vmem:[%s12583_s18 + $0x138] sm:$0xff]  ;;  %4284 = vst.msk [vmem:[#allocation2 + $0xb8] sm:$0x3] %vm4262_vm5, %v16464_v0 }
  0xb0   : > { %v12742_v51 = vpack.c.bf16 %v9860_v46, %v9859_v43  ;;  %v9905_v60 = vld [vmem:[%s12583_s18 + $0xe1] sm:$0xff]  ;;  %v9906_v62 = vld [vmem:[%s12583_s18 + $0xf1] sm:$0xff]  ;;  %v9907_v63 = vld [vmem:[%s12583_s18 + $0xf9] sm:$0xff]  ;;  %v12762_v1 = vpack.c.bf16 %v9862_v55, %v9861_v54  ;;  %4287 = vst.msk [vmem:[#allocation2 + $0xd0] sm:$0x3] %vm4262_vm5, %v16464_v0 }
  0xb1   : > { %v9864_v61 = vld [vmem:[%s12583_s18 + $0x140] sm:$0xff]  ;;  %v12764_v2 = vpack.c.bf16 %v9905_v60, %v9904_v59  ;;  %v12768_v5 = vpack.c.bf16 %v9907_v63, %v9906_v62  ;;  %v9865_v13 = vld [vmem:[%s12583_s18 + $0x150] sm:$0xff]  ;;  %v9866_v14 = vld [vmem:[%s12583_s18 + $0x158] sm:$0xff]  ;;  %4290 = vst.msk [vmem:[#allocation2 + $0xe8] sm:$0x3] %vm4262_vm5, %v16464_v0 }
  0xb2   : > { %v12766_v3 = vpack.c.bf16 %v9864_v61, %v9863_v58  ;;  %v1364_v10 = vld [vmem:[%s16590_s9] sm:$0x3]  ;;  %v9867_v15 = vld [vmem:[%s12583_s18 + $0x168] sm:$0xff]  ;;  %v9909_v18 = vld [vmem:[%s12583_s18 + $0x111] sm:$0xff]  ;;  %v12789_v27 = vpack.c.bf16 %v9866_v14, %v9865_v13  ;;  %4293 = vst.msk [vmem:[#allocation2 + $0x100] sm:$0x3] %vm4262_vm5, %v16464_v0 }
  0xb3   : > { %v1691_v11 = vand.u32 %v12586_v4, %v1364_v10  ;;  %v9908_v16 = vld [vmem:[%s12583_s18 + $0x109] sm:$0xff]  ;;  %v9869_v33 = vld [vmem:[%s12583_s18 + $0x180] sm:$0xff]  ;;  %v9914_v43 = vld [vmem:[%s12583_s18 + $0x151] sm:$0xff]  ;;  %4296 = vst.msk [vmem:[#allocation2 + $0x118] sm:$0x3] %vm4262_vm5, %v16464_v0 }
  0xb4   : > { %v9868_v20 = vld [vmem:[%s12583_s18 + $0x170] sm:$0xff]  ;;  %v12791_v28 = vpack.c.bf16 %v9909_v18, %v9908_v16  ;;  %v9870_v34 = vld [vmem:[%s12583_s18 + $0x188] sm:$0xff]  ;;  %v9912_v41 = vld [vmem:[%s12583_s18 + $0x139] sm:$0xff]  ;;  %4299 = vst.msk [vmem:[#allocation2 + $0x130] sm:$0x3] %vm4262_vm5, %v16464_v0 }
  0xb5   : > { %10740 = vmatmul.mubr.msk.bf16.vlgmr.msra.gmra.mrb[0].mxu0 %vm1425_vm4, %v12644_v53  ;;  %10642 = vmatmul.mubr.msk.bf16.gmra.mrb[4].mxu1 %vm1425_vm4, %v12692_v22  ;;  %v12793_v31 = vpack.c.bf16 %v9868_v20, %v9867_v15  ;;  %v9913_v42 = vld [vmem:[%s12583_s18 + $0x141] sm:$0xff]  ;;  %v9915_v44 = vld [vmem:[%s12583_s18 + $0x159] sm:$0xff]  ;;  %v12811_v45 = vpack.c.bf16 %v9870_v34, %v9869_v33  ;;  %v9916_v58 = vld [vmem:[%s12583_s18 + $0x169] sm:$0xff]  ;;  %4302 = vst.msk [vmem:[#allocation2 + $0x148] sm:$0x3] %vm4262_vm5, %v16464_v0 }
  0xb6   : > { %10772 = vmatpush3.bf16.msra.mxu0 %v2560_v26  ;;  %10743 = vmatprep.mubr.msk.bf16.mxu0 %vm1425_vm4, %v12647_v56  ;;  %v9854_v26 = vld [vmem:[%s12583_s18 + $0xc8] sm:$0xff]  ;;  %v12813_v46 = vpack.c.bf16 %v9913_v42, %v9912_v41  ;;  %v12815_v47 = vpack.c.bf16 %v9915_v44, %v9914_v43  ;;  %v1316_v54 = vld [vmem:[%s12583_s18] sm:$0xff]  ;;  %v9917_v59 = vld [vmem:[%s12583_s18 + $0x171] sm:$0xff]  ;;  %4305 = vst.msk [vmem:[#allocation2 + $0x160] sm:$0x3] %vm4262_vm5, %v16464_v0 }
  0xb7   : > { %10805 = vmatprep.subr.bf16.mxu0 %v12650_v57  ;;  %10645 = vmatprep.mubr.msk.bf16.mxu1 %vm1425_vm4, %v12696_v24  ;;  %v12714_v35 = vpack.c.bf16 %v9854_v26, %v9853_v25  ;;  %v9910_v25 = vld [vmem:[%s12583_s18 + $0x121] sm:$0xff]  ;;  %v9911_v26 = vld [vmem:[%s12583_s18 + $0x129] sm:$0xff]  ;;  %v12830_v62 = vpack.c.bf16 %v9917_v59, %v9916_v58  ;;  %v9947_v15 = vld [vmem:[%s12583_s18 + $0x92] sm:$0xff]  ;;  %4308 = vst.msk [vmem:[#allocation2 + $0x178] sm:$0x3] %vm4262_vm5, %v16464_v0 }
  0xb8   : > { %10669 = vmatprep.subr.bf16.mxu1 %v1691_v11  ;;  %v12795_v32 = vpack.c.bf16 %v9911_v26, %v9910_v25  ;;  %v11467_v48 = vld [vmem:[%s16590_s9 + $0x8] ss:$0 sps:$4 sm:$0x66]   ;;  %v9948_v16 = vld [vmem:[%s12583_s18 + $0x9a] sm:$0xff]  ;;  %v9950_v26 = vld [vmem:[%s12583_s18 + $0xb2] sm:$0xff] }
  0xb9   : > { %10670 = vmatpush3.bf16.msra.mxu1 %v1691_v11  ;;  %v1317_v55 = vld [vmem:[%s12583_s18 + $0x8] sm:$0xff]  ;;  %v3115_v60 = vrot.slane %v11467_v48, 1  ;;  %v12906_v20 = vpack.c.bf16 %v9948_v16, %v9947_v15  ;;  %v9955_v43 = vld [vmem:[%s12583_s18 + $0xf2] sm:$0xff]  ;;  %v9956_v44 = vld [vmem:[%s12583_s18 + $0xfa] sm:$0xff]  ;;  %4311 = vst.msk [vmem:[#allocation2 + $0x190] sm:$0x3] %vm4262_vm5, %v16464_v0 }
  0xba   : > { %11101 = vmatprep.subr.bf16.mxu1 %v12594_v12  ;;  %v1348_v61 = vpack.c.bf16 %v1317_v55, %v1316_v54  ;;  %v9951_v33 = vld [vmem:[%s12583_s18 + $0xc2] sm:$0xff]  ;;  %v9952_v34 = vld [vmem:[%s12583_s18 + $0xca] sm:$0xff]  ;;  %v12942_v54 = vpack.c.bf16 %v9956_v44, %v9955_v43  ;;  %4314 = vst.msk [vmem:[#allocation2 + $0x1a8] sm:$0x3] %vm4262_vm5, %v16464_v0 }
  0xbb   : > { %v3165_v63 = vand.u32 %v3115_v60, %v12586_v4  ;;  %v12926_v42 = vpack.c.bf16 %v9952_v34, %v9951_v33  ;;  %v9959_v55 = vld [vmem:[%s12583_s18 + $0x122] sm:$0xff]  ;;  %v9960_v58 = vld [vmem:[%s12583_s18 + $0x12a] sm:$0xff] }
  0xbc   : > { %v12958_v60 = vpack.c.bf16 %v9960_v58, %v9959_v55  ;;  %v9967_v15 = vld [vmem:[%s12583_s18 + $0x182] sm:$0xff]  ;;  %v9968_v16 = vld [vmem:[%s12583_s18 + $0x18a] sm:$0xff] }
  0xbd   : > { %10744 = vmatmul.mubr.msk.bf16.gmra.mrb[4].mxu0 %vm1425_vm4, %v12666_v6  ;;  %10646 = vmatmul.mubr.msk.bf16.gmra.mrb[8].mxu1 %vm1425_vm4, %v12716_v36 }
  0xbe   : > { %10747 = vmatprep.mubr.msk.bf16.mxu0 %vm1425_vm4, %v12670_v8  ;;  %10649 = vmatprep.mubr.msk.bf16.mxu1 %vm1425_vm4, %v12720_v40 }
  0xc5   : > { %10748 = vmatmul.mubr.msk.bf16.gmra.mrb[8].mxu0 %vm1425_vm4, %v12690_v21  ;;  %10650 = vmatmul.mubr.msk.bf16.gmra.mrb[12].mxu1 %vm1425_vm4, %v12740_v50 }
  0xc6   : > { %10751 = vmatprep.mubr.msk.bf16.mxu0 %vm1425_vm4, %v12694_v23  ;;  %10653 = vmatprep.mubr.msk.bf16.mxu1 %vm1425_vm4, %v12744_v52 }
  0xcd   : > { %10752 = vmatmul.mubr.msk.bf16.gmra.mrb[12].mxu0 %vm1425_vm4, %v12714_v35  ;;  %10654 = vmatmul.mubr.msk.bf16.gmra.mrb[16].mxu1 %vm1425_vm4, %v12764_v2 }
  0xce   : > { %10755 = vmatprep.mubr.msk.bf16.mxu0 %vm1425_vm4, %v12718_v37  ;;  %10657 = vmatprep.mubr.msk.bf16.mxu1 %vm1425_vm4, %v12768_v5 }
  0xd5   : > { %10756 = vmatmul.mubr.msk.bf16.gmra.mrb[16].mxu0 %vm1425_vm4, %v12738_v49  ;;  %10658 = vmatmul.mubr.msk.bf16.gmra.mrb[20].mxu1 %vm1425_vm4, %v12791_v28 }
  0xd6   : > { %10759 = vmatprep.mubr.msk.bf16.mxu0 %vm1425_vm4, %v12742_v51  ;;  %10661 = vmatprep.mubr.msk.bf16.mxu1 %vm1425_vm4, %v12795_v32 }
  0xdd   : > { %10760 = vmatmul.mubr.msk.bf16.gmra.mrb[20].mxu0 %vm1425_vm4, %v12762_v1  ;;  %10662 = vmatmul.mubr.msk.bf16.gmra.mrb[24].mxu1 %vm1425_vm4, %v12813_v46 }
  0xde   : > { %10763 = vmatprep.mubr.msk.bf16.mxu0 %vm1425_vm4, %v12766_v3  ;;  %10665 = vmatprep.mubr.msk.bf16.mxu1 %vm1425_vm4, %v12815_v47 }
  0xe5   : > { %10764 = vmatmul.mubr.msk.bf16.gmra.mrb[24].mxu0 %vm1425_vm4, %v12789_v27  ;;  %10666 = vmatmul.mubr.msk.bf16.gmra.mrb[28].mxu1 %vm1425_vm4, %v12830_v62 }
  0xe6   : > { %10767 = vmatprep.mubr.msk.bf16.mxu0 %vm1425_vm4, %v12793_v31  ;;  %10671 = vmatprep.mubr.msk.bf16.mxu1 %vm1425_vm4, %v1348_v61  ;;  %v9961_v61 = vld [vmem:[%s12583_s18 + $0x13a] sm:$0xff] }
  0xed   : > { %10768 = vmatmul.mubr.msk.bf16.gmra.mrb[28].mxu0 %vm1425_vm4, %v12811_v45  ;;  %10672 = vmatmul.mubr.msk.bf16.vlgmr.msra.gmra.mrb[0].mxu1 %vm1425_vm4, %v12631_v39  ;;  %v9918_v39 = vld [vmem:[%s12583_s18 + $0x181] sm:$0xff] }
  0xee   : > { %10773 = vmatprep.mubr.msk.bf16.mxu0 %vm1425_vm4, %v12668_v7  ;;  %10675 = vmatprep.mubr.msk.bf16.mxu1 %vm1425_vm4, %v12644_v53 }
  0xef   : > { %11102 = vmatpush3.bf16.msra.mxu1 %v12594_v12  ;;  %v11468_v12 = vld [vmem:[%s16590_s9 + $0x8] ss:$0 sps:$4 sm:$0xcc]  }
  0xf0   : > { %10941 = vmatprep.subr.bf16.mxu1 %v16464_v0  ;;  %v3413_v7 = vshrl.u32 %v11468_v12, 16  ;;  %v3416_v10 = vshll.u32 %v11468_v12, 16  ;;  %v9963_v12 = vld [vmem:[%s12583_s18 + $0x152] sm:$0xff] }
  0xf2   : > { %v3415_v13 = vrot.slane %v3413_v7, 2  ;;  %v3418_v14 = vrot.slane %v3416_v10, 3  ;;  %v9965_v10 = vld [vmem:[%s12583_s18 + $0x16a] sm:$0xff] }
  0xf4   : > { %v3419_v18 = vor.u32 %v3418_v14, %v3415_v13  ;;  %v9966_v13 = vld [vmem:[%s12583_s18 + $0x172] sm:$0xff] }
  0xf5   : > { %10774 = vmatmul.mubr.msk.bf16.vlgmr.msra.gmra.mrb[0].mxu0 %vm1425_vm4, %v12672_v9  ;;  %10676 = vmatmul.mubr.msk.bf16.gmra.mrb[4].mxu1 %vm1425_vm4, %v12647_v56  ;;  %v12986_v14 = vpack.c.bf16 %v9966_v13, %v9965_v10  ;;  %v13214_v10 = vld [vmem:[#allocation2 + $0x2] sm:$0xff] }
  0xf6   : > { %10806 = vmatpush3.bf16.msra.mxu0 %v12650_v57  ;;  %10777 = vmatprep.mubr.msk.bf16.mxu0 %vm1425_vm4, %v12692_v22  ;;  %v9919_v57 = vld [vmem:[%s12583_s18 + $0x189] sm:$0xff]  ;;  %v12909_v25 = vand.u32 %v3419_v18, %v12586_v4  ;;  %v13000_v18 = vpack.c.bf16 %v9968_v16, %v9967_v15 }
  0xf7   : > { %10839 = vmatprep.subr.bf16.mxu0 %v3165_v63  ;;  %10679 = vmatprep.mubr.msk.bf16.mxu1 %vm1425_vm4, %v12666_v6  ;;  %v12894_v11 = vpack.c.bf16 %v9919_v57, %v9918_v39  ;;  %v9964_v39 = vld [vmem:[%s12583_s18 + $0x15a] sm:$0xff]  ;;  %v13218_v13 = vld [vmem:[#allocation2 + $0x8] sm:$0xff] }
  0xf8   : > { %v12974_v7 = vpack.c.bf16 %v9964_v39, %v9963_v12  ;;  %v13222_v15 = vld [vmem:[#allocation2 + $0xa] sm:$0xff] }
  0xfd   : > { %10778 = vmatmul.mubr.msk.bf16.gmra.mrb[4].mxu0 %vm1425_vm4, %v12696_v24  ;;  %10680 = vmatmul.mubr.msk.bf16.gmra.mrb[8].mxu1 %vm1425_vm4, %v12670_v8 }
  0xfe   : > { %10781 = vmatprep.mubr.msk.bf16.mxu0 %vm1425_vm4, %v12716_v36  ;;  %10683 = vmatprep.mubr.msk.bf16.mxu1 %vm1425_vm4, %v12690_v21 }
 0x105   : > { %10782 = vmatmul.mubr.msk.bf16.gmra.mrb[8].mxu0 %vm1425_vm4, %v12720_v40  ;;  %10684 = vmatmul.mubr.msk.bf16.gmra.mrb[12].mxu1 %vm1425_vm4, %v12694_v23 }
 0x106   : > { %10785 = vmatprep.mubr.msk.bf16.mxu0 %vm1425_vm4, %v12740_v50  ;;  %10687 = vmatprep.mubr.msk.bf16.mxu1 %vm1425_vm4, %v12714_v35 }
 0x10d   : > { %10786 = vmatmul.mubr.msk.bf16.gmra.mrb[12].mxu0 %vm1425_vm4, %v12744_v52  ;;  %10688 = vmatmul.mubr.msk.bf16.gmra.mrb[16].mxu1 %vm1425_vm4, %v12718_v37 }
 0x10e   : > { %10789 = vmatprep.mubr.msk.bf16.mxu0 %vm1425_vm4, %v12764_v2  ;;  %10691 = vmatprep.mubr.msk.bf16.mxu1 %vm1425_vm4, %v12738_v49 }
 0x115   : > { %10790 = vmatmul.mubr.msk.bf16.gmra.mrb[16].mxu0 %vm1425_vm4, %v12768_v5  ;;  %10692 = vmatmul.mubr.msk.bf16.gmra.mrb[20].mxu1 %vm1425_vm4, %v12742_v51 }
 0x116   : > { %10793 = vmatprep.mubr.msk.bf16.mxu0 %vm1425_vm4, %v12791_v28  ;;  %10695 = vmatprep.mubr.msk.bf16.mxu1 %vm1425_vm4, %v12762_v1 }
 0x11d   : > { %10794 = vmatmul.mubr.msk.bf16.gmra.mrb[20].mxu0 %vm1425_vm4, %v12795_v32  ;;  %10696 = vmatmul.mubr.msk.bf16.gmra.mrb[24].mxu1 %vm1425_vm4, %v12766_v3 }
 0x11e   : > { %10797 = vmatprep.mubr.msk.bf16.mxu0 %vm1425_vm4, %v12813_v46  ;;  %10699 = vmatprep.mubr.msk.bf16.mxu1 %vm1425_vm4, %v12789_v27 }
 0x125   : > { %10798 = vmatmul.mubr.msk.bf16.gmra.mrb[24].mxu0 %vm1425_vm4, %v12815_v47  ;;  %10700 = vmatmul.mubr.msk.bf16.gmra.mrb[28].mxu1 %vm1425_vm4, %v12793_v31 }
 0x126   : > { %10801 = vmatprep.mubr.msk.bf16.mxu0 %vm1425_vm4, %v12830_v62  ;;  %10717 = vmatprep.mubr.msk.bf16.mxu1 %vm1425_vm4, %v12906_v20 }
 0x12d   : > { %10802 = vmatmul.mubr.msk.bf16.gmra.mrb[28].mxu0 %vm1425_vm4, %v12894_v11 }
 0x12e   : > { %10807 = vmatprep.mubr.msk.bf16.mxu0 %vm1425_vm4, %v12600_v17  ;;  %v9949_v17 = vld [vmem:[%s12583_s18 + $0xaa] sm:$0xff] }
 0x12f   : > { %v12924_v41 = vpack.c.bf16 %v9950_v26, %v9949_v17  ;;  %v3712_v17 = vld [vmem:[%s16590_s9 + $0xc] sm:$0x3] }
 0x130   : > { %v3762_v26 = vand.u32 %v3712_v17, %v12586_v4  ;;  %v10016_v4 = vld [vmem:[%s12583_s18 + $0x198] sm:$0xff] }
 0x131   : > { %10718 = vmatmul.mubr.msk.bf16.vlgmr.msra.gmra.mrb[12].mxu1 %vm1425_vm4, %v12924_v41 }
 0x132   : > { %10721 = vmatprep.mubr.msk.bf16.mxu1 %vm1425_vm4, %v12926_v42 }
 0x135   : > { %10808 = vmatmul.mubr.msk.bf16.vlgmr.msra.gmra.mrb[0].mxu0 %vm1425_vm4, %v12603_v19  ;;  %v9953_v19 = vld [vmem:[%s12583_s18 + $0xda] sm:$0xff] }
 0x136   : > { %10840 = vmatpush3.bf16.msra.mxu0 %v3165_v63  ;;  %10811 = vmatprep.mubr.msk.bf16.mxu0 %vm1425_vm4, %v12616_v29  ;;  %v9954_v29 = vld [vmem:[%s12583_s18 + $0xe2] sm:$0xff] }
 0x137   : > { %10873 = vmatprep.subr.bf16.mxu0 %v12909_v25  ;;  %v12940_v48 = vpack.c.bf16 %v9954_v29, %v9953_v19  ;;  %v9962_v63 = vld [vmem:[%s12583_s18 + $0x142] sm:$0xff] }
 0x138   : > { %v12972_v57 = vpack.c.bf16 %v9962_v63, %v9961_v61 }
 0x139   : > { %10722 = vmatmul.mubr.msk.bf16.gmra.mrb[16].mxu1 %vm1425_vm4, %v12940_v48 }
 0x13a   : > { %10725 = vmatprep.mubr.msk.bf16.mxu1 %vm1425_vm4, %v12942_v54 }
 0x13d   : > { %10812 = vmatmul.mubr.msk.bf16.gmra.mrb[4].mxu0 %vm1425_vm4, %v12618_v30  ;;  %v9957_v30 = vld [vmem:[%s12583_s18 + $0x10a] sm:$0xff] }
 0x13e   : > { %10815 = vmatprep.mubr.msk.bf16.mxu0 %vm1425_vm4, %v12629_v38  ;;  %v9958_v38 = vld [vmem:[%s12583_s18 + $0x112] sm:$0xff] }
 0x13f   : > { %v12956_v59 = vpack.c.bf16 %v9958_v38, %v9957_v30  ;;  %v10115_v30 = vld [vmem:[%s12583_s18 + $0x1a2] sm:$0xff] }
 0x141   : > { %10726 = vmatmul.mubr.msk.bf16.gmra.mrb[20].mxu1 %vm1425_vm4, %v12956_v59 }
 0x142   : > { %10729 = vmatprep.mubr.msk.bf16.mxu1 %vm1425_vm4, %v12958_v60 }
 0x145   : > { %10816 = vmatmul.mubr.msk.bf16.gmra.mrb[8].mxu0 %vm1425_vm4, %v12906_v20 }
 0x146   : > { %10819 = vmatprep.mubr.msk.bf16.mxu0 %vm1425_vm4, %v12924_v41 }
 0x149   : > { %10730 = vmatmul.mubr.msk.bf16.gmra.mrb[24].mxu1 %vm1425_vm4, %v12972_v57 }
 0x14a   : > { %10733 = vmatprep.mubr.msk.bf16.mxu1 %vm1425_vm4, %v12974_v7 }
 0x14d   : > { %10820 = vmatmul.mubr.msk.bf16.gmra.mrb[12].mxu0 %vm1425_vm4, %v12926_v42 }
 0x14e   : > { %10823 = vmatprep.mubr.msk.bf16.mxu0 %vm1425_vm4, %v12940_v48 }
 0x151   : > { %10734 = vmatmul.mubr.msk.bf16.gmra.mrb[28].mxu1 %vm1425_vm4, %v12986_v14 }
 0x155   : > { %10824 = vmatmul.mubr.msk.bf16.gmra.mrb[16].mxu0 %vm1425_vm4, %v12942_v54 }
 0x156   : > { %10827 = vmatprep.mubr.msk.bf16.mxu0 %vm1425_vm4, %v12956_v59 }
 0x15d   : > { %10828 = vmatmul.mubr.msk.bf16.gmra.mrb[20].mxu0 %vm1425_vm4, %v12958_v60 }
 0x15e   : > { %10831 = vmatprep.mubr.msk.bf16.mxu0 %vm1425_vm4, %v12972_v57 }
 0x165   : > { %10832 = vmatmul.mubr.msk.bf16.gmra.mrb[24].mxu0 %vm1425_vm4, %v12974_v7 }
 0x166   : > { %10835 = vmatprep.mubr.msk.bf16.mxu0 %vm1425_vm4, %v12986_v14 }
 0x16d   : > { %10836 = vmatmul.mubr.msk.bf16.gmra.mrb[28].mxu0 %vm1425_vm4, %v13000_v18 }
 0x16e   : > { %10841 = vmatprep.mubr.msk.bf16.mxu0 %vm1425_vm4, %v12644_v53  ;;  %v10017_v53 = vld [vmem:[%s12583_s18 + $0x1a0] sm:$0xff] }
 0x175   : > { %10842 = vmatmul.mubr.msk.bf16.vlgmr.msra.gmra.mrb[0].mxu0 %vm1425_vm4, %v12647_v56  ;;  %v3110_v56 = vpack.c.bf16 %v10017_v53, %v10016_v4  ;;  %v13232_v4 = vld [vmem:[%s12224_s17] ss:$0 sm:$0xff] }
 0x176   : > { %10874 = vmatpush3.bf16.msra.mxu0 %v12909_v25  ;;  %10845 = vmatprep.mubr.msk.bf16.mxu0 %vm1425_vm4, %v12666_v6 }
 0x177   : > { %10907 = vmatprep.subr.bf16.mxu0 %v3762_v26 }
 0x17d   : > { %10846 = vmatmul.mubr.msk.bf16.gmra.mrb[4].mxu0 %vm1425_vm4, %v12670_v8 }
 0x17e   : > { %10849 = vmatprep.mubr.msk.bf16.mxu0 %vm1425_vm4, %v12690_v21 }
 0x185   : > { %10850 = vmatmul.mubr.msk.bf16.gmra.mrb[8].mxu0 %vm1425_vm4, %v12694_v23 }
 0x186   : > { %10853 = vmatprep.mubr.msk.bf16.mxu0 %vm1425_vm4, %v12714_v35 }
 0x18d   : > { %10854 = vmatmul.mubr.msk.bf16.gmra.mrb[12].mxu0 %vm1425_vm4, %v12718_v37 }
 0x18e   : > { %10857 = vmatprep.mubr.msk.bf16.mxu0 %vm1425_vm4, %v12738_v49 }
 0x195   : > { %10858 = vmatmul.mubr.msk.bf16.gmra.mrb[16].mxu0 %vm1425_vm4, %v12742_v51  ;;  %v10066_v51 = vld [vmem:[%s12583_s18 + $0x1a1] sm:$0xff] }
 0x196   : > { %10861 = vmatprep.mubr.msk.bf16.mxu0 %vm1425_vm4, %v12762_v1  ;;  %v10085_v1 = vld [vmem:[%s12583_s18 + $0x3a] sm:$0xff] }
 0x19d   : > { %10862 = vmatmul.mubr.msk.bf16.gmra.mrb[20].mxu0 %vm1425_vm4, %v12766_v3 }
 0x19e   : > { %10865 = vmatprep.mubr.msk.bf16.mxu0 %vm1425_vm4, %v12789_v27  ;;  %v10087_v27 = vld [vmem:[%s12583_s18 + $0x52] sm:$0xff] }
 0x1a5   : > { %10866 = vmatmul.mubr.msk.bf16.gmra.mrb[24].mxu0 %vm1425_vm4, %v12793_v31  ;;  %v10089_v31 = vld [vmem:[%s12583_s18 + $0x6a] sm:$0xff] }
 0x1a6   : > { %10869 = vmatprep.mubr.msk.bf16.mxu0 %vm1425_vm4, %v12811_v45 }
 0x1ad   : > { %10870 = vmatmul.mubr.msk.bf16.gmra.mrb[28].mxu0 %vm1425_vm4, %v3110_v56 }
 0x1ae   : > { %10875 = vmatprep.mubr.msk.bf16.mxu0 %vm1425_vm4, %v12672_v9 }
 0x1b5   : > { %10876 = vmatmul.mubr.msk.bf16.vlgmr.msra.gmra.mrb[0].mxu0 %vm1425_vm4, %v12692_v22 }
 0x1b6   : > { %10908 = vmatpush3.bf16.msra.mxu0 %v3762_v26  ;;  %10879 = vmatprep.mubr.msk.bf16.mxu0 %vm1425_vm4, %v12696_v24 }
 0x1bd   : > { %10880 = vmatmul.mubr.msk.bf16.gmra.mrb[4].mxu0 %vm1425_vm4, %v12716_v36 }
 0x1be   : > { %10883 = vmatprep.mubr.msk.bf16.mxu0 %vm1425_vm4, %v12720_v40 }
 0x1c0   : > { %v13058_v6 = vpop.f32.mrb[0].mxu1 }
 0x1c1   : > { %v13060_v8 = vpop.f32.mrb[1].mxu1 }
 0x1c2   : > { %v13062_v9 = vpop.f32.mrb[2].mxu1 }
 0x1c3   : > { %v13064_v21 = vpop.f32.mrb[3].mxu1 }
 0x1c5   : > { %10884 = vmatmul.mubr.msk.bf16.gmra.mrb[8].mxu0 %vm1425_vm4, %v12740_v50  ;;  %v10065_v50 = vld [vmem:[%s12583_s18 + $0x199] sm:$0xff] }
 0x1c6   : > { %10887 = vmatprep.mubr.msk.bf16.mxu0 %vm1425_vm4, %v12744_v52  ;;  %v10084_v52 = vld [vmem:[%s12583_s18 + $0x32] sm:$0xff] }
 0x1c7   : > { %v3696_v3 = vpack.c.bf16 %v10085_v1, %v10084_v52 }
 0x1c8   : > { %v13070_v22 = vpop.f32.mrb[4].mxu1 }
 0x1c9   : > { %v13072_v23 = vpop.f32.mrb[5].mxu1 }
 0x1ca   : > { %v13074_v24 = vpop.f32.mrb[6].mxu1 }
 0x1cb   : > { %v13076_v35 = vpop.f32.mrb[7].mxu1 }
 0x1cd   : > { %10888 = vmatmul.mubr.msk.bf16.gmra.mrb[12].mxu0 %vm1425_vm4, %v12764_v2  ;;  %v3407_v2 = vpack.c.bf16 %v10066_v51, %v10065_v50 }
 0x1ce   : > { %10891 = vmatprep.mubr.msk.bf16.mxu0 %vm1425_vm4, %v12768_v5  ;;  %v10086_v5 = vld [vmem:[%s12583_s18 + $0x4a] sm:$0xff] }
 0x1d0   : > { %v13082_v36 = vpop.f32.mrb[8].mxu1 }
 0x1d1   : > { %v13084_v37 = vpop.f32.mrb[9].mxu1 }
 0x1d2   : > { %v13086_v40 = vpop.f32.mrb[10].mxu1 }
 0x1d3   : > { %v13088_v49 = vpop.f32.mrb[11].mxu1 }
 0x1d5   : > { %10892 = vmatmul.mubr.msk.bf16.gmra.mrb[16].mxu0 %vm1425_vm4, %v12791_v28  ;;  %v10088_v28 = vld [vmem:[%s12583_s18 + $0x62] sm:$0xff] }
 0x1d6   : > { %10895 = vmatprep.mubr.msk.bf16.mxu0 %vm1425_vm4, %v12795_v32  ;;  %v3697_v32 = vpack.c.bf16 %v10087_v27, %v10086_v5  ;;  %v3698_v45 = vpack.c.bf16 %v10089_v31, %v10088_v28 }
 0x1dd   : > { %10896 = vmatmul.mubr.msk.bf16.gmra.mrb[20].mxu0 %vm1425_vm4, %v12813_v46  ;;  %v10090_v46 = vld [vmem:[%s12583_s18 + $0x7a] sm:$0xff] }
 0x1de   : > { %10899 = vmatprep.mubr.msk.bf16.mxu0 %vm1425_vm4, %v12815_v47  ;;  %v10091_v47 = vld [vmem:[%s12583_s18 + $0x82] sm:$0xff] }
 0x1e5   : > { %10900 = vmatmul.mubr.msk.bf16.gmra.mrb[24].mxu0 %vm1425_vm4, %v12830_v62  ;;  %v3699_v62 = vpack.c.bf16 %v10091_v47, %v10090_v46 }
 0x1e6   : > { %10903 = vmatprep.mubr.msk.bf16.mxu0 %vm1425_vm4, %v12894_v11 }
 0x1ed   : > { %10904 = vmatmul.mubr.msk.bf16.gmra.mrb[28].mxu0 %vm1425_vm4, %v3407_v2 }
 0x1ee   : > { %10909 = vmatprep.mubr.msk.bf16.mxu0 %vm1425_vm4, %v3696_v3 }
 0x1f5   : > { %10910 = vmatmul.mubr.msk.bf16.vlgmr.msra.gmra.mrb[0].mxu0 %vm1425_vm4, %v3697_v32 }
 0x1f6   : > { %10913 = vmatprep.mubr.msk.bf16.mxu0 %vm1425_vm4, %v3698_v45 }
 0x1fd   : > { %10914 = vmatmul.mubr.msk.bf16.gmra.mrb[4].mxu0 %vm1425_vm4, %v3699_v62 }
 0x1fe   : > { %10917 = vmatprep.mubr.msk.bf16.mxu0 %vm1425_vm4, %v12906_v20 }
 0x204   : > { %v13119_v11 = vpop.f32.mrb[12].mxu1 }
 0x205   : > { %10918 = vmatmul.mubr.msk.bf16.gmra.mrb[8].mxu0 %vm1425_vm4, %v12924_v41  ;;  %v13121_v25 = vpop.f32.mrb[13].mxu1 }
 0x206   : > { %10921 = vmatprep.mubr.msk.bf16.mxu0 %vm1425_vm4, %v12926_v42  ;;  %v13123_v33 = vpop.f32.mrb[14].mxu1 }
 0x207   : > { %v13125_v20 = vpop.f32.mrb[15].mxu1 }
 0x20c   : > { %v13131_v34 = vpop.f32.mrb[16].mxu1 }
 0x20d   : > { %10922 = vmatmul.mubr.msk.bf16.gmra.mrb[12].mxu0 %vm1425_vm4, %v12940_v48  ;;  %v13133_v41 = vpop.f32.mrb[17].mxu1 }
 0x20e   : > { %10925 = vmatprep.mubr.msk.bf16.mxu0 %vm1425_vm4, %v12942_v54  ;;  %v13135_v42 = vpop.f32.mrb[18].mxu1  ;;  %v10114_v54 = vld [vmem:[%s12583_s18 + $0x19a] sm:$0xff]  ;;  %s16775_s18 = sld [smem:[#allocation21_spill]] }
 0x20f   : > { %v13137_v19 = vpop.f32.mrb[19].mxu1 }
 0x214   : > { %v13143_v29 = vpop.f32.mrb[20].mxu1 }
 0x215   : > { %10926 = vmatmul.mubr.msk.bf16.gmra.mrb[16].mxu0 %vm1425_vm4, %v12956_v59  ;;  %v13145_v43 = vpop.f32.mrb[21].mxu1  ;;  %v3711_v59 = vpack.c.bf16 %v10115_v30, %v10114_v54 }
 0x216   : > { %10929 = vmatprep.mubr.msk.bf16.mxu0 %vm1425_vm4, %v12958_v60  ;;  %v13147_v44 = vpop.f32.mrb[22].mxu1 }
 0x217   : > { %v13149_v48 = vpop.f32.mrb[23].mxu1 }
 0x21c   : > { %v13157_v38 = vpop.f32.mrb[24].mxu1 }
 0x21d   : > { %10930 = vmatmul.mubr.msk.bf16.gmra.mrb[20].mxu0 %vm1425_vm4, %v12972_v57  ;;  %v13159_v55 = vpop.f32.mrb[25].mxu1  ;;  %v13210_v57 = vld [vmem:[#allocation2] sm:$0xff] }
 0x21e   : > { %10933 = vmatprep.mubr.msk.bf16.mxu0 %vm1425_vm4, %v12974_v7  ;;  %16602 = vst [vmem:[#allocation45_spill] sm:$0xff] %v13159_v55  ;;  %v13161_v58 = vpop.f32.mrb[26].mxu1  ;;  %v13212_v7 = vld [vmem:[#allocation2 + $0x1] sm:$0xff] }
 0x21f   : > { %16603 = vst [vmem:[#allocation46_spill] sm:$0xff] %v13161_v58  ;;  %v13163_v60 = vpop.f32.mrb[27].mxu1  ;;  %6647 = vst.msk [vmem:[#allocation2] sm:$0xff] %vm4259_vm0, %v16464_v0 }
 0x220   : > { %16604 = vst [vmem:[#allocation47_spill] sm:$0xff] %v13163_v60 }
 0x224   : > { %v13166_v61 = vpop.f32.mrb[28].mxu1 }
 0x225   : > { %10934 = vmatmul.mubr.msk.bf16.gmra.mrb[24].mxu0 %vm1425_vm4, %v12986_v14  ;;  %16605 = vst [vmem:[#allocation48_spill] sm:$0xff] %v13166_v61  ;;  %v13168_v63 = vpop.f32.mrb[29].mxu1  ;;  %v13220_v14 = vld [vmem:[#allocation2 + $0x9] sm:$0xff] }
 0x226   : > { %10937 = vmatprep.mubr.msk.bf16.mxu0 %vm1425_vm4, %v13000_v18  ;;  %16606 = vst [vmem:[#allocation49_spill] sm:$0xff] %v13168_v63  ;;  %v13170_v12 = vpop.f32.mrb[30].mxu1  ;;  %6648 = vst.msk [vmem:[#allocation2 + $0x8] sm:$0xff] %vm4259_vm0, %v16464_v0  ;;  %v13228_v18 = vld [vmem:[#allocation3] ss:$0 sm:$0xff] }
 0x227   : > { %16607 = vst [vmem:[#allocation50_spill] sm:$0xff] %v13170_v12  ;;  %v13172_v39 = vpop.f32.mrb[31].mxu1  ;;  %6650 = vst.msk [vmem:[#allocation2 + $0x10] sm:$0xf] %vm6649_vm1, %v16464_v0 }
 0x228   : > { %16608 = vst [vmem:[#allocation51_spill] sm:$0xff] %v13172_v39 }
 0x22d   : > { %10938 = vmatmul.mubr.msk.bf16.gmra.mrb[28].mxu0 %vm1425_vm4, %v3711_v59 }
 0x2c8   : > { %v10911_v16 = vpop.f32.mrb[0].mxu0 }
 0x2c9   : > { %v11103_v17 = vadd.f32 %v10911_v16, %v13058_v6  ;;  %v3798_v26 = vpop.f32.mrb[1].mxu0 }
 0x2ca   : > { %v11104_v53 = vadd.f32 %v3798_v26, %v13060_v8  ;;  %v10912_v56 = vpop.f32.mrb[2].mxu0 }
 0x2cb   : > { %v3966_v50 = vmul.f32 %v11103_v17, %v13228_v18  ;;  %v11105_v51 = vadd.f32 %v10912_v56, %v13062_v9  ;;  %v3801_v52 = vpop.f32.mrb[3].mxu0 }
 0x2cc   : > { %v3964_v1 = vmul.f32 %v11104_v53, %v13228_v18  ;;  %v11106_v2 = vadd.f32 %v3801_v52, %v13064_v21 }
 0x2cd   : > { %v13240_v3 = vadd.f32 %v13232_v4, %v3966_v50  ;;  %v3967_v6 = vmul.f32 %v11105_v51, %v13228_v18 }
 0x2ce   : > { %v13244_v5 = vadd.f32 %v13232_v4, %v3964_v1  ;;  %v3965_v8 = vmul.f32 %v11106_v2, %v13228_v18 }
 0x2cf   : > { %v10136_v27 = vmul.f32 -1.442695, %v13240_v3  ;;  %v13249_v28 = vadd.f32 %v13232_v4, %v3967_v6 }
 0x2d0   : > { %v10134_v9 = vmul.f32 -1.442695, %v13244_v5  ;;  %v13253_v31 = vadd.f32 %v13232_v4, %v3965_v8  ;;  %v10915_v21 = vpop.f32.mrb[4].mxu0 }
 0x2d1   : > { %11488 = vpow2.f32 %v10136_v27  ;;  %v10137_v32 = vmul.f32 -1.442695, %v13249_v28  ;;  %v11107_v45 = vadd.f32 %v10915_v21, %v13070_v22  ;;  %v3814_v46 = vpop.f32.mrb[5].mxu0 }
 0x2d2   : > { %11490 = vpow2.f32 %v10134_v9  ;;  %v10135_v47 = vmul.f32 -1.442695, %v13253_v31  ;;  %v11108_v62 = vadd.f32 %v3814_v46, %v13072_v23  ;;  %v10916_v54 = vpop.f32.mrb[6].mxu0 }
 0x2d3   : > { %11492 = vpow2.f32 %v10137_v32  ;;  %v3970_v30 = vmul.f32 %v11107_v45, %v13228_v18  ;;  %v11109_v59 = vadd.f32 %v10916_v54, %v13074_v24  ;;  %v3817_v16 = vpop.f32.mrb[7].mxu0 }
 0x2d4   : > { %11494 = vpow2.f32 %v10135_v47  ;;  %v3968_v17 = vmul.f32 %v11108_v62, %v13228_v18  ;;  %v11110_v26 = vadd.f32 %v3817_v16, %v13076_v35 }
 0x2d5   : > { %v13264_v22 = vadd.f32 %v13232_v4, %v3970_v30  ;;  %v3971_v53 = vmul.f32 %v11109_v59, %v13228_v18 }
 0x2d6   : > { %v13268_v56 = vadd.f32 %v13232_v4, %v3968_v17  ;;  %v3969_v50 = vmul.f32 %v11110_v26, %v13228_v18 }
 0x2d7   : > { %v10140_v23 = vmul.f32 -1.442695, %v13264_v22  ;;  %v13274_v52 = vadd.f32 %v13232_v4, %v3971_v53 }
 0x2d8   : > { %v10138_v24 = vmul.f32 -1.442695, %v13268_v56  ;;  %v10919_v51 = vpop.f32.mrb[8].mxu0  ;;  %v13279_v27 = vadd.f32 %v13232_v4, %v3969_v50 }
 0x2d9   : > { %11496 = vpow2.f32 %v10140_v23  ;;  %v11111_v35 = vadd.f32 %v10919_v51, %v13082_v36  ;;  %v3830_v1 = vpop.f32.mrb[9].mxu0 }
 0x2da   : > { %11498 = vpow2.f32 %v10138_v24  ;;  %v11112_v2 = vadd.f32 %v3830_v1, %v13084_v37  ;;  %v10920_v6 = vpop.f32.mrb[10].mxu0  ;;  %v10141_v37 = vmul.f32 -1.442695, %v13274_v52 }
 0x2db   : > { %v11489_v8 = vpop.eup %11488  ;;  %v3974_v9 = vmul.f32 %v11111_v35, %v13228_v18  ;;  %v11113_v21 = vadd.f32 %v10920_v6, %v13086_v40  ;;  %v3833_v32 = vpop.f32.mrb[11].mxu0 }
 0x2dc   : > { %v11491_v45 = vpop.eup %11490  ;;  %v4133_v46 = vadd.f32 1.0, %v11489_v8  ;;  %v3972_v47 = vmul.f32 %v11112_v2, %v13228_v18  ;;  %v11114_v36 = vadd.f32 %v3833_v32, %v13088_v49  ;;  %v10139_v49 = vmul.f32 -1.442695, %v13279_v27 }
 0x2dd   : > { %v11493_v62 = vpop.eup %11492  ;;  %v4131_v54 = vadd.f32 1.0, %v11491_v45  ;;  %v13287_v30 = vadd.f32 %v13232_v4, %v3974_v9  ;;  %v3975_v59 = vmul.f32 %v11113_v21, %v13228_v18 }
 0x2de   : > { %v11495_v16 = vpop.eup %11494  ;;  %11500 = vrcp.f32 %v4133_v46  ;;  %v4134_v17 = vadd.f32 1.0, %v11493_v62  ;;  %v13291_v40 = vadd.f32 %v13232_v4, %v3972_v47  ;;  %v3973_v26 = vmul.f32 %v11114_v36, %v13228_v18  ;;  %v13318_v62 = vld [vmem:[%s12229_s21] ss:$0 sm:$0xff] }
 0x2df   : > { %11502 = vrcp.f32 %v4131_v54  ;;  %v4132_v53 = vadd.f32 1.0, %v11495_v16  ;;  %v10144_v23 = vmul.f32 -1.442695, %v13287_v30  ;;  %v13297_v50 = vadd.f32 %v13232_v4, %v3975_v59  ;;  %v13321_v54 = vld [vmem:[%s12229_s21 + $0x1] ss:$0 sm:$0xff] }
 0x2e0   : > { %11504 = vrcp.f32 %v4134_v17  ;;  %v10923_v24 = vpop.f32.mrb[12].mxu0  ;;  %v10142_v51 = vmul.f32 -1.442695, %v13291_v40  ;;  %v13301_v35 = vadd.f32 %v13232_v4, %v3973_v26 }
 0x2e1   : > { %11506 = vrcp.f32 %v4132_v53  ;;  %v13304_v1 = vadd.f32 %v10923_v24, %v13119_v11  ;;  %v3846_v2 = vpop.f32.mrb[13].mxu0  ;;  %v10145_v11 = vmul.f32 -1.442695, %v13297_v50 }
 0x2e2   : > { %11508 = vpow2.f32 %v10141_v37  ;;  %v13307_v6 = vadd.f32 %v3846_v2, %v13121_v25  ;;  %v10924_v8 = vpop.f32.mrb[14].mxu0  ;;  %v10143_v25 = vmul.f32 -1.442695, %v13301_v35 }
 0x2e3   : > { %v11497_v9 = vpop.eup %11496  ;;  %11510 = vpow2.f32 %v10139_v49  ;;  %v13310_v21 = vadd.f32 %v10924_v8, %v13123_v33  ;;  %v3849_v32 = vpop.f32.mrb[15].mxu0  ;;  %v4385_v49 = vmul.f32 %v13318_v62, %v13210_v57 }
 0x2e4   : > { %v11499_v45 = vpop.eup %11498  ;;  %v4137_v46 = vadd.f32 1.0, %v11497_v9  ;;  %11512 = vpow2.f32 %v10144_v23  ;;  %v13314_v47 = vadd.f32 %v3849_v32, %v13125_v20  ;;  %v4486_v23 = vmul.f32 %v13321_v54, %v13212_v7 }
 0x2e5   : > { %v4135_v36 = vadd.f32 1.0, %v11499_v45  ;;  %11514 = vpow2.f32 %v10142_v51  ;;  %v4487_v7 = vmul.f32 %v13321_v54, %v13220_v14  ;;  %v13357_v14 = vld [vmem:[%s12229_s21 + $0x3] ss:$0 sm:$0xff] }
 0x2e6   : > { %11516 = vrcp.f32 %v4137_v46  ;;  %v4518_v45 = vadd.f32 %v4486_v23, %v4385_v49 }
 0x2e7   : > { %11518 = vrcp.f32 %v4135_v36 }
 0x2e8   : > { %v11501_v33 = vpop.eup %11500  ;;  %11520 = vpow2.f32 %v10145_v11  ;;  %v10927_v37 = vpop.f32.mrb[16].mxu0 }
 0x2e9   : > { %v11503_v59 = vpop.eup %11502  ;;  %v4229_v16 = vmul.f32 %v11501_v33, %v13240_v3  ;;  %11522 = vpow2.f32 %v10143_v25  ;;  %v13325_v20 = vadd.f32 %v10927_v37, %v13131_v34  ;;  %v3862_v17 = vpop.f32.mrb[17].mxu0  ;;  %v13337_v3 = vld [vmem:[%s12229_s21 + $0x2] ss:$0 sm:$0xff] }
 0x2ea   : > { %v11505_v26 = vpop.eup %11504  ;;  %v4227_v53 = vmul.f32 %v11503_v59, %v13244_v5  ;;  %v13333_v24 = vadd.f32 %v3862_v17, %v13133_v41  ;;  %v10928_v51 = vpop.f32.mrb[18].mxu0  ;;  %v4386_v41 = vmul.f32 %v13318_v62, %v13218_v13  ;;  %v4587_v46 = vmul.f32 %v13337_v3, %v13214_v10 }
 0x2eb   : > { %v11507_v2 = vpop.eup %11506  ;;  %4318 = vst.msk [vmem:[#allocation2 + $0x31] sm:$0xff] %vm4259_vm0, %v4229_v16  ;;  %v4230_v34 = vmul.f32 %v11505_v26, %v13249_v28  ;;  %v13341_v8 = vadd.f32 %v10928_v51, %v13135_v42  ;;  %v3865_v5 = vpop.f32.mrb[19].mxu0  ;;  %v13366_v26 = vld [vmem:[%s12229_s21 + $0x4] ss:$0 sm:$0xff] }
 0x2ec   : > { %v11509_v9 = vpop.eup %11508  ;;  %4316 = vst.msk [vmem:[#allocation2 + $0x19] sm:$0xff] %vm4259_vm0, %v4227_v53  ;;  %v4228_v57 = vmul.f32 %v11507_v2, %v13253_v31  ;;  %v13350_v32 = vadd.f32 %v3865_v5, %v13137_v19  ;;  %v4519_v13 = vadd.f32 %v4487_v7, %v4386_v41  ;;  %v4588_v19 = vmul.f32 %v13337_v3, %v13222_v15 }
 0x2ed   : > { %v11511_v28 = vpop.eup %11510  ;;  %4319 = vst.msk [vmem:[#allocation2 + $0x39] sm:$0xff] %vm4259_vm0, %v4230_v34  ;;  %v4138_v37 = vadd.f32 1.0, %v11509_v9  ;;  %v4619_v17 = vadd.f32 %v4587_v46, %v4518_v45  ;;  %v3978_v5 = vmul.f32 %v13304_v1, %v13228_v18 }
 0x2ee   : > { %v11513_v42 = vpop.eup %11512  ;;  %4317 = vst.msk [vmem:[#allocation2 + $0x21] sm:$0xff] %vm4259_vm0, %v4228_v57  ;;  %v4136_v49 = vadd.f32 1.0, %v11511_v28 }
 0x2ef   : > { %v11515_v31 = vpop.eup %11514  ;;  %11524 = vrcp.f32 %v4138_v37  ;;  %v13411_v37 = vld [vmem:[%s12229_s21 + $0x6] ss:$0 sm:$0xff] }
 0x2f0   : > { %v11517_v11 = vpop.eup %11516  ;;  %v10931_v36 = vpop.f32.mrb[20].mxu0  ;;  %11526 = vrcp.f32 %v4136_v49 }
 0x2f1   : > { %v11519_v25 = vpop.eup %11518  ;;  %v4233_v33 = vmul.f32 %v11517_v11, %v13264_v22  ;;  %v13363_v59 = vadd.f32 %v10931_v36, %v13143_v29  ;;  %v3878_v16 = vpop.f32.mrb[21].mxu0  ;;  %v4141_v29 = vadd.f32 1.0, %v11513_v42  ;;  %v4139_v42 = vadd.f32 1.0, %v11515_v31 }
 0x2f2   : > { %v11521_v10 = vpop.eup %11520  ;;  %v4231_v53 = vmul.f32 %v11519_v25, %v13268_v56  ;;  %v13370_v23 = vadd.f32 %v3878_v16, %v13145_v43  ;;  %v13372_v51 = vpop.f32.mrb[22].mxu0  ;;  %v13374_v2 = vld [vmem:[#allocation2 + $0x30] sm:$0xff]  ;;  %v4620_v11 = vadd.f32 %v4588_v19, %v4519_v13  ;;  %v13399_v25 = vmul.f32 %v13307_v6, %v13228_v18 }
 0x2f3   : > { %16609 = vst [vmem:[#allocation52_spill] sm:$0xff] %v13363_v59  ;;  %v11523_v15 = vpop.eup %11522  ;;  %v4350_v22 = vld [vmem:[#allocation2 + $0x18] sm:$0xff]  ;;  %4322 = vst.msk [vmem:[#allocation2 + $0x61] sm:$0xff] %vm4259_vm0, %v4233_v33  ;;  %v13379_v9 = vpop.f32.mrb[23].mxu0  ;;  %v4142_v36 = vadd.f32 1.0, %v11521_v10  ;;  %v4389_v19 = vmul.f32 %v13318_v62, %v13374_v2  ;;  %11528 = vrcp.f32 %v4141_v29 }
 0x2f4   : > { %16610 = vst [vmem:[#allocation53_spill] sm:$0xff] %v13370_v23  ;;  %v4451_v34 = vld [vmem:[#allocation2 + $0x19] sm:$0xff]  ;;  %v13381_v56 = vld [vmem:[#allocation2 + $0x31] sm:$0xff]  ;;  %v4387_v43 = vmul.f32 %v13318_v62, %v4350_v22  ;;  %v4688_v41 = vmul.f32 %v13357_v14, %v4350_v22  ;;  %4320 = vst.msk [vmem:[#allocation2 + $0x49] sm:$0xff] %vm4259_vm0, %v4231_v53  ;;  %v4140_v13 = vadd.f32 1.0, %v11523_v15  ;;  %11530 = vrcp.f32 %v4139_v42 }
 0x2f5   : > { %v4488_v57 = vmul.f32 %v13321_v54, %v4451_v34  ;;  %v13386_v7 = vld [vmem:[#allocation2 + $0x38] sm:$0xff]  ;;  %v4351_v46 = vld [vmem:[#allocation2 + $0x20] sm:$0xff]  ;;  %v4789_v31 = vmul.f32 %v13366_v26, %v4451_v34  ;;  %v4490_v6 = vmul.f32 %v13321_v54, %v13381_v56  ;;  %v3979_v34 = vmul.f32 %v13310_v21, %v13228_v18  ;;  %v13449_v23 = vld [vmem:[%s12229_s21 + $0x8] ss:$0 sm:$0xff] }
 0x2f6   : > { %v13388_v28 = vld [vmem:[#allocation2 + $0x32] sm:$0xff]  ;;  %v13393_v1 = vld [vmem:[#allocation2 + $0x3a] sm:$0xff]  ;;  %v4720_v33 = vadd.f32 %v4688_v41, %v4619_v17  ;;  %v4553_v22 = vld [vmem:[#allocation2 + $0x22] sm:$0xff]  ;;  %v13423_v17 = vadd.f32 %v13232_v4, %v3978_v5  ;;  %v4388_v39 = vmul.f32 %v13318_v62, %v4351_v46  ;;  %11532 = vrcp.f32 %v4142_v36 }
 0x2f7   : > { %v13391_v45 = vld [vmem:[#allocation2 + $0x39] sm:$0xff]  ;;  %6654 = vst.msk [vmem:[#allocation2 + $0x30] sm:$0xff] %vm4259_vm0, %v16464_v0  ;;  %v4452_v16 = vld [vmem:[#allocation2 + $0x21] sm:$0xff]  ;;  %v4520_v49 = vadd.f32 %v4488_v57, %v4387_v43  ;;  %v4992_v5 = vmul.f32 %v13411_v37, %v13374_v2  ;;  %v4689_v43 = vmul.f32 %v13357_v14, %v4351_v46  ;;  %11534 = vrcp.f32 %v4140_v13 }
 0x2f8   : > { %6656 = vst.msk [vmem:[#allocation2 + $0x40] sm:$0xf] %vm6649_vm1, %v16464_v0  ;;  %v4552_v53 = vld [vmem:[#allocation2 + $0x1a] sm:$0xff]  ;;  %v13414_v10 = vld [vmem:[%s12229_s21 + $0x5] ss:$0 sm:$0xff]  ;;  %v4821_v15 = vadd.f32 %v4789_v31, %v4720_v33  ;;  %v13427_v41 = vpop.f32.mrb[24].mxu0  ;;  %v4489_v12 = vmul.f32 %v13321_v54, %v4452_v16  ;;  %v4522_v42 = vadd.f32 %v4490_v6, %v4389_v19  ;;  %v4591_v31 = vmul.f32 %v13337_v3, %v13388_v28 }
 0x2f9   : > { %6655 = vst.msk [vmem:[#allocation2 + $0x38] sm:$0xff] %vm4259_vm0, %v16464_v0  ;;  %6651 = vst.msk [vmem:[#allocation2 + $0x18] sm:$0xff] %vm4259_vm0, %v16464_v0  ;;  %v13432_v29 = vpop.f32.mrb[25].mxu0  ;;  %v4890_v57 = vmul.f32 %v13414_v10, %v4552_v53  ;;  %v13441_v33 = vld [vmem:[%s12229_s21 + $0x7] ss:$0 sm:$0xff]  ;;  %v4590_v36 = vmul.f32 %v13337_v3, %v4553_v22  ;;  %v4721_v46 = vadd.f32 %v4689_v43, %v4620_v11 }
 0x2fa   : > { %6652 = vst.msk [vmem:[#allocation2 + $0x20] sm:$0xff] %vm4259_vm0, %v16464_v0  ;;  %16611 = vst [vmem:[#allocation54_spill] sm:$0xff] %v13432_v29  ;;  %v13438_v21 = vpop.f32.mrb[26].mxu0  ;;  %v4521_v63 = vadd.f32 %v4489_v12, %v4388_v39  ;;  %v4690_v19 = vmul.f32 %v13357_v14, %v13374_v2  ;;  %v4691_v6 = vmul.f32 %v13357_v14, %v13386_v7 }
 0x2fb   : > { %6653 = vst.msk [vmem:[#allocation2 + $0x28] sm:$0xf] %vm6649_vm1, %v16464_v0  ;;  %v4589_v0 = vmul.f32 %v13337_v3, %v4552_v53  ;;  %16612 = vst [vmem:[#allocation55_spill] sm:$0xff] %v13438_v21  ;;  %v13446_v61 = vpop.f32.mrb[27].mxu0  ;;  %v4790_v53 = vmul.f32 %v13366_v26, %v4452_v16  ;;  %v4922_v13 = vadd.f32 %v4890_v57, %v4821_v15  ;;  %v13456_v58 = vld [vmem:[#allocation2 + $0x48] sm:$0xff] }
 0x2fc   : > { %16613 = vst [vmem:[#allocation56_spill] sm:$0xff] %v13446_v61  ;;  %v4622_v21 = vadd.f32 %v4590_v36, %v4521_v63  ;;  %v3977_v12 = vmul.f32 %v13314_v47, %v13228_v18  ;;  %v5093_v39 = vmul.f32 %v13441_v33, %v13381_v56  ;;  %v4891_v11 = vmul.f32 %v13414_v10, %v4553_v22 }
 0x2fd   : > { %v4621_v60 = vadd.f32 %v4589_v0, %v4520_v49  ;;  %v4822_v0 = vadd.f32 %v4790_v53, %v4721_v46  ;;  %v5024_v16 = vadd.f32 %v4992_v5, %v4922_v13  ;;  %v11525_v49 = vpop.eup %11524  ;;  %v4993_v2 = vmul.f32 %v13411_v37, %v13386_v7  ;;  %v13474_v5 = vld [vmem:[%s12234_s25] ss:$0 sm:$0xff] }
 0x2fe   : > { %v5194_v63 = vmul.f32 %v13449_v23, %v13388_v28  ;;  %v13467_v15 = vadd.f32 %v4691_v6, %v4622_v21  ;;  %v4623_v43 = vadd.f32 %v4591_v31, %v4522_v42  ;;  %v11527_v57 = vpop.eup %11526  ;;  %v4692_v61 = vmul.f32 %v13357_v14, %v13456_v58 }
 0x2ff   : > { %v4923_v47 = vadd.f32 %v4891_v11, %v4822_v0  ;;  %v5125_v36 = vadd.f32 %v5093_v39, %v5024_v16  ;;  %v4722_v46 = vadd.f32 %v4690_v19, %v4621_v60  ;;  %v11529_v53 = vpop.eup %11528  ;;  %v5094_v22 = vmul.f32 %v13441_v33, %v13391_v45 }
 0x300   : > { %v4791_v13 = vmul.f32 %v13366_v26, %v13381_v56  ;;  %v10148_v21 = vmul.f32 -1.442695, %v13423_v17  ;;  %v13481_v42 = vadd.f32 %v13232_v4, %v13399_v25  ;;  %v13483_v31 = vpop.f32.mrb[28].mxu0  ;;  %v11531_v6 = vpop.eup %11530  ;;  %v13485_v19 = vadd.f32 %v4692_v61, %v4623_v43 }
 0x301   : > { %16614 = vst [vmem:[#allocation57_spill] sm:$0xff] %v13483_v31  ;;  %v5025_v39 = vadd.f32 %v4993_v2, %v4923_v47  ;;  %v5226_v60 = vadd.f32 %v5194_v63, %v5125_v36  ;;  %v4234_v0 = vmul.f32 %v11525_v49, %v13274_v52  ;;  %v13488_v11 = vpop.f32.mrb[29].mxu0  ;;  %v11533_v16 = vpop.eup %11532  ;;  %v4892_v56 = vmul.f32 %v13414_v10, %v13388_v28  ;;  %v13506_v28 = vld [vmem:[%s12239_s29] ss:$0 sm:$0xff] }
 0x302   : > { %16615 = vst [vmem:[#allocation58_spill] sm:$0xff] %v13488_v11  ;;  %v4823_v29 = vadd.f32 %v4791_v13, %v4722_v46  ;;  %v4232_v25 = vmul.f32 %v11527_v57, %v13279_v27  ;;  %v13494_v55 = vadd.f32 %v13232_v4, %v3979_v34  ;;  %v13496_v31 = vpop.f32.mrb[30].mxu0  ;;  %v11535_v2 = vpop.eup %11534  ;;  %v5195_v61 = vmul.f32 %v13449_v23, %v13393_v1  ;;  %v4356_v27 = vld [vmem:[#allocation2 + $0x60] sm:$0xff]  ;;  %v4455_v13 = vld [vmem:[#allocation2 + $0x49] sm:$0xff] }
 0x303   : > { %16617 = vst [vmem:[#allocation60_spill] sm:$0xff] %v13496_v31  ;;  %v5126_v63 = vadd.f32 %v5094_v22, %v5025_v39  ;;  %v5265_v52 = vmul.f32 %v13474_v5, %v5226_v60  ;;  %4323 = vst.msk [vmem:[#allocation2 + $0x69] sm:$0xff] %vm4259_vm0, %v4234_v0  ;;  %v13503_v49 = vadd.f32 %v13232_v4, %v3977_v12  ;;  %v13517_v22 = vld [vmem:[#allocation2 + $0x61] sm:$0xff]  ;;  %11536 = vpow2.f32 %v10148_v21 }
 0x304   : > { %16616 = vst [vmem:[#allocation59_spill] sm:$0xff] %v13494_v55  ;;  %v4924_v43 = vadd.f32 %v4892_v56, %v4823_v29  ;;  %v4994_v34 = vmul.f32 %v13411_v37, %v13456_v58  ;;  %4321 = vst.msk [vmem:[#allocation2 + $0x51] sm:$0xff] %vm4259_vm0, %v4232_v25  ;;  %v4237_v57 = vmul.f32 %v11529_v53, %v13287_v30 }
 0x305   : > { %16618 = vst [vmem:[#allocation61_spill] sm:$0xff] %v13503_v49  ;;  %v4235_v47 = vmul.f32 %v11531_v6, %v13291_v40  ;;  %v4390_v36 = vmul.f32 %v13318_v62, %v13386_v7  ;;  %v4491_v12 = vmul.f32 %v13321_v54, %v13391_v45  ;;  %v5227_v46 = vadd.f32 %v5195_v61, %v5126_v63 }
 0x306   : > { %v4238_v29 = vmul.f32 %v11533_v16, %v13297_v50  ;;  %v5026_v39 = vadd.f32 %v4994_v34, %v4924_v43  ;;  %4326 = vst.msk [vmem:[#allocation2 + $0x91] sm:$0xff] %vm4259_vm0, %v4237_v57  ;;  %v4236_v30 = vmul.f32 %v11535_v2, %v13301_v35  ;;  %v10146_v40 = vmul.f32 -1.442695, %v13481_v42  ;;  %v13548_v2 = vpop.f32.mrb[31].mxu0 }
 0x307   : > { %4324 = vst.msk [vmem:[#allocation2 + $0x79] sm:$0xff] %vm4259_vm0, %v4235_v47  ;;  %v13525_v7 = vadd.f32 %v13506_v28, %v5265_v52  ;;  %v4393_v53 = vmul.f32 %v13318_v62, %v4356_v27  ;;  %v13530_v6 = vmul.f32 -1.442695, %v13494_v55  ;;  %v4494_v50 = vmul.f32 %v13321_v54, %v13517_v22  ;;  %16621 = vst [vmem:[#allocation64_spill] sm:$0xff] %v13548_v2 }
 0x308   : > { %4327 = vst.msk [vmem:[#allocation2 + $0x99] sm:$0xff] %vm4259_vm0, %v4238_v29  ;;  %v4391_v60 = vmul.f32 %v13318_v62, %v13456_v58  ;;  %v4492_v35 = vmul.f32 %v13321_v54, %v4455_v13  ;;  %v4792_v0 = vmul.f32 %v13366_v26, %v13391_v45  ;;  %4325 = vst.msk [vmem:[#allocation2 + $0x81] sm:$0xff] %vm4259_vm0, %v4236_v30  ;;  %v13542_v21 = vmul.f32 -1.442695, %v13503_v49 }
 0x309   : > { %16619 = vst [vmem:[#allocation62_spill] sm:$0xff] %v13525_v7  ;;  %v4523_v16 = vadd.f32 %v4491_v12, %v4390_v36  ;;  %v5266_v56 = vmul.f32 %v13474_v5, %v5227_v46  ;;  %v13546_v25 = vadd.f32 %v13372_v51, %v13147_v44  ;;  %11538 = vpow2.f32 %v10146_v40 }
 0x30a   : > { %v13550_v58 = vld [vmem:[#allocation2 + $0x68] sm:$0xff]  ;;  %v4824_v45 = vadd.f32 %v4792_v0, %v13467_v15  ;;  %v13559_v52 = vadd.f32 %v13379_v9, %v13149_v48  ;;  %v13563_v43 = vadd.f32 %v13427_v41, %v13157_v38  ;;  %v4592_v44 = vmul.f32 %v13337_v3, %v13393_v1 }
 0x30b   : > { %16620 = vst [vmem:[#allocation63_spill] sm:$0xff] %v13546_v25  ;;  %v13552_v61 = vld [vmem:[#allocation2 + $0x69] sm:$0xff]  ;;  %v4893_v51 = vmul.f32 %v13414_v10, %v13393_v1  ;;  %v10177_v34 = vmul.f32 -1.442695, %v13525_v7  ;;  %v4793_v57 = vmul.f32 %v13366_v26, %v4455_v13  ;;  %v16624_v47 = vmov 0.0   ;;  %v4456_v9 = vld [vmem:[#allocation2 + $0x51] sm:$0xff] }
 0x30c   : > { %v13554_v63 = vld [vmem:[#allocation2 + $0x62] sm:$0xff]  ;;  %16622 = vst [vmem:[#allocation65_spill] sm:$0xff] %v13559_v52  ;;  %16623 = vst [vmem:[#allocation66_spill] sm:$0xff] %v13563_v43  ;;  %v13571_v15 = vld [vmem:[#allocation2 + $0x6a] sm:$0xff]  ;;  %v13575_v36 = vadd.f32 %v4494_v50, %v4393_v53  ;;  %v4694_v38 = vmul.f32 %v13357_v14, %v4356_v27  ;;  %v4996_v41 = vmul.f32 %v13411_v37, %v4356_v27 }
 0x30d   : > { %6660 = vst.msk [vmem:[#allocation2 + $0x60] sm:$0xff] %vm4259_vm0, %v16624_v47  ;;  %v4355_v48 = vld [vmem:[#allocation2 + $0x50] sm:$0xff]  ;;  %v4524_v12 = vadd.f32 %v4492_v35, %v4391_v60  ;;  %6661 = vst.msk [vmem:[#allocation2 + $0x68] sm:$0xff] %vm4259_vm0, %v16624_v47  ;;  %v13586_v29 = vadd.f32 %v13506_v28, %v5266_v56  ;;  %v4825_v30 = vadd.f32 %v4793_v57, %v13485_v19  ;;  %11540 = vpow2.f32 %v10177_v34 }
 0x30e   : > { %6662 = vst.msk [vmem:[#allocation2 + $0x70] sm:$0xf] %vm6649_vm1, %v16624_v47  ;;  %v4556_v1 = vld [vmem:[#allocation2 + $0x4a] sm:$0xff]  ;;  %v13583_v46 = vld [vmem:[#allocation2 + $0x52] sm:$0xff]  ;;  %v5095_v40 = vmul.f32 %v13441_v33, %v4455_v13  ;;  %v4624_v53 = vadd.f32 %v4592_v44, %v4523_v16  ;;  %v4392_v60 = vmul.f32 %v13318_v62, %v4355_v48  ;;  %v4493_v19 = vmul.f32 %v13321_v54, %v4456_v9 }
 0x30f   : > { %16625 = vst [vmem:[#allocation67_spill] sm:$0xff] %v13586_v29  ;;  %6659 = vst.msk [vmem:[#allocation2 + $0x58] sm:$0xf] %vm6649_vm1, %v16624_v47  ;;  %v13596_v27 = vld [vmem:[#allocation2 + $0x90] sm:$0xff]  ;;  %v4593_v13 = vmul.f32 %v13337_v3, %v4556_v1  ;;  %v4925_v35 = vadd.f32 %v4893_v51, %v4824_v45  ;;  %v13603_v0 = vld [vmem:[#allocation2 + $0x78] sm:$0xff]  ;;  %v4693_v2 = vmul.f32 %v13357_v14, %v4355_v48 }
 0x310   : > { %6657 = vst.msk [vmem:[#allocation2 + $0x48] sm:$0xff] %vm4259_vm0, %v16624_v47  ;;  %6658 = vst.msk [vmem:[#allocation2 + $0x50] sm:$0xff] %vm4259_vm0, %v16624_v47  ;;  %v13598_v50 = vld [vmem:[#allocation2 + $0x91] sm:$0xff]  ;;  %v13605_v16 = vld [vmem:[#allocation2 + $0x79] sm:$0xff]  ;;  %v5127_v57 = vadd.f32 %v5095_v40, %v5026_v39  ;;  %v4894_v31 = vmul.f32 %v13414_v10, %v4556_v1  ;;  %v4525_v45 = vadd.f32 %v4493_v19, %v4392_v60  ;;  %v11537_v60 = vpop.eup %11536 }
 0x311   : > { %v13607_v56 = vld [vmem:[#allocation2 + $0x98] sm:$0xff]  ;;  %v13617_v52 = vld [vmem:[#allocation2 + $0x80] sm:$0xff]  ;;  %v4594_v51 = vmul.f32 %v13337_v3, %v13583_v46  ;;  %v4625_v25 = vadd.f32 %v4593_v13, %v4524_v12  ;;  %v4995_v7 = vmul.f32 %v13411_v37, %v4355_v48  ;;  %v10178_v12 = vmul.f32 -1.442695, %v13586_v29 }
 0x312   : > { %v13609_v44 = vld [vmem:[#allocation2 + $0x99] sm:$0xff]  ;;  %v13628_v39 = vld [vmem:[#allocation2 + $0x81] sm:$0xff]  ;;  %v4725_v19 = vadd.f32 %v4693_v2, %v4624_v53  ;;  %v4794_v48 = vmul.f32 %v13366_v26, %v4456_v9  ;;  %v4926_v13 = vadd.f32 %v4894_v31, %v4825_v30  ;;  %v4695_v49 = vmul.f32 %v13357_v14, %v13550_v58 }
 0x313   : > { %16626 = vst [vmem:[#allocation68_spill] sm:$0xff] %v13609_v44  ;;  %v13613_v11 = vld [vmem:[#allocation2 + $0x92] sm:$0xff]  ;;  %v13615_v43 = vld [vmem:[#allocation2 + $0x9a] sm:$0xff]  ;;  %v13632_v40 = vld [vmem:[#allocation2 + $0x82] sm:$0xff]  ;;  %v4626_v55 = vadd.f32 %v4594_v51, %v4525_v45  ;;  %v5027_v59 = vadd.f32 %v4995_v7, %v4925_v35  ;;  %v4895_v2 = vmul.f32 %v13414_v10, %v13583_v46  ;;  %v5096_v30 = vmul.f32 %v13441_v33, %v4456_v9  ;;  %v11539_v53 = vpop.eup %11538 }
 0x314   : > { %16627 = vst [vmem:[#allocation69_spill] sm:$0xff] %v13613_v11  ;;  %16628 = vst [vmem:[#allocation70_spill] sm:$0xff] %v13615_v43  ;;  %v13630_v34 = vld [vmem:[#allocation2 + $0x7a] sm:$0xff]  ;;  %v4726_v43 = vadd.f32 %v4694_v38, %v4625_v25  ;;  %v4826_v29 = vadd.f32 %v4794_v48, %v4725_v19  ;;  %v5028_v31 = vadd.f32 %v4996_v41, %v4926_v13  ;;  %11542 = vpow2.f32 %v10178_v12 }
 0x315   : > { %6668 = vst.msk [vmem:[#allocation2 + $0xa0] sm:$0xf] %vm6649_vm1, %v16624_v47  ;;  %6665 = vst.msk [vmem:[#allocation2 + $0x88] sm:$0xf] %vm6649_vm1, %v16624_v47  ;;  %v4595_v44 = vmul.f32 %v13337_v3, %v13554_v63  ;;  %v13649_v11 = vadd.f32 %v4695_v49, %v4626_v55  ;;  %v5196_v45 = vmul.f32 %v13449_v23, %v4556_v1  ;;  %11544 = vpow2.f32 %v13530_v6 }
 0x316   : > { %6666 = vst.msk [vmem:[#allocation2 + $0x90] sm:$0xff] %vm4259_vm0, %v16624_v47  ;;  %6667 = vst.msk [vmem:[#allocation2 + $0x98] sm:$0xff] %vm4259_vm0, %v16624_v47  ;;  %v4997_v7 = vmul.f32 %v13411_v37, %v13550_v58  ;;  %v4927_v25 = vadd.f32 %v4895_v2, %v4826_v29  ;;  %v5128_v38 = vadd.f32 %v5096_v30, %v5027_v59  ;;  %11546 = vpow2.f32 %v13542_v21 }
 0x317   : > { %6663 = vst.msk [vmem:[#allocation2 + $0x78] sm:$0xff] %vm4259_vm0, %v16624_v47  ;;  %6664 = vst.msk [vmem:[#allocation2 + $0x80] sm:$0xff] %vm4259_vm0, %v16624_v47  ;;  %v5097_v47 = vmul.f32 %v13441_v33, %v13517_v22  ;;  %v5228_v41 = vadd.f32 %v5196_v45, %v5127_v57  ;;  %v3982_v9 = vmul.f32 %v13325_v20, %v13228_v18  ;;  %v11541_v59 = vpop.eup %11540  ;;  %v4145_v21 = vadd.f32 1.0, %v11537_v60 }
 0x318   : > { %v5029_v35 = vadd.f32 %v4997_v7, %v4927_v25  ;;  %v5197_v55 = vmul.f32 %v13449_v23, %v13583_v46  ;;  %v5198_v49 = vmul.f32 %v13449_v23, %v13554_v63  ;;  %v13666_v1 = vmul.f32 %v13333_v24, %v13228_v18 }
 0x319   : > { %v5129_v51 = vadd.f32 %v5097_v47, %v5028_v31  ;;  %v5098_v20 = vmul.f32 %v13441_v33, %v13552_v61  ;;  %v4627_v47 = vadd.f32 %v4595_v44, %v13575_v36  ;;  %v4696_v46 = vmul.f32 %v13357_v14, %v13603_v0 }
 0x31a   : > { %v5229_v29 = vadd.f32 %v5197_v55, %v5128_v38  ;;  %v5267_v6 = vmul.f32 %v13474_v5, %v5228_v41  ;;  %v4795_v57 = vmul.f32 %v13366_v26, %v13517_v22  ;;  %v13677_v12 = vadd.f32 %v13232_v4, %v3982_v9 }
 0x31b   : > { %v5130_v24 = vadd.f32 %v5098_v20, %v5029_v35  ;;  %v5230_v19 = vadd.f32 %v5198_v49, %v5129_v51  ;;  %v4728_v48 = vadd.f32 %v4696_v46, %v4627_v47  ;;  %v4143_v13 = vadd.f32 1.0, %v11539_v53 }
 0x31c   : > { %v4394_v2 = vmul.f32 %v13318_v62, %v13550_v58  ;;  %v4495_v36 = vmul.f32 %v13321_v54, %v13552_v61  ;;  %v4896_v44 = vmul.f32 %v13414_v10, %v13554_v63  ;;  %v4827_v31 = vadd.f32 %v4795_v57, %v4726_v43 }
 0x31d   : > { %v5199_v22 = vmul.f32 %v13449_v23, %v13571_v15  ;;  %v5268_v60 = vmul.f32 %v13474_v5, %v5229_v29  ;;  %v4395_v30 = vmul.f32 %v13318_v62, %v13603_v0  ;;  %v4496_v53 = vmul.f32 %v13321_v54, %v13605_v16 }
 0x31e   : > { %v13693_v58 = vadd.f32 %v13506_v28, %v5267_v6  ;;  %v4928_v45 = vadd.f32 %v4896_v44, %v4827_v31  ;;  %v4998_v7 = vmul.f32 %v13411_v37, %v13603_v0  ;;  %11548 = vrcp.f32 %v4145_v21  ;;  %v11543_v63 = vpop.eup %11542 }
 0x31f   : > { %v4596_v43 = vmul.f32 %v13337_v3, %v13571_v15  ;;  %v5231_v25 = vadd.f32 %v5199_v22, %v5130_v24  ;;  %v5269_v38 = vmul.f32 %v13474_v5, %v5230_v19  ;;  %11550 = vrcp.f32 %v4143_v13  ;;  %v11545_v55 = vpop.eup %11544 }
 0x320   : > { %v5432_v41 = vadd.f32 1.0, %v11541_v59  ;;  %v4527_v9 = vadd.f32 %v4495_v36, %v4394_v2  ;;  %v4897_v35 = vmul.f32 %v13414_v10, %v13571_v15  ;;  %v13702_v51 = vadd.f32 %v4998_v7, %v4928_v45  ;;  %v11547_v47 = vpop.eup %11546 }
 0x321   : > { %v13705_v49 = vadd.f32 %v13506_v28, %v5268_v60  ;;  %v4698_v0 = vmul.f32 %v13357_v14, %v13596_v27  ;;  %v5000_v20 = vmul.f32 %v13411_v37, %v13596_v27  ;;  %v4528_v29 = vadd.f32 %v4496_v53, %v4395_v30 }
 0x322   : > { %v5433_v46 = vadd.f32 1.0, %v11543_v63  ;;  %v10179_v59 = vmul.f32 -1.442695, %v13693_v58  ;;  %v4797_v15 = vmul.f32 %v13366_v26, %v13605_v16  ;;  %v4396_v6 = vmul.f32 %v13318_v62, %v13617_v52 }
 0x323   : > { %v5270_v57 = vmul.f32 %v13474_v5, %v5231_v25  ;;  %v13718_v21 = vadd.f32 %v13506_v28, %v5269_v38  ;;  %v4497_v24 = vmul.f32 %v13321_v54, %v13628_v39  ;;  %v4597_v19 = vmul.f32 %v13337_v3, %v13630_v34 }
 0x324   : > { %v4829_v13 = vadd.f32 %v4797_v15, %v4728_v48  ;;  %v4628_v2 = vadd.f32 %v4596_v43, %v4527_v9  ;;  %v4697_v36 = vmul.f32 %v13357_v14, %v13617_v52  ;;  %v4796_v44 = vmul.f32 %v13366_v26, %v13552_v61 }
 0x325   : > { %v10180_v31 = vmul.f32 -1.442695, %v13705_v49  ;;  %v4529_v22 = vadd.f32 %v4497_v24, %v4396_v6  ;;  %v4598_v60 = vmul.f32 %v13337_v3, %v13632_v40  ;;  %v4629_v30 = vadd.f32 %v4597_v19, %v4528_v29 }
 0x326   : > { %v4729_v53 = vadd.f32 %v4697_v36, %v4628_v2  ;;  %v4798_v45 = vmul.f32 %v13366_v26, %v13628_v39  ;;  %v4828_v48 = vadd.f32 %v4796_v44, %v13649_v11  ;;  %v4898_v7 = vmul.f32 %v13414_v10, %v13630_v34 }
 0x327   : > { %v13737_v63 = vadd.f32 %v13506_v28, %v5270_v57  ;;  %v4699_v61 = vmul.f32 %v13357_v14, %v13607_v56  ;;  %v4630_v43 = vadd.f32 %v4598_v60, %v4529_v22  ;;  %v4730_v25 = vadd.f32 %v4698_v0, %v4629_v30 }
 0x328   : > { %v11549_v38 = vpop.eup %11548  ;;  %v4830_v9 = vadd.f32 %v4798_v45, %v4729_v53  ;;  %v4899_v29 = vmul.f32 %v13414_v10, %v13632_v40  ;;  %v4929_v15 = vadd.f32 %v4897_v35, %v4828_v48  ;;  %v4930_v6 = vadd.f32 %v4898_v7, %v4829_v13  ;;  %v11469_v7 = vld [vmem:[%s16591_s3] sm:$0xff]  }
 0x329   : > { %v11551_v24 = vpop.eup %11550  ;;  %11552 = vpow2.f32 %v10179_v59  ;;  %v10181_v11 = vmul.f32 -1.442695, %v13718_v21  ;;  %v13744_v19 = vadd.f32 %v4699_v61, %v4630_v43  ;;  %v4999_v57 = vmul.f32 %v13411_v37, %v13617_v52  ;;  %10942 = vmatpush3.bf16.msra.mxu1 %v11469_v7 }
 0x32a   : > { %11554 = vpow2.f32 %v10180_v31  ;;  %v5001_v0 = vmul.f32 %v13411_v37, %v13607_v56  ;;  %v4931_v2 = vadd.f32 %v4899_v29, %v4830_v9  ;;  %v5032_v36 = vadd.f32 %v5000_v20, %v4930_v6 }
 0x32b   : > { %v5031_v44 = vadd.f32 %v4999_v57, %v4929_v15  ;;  %v4146_v22 = vadd.f32 1.0, %v11545_v55  ;;  %v3983_v35 = vmul.f32 %v13341_v8, %v13228_v18  ;;  %11556 = vrcp.f32 %v5432_v41  ;;  %v11470_v15 = vld [vmem:[%s16591_s3 + $0x8] sm:$0xff]   ;;  %s16795_s3 = sld [smem:[#allocation32_spill]] }
 0x32c   : > { %v10182_v59 = vmul.f32 -1.442695, %v13737_v63  ;;  %v5033_v13 = vadd.f32 %v5001_v0, %v4931_v2  ;;  %v13755_v60 = vadd.f32 %v13232_v4, %v13666_v1  ;;  %11558 = vrcp.f32 %v5433_v46 }
 0x32d   : > { %v4241_v52 = vmul.f32 %v11549_v38, %v13423_v17  ;;  %v4239_v31 = vmul.f32 %v11551_v24, %v13481_v42  ;;  %v4144_v30 = vadd.f32 1.0, %v11547_v47  ;;  %11560 = vpow2.f32 %v10181_v11  ;;  %v16629_v38 = vld [vmem:[#allocation69_spill] sm:$0xff]  ;;  %v16630_v11 = vld [vmem:[#allocation68_spill] sm:$0xff] }
 0x32e   : > { %v5099_v55 = vmul.f32 %v13441_v33, %v13605_v16  ;;  %v10152_v8 = vmul.f32 -1.442695, %v13677_v12  ;;  %v5100_v41 = vmul.f32 %v13441_v33, %v13628_v39  ;;  %11562 = vrcp.f32 %v4146_v22 }
 0x32f   : > { %4330 = vst.msk [vmem:[#allocation2 + $0xc1] sm:$0xff] %vm4259_vm0, %v4241_v52  ;;  %4328 = vst.msk [vmem:[#allocation2 + $0xa9] sm:$0xff] %vm4259_vm0, %v4239_v31  ;;  %v13767_v1 = vadd.f32 %v13232_v4, %v3983_v35  ;;  %11564 = vpow2.f32 %v10182_v59  ;;  %v5101_v42 = vmul.f32 %v13441_v33, %v13598_v50  ;;  %v10150_v20 = vmul.f32 -1.442695, %v13755_v60  ;;  %v13799_v59 = vld [vmem:[%s12224_s17] ss:$0 sm:$0xff] }
 0x330   : > { %v5131_v17 = vadd.f32 %v5099_v55, %v13702_v51  ;;  %v5132_v16 = vadd.f32 %v5100_v41, %v5031_v44  ;;  %11566 = vrcp.f32 %v4144_v30  ;;  %v4397_v39 = vmul.f32 %v13318_v62, %v13596_v27  ;;  %16632 = vst [vmem:[#allocation69_spill] sm:$0xff] %v13799_v59  ;;  %v13804_v31 = vld [vmem:[#allocation3] ss:$0 sm:$0xff] }
 0x331   : > { %v4498_v47 = vmul.f32 %v13321_v54, %v13598_v50  ;;  %v5200_v4 = vmul.f32 %v13449_v23, %v13630_v34  ;;  %11568 = vpow2.f32 %v10152_v8  ;;  %v5133_v51 = vadd.f32 %v5101_v42, %v5032_v36  ;;  %16634 = vst [vmem:[#allocation71_spill] sm:$0xff] %v13804_v31  ;;  %v16635_v30 = vld [vmem:[#allocation52_spill] sm:$0xff] }
 0x332   : > { %v5201_v53 = vmul.f32 %v13449_v23, %v13632_v40  ;;  %v4799_v45 = vmul.f32 %v13366_v26, %v13598_v50  ;;  %v10153_v48 = vmul.f32 -1.442695, %v13767_v1  ;;  %v3981_v43 = vmul.f32 %v13350_v32, %v13228_v18 }
 0x333   : > { %v11553_v46 = vpop.eup %11552  ;;  %v5232_v61 = vadd.f32 %v5200_v4, %v5131_v17  ;;  %v5202_v34 = vmul.f32 %v13449_v23, %v16629_v38  ;;  %11570 = vpow2.f32 %v10150_v20  ;;  %v4530_v50 = vadd.f32 %v4498_v47, %v4397_v39  ;;  %v16636_v20 = vld [vmem:[#allocation70_spill] sm:$0xff] }
 0x334   : > { %v11555_v27 = vpop.eup %11554  ;;  %v5233_v9 = vadd.f32 %v5201_v53, %v5132_v16  ;;  %v4831_v29 = vadd.f32 %v4799_v45, %v4730_v25  ;;  %v5434_v6 = vadd.f32 1.0, %v11553_v46  ;;  %v4599_v24 = vmul.f32 %v13337_v3, %v16629_v38 }
 0x335   : > { %v11557_v40 = vpop.eup %11556  ;;  %v5102_v57 = vmul.f32 %v13441_v33, %v16630_v11  ;;  %v16631_v0 = vmov 0.0   ;;  %v5435_v32 = vadd.f32 1.0, %v11555_v27  ;;  %v4900_v25 = vmul.f32 %v13414_v10, %v16629_v38 }
 0x336   : > { %10943 = vmatprep.subr.bf16.mxu1 %v16631_v0  ;;  %v11559_v18 = vpop.eup %11558  ;;  %v5234_v2 = vadd.f32 %v5202_v34, %v5133_v51  ;;  %v4362_v36 = vld [vmem:[#allocation2 + $0xa8] sm:$0xff]  ;;  %11572 = vpow2.f32 %v10153_v48  ;;  %v5271_v35 = vmul.f32 %v13474_v5, %v5232_v61  ;;  %v13802_v52 = vadd.f32 %v13799_v59, %v3981_v43  ;;  %v16637_v61 = vld [vmem:[#allocation59_spill] sm:$0xff]  ;;  %10945 = vmatprep.mubr.msk.bf16.mxu1 %vm12198_vm6, %v16631_v0 }
 0x337   : > { %v11561_v44 = vpop.eup %11560  ;;  %v5134_v22 = vadd.f32 %v5102_v57, %v5033_v13  ;;  %v3986_v55 = vmul.f32 %v13804_v31, %v16635_v30  ;;  %v4398_v41 = vmul.f32 %v13318_v62, %v13607_v56  ;;  %v4499_v17 = vmul.f32 %v13321_v54, %v16630_v11  ;;  %10944 = vmatpush3.bf16.msra.mxu1 %v11470_v15 }
 0x338   : > { %16633 = vst [vmem:[#allocation68_spill] sm:$0xff] %v13802_v52  ;;  %v11563_v8 = vpop.eup %11562  ;;  %v5272_v13 = vmul.f32 %v13474_v5, %v5233_v9  ;;  %v4932_v42 = vadd.f32 %v4900_v25, %v4831_v29  ;;  %11574 = vrcp.f32 %v5434_v6  ;;  %v5203_v39 = vmul.f32 %v13449_v23, %v16636_v20  ;;  %10949 = vmatprep.subr.bf16.mxu1 %v16631_v0  ;;  %v16639_v29 = vld [vmem:[#allocation61_spill] sm:$0xff]  ;;  %v16640_v6 = vld [vmem:[#allocation67_spill] sm:$0xff] }
 0x339   : > { %v11565_v16 = vpop.eup %11564  ;;  %v4631_v47 = vadd.f32 %v4599_v24, %v4530_v50  ;;  %v4700_v4 = vmul.f32 %v13357_v14, %v4362_v36  ;;  %v5436_v51 = vadd.f32 1.0, %v11561_v44  ;;  %11576 = vrcp.f32 %v5435_v32  ;;  %v16642_v24 = vld [vmem:[#allocation62_spill] sm:$0xff] }
 0x33a   : > { %v11567_v46 = vpop.eup %11566  ;;  %v5273_v56 = vmul.f32 %v13474_v5, %v5234_v2  ;;  %v5002_v53 = vmul.f32 %v13411_v37, %v4362_v36  ;;  %v5235_v48 = vadd.f32 %v5203_v39, %v5134_v22  ;;  %v13820_v7 = vadd.f32 %v13506_v28, %v5271_v35  ;;  %v13847_v35 = vld [vmem:[#allocation2 + $0xa9] sm:$0xff] }
 0x33b   : > { %v11569_v45 = vpop.eup %11568  ;;  %v13822_v27 = vadd.f32 %v4700_v4, %v4631_v47  ;;  %v4242_v43 = vmul.f32 %v11563_v8, %v16637_v61  ;;  %v5437_v38 = vadd.f32 1.0, %v11565_v16  ;;  %v13826_v34 = vadd.f32 %v13506_v28, %v5272_v13  ;;  %v13859_v4 = vld [vmem:[#allocation2 + $0x198] sm:$0xff] }
 0x33c   : > { %v13828_v9 = vadd.f32 %v5002_v53, %v4932_v42  ;;  %v4240_v15 = vmul.f32 %v11567_v46, %v16639_v29  ;;  %v13832_v50 = vmul.f32 %v11559_v18, %v16640_v6  ;;  %v13835_v57 = vmul.f32 %v11557_v40, %v16642_v24  ;;  %16645 = vst [vmem:[#allocation67_spill] sm:$0xff] %v13859_v4  ;;  %v13863_v46 = vld [vmem:[#allocation2 + $0x199] sm:$0xff]  ;;  %v13871_v53 = vld [vmem:[#allocation2 + $0x1a1] sm:$0xff]  ;;  %v16653_v29 = vld [vmem:[#allocation54_spill] sm:$0xff] }
 0x33d   : > { %16638 = vst [vmem:[#allocation52_spill] sm:$0xff] %v13826_v34  ;;  %4331 = vst.msk [vmem:[#allocation2 + $0xc9] sm:$0xff] %vm4259_vm0, %v4242_v43  ;;  %v4149_v32 = vadd.f32 1.0, %v11569_v45  ;;  %v11571_v25 = vpop.eup %11570  ;;  %v13839_v2 = vadd.f32 %v13506_v28, %v5273_v56  ;;  %v13843_v44 = vmul.f32 -1.442695, %v13802_v52  ;;  %11578 = vrcp.f32 %v5436_v51  ;;  %v13873_v45 = vld [vmem:[#allocation2 + $0x19a] sm:$0xff] }
 0x33e   : > { %16641 = vst [vmem:[#allocation70_spill] sm:$0xff] %v13832_v50  ;;  %16643 = vst [vmem:[#allocation59_spill] sm:$0xff] %v13835_v57  ;;  %v5274_v22 = vmul.f32 %v13474_v5, %v5235_v48  ;;  %v10183_v18 = vmul.f32 -1.442695, %v13820_v7  ;;  %v13850_v40 = vadd.f32 %v13799_v59, %v3986_v55  ;;  %11580 = vrcp.f32 %v5437_v38  ;;  %v13861_v55 = vld [vmem:[#allocation2 + $0x1a0] sm:$0xff] }
 0x33f   : > { %16644 = vst [vmem:[#allocation61_spill] sm:$0xff] %v13839_v2  ;;  %4329 = vst.msk [vmem:[#allocation2 + $0xb1] sm:$0xff] %vm4259_vm0, %v4240_v15  ;;  %v4531_v8 = vadd.f32 %v4499_v17, %v4398_v41  ;;  %v4600_v13 = vmul.f32 %v13337_v3, %v16636_v20  ;;  %v10184_v42 = vmul.f32 -1.442695, %v13826_v34  ;;  %v5560_v16 = vsel %vm4259_vm0, %v13835_v57, 0.0  ;;  %v13875_v48 = vld [vmem:[#allocation2 + $0x1a2] sm:$0xff] }
 0x340   : > { %v11573_v30 = vpop.eup %11572  ;;  %v5561_v39 = vsel %vm4259_vm0, %v13832_v50, 0.0  ;;  %11582 = vrcp.f32 %v4149_v32  ;;  %v4147_v47 = vadd.f32 1.0, %v11571_v25  ;;  %16646 = vst [vmem:[#allocation62_spill] sm:$0xff] %v13861_v55  ;;  %16647 = vst [vmem:[#allocation72_spill] sm:$0xff] %v13863_v46  ;;  %v10185_v41 = vmul.f32 -1.442695, %v13839_v2 }
 0x341   : > { %v4399_v17 = vmul.f32 %v13318_v62, %v4362_v36  ;;  %v4500_v51 = vmul.f32 %v13321_v54, %v13847_v35  ;;  %v4800_v56 = vmul.f32 %v13366_v26, %v16630_v11  ;;  %16648 = vst [vmem:[#allocation73_spill] sm:$0xff] %v13871_v53  ;;  %16649 = vst [vmem:[#allocation74_spill] sm:$0xff] %v13873_v45  ;;  %11584 = vpow2.f32 %v10183_v18  ;;  %v13880_v38 = vld [vmem:[#allocation2 + $0xc0] sm:$0xff]  ;;  %v16655_v18 = vld [vmem:[#allocation55_spill] sm:$0xff] }
 0x342   : > { %16650 = vst [vmem:[#allocation75_spill] sm:$0xff] %v13875_v48  ;;  %v11575_v61 = vpop.eup %11574  ;;  %v13878_v43 = vadd.f32 %v13506_v28, %v5274_v22  ;;  %v13882_v62 = vld [vmem:[#allocation2 + $0xc1] sm:$0xff]  ;;  %v4150_v36 = vadd.f32 1.0, %v11573_v30  ;;  %6699 = vst.msk [vmem:[#allocation2 + $0x198] sm:$0xff] %vm4259_vm0, %v16631_v0  ;;  %11586 = vpow2.f32 %v10184_v42  ;;  %v16654_v22 = vld [vmem:[#allocation46_spill] sm:$0xff]  ;;  %v13909_v57 = vadd.f32 %v5561_v39, %v5560_v16 }
 0x343   : > { %v16652_v54 = vld [vmem:[#allocation45_spill] sm:$0xff]  ;;  %6700 = vst.msk [vmem:[#allocation2 + $0x1a0] sm:$0xff] %vm4259_vm0, %v16631_v0  ;;  %v11577_v11 = vpop.eup %11576  ;;  %v4832_v25 = vadd.f32 %v4800_v56, %v13744_v19  ;;  %v13903_v30 = vadd.f32 %v16655_v18, %v16654_v22  ;;  %v4901_v42 = vmul.f32 %v13414_v10, %v16636_v20  ;;  %v4801_v48 = vmul.f32 %v13366_v26, %v13847_v35  ;;  %v13956_v53 = vld [vmem:[%s12229_s21 + $0x2] ss:$0 sm:$0xff] }
 0x344   : > { %16651 = vst [vmem:[#allocation76_spill] sm:$0xff] %v13878_v43  ;;  %v13886_v15 = vadd.f32 %v16653_v29, %v16652_v54  ;;  %6701 = vst.msk [vmem:[#allocation2 + $0x1a8] sm:$0xf] %vm6649_vm1, %v16631_v0  ;;  %v13894_v6 = vld [vmem:[#allocation2 + $0xc8] sm:$0xff]  ;;  %v16656_v54 = vld [vmem:[#allocation47_spill] sm:$0xff]  ;;  %11588 = vrcp.f32 %v4147_v47  ;;  %v13920_v22 = vmul.f32 %v11575_v61, %v13693_v58  ;;  %v4532_v16 = vadd.f32 %v4500_v51, %v4399_v17 }
 0x345   : > { %v13896_v24 = vld [vmem:[#allocation2 + $0xc9] sm:$0xff]  ;;  %v16657_v29 = vld [vmem:[#allocation56_spill] sm:$0xff]  ;;  %11590 = vpow2.f32 %v10185_v41  ;;  %v4632_v18 = vadd.f32 %v4600_v13, %v4531_v8  ;;  %v10186_v47 = vmul.f32 -1.442695, %v13878_v43  ;;  %v4833_v58 = vadd.f32 %v4801_v48, %v13822_v27 }
 0x346   : > { %v13898_v32 = vld [vmem:[#allocation2 + $0xc2] sm:$0xff]  ;;  %v13907_v50 = vadd.f32 %v16657_v29, %v16656_v54  ;;  %v13915_v45 = vld [vmem:[#allocation2 + $0xca] sm:$0xff]  ;;  %16659 = vst [vmem:[#allocation54_spill] sm:$0xff] %v13920_v22  ;;  %v13926_v39 = vld [vmem:[#allocation2 + $0xb2] sm:$0xff]  ;;  %v13929_v54 = vmul.f32 %v11577_v11, %v13705_v49  ;;  %11592 = vrcp.f32 %v4150_v36  ;;  %v4933_v17 = vadd.f32 %v4901_v42, %v4832_v25 }
 0x347   : > { %6672 = vst.msk [vmem:[#allocation2 + $0xc0] sm:$0xff] %vm4259_vm0, %v16631_v0  ;;  %v4363_v19 = vld [vmem:[#allocation2 + $0xb0] sm:$0xff]  ;;  %6673 = vst.msk [vmem:[#allocation2 + $0xc8] sm:$0xff] %vm4259_vm0, %v16631_v0  ;;  %v13940_v41 = vld [vmem:[%s12229_s21] ss:$0 sm:$0xff]  ;;  %v11579_v51 = vpop.eup %11578  ;;  %v4702_v48 = vmul.f32 %v13357_v14, %v13880_v38  ;;  %11594 = vpow2.f32 %v13843_v44  ;;  %v4602_v46 = vmul.f32 %v13956_v53, %v13926_v39  ;;  %v5004_v55 = vmul.f32 %v13411_v37, %v13880_v38 }
 0x348   : > { %16658 = vst [vmem:[#allocation45_spill] sm:$0xff] %v13907_v50  ;;  %v4464_v56 = vld [vmem:[#allocation2 + $0xb1] sm:$0xff]  ;;  %6674 = vst.msk [vmem:[#allocation2 + $0xd0] sm:$0xf] %vm6649_vm1, %v16631_v0  ;;  %v4400_v49 = vmul.f32 %v13940_v41, %v4363_v19  ;;  %v13944_v8 = vld [vmem:[%s12229_s21 + $0x1] ss:$0 sm:$0xff]  ;;  %v4701_v61 = vmul.f32 %v13357_v14, %v4363_v19  ;;  %v13953_v36 = vpop.eup %11580  ;;  %v5003_v25 = vmul.f32 %v13411_v37, %v4363_v19  ;;  %11596 = vpow2.f32 %v10186_v47 }
 0x349   : > { %v4564_v20 = vld [vmem:[#allocation2 + $0xaa] sm:$0xff]  ;;  %16660 = vst [vmem:[#allocation46_spill] sm:$0xff] %v13929_v54  ;;  %6671 = vst.msk [vmem:[#allocation2 + $0xb8] sm:$0xf] %vm6649_vm1, %v16631_v0  ;;  %v4501_v13 = vmul.f32 %v13944_v8, %v4464_v56  ;;  %v4802_v43 = vmul.f32 %v13366_v26, %v4464_v56  ;;  %v4703_v44 = vmul.f32 %v13357_v14, %v13894_v6 }
 0x34a   : > { %6669 = vst.msk [vmem:[#allocation2 + $0xa8] sm:$0xff] %vm4259_vm0, %v16631_v0  ;;  %6670 = vst.msk [vmem:[#allocation2 + $0xb0] sm:$0xff] %vm4259_vm0, %v16631_v0  ;;  %v4601_v27 = vmul.f32 %v13337_v3, %v4564_v20  ;;  %v4902_v11 = vmul.f32 %v13414_v10, %v4564_v20  ;;  %v11583_v42 = vpop.eup %11582  ;;  %v4733_v4 = vadd.f32 %v4701_v61, %v4632_v18  ;;  %v5563_v18 = vsel %vm4259_vm0, %v13920_v22, 0.0 }
 0x34b   : > { %v4533_v29 = vadd.f32 %v4501_v13, %v4400_v49  ;;  %v5035_v50 = vadd.f32 %v5003_v25, %v4933_v17  ;;  %v11585_v52 = vpop.eup %11584  ;;  %v4903_v19 = vmul.f32 %v13414_v10, %v13926_v39  ;;  %v5103_v26 = vmul.f32 %v13441_v33, %v13847_v35  ;;  %v16661_v17 = vld [vmem:[#allocation53_spill] sm:$0xff] }
 0x34c   : > { %v4633_v3 = vadd.f32 %v4601_v27, %v4532_v16  ;;  %v4934_v2 = vadd.f32 %v4902_v11, %v4833_v58  ;;  %v4834_v34 = vadd.f32 %v4802_v43, %v4733_v4  ;;  %v11587_v27 = vpop.eup %11586  ;;  %v4245_v14 = vmul.f32 %v11583_v42, %v13677_v12 }
 0x34d   : > { %v4634_v49 = vadd.f32 %v4602_v46, %v4533_v29  ;;  %v5005_v47 = vmul.f32 %v13411_v37, %v13894_v6  ;;  %v5135_v10 = vadd.f32 %v5103_v26, %v13828_v9  ;;  %v3984_v35 = vmul.f32 %v13804_v31, %v16661_v17 }
 0x34e   : > { %v4734_v13 = vadd.f32 %v4702_v48, %v4633_v3  ;;  %v5036_v16 = vadd.f32 %v5004_v55, %v4934_v2  ;;  %v11589_v46 = vpop.eup %11588  ;;  %v4935_v4 = vadd.f32 %v4903_v19, %v4834_v34  ;;  %v5104_v2 = vmul.f32 %v13441_v33, %v4464_v56  ;;  %4334 = vst.msk [vmem:[#allocation2 + $0xf1] sm:$0xff] %vm4259_vm0, %v4245_v14 }
 0x34f   : > { %v13972_v58 = vadd.f32 %v4703_v44, %v4634_v49  ;;  %v11591_v43 = vpop.eup %11590  ;;  %v10156_v55 = vmul.f32 -1.442695, %v13850_v40  ;;  %v5564_v12 = vadd.f32 %v5563_v18, %v13909_v57  ;;  %v5565_v61 = vsel %vm4259_vm0, %v13929_v54, 0.0  ;;  %v16687_v54 = vld [vmem:[#allocation51_spill] sm:$0xff] }
 0x350   : > { %v11593_v48 = vpop.eup %11592  ;;  %v13986_v37 = vadd.f32 %v5005_v47, %v4935_v4  ;;  %v5105_v34 = vmul.f32 %v13441_v33, %v13882_v62  ;;  %v5438_v9 = vadd.f32 1.0, %v11585_v52  ;;  %v5136_v56 = vadd.f32 %v5104_v2, %v5035_v50  ;;  %v14024_v47 = vld [vmem:[%s12229_s21 + $0x5] ss:$0 sm:$0xff]  ;;  %v16664_v4 = vld [vmem:[#allocation63_spill] sm:$0xff]  ;;  %v16665_v2 = vld [vmem:[#allocation65_spill] sm:$0xff] }
 0x351   : > { %v5204_v11 = vmul.f32 %v13449_v23, %v4564_v20  ;;  %v4243_v29 = vmul.f32 %v11589_v46, %v13755_v60  ;;  %v11595_v3 = vpop.eup %11594  ;;  %v13993_v25 = vmul.f32 %v11579_v51, %v13718_v21  ;;  %v5439_v57 = vadd.f32 1.0, %v11587_v27  ;;  %v14004_v21 = vld [vmem:[%s12229_s21 + $0x4] ss:$0 sm:$0xff] }
 0x352   : > { %v4401_v42 = vmul.f32 %v13940_v41, %v13880_v38  ;;  %v4502_v44 = vmul.f32 %v13944_v8, %v13882_v62  ;;  %v5137_v49 = vadd.f32 %v5105_v34, %v5036_v16  ;;  %v5205_v33 = vmul.f32 %v13449_v23, %v13926_v39 }
 0x353   : > { %16662 = vst [vmem:[#allocation55_spill] sm:$0xff] %v13993_v25  ;;  %v5236_v52 = vadd.f32 %v5204_v11, %v5135_v10  ;;  %4332 = vst.msk [vmem:[#allocation2 + $0xd9] sm:$0xff] %vm4259_vm0, %v4243_v29  ;;  %v4246_v60 = vmul.f32 %v11593_v48, %v13767_v1  ;;  %v5566_v50 = vadd.f32 %v5565_v61, %v5564_v12  ;;  %v5440_v20 = vadd.f32 1.0, %v11591_v43  ;;  %v11597_v1 = vpop.eup %11596 }
 0x354   : > { %v4803_v51 = vmul.f32 %v14004_v21, %v13882_v62  ;;  %v14009_v38 = vadd.f32 %v13799_v59, %v3984_v35  ;;  %11598 = vrcp.f32 %v5438_v9  ;;  %v5206_v39 = vmul.f32 %v13449_v23, %v13898_v32 }
 0x355   : > { %v5237_v19 = vadd.f32 %v5205_v33, %v5136_v56  ;;  %4335 = vst.msk [vmem:[#allocation2 + $0xf9] sm:$0xff] %vm4259_vm0, %v4246_v60  ;;  %v4148_v16 = vadd.f32 1.0, %v11595_v3  ;;  %v14016_v27 = vmul.f32 %v13953_v36, %v13737_v63  ;;  %v5567_v62 = vsel %vm4259_vm0, %v13993_v25, 0.0  ;;  %v14043_v56 = vld [vmem:[%s12229_s21 + $0x3] ss:$0 sm:$0xff]  ;;  %v14047_v29 = vld [vmem:[#allocation2 + $0xf0] sm:$0xff] }
 0x356   : > { %11600 = vrcp.f32 %v5439_v57  ;;  %v4835_v18 = vadd.f32 %v4803_v51, %v4734_v13  ;;  %v4534_v26 = vadd.f32 %v4502_v44, %v4401_v42  ;;  %v4603_v14 = vmul.f32 %v13956_v53, %v13898_v32  ;;  %16667 = vst [vmem:[#allocation53_spill] sm:$0xff] %v14043_v56  ;;  %v14049_v3 = vld [vmem:[#allocation2 + $0xf1] sm:$0xff]  ;;  %v14052_v57 = vld [vmem:[%s12229_s21 + $0x6] ss:$0 sm:$0xff] }
 0x357   : > { %16663 = vst [vmem:[#allocation47_spill] sm:$0xff] %v14016_v27  ;;  %v5238_v46 = vadd.f32 %v5206_v39, %v5137_v49  ;;  %v5275_v23 = vmul.f32 %v13474_v5, %v5236_v52  ;;  %11602 = vrcp.f32 %v5440_v20  ;;  %v4904_v63 = vmul.f32 %v14024_v47, %v13898_v32  ;;  %v16669_v44 = vld [vmem:[#allocation66_spill] sm:$0xff] }
 0x358   : > { %v10154_v36 = vmul.f32 -1.442695, %v14009_v38  ;;  %v3987_v43 = vmul.f32 %v13804_v31, %v16664_v4  ;;  %v5441_v13 = vadd.f32 1.0, %v11597_v1  ;;  %v5276_v10 = vmul.f32 %v13474_v5, %v5237_v19 }
 0x359   : > { %11604 = vrcp.f32 %v4148_v16  ;;  %v3985_v17 = vmul.f32 %v13804_v31, %v16665_v2  ;;  %v5568_v35 = vadd.f32 %v5567_v62, %v5566_v50  ;;  %v5569_v48 = vsel %vm4259_vm0, %v14016_v27, 0.0 }
 0x35a   : > { %v14036_v12 = vld [vmem:[#allocation2 + $0xd8] sm:$0xff]  ;;  %v4936_v32 = vadd.f32 %v4904_v63, %v4835_v18  ;;  %11606 = vpow2.f32 %v10156_v55  ;;  %v5277_v61 = vmul.f32 %v13474_v5, %v5238_v46  ;;  %v14040_v34 = vadd.f32 %v13506_v28, %v5275_v23 }
 0x35b   : > { %v4635_v9 = vadd.f32 %v4603_v14, %v4534_v26  ;;  %v4704_v11 = vmul.f32 %v14043_v56, %v14036_v12  ;;  %v5006_v55 = vmul.f32 %v14052_v57, %v14036_v12  ;;  %11608 = vpow2.f32 %v10154_v36  ;;  %v14139_v27 = vld [vmem:[#allocation2 + $0xd9] sm:$0xff] }
 0x35c   : > { %16666 = vst [vmem:[#allocation56_spill] sm:$0xff] %v14040_v34  ;;  %v14056_v42 = vld [vmem:[#allocation2 + $0xf2] sm:$0xff]  ;;  %v14059_v5 = vadd.f32 %v13799_v59, %v3987_v43  ;;  %v3990_v49 = vmul.f32 %v13804_v31, %v16669_v44  ;;  %11610 = vrcp.f32 %v5441_v13  ;;  %v14064_v33 = vadd.f32 %v13506_v28, %v5276_v10  ;;  %v14072_v20 = vld [vmem:[#allocation2 + $0xfa] sm:$0xff]  ;;  %v14112_v10 = vld [vmem:[%s12229_s21 + $0x8] ss:$0 sm:$0xff] }
 0x35d   : > { %v14066_v52 = vadd.f32 %v4704_v11, %v4635_v9  ;;  %v14068_v60 = vld [vmem:[#allocation2 + $0xf8] sm:$0xff]  ;;  %6678 = vst.msk [vmem:[#allocation2 + $0xf0] sm:$0xff] %vm4259_vm0, %v16631_v0  ;;  %v14077_v51 = vadd.f32 %v13799_v59, %v3985_v17  ;;  %v4402_v39 = vmul.f32 %v13940_v41, %v13894_v6  ;;  %v4503_v19 = vmul.f32 %v13944_v8, %v13896_v24 }
 0x35e   : > { %16668 = vst [vmem:[#allocation63_spill] sm:$0xff] %v14059_v5  ;;  %16670 = vst [vmem:[#allocation65_spill] sm:$0xff] %v14064_v33  ;;  %v14070_v50 = vld [vmem:[#allocation2 + $0xf9] sm:$0xff]  ;;  %v14083_v16 = vadd.f32 %v5006_v55, %v4936_v32  ;;  %v3988_v1 = vmul.f32 %v13804_v31, %v13886_v15  ;;  %v11599_v62 = vpop.eup %11598  ;;  %v14092_v18 = vadd.f32 %v13506_v28, %v5277_v61  ;;  %v10187_v6 = vmul.f32 -1.442695, %v14040_v34 }
 0x35f   : > { %16671 = vst [vmem:[#allocation66_spill] sm:$0xff] %v14077_v51  ;;  %6680 = vst.msk [vmem:[#allocation2 + $0x100] sm:$0xf] %vm6649_vm1, %v16631_v0  ;;  %v14095_v14 = vadd.f32 %v5569_v48, %v5568_v35  ;;  %v10157_v46 = vmul.f32 -1.442695, %v14059_v5  ;;  %v14099_v23 = vadd.f32 %v13799_v59, %v3990_v49  ;;  %v3991_v63 = vmul.f32 %v13804_v31, %v13903_v30  ;;  %v16676_v61 = vld [vmem:[#allocation52_spill] sm:$0xff] }
 0x360   : > { %6679 = vst.msk [vmem:[#allocation2 + $0xf8] sm:$0xff] %vm4259_vm0, %v16631_v0  ;;  %16672 = vst [vmem:[#allocation77_spill] sm:$0xff] %v14092_v18  ;;  %v11601_v26 = vpop.eup %11600  ;;  %v4604_v15 = vmul.f32 %v13956_v53, %v13915_v45  ;;  %v14107_v28 = vmul.f32 %v14024_v47, %v13915_v45  ;;  %v10188_v36 = vmul.f32 -1.442695, %v14064_v33  ;;  %v10155_v4 = vmul.f32 -1.442695, %v14077_v51 }
 0x361   : > { %16673 = vst [vmem:[#allocation78_spill] sm:$0xff] %v14099_v23  ;;  %v11603_v43 = vpop.eup %11602  ;;  %v4535_v13 = vadd.f32 %v4503_v19, %v4402_v39  ;;  %v14116_v2 = vmul.f32 %v14112_v10, %v13915_v45  ;;  %v14119_v30 = vld [vmem:[%s12229_s21 + $0x7] ss:$0 sm:$0xff]  ;;  %v14124_v35 = vadd.f32 %v13799_v59, %v3988_v1  ;;  %v14127_v32 = vmul.f32 %v11599_v62, %v13820_v7  ;;  %v16678_v55 = vld [vmem:[#allocation68_spill] sm:$0xff] }
 0x362   : > { %v5106_v17 = vmul.f32 %v14119_v30, %v13896_v24  ;;  %v14130_v9 = vmul.f32 %v11601_v26, %v16676_v61  ;;  %11612 = vpow2.f32 %v10187_v6  ;;  %v10189_v11 = vmul.f32 -1.442695, %v14092_v18  ;;  %v16680_v39 = vld [vmem:[#allocation48_spill] sm:$0xff]  ;;  %v16681_v19 = vld [vmem:[#allocation57_spill] sm:$0xff]  ;;  %v16683_v26 = vld [vmem:[#allocation58_spill] sm:$0xff] }
 0x363   : > { %16674 = vst [vmem:[#allocation79_spill] sm:$0xff] %v14124_v35  ;;  %v11605_v48 = vpop.eup %11604  ;;  %16675 = vst [vmem:[#allocation80_spill] sm:$0xff] %v14127_v32  ;;  %11614 = vpow2.f32 %v10157_v46  ;;  %v14135_v49 = vadd.f32 %v13799_v59, %v3991_v63  ;;  %v11131_v1 = vadd.f32 %v16681_v19, %v16680_v39  ;;  %v4804_v7 = vmul.f32 %v14004_v21, %v13896_v24  ;;  %v16682_v6 = vld [vmem:[#allocation49_spill] sm:$0xff] }
 0x364   : > { %16677 = vst [vmem:[#allocation52_spill] sm:$0xff] %v14130_v9  ;;  %v11607_v45 = vpop.eup %11606  ;;  %v4244_v44 = vmul.f32 %v11605_v48, %v16678_v55  ;;  %11616 = vpow2.f32 %v10188_v36  ;;  %v11132_v61 = vadd.f32 %v16683_v26, %v16682_v6  ;;  %v10160_v46 = vmul.f32 -1.442695, %v14099_v23  ;;  %v16684_v48 = vld [vmem:[#allocation50_spill] sm:$0xff]  ;;  %v16685_v55 = vld [vmem:[#allocation60_spill] sm:$0xff]  ;;  %v16686_v24 = vld [vmem:[#allocation45_spill] sm:$0xff] }
 0x365   : > { %16679 = vst [vmem:[#allocation68_spill] sm:$0xff] %v14135_v49  ;;  %v4153_v62 = vadd.f32 1.0, %v11607_v45  ;;  %v11609_v25 = vpop.eup %11608  ;;  %11618 = vpow2.f32 %v10155_v4  ;;  %v10158_v63 = vmul.f32 -1.442695, %v14124_v35  ;;  %v14150_v36 = vadd.f32 %v16685_v55, %v16684_v48  ;;  %v16688_v6 = vld [vmem:[#allocation64_spill] sm:$0xff]  ;;  %v16690_v55 = vld [vmem:[#allocation61_spill] sm:$0xff] }
 0x366   : > { %4333 = vst.msk [vmem:[#allocation2 + $0xe1] sm:$0xff] %vm4259_vm0, %v4244_v44  ;;  %v11611_v39 = vpop.eup %11610  ;;  %v4151_v19 = vadd.f32 1.0, %v11609_v25  ;;  %v3989_v45 = vmul.f32 %v13804_v31, %v16686_v24  ;;  %v14156_v26 = vadd.f32 %v16688_v6, %v16687_v54  ;;  %v4403_v4 = vmul.f32 %v13940_v41, %v14036_v12 }
 0x367   : > { %11620 = vrcp.f32 %v4153_v62  ;;  %v4504_v44 = vmul.f32 %v13944_v8, %v14139_v27  ;;  %v10161_v48 = vmul.f32 -1.442695, %v14135_v49  ;;  %v14164_v22 = vmul.f32 %v11603_v43, %v16690_v55  ;;  %v16692_v62 = vld [vmem:[#allocation76_spill] sm:$0xff] }
 0x368   : > { %16689 = vst [vmem:[#allocation48_spill] sm:$0xff] %v14156_v26  ;;  %11622 = vpow2.f32 %v10189_v11  ;;  %v4836_v25 = vadd.f32 %v4804_v7, %v13972_v58  ;;  %v14168_v24 = vmul.f32 %v11611_v39, %v16692_v62  ;;  %v14172_v54 = vsel %vm4259_vm0, %v14127_v32, 0.0 }
 0x369   : > { %16691 = vst [vmem:[#allocation57_spill] sm:$0xff] %v14164_v22  ;;  %11624 = vrcp.f32 %v4151_v19  ;;  %v14175_v12 = vadd.f32 %v5106_v17, %v13986_v37  ;;  %v4636_v43 = vadd.f32 %v4604_v15, %v4535_v13  ;;  %v14180_v58 = vadd.f32 %v13799_v59, %v3989_v45 }
 0x36a   : > { %16693 = vst [vmem:[#allocation49_spill] sm:$0xff] %v14168_v24  ;;  %11626 = vpow2.f32 %v10160_v46  ;;  %v3994_v11 = vmul.f32 %v13804_v31, %v11131_v1  ;;  %v4706_v7 = vmul.f32 %v14043_v56, %v14047_v29  ;;  %v4536_v39 = vadd.f32 %v4504_v44, %v4403_v4 }
 0x36b   : > { %11628 = vpow2.f32 %v10158_v63  ;;  %16694 = vst [vmem:[#allocation58_spill] sm:$0xff] %v14180_v58  ;;  %v4805_v37 = vmul.f32 %v14004_v21, %v14139_v27  ;;  %v5008_v46 = vmul.f32 %v14052_v57, %v14047_v29  ;;  %v4707_v15 = vmul.f32 %v14043_v56, %v14068_v60 }
 0x36c   : > { %11630 = vpow2.f32 %v10161_v48  ;;  %v14187_v17 = vpop.eup %11612  ;;  %v4937_v19 = vadd.f32 %v14107_v28, %v4836_v25  ;;  %v3992_v45 = vmul.f32 %v13804_v31, %v11132_v61  ;;  %v5009_v28 = vmul.f32 %v14052_v57, %v14068_v60 }
 0x36d   : > { %v4367_v13 = vld [vmem:[#allocation2 + $0xe0] sm:$0xff]  ;;  %v11615_v6 = vpop.eup %11614  ;;  %v4837_v4 = vadd.f32 %v4805_v37, %v14066_v52  ;;  %v10159_v61 = vmul.f32 -1.442695, %v14180_v58  ;;  %v14220_v25 = vadd.f32 %v13799_v59, %v3994_v11 }
 0x36e   : > { %v14193_v63 = vld [vmem:[#allocation2 + $0xe1] sm:$0xff]  ;;  %v4404_v44 = vmul.f32 %v13940_v41, %v4367_v13  ;;  %v14209_v32 = vpop.eup %11616  ;;  %v4705_v52 = vmul.f32 %v14043_v56, %v4367_v13  ;;  %v14229_v58 = vadd.f32 %v13799_v59, %v3992_v45 }
 0x36f   : > { %v14195_v1 = vld [vmem:[#allocation2 + $0xda] sm:$0xff]  ;;  %v4505_v48 = vmul.f32 %v13944_v8, %v14193_v63  ;;  %v14203_v55 = vld [vmem:[#allocation2 + $0xe2] sm:$0xff]  ;;  %v11619_v37 = vpop.eup %11618  ;;  %v4806_v23 = vmul.f32 %v14004_v21, %v14193_v63  ;;  %v10164_v5 = vmul.f32 -1.442695, %v14220_v25  ;;  %11632 = vpow2.f32 %v10159_v61 }
 0x370   : > { %v4605_v62 = vmul.f32 %v13956_v53, %v14195_v1  ;;  %6675 = vst.msk [vmem:[#allocation2 + $0xd8] sm:$0xff] %vm4259_vm0, %v16631_v0  ;;  %6676 = vst.msk [vmem:[#allocation2 + $0xe0] sm:$0xff] %vm4259_vm0, %v16631_v0  ;;  %v4606_v33 = vmul.f32 %v13956_v53, %v14203_v55  ;;  %v4906_v56 = vmul.f32 %v14024_v47, %v14195_v1 }
 0x371   : > { %6677 = vst.msk [vmem:[#allocation2 + $0xe8] sm:$0xf] %vm6649_vm1, %v16631_v0  ;;  %v4537_v18 = vadd.f32 %v4505_v48, %v4404_v44  ;;  %v11621_v49 = vpop.eup %11620  ;;  %v4737_v35 = vadd.f32 %v4705_v52, %v4636_v43  ;;  %v4154_v0 = vadd.f32 1.0, %v11615_v6  ;;  %v4907_v43 = vmul.f32 %v14024_v47, %v14203_v55 }
 0x372   : > { %v4637_v34 = vadd.f32 %v4605_v62, %v4536_v39  ;;  %v14231_v11 = vpop.eup %11622  ;;  %v4938_v48 = vadd.f32 %v4906_v56, %v4837_v4  ;;  %v5007_v39 = vmul.f32 %v14052_v57, %v4367_v13  ;;  %v4152_v52 = vadd.f32 1.0, %v11619_v37 }
 0x373   : > { %v4638_v51 = vadd.f32 %v4606_v33, %v4537_v18  ;;  %v11625_v62 = vpop.eup %11624  ;;  %v4838_v26 = vadd.f32 %v4806_v23, %v4737_v35  ;;  %v4249_v33 = vmul.f32 %v11621_v49, %v13850_v40  ;;  %v10162_v23 = vmul.f32 -1.442695, %v14229_v58 }
 0x374   : > { %v14233_v44 = vadd.f32 %v4706_v7, %v4637_v34  ;;  %v11627_v6 = vpop.eup %11626  ;;  %v5039_v45 = vadd.f32 %v5007_v39, %v4937_v19  ;;  %v5040_v59 = vadd.f32 %v5008_v46, %v4938_v48  ;;  %v4247_v56 = vmul.f32 %v11625_v62, %v14009_v38 }
 0x375   : > { %v14239_v31 = vadd.f32 %v4707_v15, %v4638_v51  ;;  %v11629_v34 = vpop.eup %11628  ;;  %v4939_v18 = vadd.f32 %v4907_v43, %v4838_v26  ;;  %v5572_v7 = vadd.f32 %v14172_v54, %v14095_v14  ;;  %v5573_v13 = vsel %vm4259_vm0, %v14130_v9, 0.0  ;;  %4338 = vst.msk [vmem:[#allocation2 + $0x121] sm:$0xff] %vm4259_vm0, %v4249_v33 }
 0x376   : > { %v11631_v35 = vpop.eup %11630  ;;  %v14250_v51 = vsel %vm4259_vm0, %v14164_v22, 0.0  ;;  %11634 = vrcp.f32 %v4154_v0  ;;  %v5239_v40 = vadd.f32 %v14116_v2, %v14175_v12  ;;  %v4405_v38 = vmul.f32 %v13940_v41, %v14047_v29  ;;  %4336 = vst.msk [vmem:[#allocation2 + $0x109] sm:$0xff] %vm4259_vm0, %v4247_v56 }
 0x377   : > { %16695 = vst [vmem:[#allocation50_spill] sm:$0xff] %v14250_v51  ;;  %v5041_v49 = vadd.f32 %v5009_v28, %v4939_v18  ;;  %11636 = vrcp.f32 %v4152_v52  ;;  %v4506_v14 = vmul.f32 %v13944_v8, %v14049_v3  ;;  %v5107_v26 = vmul.f32 %v14119_v30, %v14139_v27  ;;  %v14272_v27 = vld [vmem:[%s12234_s25] ss:$0 sm:$0xff] }
 0x378   : > { %v4157_v54 = vadd.f32 1.0, %v11627_v6  ;;  %11638 = vpow2.f32 %v10164_v5  ;;  %v4406_v0 = vmul.f32 %v13940_v41, %v14068_v60  ;;  %v4155_v2 = vadd.f32 1.0, %v11629_v34  ;;  %16697 = vst [vmem:[#allocation45_spill] sm:$0xff] %v14272_v27 }
 0x379   : > { %v4158_v12 = vadd.f32 1.0, %v11631_v35  ;;  %11640 = vpow2.f32 %v10162_v23  ;;  %v5139_v29 = vadd.f32 %v5107_v26, %v14083_v16  ;;  %v4507_v46 = vmul.f32 %v13944_v8, %v14070_v50  ;;  %v11633_v6 = vpop.eup %11632 }
 0x37a   : > { %v5108_v15 = vmul.f32 %v14119_v30, %v14193_v63  ;;  %11642 = vrcp.f32 %v4157_v54  ;;  %v14269_v19 = vadd.f32 %v5573_v13, %v5572_v7  ;;  %v14275_v5 = vmul.f32 %v14272_v27, %v5239_v40  ;;  %v16700_v13 = vld [vmem:[#allocation63_spill] sm:$0xff]  ;;  %v16702_v54 = vld [vmem:[#allocation66_spill] sm:$0xff] }
 0x37b   : > { %v14279_v60 = vsel %vm4259_vm0, %v14168_v24, 0.0  ;;  %11644 = vrcp.f32 %v4155_v2  ;;  %v5109_v16 = vmul.f32 %v14119_v30, %v14049_v3  ;;  %v5208_v63 = vmul.f32 %v14112_v10, %v14195_v1 }
 0x37c   : > { %16696 = vst [vmem:[#allocation60_spill] sm:$0xff] %v14269_v19  ;;  %16698 = vst [vmem:[#allocation51_spill] sm:$0xff] %v14279_v60  ;;  %v5140_v4 = vadd.f32 %v5108_v15, %v5039_v45  ;;  %11646 = vrcp.f32 %v4158_v12  ;;  %v4538_v28 = vadd.f32 %v4506_v14, %v4405_v38  ;;  %v4607_v61 = vmul.f32 %v13956_v53, %v14056_v42  ;;  %v16701_v38 = vld [vmem:[#allocation48_spill] sm:$0xff] }
 0x37d   : > { %v4608_v37 = vmul.f32 %v13956_v53, %v14072_v20  ;;  %v4807_v48 = vmul.f32 %v14004_v21, %v14049_v3  ;;  %v5442_v39 = vadd.f32 1.0, %v14187_v17  ;;  %v4539_v62 = vadd.f32 %v4507_v46, %v4406_v0  ;;  %v16703_v46 = vld [vmem:[#allocation69_spill] sm:$0xff] }
 0x37e   : > { %v5209_v43 = vmul.f32 %v14112_v10, %v14203_v55  ;;  %v5240_v52 = vadd.f32 %v5208_v63, %v5139_v29  ;;  %v5443_v1 = vadd.f32 1.0, %v14209_v32  ;;  %v4908_v45 = vmul.f32 %v14024_v47, %v14056_v42  ;;  %v16699_v55 = vld [vmem:[#allocation71_spill] sm:$0xff] }
 0x37f   : > { %v14299_v33 = vmul.f32 %v14024_v47, %v14072_v20  ;;  %v5110_v3 = vmul.f32 %v14119_v30, %v14070_v50  ;;  %v5444_v17 = vadd.f32 1.0, %v14231_v11  ;;  %v5141_v18 = vadd.f32 %v5109_v16, %v5040_v59 }
 0x380   : > { %v11635_v34 = vpop.eup %11634  ;;  %v5241_v56 = vadd.f32 %v5209_v43, %v5140_v4  ;;  %v3995_v23 = vmul.f32 %v16699_v55, %v14150_v36  ;;  %v5210_v32 = vmul.f32 %v14112_v10, %v14056_v42  ;;  %v3993_v14 = vmul.f32 %v16699_v55, %v16701_v38  ;;  %v16704_v4 = vld [vmem:[#allocation78_spill] sm:$0xff]  ;;  %v16714_v38 = vld [vmem:[#allocation72_spill] sm:$0xff] }
 0x381   : > { %v11637_v35 = vpop.eup %11636  ;;  %v5142_v7 = vadd.f32 %v5110_v3, %v5041_v49  ;;  %v4250_v40 = vmul.f32 %v11635_v34, %v16700_v13  ;;  %11648 = vrcp.f32 %v5442_v39  ;;  %v5211_v11 = vmul.f32 %v14112_v10, %v14072_v20  ;;  %v4370_v13 = vld [vmem:[#allocation2 + $0x108] sm:$0xff] }
 0x382   : > { %v11639_v26 = vpop.eup %11638  ;;  %v5279_v59 = vmul.f32 %v14272_v27, %v5240_v52  ;;  %v4248_v0 = vmul.f32 %v11637_v35, %v16702_v54  ;;  %11650 = vrcp.f32 %v5443_v1  ;;  %v14315_v2 = vadd.f32 %v4607_v61, %v4538_v28  ;;  %v16707_v52 = vld [vmem:[#allocation79_spill] sm:$0xff] }
 0x383   : > { %v11641_v36 = vpop.eup %11640  ;;  %4339 = vst.msk [vmem:[#allocation2 + $0x129] sm:$0xff] %vm4259_vm0, %v4250_v40  ;;  %v14318_v42 = vadd.f32 %v4608_v37, %v4539_v62  ;;  %v4808_v49 = vmul.f32 %v14004_v21, %v14070_v50  ;;  %11652 = vrcp.f32 %v5444_v17  ;;  %v5242_v29 = vadd.f32 %v5210_v32, %v5141_v18  ;;  %v14332_v50 = vld [vmem:[%s12239_s29] ss:$0 sm:$0xff] }
 0x384   : > { %v11643_v12 = vpop.eup %11642  ;;  %v5280_v20 = vmul.f32 %v14272_v27, %v5241_v56  ;;  %4337 = vst.msk [vmem:[#allocation2 + $0x111] sm:$0xff] %vm4259_vm0, %v4248_v0  ;;  %v14325_v15 = vadd.f32 %v16703_v46, %v3995_v23  ;;  %v4156_v28 = vadd.f32 1.0, %v11633_v6  ;;  %v14329_v61 = vadd.f32 %v16703_v46, %v3993_v14  ;;  %16705 = vst [vmem:[#allocation64_spill] sm:$0xff] %v14332_v50  ;;  %v16708_v6 = vld [vmem:[#allocation68_spill] sm:$0xff]  ;;  %v16709_v56 = vld [vmem:[#allocation67_spill] sm:$0xff] }
 0x385   : > { %v11645_v16 = vpop.eup %11644  ;;  %v4253_v63 = vmul.f32 %v11643_v12, %v16704_v4  ;;  %v5243_v37 = vadd.f32 %v5211_v11, %v5142_v7  ;;  %v14335_v62 = vadd.f32 %v14332_v50, %v5279_v59  ;;  %v4839_v43 = vadd.f32 %v4807_v48, %v14233_v44  ;;  %v16712_v48 = vld [vmem:[#allocation62_spill] sm:$0xff]  ;;  %v4372_v32 = vld [vmem:[#allocation2 + $0x120] sm:$0xff] }
 0x386   : > { %v11647_v39 = vpop.eup %11646  ;;  %v4251_v1 = vmul.f32 %v11645_v16, %v16707_v52  ;;  %v4161_v3 = vadd.f32 1.0, %v11639_v26  ;;  %v4840_v34 = vadd.f32 %v4808_v49, %v14239_v31  ;;  %v4159_v18 = vadd.f32 1.0, %v11641_v36  ;;  %v4473_v7 = vld [vmem:[#allocation2 + $0x121] sm:$0xff]  ;;  %v4471_v59 = vld [vmem:[#allocation2 + $0x109] sm:$0xff] }
 0x387   : > { %16706 = vst [vmem:[#allocation61_spill] sm:$0xff] %v14335_v62  ;;  %4342 = vst.msk [vmem:[#allocation2 + $0x151] sm:$0xff] %vm4259_vm0, %v4253_v63  ;;  %v4254_v17 = vmul.f32 %v11647_v39, %v16708_v6  ;;  %v14344_v55 = vmul.f32 %v14052_v57, %v16709_v56  ;;  %v14347_v23 = vadd.f32 %v14332_v50, %v5280_v20  ;;  %v10165_v44 = vmul.f32 -1.442695, %v14325_v15  ;;  %v16716_v49 = vld [vmem:[#allocation73_spill] sm:$0xff]  ;;  %v16719_v4 = vld [vmem:[#allocation74_spill] sm:$0xff] }
 0x388   : > { %4340 = vst.msk [vmem:[#allocation2 + $0x139] sm:$0xff] %vm4259_vm0, %v4251_v1  ;;  %v14353_v35 = vmul.f32 %v14052_v57, %v16712_v48  ;;  %v5281_v31 = vmul.f32 %v14272_v27, %v5242_v29  ;;  %11654 = vrcp.f32 %v4156_v28  ;;  %v10163_v40 = vmul.f32 -1.442695, %v14329_v61 }
 0x389   : > { %16710 = vst [vmem:[#allocation76_spill] sm:$0xff] %v14344_v55  ;;  %16711 = vst [vmem:[#allocation71_spill] sm:$0xff] %v14347_v23  ;;  %v14360_v14 = vmul.f32 %v14119_v30, %v16714_v38  ;;  %v5282_v26 = vmul.f32 %v14272_v27, %v5243_v37  ;;  %v10191_v11 = vmul.f32 -1.442695, %v14335_v62  ;;  %v4940_v54 = vadd.f32 %v4908_v45, %v4839_v43  ;;  %v16723_v43 = vld [vmem:[#allocation53_spill] sm:$0xff] }
 0x38a   : > { %16713 = vst [vmem:[#allocation63_spill] sm:$0xff] %v14353_v35  ;;  %4343 = vst.msk [vmem:[#allocation2 + $0x159] sm:$0xff] %vm4259_vm0, %v4254_v17  ;;  %v14364_v0 = vld [vmem:[#allocation2 + $0x128] sm:$0xff]  ;;  %11656 = vrcp.f32 %v4161_v3  ;;  %v14370_v12 = vmul.f32 %v14119_v30, %v16716_v49  ;;  %v16718_v46 = vmov 0.0   ;;  %v14381_v45 = vadd.f32 %v14299_v33, %v4840_v34 }
 0x38b   : > { %16715 = vst [vmem:[#allocation48_spill] sm:$0xff] %v14360_v14  ;;  %v14366_v36 = vld [vmem:[#allocation2 + $0x122] sm:$0xff]  ;;  %v14374_v20 = vld [vmem:[#allocation2 + $0x12a] sm:$0xff]  ;;  %11658 = vrcp.f32 %v4159_v18  ;;  %v14385_v63 = vmul.f32 %v14112_v10, %v16719_v4  ;;  %v14389_v28 = vadd.f32 %v14332_v50, %v14275_v5  ;;  %v14391_v37 = vpop.eup %11648  ;;  %v10192_v39 = vmul.f32 -1.442695, %v14347_v23  ;;  %v14403_v3 = vld [vmem:[#allocation2 + $0x112] sm:$0xff] }
 0x38c   : > { %16717 = vst [vmem:[#allocation66_spill] sm:$0xff] %v14370_v12  ;;  %v14372_v29 = vld [vmem:[#allocation2 + $0x129] sm:$0xff]  ;;  %6684 = vst.msk [vmem:[#allocation2 + $0x120] sm:$0xff] %vm4259_vm0, %v16718_v46  ;;  %v4708_v52 = vmul.f32 %v16723_v43, %v4370_v13  ;;  %v14399_v33 = vld [vmem:[#allocation2 + $0x111] sm:$0xff]  ;;  %11660 = vpow2.f32 %v10165_v44  ;;  %v14406_v5 = vadd.f32 %v14332_v50, %v5281_v31  ;;  %v14408_v34 = vpop.eup %11650  ;;  %v4407_v6 = vmul.f32 %v13940_v41, %v4370_v13 }
 0x38d   : > { %v14378_v16 = vld [vmem:[#allocation2 + $0x110] sm:$0xff]  ;;  %16720 = vst [vmem:[#allocation69_spill] sm:$0xff] %v14385_v63  ;;  %16721 = vst [vmem:[#allocation78_spill] sm:$0xff] %v14389_v28  ;;  %v4508_v17 = vmul.f32 %v13944_v8, %v4471_v59  ;;  %11662 = vpow2.f32 %v10163_v40  ;;  %v14419_v18 = vadd.f32 %v14332_v50, %v5282_v26  ;;  %v14421_v56 = vpop.eup %11652  ;;  %v4409_v44 = vmul.f32 %v13940_v41, %v4372_v32 }
 0x38e   : > { %16722 = vst [vmem:[#allocation79_spill] sm:$0xff] %v14391_v37  ;;  %6686 = vst.msk [vmem:[#allocation2 + $0x130] sm:$0xf] %vm6649_vm1, %v16718_v46  ;;  %v14401_v1 = vld [vmem:[#allocation2 + $0x10a] sm:$0xff]  ;;  %11664 = vpow2.f32 %v10191_v11  ;;  %v4510_v48 = vmul.f32 %v13944_v8, %v4473_v7  ;;  %v5010_v31 = vmul.f32 %v14052_v57, %v4370_v13  ;;  %v4710_v38 = vmul.f32 %v16723_v43, %v4372_v32 }
 0x38f   : > { %6685 = vst.msk [vmem:[#allocation2 + $0x128] sm:$0xff] %vm4259_vm0, %v16718_v46  ;;  %16724 = vst [vmem:[#allocation68_spill] sm:$0xff] %v14406_v5  ;;  %v14428_v49 = vmul.f32 %v14004_v21, %v4473_v7  ;;  %v14431_v4 = vmul.f32 %v14052_v57, %v4372_v32  ;;  %v10190_v40 = vmul.f32 -1.442695, %v14389_v28  ;;  %v14435_v26 = vmul.f32 %v14119_v30, %v4473_v7  ;;  %v14438_v22 = vld [vmem:[#allocation2 + $0x150] sm:$0xff] }
 0x390   : > { %16725 = vst [vmem:[#allocation67_spill] sm:$0xff] %v14408_v34  ;;  %6683 = vst.msk [vmem:[#allocation2 + $0x118] sm:$0xf] %vm6649_vm1, %v16718_v46  ;;  %v4740_v11 = vadd.f32 %v4708_v52, %v14315_v2  ;;  %v5042_v24 = vadd.f32 %v5010_v31, %v4940_v54  ;;  %v14440_v9 = vld [vmem:[#allocation2 + $0x151] sm:$0xff]  ;;  %v10193_v23 = vmul.f32 -1.442695, %v14406_v5  ;;  %11666 = vpow2.f32 %v10192_v39 }
 0x391   : > { %6681 = vst.msk [vmem:[#allocation2 + $0x108] sm:$0xff] %vm4259_vm0, %v16718_v46  ;;  %6682 = vst.msk [vmem:[#allocation2 + $0x110] sm:$0xff] %vm4259_vm0, %v16718_v46  ;;  %v14442_v13 = vld [vmem:[#allocation2 + $0x152] sm:$0xff]  ;;  %v4540_v62 = vadd.f32 %v4508_v17, %v4407_v6  ;;  %v4609_v32 = vmul.f32 %v13956_v53, %v14401_v1  ;;  %v10194_v2 = vmul.f32 -1.442695, %v14419_v18  ;;  %v4809_v54 = vmul.f32 %v14004_v21, %v4471_v59 }
 0x392   : > { %16726 = vst [vmem:[#allocation62_spill] sm:$0xff] %v14419_v18  ;;  %16727 = vst [vmem:[#allocation72_spill] sm:$0xff] %v14421_v56  ;;  %v14447_v28 = vld [vmem:[#allocation2 + $0x158] sm:$0xff]  ;;  %v5111_v52 = vmul.f32 %v14119_v30, %v4471_v59  ;;  %v4410_v39 = vmul.f32 %v13940_v41, %v14364_v0  ;;  %v4511_v6 = vmul.f32 %v13944_v8, %v14372_v29  ;;  %v11655_v17 = vpop.eup %11654  ;;  %11668 = vpow2.f32 %v10190_v40 }
 0x393   : > { %v14449_v7 = vld [vmem:[#allocation2 + $0x159] sm:$0xff]  ;;  %6690 = vst.msk [vmem:[#allocation2 + $0x150] sm:$0xff] %vm4259_vm0, %v16718_v46  ;;  %v14466_v31 = vadd.f32 %v4510_v48, %v4409_v44  ;;  %v4408_v18 = vmul.f32 %v13940_v41, %v14378_v16  ;;  %v4509_v59 = vmul.f32 %v13944_v8, %v14399_v33  ;;  %v4841_v34 = vadd.f32 %v4809_v54, %v4740_v11 }
 0x394   : > { %v14451_v56 = vld [vmem:[#allocation2 + $0x15a] sm:$0xff]  ;;  %v11657_v5 = vpop.eup %11656  ;;  %v5143_v60 = vadd.f32 %v5111_v52, %v5042_v24  ;;  %v4709_v63 = vmul.f32 %v16723_v43, %v14378_v16  ;;  %11670 = vpow2.f32 %v10193_v23  ;;  %v4611_v12 = vmul.f32 %v13956_v53, %v14366_v36 }
 0x395   : > { %6692 = vst.msk [vmem:[#allocation2 + $0x160] sm:$0xf] %vm6649_vm1, %v16718_v46  ;;  %v11659_v37 = vpop.eup %11658  ;;  %v14478_v44 = vmul.f32 %v13956_v53, %v14374_v20  ;;  %v4641_v48 = vadd.f32 %v4609_v32, %v4540_v62  ;;  %11672 = vpow2.f32 %v10194_v2  ;;  %v14480_v19 = vadd.f32 %v4511_v6, %v4410_v39 }
 0x396   : > { %6691 = vst.msk [vmem:[#allocation2 + $0x158] sm:$0xff] %vm4259_vm0, %v16718_v46  ;;  %v11661_v51 = vpop.eup %11660  ;;  %v4711_v24 = vmul.f32 %v16723_v43, %v14364_v0  ;;  %v14486_v40 = vmul.f32 %v14004_v21, %v14372_v29  ;;  %v4912_v23 = vmul.f32 %v14024_v47, %v14366_v36  ;;  %v14492_v54 = vmul.f32 %v14024_v47, %v14374_v20 }
 0x397   : > { %v11663_v11 = vpop.eup %11662  ;;  %v14496_v62 = vmul.f32 %v14052_v57, %v14364_v0  ;;  %v4541_v32 = vadd.f32 %v4509_v59, %v4408_v18  ;;  %v5011_v2 = vmul.f32 %v14052_v57, %v14378_v16  ;;  %v14504_v39 = vmul.f32 %v14119_v30, %v14372_v29  ;;  %v16730_v59 = vld [vmem:[#allocation58_spill] sm:$0xff] }
 0x398   : > { %v14500_v52 = vpop.eup %11664  ;;  %v4610_v6 = vmul.f32 %v13956_v53, %v14403_v3  ;;  %v4741_v14 = vadd.f32 %v4709_v63, %v14318_v42  ;;  %v4810_v35 = vmul.f32 %v14004_v21, %v14399_v33  ;;  %v4742_v0 = vadd.f32 %v4710_v38, %v4641_v48 }
 0x399   : > { %16728 = vst [vmem:[#allocation73_spill] sm:$0xff] %v14500_v52  ;;  %16729 = vst [vmem:[#allocation74_spill] sm:$0xff] %v14504_v39  ;;  %v4910_v18 = vmul.f32 %v14024_v47, %v14401_v1  ;;  %v5043_v16 = vadd.f32 %v5011_v2, %v14381_v45  ;;  %v4252_v52 = vmul.f32 %v11655_v17, %v16730_v59  ;;  %v4162_v50 = vadd.f32 1.0, %v11661_v51  ;;  %v4374_v45 = vld [vmem:[#allocation2 + $0x138] sm:$0xff] }
 0x39a   : > { %v4257_v55 = vmul.f32 %v11657_v5, %v14220_v25  ;;  %v4255_v29 = vmul.f32 %v11659_v37, %v14229_v58  ;;  %v4160_v27 = vadd.f32 1.0, %v11663_v11  ;;  %v14517_v39 = vpop.eup %11666  ;;  %v14521_v42 = vmul.f32 %v14112_v10, %v14366_v36  ;;  %v4475_v2 = vld [vmem:[#allocation2 + $0x139] sm:$0xff] }
 0x39b   : > { %v4642_v63 = vadd.f32 %v4610_v6, %v4541_v32  ;;  %v4942_v38 = vadd.f32 %v4910_v18, %v4841_v34  ;;  %v5112_v48 = vmul.f32 %v14119_v30, %v14399_v33  ;;  %4341 = vst.msk [vmem:[#allocation2 + $0x141] sm:$0xff] %vm4259_vm0, %v4252_v52  ;;  %v14528_v58 = vmul.f32 %v14112_v10, %v14374_v20 }
 0x39c   : > { %v4842_v25 = vadd.f32 %v4810_v35, %v4741_v14  ;;  %v4911_v51 = vmul.f32 %v14024_v47, %v14403_v3  ;;  %4346 = vst.msk [vmem:[#allocation2 + $0x181] sm:$0xff] %vm4259_vm0, %v4257_v55  ;;  %4344 = vst.msk [vmem:[#allocation2 + $0x169] sm:$0xff] %vm4259_vm0, %v4255_v29  ;;  %11674 = vrcp.f32 %v4162_v50  ;;  %v14534_v36 = vpop.eup %11668  ;;  %v5212_v33 = vmul.f32 %v14112_v10, %v14401_v1 }
 0x39d   : > { %v5144_v37 = vadd.f32 %v5112_v48, %v5043_v16  ;;  %v4843_v5 = vadd.f32 %v14428_v49, %v4742_v0  ;;  %11676 = vrcp.f32 %v4160_v27  ;;  %v4413_v35 = vmul.f32 %v13940_v41, %v14438_v22 }
 0x39e   : > { %v14539_v20 = vpop.eup %11670  ;;  %v4514_v55 = vmul.f32 %v13944_v8, %v14440_v9  ;;  %v4411_v14 = vmul.f32 %v13940_v41, %v4374_v45  ;;  %v4512_v50 = vmul.f32 %v13944_v8, %v4475_v2  ;;  %v4743_v17 = vadd.f32 %v4711_v24, %v4642_v63 }
 0x39f   : > { %v14547_v34 = vpop.eup %11672  ;;  %v14550_v1 = vadd.f32 %v14431_v4, %v4942_v38  ;;  %v5213_v27 = vmul.f32 %v14112_v10, %v14403_v3  ;;  %v14554_v49 = vadd.f32 %v5212_v33, %v5143_v60  ;;  %v4943_v11 = vadd.f32 %v4911_v51, %v4842_v25 }
 0x3a0   : > { %16731 = vst [vmem:[#allocation53_spill] sm:$0xff] %v14547_v34  ;;  %v4714_v32 = vmul.f32 %v16723_v43, %v14438_v22  ;;  %v14560_v52 = vmul.f32 %v14052_v57, %v14438_v22  ;;  %v4712_v6 = vmul.f32 %v16723_v43, %v4374_v45  ;;  %v4643_v4 = vadd.f32 %v4611_v12, %v14466_v31 }
 0x3a1   : > { %v14563_v0 = vadd.f32 %v5213_v27, %v5144_v37  ;;  %v4944_v24 = vadd.f32 %v4912_v23, %v4843_v5  ;;  %v5014_v18 = vmul.f32 %v14052_v57, %v4374_v45  ;;  %v4544_v3 = vadd.f32 %v4512_v50, %v4411_v14 }
 0x3a2   : > { %v4414_v60 = vmul.f32 %v13940_v41, %v14447_v28  ;;  %v14569_v16 = vld [vmem:[#allocation2 + $0x140] sm:$0xff]  ;;  %v4515_v22 = vmul.f32 %v13944_v8, %v14449_v7  ;;  %v4546_v63 = vadd.f32 %v4514_v55, %v4413_v35  ;;  %v4615_v48 = vmul.f32 %v13956_v53, %v14442_v13 }
 0x3a3   : > { %v14571_v59 = vld [vmem:[#allocation2 + $0x141] sm:$0xff]  ;;  %v4412_v12 = vmul.f32 %v13940_v41, %v14569_v16  ;;  %v4744_v45 = vadd.f32 %v4712_v6, %v4643_v4  ;;  %v4813_v25 = vmul.f32 %v14004_v21, %v4475_v2  ;;  %v5115_v51 = vmul.f32 %v14119_v30, %v4475_v2 }
 0x3a4   : > { %v14573_v29 = vld [vmem:[#allocation2 + $0x13a] sm:$0xff]  ;;  %v4513_v31 = vmul.f32 %v13944_v8, %v14571_v59  ;;  %v14581_v23 = vld [vmem:[#allocation2 + $0x142] sm:$0xff]  ;;  %v4715_v41 = vmul.f32 %v16723_v43, %v14447_v28  ;;  %v5046_v8 = vadd.f32 %v5014_v18, %v4944_v24  ;;  %v4644_v37 = vadd.f32 %v14478_v44, %v14480_v19 }
 0x3a5   : > { %v4613_v38 = vmul.f32 %v13956_v53, %v14573_v29  ;;  %6687 = vst.msk [vmem:[#allocation2 + $0x138] sm:$0xff] %vm4259_vm0, %v16718_v46  ;;  %6688 = vst.msk [vmem:[#allocation2 + $0x140] sm:$0xff] %vm4259_vm0, %v16718_v46  ;;  %v4713_v33 = vmul.f32 %v16723_v43, %v14569_v16  ;;  %v4616_v5 = vmul.f32 %v13956_v53, %v14451_v56  ;;  %v14603_v35 = vld [vmem:[#allocation2 + $0x168] sm:$0xff] }
 0x3a6   : > { %6689 = vst.msk [vmem:[#allocation2 + $0x148] sm:$0xf] %vm6649_vm1, %v16718_v46  ;;  %v11675_v2 = vpop.eup %11674  ;;  %v4547_v55 = vadd.f32 %v4515_v22, %v4414_v60  ;;  %v4815_v50 = vmul.f32 %v14004_v21, %v14440_v9  ;;  %v4844_v27 = vadd.f32 %v14486_v40, %v4743_v17  ;;  %v4545_v4 = vadd.f32 %v4513_v31, %v4412_v12  ;;  %v14622_v17 = vld [vmem:[#allocation2 + $0x169] sm:$0xff] }
 0x3a7   : > { %v4645_v14 = vadd.f32 %v4613_v38, %v4544_v3  ;;  %v11677_v6 = vpop.eup %11676  ;;  %v4258_v19 = vmul.f32 %v11675_v2, %v14325_v15  ;;  %v4647_v44 = vadd.f32 %v4615_v48, %v4546_v63  ;;  %v14611_v24 = vmul.f32 %v14004_v21, %v14449_v7  ;;  %v4681_v2 = vld [vmem:[#allocation2 + $0x180] sm:$0xff] }
 0x3a8   : > { %v4256_v18 = vmul.f32 %v11677_v6, %v14329_v61  ;;  %v4845_v34 = vadd.f32 %v4813_v25, %v4744_v45  ;;  %v4916_v3 = vmul.f32 %v14024_v47, %v14442_v13  ;;  %v14618_v60 = vmul.f32 %v14024_v47, %v14451_v56  ;;  %v16732_v6 = vld [vmem:[#allocation74_spill] sm:$0xff] }
 0x3a9   : > { %v4614_v40 = vmul.f32 %v13956_v53, %v14581_v23  ;;  %v4745_v15 = vadd.f32 %v4713_v33, %v4644_v37  ;;  %4347 = vst.msk [vmem:[#allocation2 + $0x189] sm:$0xff] %vm4259_vm0, %v4258_v19  ;;  %v4716_v61 = vmul.f32 %v16723_v43, %v14603_v35  ;;  %v14629_v22 = vmul.f32 %v14052_v57, %v14447_v28  ;;  %v12006_v37 = vld [vmem:[%s12229_s21 + $0x1] ss:$0 sm:$0xff] }
 0x3aa   : > { %4345 = vst.msk [vmem:[#allocation2 + $0x171] sm:$0xff] %vm4259_vm0, %v4256_v18  ;;  %v14632_v63 = vadd.f32 %v4616_v5, %v4547_v55  ;;  %v4746_v12 = vadd.f32 %v4714_v32, %v4645_v14  ;;  %v4945_v53 = vadd.f32 %v14492_v54, %v4844_v27  ;;  %v5045_v31 = vadd.f32 %v14496_v62, %v4943_v11  ;;  %v12005_v32 = vld [vmem:[%s12229_s21] ss:$0 sm:$0xff]  ;;  %v4782_v55 = vld [vmem:[#allocation2 + $0x181] sm:$0xff] }
 0x3ab   : > { %v4646_v38 = vadd.f32 %v4614_v40, %v4545_v4  ;;  %v4814_v48 = vmul.f32 %v14004_v21, %v14571_v59  ;;  %v14640_v45 = vmul.f32 %v14119_v30, %v14440_v9  ;;  %v14644_v28 = vmul.f32 %v14119_v30, %v14449_v7 }
 0x3ac   : > { %v4914_v25 = vmul.f32 %v14024_v47, %v14573_v29  ;;  %v4415_v54 = vmul.f32 %v12005_v32, %v14603_v35  ;;  %v4516_v62 = vmul.f32 %v12006_v37, %v14622_v17  ;;  %v5145_v11 = vadd.f32 %v14435_v26, %v14550_v1 }
 0x3ad   : > { %v4748_v33 = vadd.f32 %v4716_v61, %v4647_v44  ;;  %v4846_v5 = vadd.f32 %v4814_v48, %v4745_v15  ;;  %v14654_v9 = vadd.f32 %v5115_v51, %v5046_v8  ;;  %v14658_v7 = vmul.f32 %v14112_v10, %v14442_v13  ;;  %v16733_v13 = vld [vmem:[#allocation45_spill] sm:$0xff] }
 0x3ae   : > { %v4847_v14 = vadd.f32 %v4815_v50, %v4746_v12  ;;  %v4946_v27 = vadd.f32 %v4914_v25, %v4845_v34  ;;  %v5146_v4 = vadd.f32 %v16732_v6, %v5045_v31  ;;  %v14663_v19 = vmul.f32 %v14112_v10, %v14451_v56 }
 0x3af   : > { %v4747_v18 = vadd.f32 %v4715_v41, %v4646_v38  ;;  %v4817_v26 = vmul.f32 %v14004_v21, %v14622_v17  ;;  %v4915_v1 = vmul.f32 %v14024_v47, %v14581_v23  ;;  %v14671_v51 = vmul.f32 %v16733_v13, %v14554_v49 }
 0x3b0   : > { %v5015_v34 = vmul.f32 %v14052_v57, %v14569_v16  ;;  %v4548_v8 = vadd.f32 %v4516_v62, %v4415_v54  ;;  %v14675_v50 = vld [vmem:[#allocation2 + $0x188] sm:$0xff]  ;;  %v5246_v41 = vadd.f32 %v14521_v42, %v5145_v11  ;;  %v14682_v44 = vmul.f32 %v16733_v13, %v14563_v0  ;;  %v12007_v0 = vld [vmem:[%s12229_s21 + $0x2] ss:$0 sm:$0xff] }
 0x3b1   : > { %v14677_v56 = vld [vmem:[#allocation2 + $0x182] sm:$0xff]  ;;  %v14684_v47 = vld [vmem:[#allocation2 + $0x171] sm:$0xff]  ;;  %v4718_v16 = vmul.f32 %v16723_v43, %v4681_v2  ;;  %v4819_v15 = vmul.f32 %v14004_v21, %v4782_v55  ;;  %v4849_v61 = vadd.f32 %v4817_v26, %v4748_v33  ;;  %v4947_v12 = vadd.f32 %v4915_v1, %v4846_v5 }
 0x3b2   : > { %v14686_v40 = vld [vmem:[#allocation2 + $0x16a] sm:$0xff]  ;;  %v14688_v49 = vld [vmem:[#allocation2 + $0x172] sm:$0xff]  ;;  %6696 = vst.msk [vmem:[#allocation2 + $0x180] sm:$0xff] %vm4259_vm0, %v16718_v46  ;;  %v4517_v31 = vmul.f32 %v12006_v37, %v14684_v47  ;;  %v4948_v54 = vadd.f32 %v4916_v3, %v4847_v14  ;;  %v5048_v62 = vadd.f32 %v14560_v52, %v4946_v27  ;;  %v4848_v37 = vadd.f32 %v14611_v24, %v4747_v18  ;;  %v12008_v1 = vld [vmem:[%s12229_s21 + $0x4] ss:$0 sm:$0xff] }
 0x3b3   : > { %v4379_v42 = vld [vmem:[#allocation2 + $0x170] sm:$0xff]  ;;  %v4617_v38 = vmul.f32 %v12007_v0, %v14686_v40  ;;  %6695 = vst.msk [vmem:[#allocation2 + $0x178] sm:$0xf] %vm6649_vm1, %v16718_v46  ;;  %v5018_v33 = vmul.f32 %v14052_v57, %v14603_v35  ;;  %v5020_v3 = vmul.f32 %v14052_v57, %v4681_v2  ;;  %v5116_v24 = vmul.f32 %v14119_v30, %v14571_v59 }
 0x3b4   : > { %v14697_v48 = vld [vmem:[#allocation2 + $0x189] sm:$0xff]  ;;  %6693 = vst.msk [vmem:[#allocation2 + $0x168] sm:$0xff] %vm4259_vm0, %v16718_v46  ;;  %v4416_v21 = vmul.f32 %v12005_v32, %v4379_v42  ;;  %v4717_v11 = vmul.f32 %v16723_v43, %v4379_v42  ;;  %6694 = vst.msk [vmem:[#allocation2 + $0x170] sm:$0xff] %vm4259_vm0, %v16718_v46  ;;  %v5047_v32 = vadd.f32 %v5015_v34, %v4945_v53 }
 0x3b5   : > { %v14699_v25 = vld [vmem:[#allocation2 + $0x18a] sm:$0xff]  ;;  %v4649_v52 = vadd.f32 %v4617_v38, %v4548_v8  ;;  %v4618_v35 = vmul.f32 %v12007_v0, %v14688_v49  ;;  %v5119_v27 = vmul.f32 %v14119_v30, %v14622_v17  ;;  %v5049_v6 = vadd.f32 %v14629_v22, %v4947_v12 }
 0x3b6   : > { %6698 = vst.msk [vmem:[#allocation2 + $0x190] sm:$0xf] %vm6649_vm1, %v16718_v46  ;;  %v4549_v5 = vadd.f32 %v4517_v31, %v4416_v21  ;;  %v4749_v14 = vadd.f32 %v4717_v11, %v14632_v63  ;;  %v5050_v18 = vadd.f32 %v5018_v33, %v4948_v54  ;;  %v5121_v26 = vmul.f32 %v14119_v30, %v4782_v55  ;;  %v12009_v55 = vld [vmem:[%s12229_s21 + $0x5] ss:$0 sm:$0xff] }
 0x3b7   : > { %6697 = vst.msk [vmem:[#allocation2 + $0x188] sm:$0xff] %vm4259_vm0, %v16718_v46  ;;  %v5149_v2 = vadd.f32 %v14640_v45, %v5048_v62  ;;  %v4818_v59 = vmul.f32 %v12008_v1, %v14684_v47  ;;  %v4949_v34 = vadd.f32 %v14618_v60, %v4848_v37  ;;  %v5216_v63 = vmul.f32 %v14112_v10, %v14573_v29 }
 0x3b8   : > { %v4650_v53 = vadd.f32 %v4618_v35, %v4549_v5  ;;  %v4719_v8 = vmul.f32 %v16723_v43, %v14675_v50  ;;  %v4750_v17 = vadd.f32 %v4718_v16, %v4649_v52  ;;  %v5148_v31 = vadd.f32 %v5116_v24, %v5047_v32  ;;  %v16734_v52 = vld [vmem:[#allocation64_spill] sm:$0xff] }
 0x3b9   : > { %v5247_v22 = vadd.f32 %v14528_v58, %v5146_v4  ;;  %v4850_v12 = vadd.f32 %v4818_v59, %v4749_v14  ;;  %v4918_v45 = vmul.f32 %v12009_v55, %v14686_v40  ;;  %v5217_v0 = vmul.f32 %v14112_v10, %v14581_v23  ;;  %v16735_v59 = vld [vmem:[#allocation76_spill] sm:$0xff] }
 0x3ba   : > { %v5248_v38 = vadd.f32 %v5216_v63, %v14654_v9  ;;  %v4751_v60 = vadd.f32 %v4719_v8, %v4650_v53  ;;  %v5150_v54 = vadd.f32 %v14644_v28, %v5049_v6  ;;  %v5151_v29 = vadd.f32 %v5119_v27, %v5050_v18  ;;  %v16736_v8 = vld [vmem:[#allocation73_spill] sm:$0xff] }
 0x3bb   : > { %v5250_v43 = vadd.f32 %v14658_v7, %v5149_v2  ;;  %v4919_v16 = vmul.f32 %v12009_v55, %v14688_v49  ;;  %v4950_v62 = vadd.f32 %v4918_v45, %v4849_v61  ;;  %v5019_v58 = vmul.f32 %v14052_v57, %v4379_v42  ;;  %v12010_v57 = vld [vmem:[%s12229_s21 + $0x6] ss:$0 sm:$0xff] }
 0x3bc   : > { %v5285_v4 = vmul.f32 %v16733_v13, %v5246_v41  ;;  %v4820_v21 = vmul.f32 %v12008_v1, %v14697_v48  ;;  %v4851_v11 = vadd.f32 %v4819_v15, %v4750_v17  ;;  %v5249_v23 = vadd.f32 %v5217_v0, %v5148_v31 }
 0x3bd   : > { %v5286_v9 = vmul.f32 %v16733_v13, %v5247_v22  ;;  %v4951_v37 = vadd.f32 %v4919_v16, %v4850_v12  ;;  %v5051_v33 = vadd.f32 %v5019_v58, %v4949_v34  ;;  %v5287_v28 = vmul.f32 %v16733_v13, %v5248_v38  ;;  %v16737_v12 = vld [vmem:[#allocation63_spill] sm:$0xff]  ;;  %v12011_v38 = vld [vmem:[%s12229_s21 + $0x8] ss:$0 sm:$0xff]  ;;  %v16738_v16 = vld [vmem:[#allocation48_spill] sm:$0xff] }
 0x3be   : > { %v14749_v7 = vadd.f32 %v16734_v52, %v14671_v51  ;;  %v4852_v32 = vadd.f32 %v4820_v21, %v4751_v60  ;;  %v4920_v61 = vmul.f32 %v12009_v55, %v14677_v56  ;;  %v5021_v41 = vmul.f32 %v12010_v57, %v14675_v50  ;;  %v16739_v58 = vld [vmem:[#allocation60_spill] sm:$0xff]  ;;  %v16744_v57 = vld [vmem:[#allocation79_spill] sm:$0xff] }
 0x3bf   : > { %v14756_v15 = vadd.f32 %v16734_v52, %v14682_v44  ;;  %v4921_v42 = vmul.f32 %v12009_v55, %v14699_v25  ;;  %v5052_v24 = vadd.f32 %v5020_v3, %v4950_v62  ;;  %v5120_v5 = vmul.f32 %v14119_v30, %v14684_v47 }
 0x3c0   : > { %v5251_v35 = vadd.f32 %v14663_v19, %v5150_v54  ;;  %v4952_v51 = vadd.f32 %v4920_v61, %v4851_v11  ;;  %v5122_v14 = vmul.f32 %v14119_v30, %v14697_v48  ;;  %v5220_v27 = vmul.f32 %v14112_v10, %v14686_v40  ;;  %v16743_v61 = vld [vmem:[#allocation56_spill] sm:$0xff] }
 0x3c1   : > { %v14767_v50 = vadd.f32 %v16734_v52, %v5285_v4  ;;  %v5053_v44 = vadd.f32 %v5021_v41, %v4951_v37  ;;  %v5152_v6 = vadd.f32 %v5120_v5, %v5051_v33  ;;  %v5221_v3 = vmul.f32 %v14112_v10, %v14688_v49  ;;  %v16740_v4 = vld [vmem:[#allocation50_spill] sm:$0xff] }
 0x3c2   : > { %v10195_v18 = vmul.f32 -1.442695, %v14749_v7  ;;  %v4953_v47 = vadd.f32 %v4921_v42, %v4852_v32  ;;  %v5288_v19 = vmul.f32 %v16733_v13, %v5249_v23  ;;  %v14774_v2 = vadd.f32 %v16734_v52, %v5286_v9  ;;  %v16742_v37 = vld [vmem:[#allocation66_spill] sm:$0xff] }
 0x3c3   : > { %v10196_v30 = vmul.f32 -1.442695, %v14756_v15  ;;  %v5153_v48 = vadd.f32 %v5121_v26, %v5052_v24  ;;  %v5252_v40 = vadd.f32 %v5220_v27, %v5151_v29  ;;  %v5289_v53 = vmul.f32 %v16733_v13, %v5250_v43 }
 0x3c4   : > { %v5290_v1 = vmul.f32 %v16733_v13, %v5251_v35  ;;  %v5054_v34 = vadd.f32 %v16735_v59, %v4952_v51  ;;  %v14781_v49 = vadd.f32 %v16734_v52, %v5287_v28  ;;  %11678 = vpow2.f32 %v10195_v18 }
 0x3c5   : > { %v10197_v63 = vmul.f32 -1.442695, %v14767_v50  ;;  %v5446_v17 = vadd.f32 1.0, %v16736_v8  ;;  %v5154_v31 = vadd.f32 %v5122_v14, %v5053_v44  ;;  %v5222_v26 = vmul.f32 %v14112_v10, %v14677_v56  ;;  %v16746_v14 = vld [vmem:[#allocation51_spill] sm:$0xff] }
 0x3c6   : > { %v5253_v22 = vadd.f32 %v5221_v3, %v5152_v6  ;;  %v5055_v55 = vadd.f32 %v16737_v12, %v4953_v47  ;;  %v14789_v45 = vadd.f32 %v16734_v52, %v5288_v19  ;;  %11680 = vpow2.f32 %v10196_v30  ;;  %v16747_v30 = vld [vmem:[#allocation65_spill] sm:$0xff] }
 0x3c7   : > { %v10198_v0 = vmul.f32 -1.442695, %v14774_v2  ;;  %v5223_v60 = vmul.f32 %v12011_v38, %v14699_v25  ;;  %v5254_v54 = vadd.f32 %v5222_v26, %v5153_v48  ;;  %v5291_v29 = vmul.f32 %v16733_v13, %v5252_v40  ;;  %v16741_v25 = vld [vmem:[#allocation75_spill] sm:$0xff] }
 0x3c8   : > { %v14796_v43 = vadd.f32 %v16734_v52, %v5289_v53  ;;  %v5155_v10 = vadd.f32 %v16738_v16, %v5054_v34  ;;  %v14800_v56 = vadd.f32 %v16734_v52, %v5290_v1  ;;  %11682 = vpow2.f32 %v10197_v63  ;;  %v16748_v48 = vld [vmem:[#allocation67_spill] sm:$0xff]  ;;  %v16749_v1 = vld [vmem:[#allocation53_spill] sm:$0xff] }
 0x3c9   : > { %v10199_v62 = vmul.f32 -1.442695, %v14781_v49  ;;  %v5576_v21 = vadd.f32 %v16740_v4, %v16739_v58  ;;  %v5447_v11 = vadd.f32 1.0, %v14517_v39  ;;  %v5225_v23 = vmul.f32 %v12011_v38, %v16741_v25  ;;  %v16745_v39 = vld [vmem:[#allocation69_spill] sm:$0xff] }
 0x3ca   : > { %v5292_v9 = vmul.f32 %v16733_v13, %v5253_v22  ;;  %v5156_v33 = vadd.f32 %v16742_v37, %v5055_v55  ;;  %v5255_v28 = vadd.f32 %v5223_v60, %v5154_v31  ;;  %11684 = vpow2.f32 %v10198_v0 }
 0x3cb   : > { %v10200_v32 = vmul.f32 -1.442695, %v14789_v45  ;;  %v14812_v41 = vmul.f32 %v16744_v57, %v16743_v61  ;;  %11686 = vrcp.f32 %v5446_v17  ;;  %v5293_v42 = vmul.f32 %v16733_v13, %v5254_v54  ;;  %v16752_v57 = vld [vmem:[#allocation61_spill] sm:$0xff] }
 0x3cc   : > { %v10201_v24 = vmul.f32 -1.442695, %v14796_v43  ;;  %v5256_v5 = vadd.f32 %v16745_v39, %v5155_v10  ;;  %v14818_v35 = vadd.f32 %v16734_v52, %v5291_v29  ;;  %11688 = vpow2.f32 %v10199_v62  ;;  %v16751_v29 = vld [vmem:[#allocation72_spill] sm:$0xff] }
 0x3cd   : > { %v10202_v51 = vmul.f32 -1.442695, %v14800_v56  ;;  %v5578_v27 = vadd.f32 %v16746_v14, %v5576_v21  ;;  %11690 = vrcp.f32 %v5447_v11  ;;  %v5445_v44 = vadd.f32 1.0, %v14534_v36  ;;  %v16753_v14 = vld [vmem:[#allocation78_spill] sm:$0xff] }
 0x3ce   : > { %v5448_v6 = vadd.f32 1.0, %v14539_v20  ;;  %v11679_v3 = vpop.eup %11678  ;;  %v5257_v18 = vadd.f32 %v5225_v23, %v5156_v33  ;;  %v5294_v47 = vmul.f32 %v16733_v13, %v5255_v28  ;;  %v14826_v19 = vadd.f32 %v16734_v52, %v5292_v9 }
 0x3cf   : > { %11692 = vpow2.f32 %v10200_v32  ;;  %v14830_v40 = vmul.f32 %v16748_v48, %v16747_v30  ;;  %v5579_v53 = vsel %vm4259_vm0, %v14812_v41, 0.0  ;;  %v5449_v36 = vadd.f32 1.0, %v16749_v1  ;;  %v16755_v30 = vld [vmem:[#allocation68_spill] sm:$0xff] }
 0x3d0   : > { %11694 = vpow2.f32 %v10201_v24  ;;  %v11681_v59 = vpop.eup %11680  ;;  %v5295_v20 = vmul.f32 %v16733_v13, %v5256_v5  ;;  %v14837_v34 = vadd.f32 %v16734_v52, %v5293_v42  ;;  %v10203_v63 = vmul.f32 -1.442695, %v14818_v35 }
 0x3d1   : > { %11696 = vpow2.f32 %v10202_v51  ;;  %v5450_v8 = vadd.f32 1.0, %v11679_v3  ;;  %v5296_v31 = vmul.f32 %v16733_v13, %v5257_v18  ;;  %v14842_v26 = vadd.f32 %v16734_v52, %v5294_v47  ;;  %v16750_v13 = vld [vmem:[#allocation77_spill] sm:$0xff] }
 0x3d2   : > { %11698 = vrcp.f32 %v5445_v44  ;;  %v11683_v17 = vpop.eup %11682  ;;  %v10204_v22 = vmul.f32 -1.442695, %v14826_v19  ;;  %v5580_v12 = vadd.f32 %v5579_v53, %v5578_v27  ;;  %v5581_v55 = vsel %vm4259_vm0, %v14830_v40, 0.0  ;;  %v16754_v44 = vld [vmem:[#allocation71_spill] sm:$0xff] }
 0x3d3   : > { %11700 = vrcp.f32 %v5448_v6  ;;  %v5451_v0 = vadd.f32 1.0, %v11681_v59  ;;  %v14848_v60 = vadd.f32 %v16734_v52, %v5295_v20  ;;  %v10205_v54 = vmul.f32 -1.442695, %v14837_v34 }
 0x3d4   : > { %11702 = vrcp.f32 %v5449_v36  ;;  %v11685_v38 = vpop.eup %11684  ;;  %v14853_v16 = vmul.f32 %v16751_v29, %v16750_v13  ;;  %v5452_v62 = vadd.f32 1.0, %v11683_v17  ;;  %v14856_v4 = vadd.f32 %v16734_v52, %v5296_v31 }
 0x3d5   : > { %11704 = vpow2.f32 %v10203_v63  ;;  %v11687_v10 = vpop.eup %11686  ;;  %v10206_v21 = vmul.f32 -1.442695, %v14842_v26  ;;  %v5453_v25 = vadd.f32 1.0, %v11685_v38  ;;  %v5582_v23 = vadd.f32 %v5581_v55, %v5580_v12 }
 0x3d6   : > { %11706 = vrcp.f32 %v5450_v8  ;;  %v11689_v58 = vpop.eup %11688  ;;  %v10207_v37 = vmul.f32 -1.442695, %v14848_v60  ;;  %v5583_v33 = vsel %vm4259_vm0, %v14853_v16, 0.0  ;;  %v10208_v52 = vmul.f32 -1.442695, %v14856_v4  ;;  %v16756_v8 = vld [vmem:[#allocation62_spill] sm:$0xff] }
 0x3d7   : > { %11708 = vpow2.f32 %v10204_v22  ;;  %v11691_v11 = vpop.eup %11690  ;;  %v5454_v32 = vadd.f32 1.0, %v11689_v58  ;;  %v14864_v42 = vmul.f32 %v11687_v10, %v16752_v57  ;;  %v5584_v5 = vadd.f32 %v5583_v33, %v5582_v23 }
 0x3d8   : > { %11710 = vrcp.f32 %v5451_v0  ;;  %v14870_v6 = vmul.f32 %v11691_v11, %v16754_v44 }
 0x3d9   : > { %v11693_v9 = vpop.eup %11692  ;;  %11712 = vpow2.f32 %v10205_v54  ;;  %v5587_v1 = vsel %vm4259_vm0, %v14864_v42, 0.0 }
 0x3da   : > { %v11695_v28 = vpop.eup %11694  ;;  %11714 = vrcp.f32 %v5452_v62  ;;  %v5455_v39 = vadd.f32 1.0, %v11693_v9  ;;  %v5589_v31 = vsel %vm4259_vm0, %v14870_v6, 0.0 }
 0x3db   : > { %v11697_v61 = vpop.eup %11696  ;;  %11716 = vpow2.f32 %v10206_v21  ;;  %v5456_v18 = vadd.f32 1.0, %v11695_v28 }
 0x3dc   : > { %v11699_v24 = vpop.eup %11698  ;;  %11718 = vrcp.f32 %v5453_v25  ;;  %v5457_v59 = vadd.f32 1.0, %v11697_v61 }
 0x3dd   : > { %v11701_v51 = vpop.eup %11700  ;;  %11720 = vpow2.f32 %v10207_v37  ;;  %v14867_v27 = vmul.f32 %v11699_v24, %v16753_v14 }
 0x3de   : > { %v11703_v3 = vpop.eup %11702  ;;  %11722 = vrcp.f32 %v5454_v32  ;;  %v14873_v48 = vmul.f32 %v11701_v51, %v16755_v30 }
 0x3df   : > { %v11705_v47 = vpop.eup %11704  ;;  %11724 = vpow2.f32 %v10208_v52  ;;  %v5585_v53 = vsel %vm4259_vm0, %v14867_v27, 0.0  ;;  %v14880_v17 = vmul.f32 %v11703_v3, %v16756_v8 }
 0x3e0   : > { %v11707_v36 = vpop.eup %11706  ;;  %11726 = vrcp.f32 %v5455_v39  ;;  %v5586_v20 = vadd.f32 %v5585_v53, %v5584_v5  ;;  %v5458_v12 = vadd.f32 1.0, %v11705_v47  ;;  %v5591_v54 = vsel %vm4259_vm0, %v14873_v48, 0.0 }
 0x3e1   : > { %v11709_v63 = vpop.eup %11708  ;;  %11728 = vrcp.f32 %v5456_v18  ;;  %v14885_v38 = vmul.f32 %v11707_v36, %v14749_v7  ;;  %v5593_v21 = vsel %vm4259_vm0, %v14880_v17, 0.0 }
 0x3e2   : > { %v11711_v22 = vpop.eup %11710  ;;  %v5588_v55 = vadd.f32 %v5587_v1, %v5586_v20  ;;  %v5459_v29 = vadd.f32 1.0, %v11709_v63  ;;  %11730 = vrcp.f32 %v5457_v59 }
 0x3e3   : > { %v11713_v0 = vpop.eup %11712  ;;  %v14890_v58 = vmul.f32 %v11711_v22, %v14756_v15  ;;  %11732 = vrcp.f32 %v5458_v12  ;;  %v5595_v37 = vsel %vm4259_vm0, %v14885_v38, 0.0 }
 0x3e4   : > { %v11715_v13 = vpop.eup %11714  ;;  %v5590_v10 = vadd.f32 %v5589_v31, %v5588_v55  ;;  %v5460_v25 = vadd.f32 1.0, %v11713_v0  ;;  %11734 = vrcp.f32 %v5459_v29 }
 0x3e5   : > { %v11717_v62 = vpop.eup %11716  ;;  %v14895_v9 = vmul.f32 %v11715_v13, %v14767_v50  ;;  %v5597_v52 = vsel %vm4259_vm0, %v14890_v58, 0.0 }
 0x3e6   : > { %v11719_v11 = vpop.eup %11718  ;;  %v5592_v23 = vadd.f32 %v5591_v54, %v5590_v10  ;;  %v5461_v28 = vadd.f32 1.0, %v11717_v62  ;;  %11736 = vrcp.f32 %v5460_v25 }
 0x3e7   : > { %v11721_v7 = vpop.eup %11720  ;;  %v14900_v61 = vmul.f32 %v11719_v11, %v14774_v2  ;;  %v5599_v5 = vsel %vm4259_vm0, %v14895_v9, 0.0 }
 0x3e8   : > { %v11723_v33 = vpop.eup %11722  ;;  %v5594_v32 = vadd.f32 %v5593_v21, %v5592_v23  ;;  %v5462_v24 = vadd.f32 1.0, %v11721_v7  ;;  %11738 = vrcp.f32 %v5461_v28 }
 0x3e9   : > { %v11725_v15 = vpop.eup %11724  ;;  %v14905_v50 = vmul.f32 %v11723_v33, %v14781_v49  ;;  %v5601_v3 = vsel %vm4259_vm0, %v14900_v61, 0.0 }
 0x3ea   : > { %v11727_v57 = vpop.eup %11726  ;;  %v5596_v39 = vadd.f32 %v5595_v37, %v5594_v32  ;;  %v5463_v14 = vadd.f32 1.0, %v11725_v15  ;;  %11740 = vrcp.f32 %v5462_v24 }
 0x3eb   : > { %v11729_v51 = vpop.eup %11728  ;;  %v14910_v2 = vmul.f32 %v11727_v57, %v14789_v45  ;;  %v5603_v49 = vsel %vm4259_vm0, %v14905_v50, 0.0 }
 0x3ec   : > { %v5598_v44 = vadd.f32 %v5597_v52, %v5596_v39  ;;  %v11731_v18 = vpop.eup %11730  ;;  %v14915_v30 = vmul.f32 %v11729_v51, %v14796_v43  ;;  %11742 = vrcp.f32 %v5463_v14  ;;  %v5700_v51 = vld [vmem:[%s12254_s14] sm:$0xf] }
 0x3ed   : > { %v11733_v53 = vpop.eup %11732  ;;  %v14920_v36 = vmul.f32 %v11731_v18, %v14800_v56  ;;  %v5605_v45 = vsel %vm4259_vm0, %v14910_v2, 0.0  ;;  %v5708_v14 = vsel %vm5706_vm7, %v5700_v51, 0  ;;  %v16765_v51 = vld [vmem:[#allocation47_spill] sm:$0xff] }
 0x3ee   : > { %v5600_v47 = vadd.f32 %v5599_v5, %v5598_v44  ;;  %v11735_v59 = vpop.eup %11734  ;;  %v14925_v63 = vmul.f32 %v11733_v53, %v14818_v35  ;;  %v5607_v43 = vsel %vm4259_vm0, %v14915_v30, 0.0  ;;  %v5636_v44 = vld [vmem:[%s16757_s8] sm:$0x1] }
 0x3ef   : > { %v14930_v22 = vmul.f32 %v11735_v59, %v14826_v19  ;;  %v5609_v56 = vsel %vm4259_vm0, %v14920_v36, 0.0 }
 0x3f0   : > { %v5602_v1 = vadd.f32 %v5601_v3, %v5600_v47  ;;  %v11737_v8 = vpop.eup %11736  ;;  %v5611_v35 = vsel %vm4259_vm0, %v14925_v63, 0.0 }
 0x3f1   : > { %v14935_v0 = vmul.f32 %v11737_v8, %v14837_v34  ;;  %v5613_v19 = vsel %vm4259_vm0, %v14930_v22, 0.0 }
 0x3f2   : > { %v5604_v20 = vadd.f32 %v5603_v49, %v5602_v1  ;;  %v11739_v12 = vpop.eup %11738 }
 0x3f3   : > { %v14940_v29 = vmul.f32 %v11739_v12, %v14842_v26  ;;  %v5615_v34 = vsel %vm4259_vm0, %v14935_v0, 0.0  ;;  %v11473_v12 = vld [vmem:[%s16758_s12] sm:$0xff]  }
 0x3f4   : > { %v5606_v31 = vadd.f32 %v5605_v45, %v5604_v20  ;;  %v11741_v54 = vpop.eup %11740 }
 0x3f5   : > { %v14945_v21 = vmul.f32 %v11741_v54, %v14848_v60  ;;  %v5617_v23 = vsel %vm4259_vm0, %v14940_v29, 0.0 }
 0x3f6   : > { %v5608_v55 = vadd.f32 %v5607_v43, %v5606_v31  ;;  %v11743_v10 = vpop.eup %11742  ;;  %v11471_v31 = vld [vmem:[%s12264_s24] sm:$0xff]  }
 0x3f7   : > { %v14950_v25 = vmul.f32 %v11743_v10, %v14856_v4  ;;  %v5619_v7 = vsel %vm4259_vm0, %v14945_v21, 0.0 }
 0x3f8   : > { %v5610_v13 = vadd.f32 %v5609_v56, %v5608_v55  ;;  %v11472_v56 = vld [vmem:[%s12264_s24 + $0x8] sm:$0xff]   ;;  %v5701_v55 = vld [vmem:[%s12259_s19] sm:$0x1] }
 0x3f9   : > { %v5621_v60 = vsel %vm4259_vm0, %v14950_v25, 0.0 }
 0x3fa   : > { %v5612_v62 = vadd.f32 %v5611_v35, %v5610_v13 }
 0x3fc   : > { %v5614_v11 = vadd.f32 %v5613_v19, %v5612_v62 }
 0x3fe   : > { %v5616_v26 = vadd.f32 %v5615_v34, %v5614_v11 }
 0x400   : > { %v5618_v37 = vadd.f32 %v5617_v23, %v5616_v26  ;;  %v5756_v23 = vlaneseq }
 0x402   : > { %v5620_v33 = vadd.f32 %v5619_v7, %v5618_v37  ;;  %v5757_v26 = vshrl.u32 %v5756_v23, 7 }
 0x404   : > { %v5622_v28 = vadd.f32 %v5621_v60, %v5620_v33  ;;  %v14968_v7 = vsub.s32 0, %v5757_v26  ;;  %v16760_v33 = vld [vmem:[#allocation59_spill] sm:$0xff] }
 0x406   : > { %v5623_v32 = vrot.slane %v5622_v28, 4  ;;  %16759 = vst [vmem:[#allocation58_spill] sm:$0xff] %v14968_v7 }
 0x408   : > { %v5624_v15 = vadd.f32 %v5623_v32, %v5622_v28  ;;  %v16761_v32 = vld [vmem:[#allocation70_spill] sm:$0xff] }
 0x40a   : > { %v5625_v52 = vrot.slane %v5624_v15, 2 }
 0x40c   : > { %v5626_v4 = vadd.f32 %v5625_v52, %v5624_v15  ;;  %v16762_v52 = vld [vmem:[#allocation54_spill] sm:$0xff] }
 0x40e   : > { %v5627_v57 = vrot.slane %v5626_v4, 1 }
 0x410   : > { %v5628_v24 = vadd.f32 %v5627_v57, %v5626_v4  ;;  %v16763_v57 = vld [vmem:[#allocation46_spill] sm:$0xff] }
 0x412   : > { %v5630_v39 = vmul.f32 0.00390625, %v5628_v24 }
 0x414   : > { %v5631_v5 = vpack.c.bf16 %v5630_v39, %v5630_v39  ;;  %v16764_v39 = vld [vmem:[#allocation55_spill] sm:$0xff] }
 0x416   : > { %10946 = vmatmul.mubr.msk.bf16.vlgmr.msra.gmra.mrb[32].mxu1 %vm4259_vm0, %v5631_v5 }
 0x417   : > { %10951 = vmatprep.mubr.msk.bf16.mxu1 %vm12198_vm6, %v16718_v46  ;;  %10950 = vmatpush3.bf16.msra.mxu1 %v5708_v14 }
 0x418   : > { %10955 = vmatprep.subr.bf16.mxu1 %v11471_v31 }
 0x4e9   : > { %v5686_v3 = vpop.f32.mrb[32].mxu1 }
 0x4ea   : > { %v5687_v18 = vadd.f32 %v5686_v3, %v5636_v44  ;;  %v10947_v47 = vpop.f32.mrb[33].mxu1 }
 0x4eb   : > { %v5689_v49 = vpop.f32.mrb[34].mxu1  ;;  %v16766_v47 = vld [vmem:[#allocation80_spill] sm:$0xff] }
 0x4ec   : > { %v10212_v53 = vmul.f32 -1.442695, %v5687_v18  ;;  %v10948_v1 = vpop.f32.mrb[35].mxu1 }
 0x4ee   : > { %11744 = vpow2.f32 %v10212_v53  ;;  %v16767_v53 = vld [vmem:[#allocation52_spill] sm:$0xff] }
 0x4f8   : > { %v11745_v45 = vpop.eup %11744 }
 0x4f9   : > { %v5695_v59 = vadd.f32 1.0, %v11745_v45  ;;  %v16768_v45 = vld [vmem:[#allocation57_spill] sm:$0xff] }
 0x4fb   : > { %11746 = vrcp.f32 %v5695_v59 }
 0x505   : > { %v11747_v20 = vpop.eup %11746 }
 0x506   : > { %v5698_v43 = vmul.f32 %v11747_v20, %v5687_v18  ;;  %v16769_v20 = vld [vmem:[#allocation49_spill] sm:$0xff] }
 0x508   : > { %v5699_v8 = vpack.c.bf16 %v5698_v43, %v5698_v43 }
 0x50a   : > { %10952 = vmatmul.mubr.msk.bf16.vlgmr.msra.gmra.mrb[36].mxu1 %vm5702_vm8, %v5699_v8 }
 0x50b   : > { %10956 = vmatpush3.bf16.msra.mxu1 %v11471_v31 }
 0x50c   : > { %10957 = vmatprep.subr.bf16.mxu1 %v11472_v56 }
 0x50f   : > { %10958 = vmatpush3.bf16.msra.mxu1 %v11472_v56 }
 0x510   : > { %10991 = vmatprep.subr.bf16.mxu1 %v11473_v12 }
 0x5dd   : > { %v5744_v35 = vpop.f32.mrb[36].mxu1 }
 0x5de   : > { %v5745_v54 = vadd.f32 %v5744_v35, %v5701_v55  ;;  %v10953_v13 = vpop.f32.mrb[37].mxu1 }
 0x5df   : > { %v5747_v19 = vpop.f32.mrb[38].mxu1 }
 0x5e0   : > { %v10214_v10 = vmul.f32 -1.442695, %v5745_v54  ;;  %v10954_v62 = vpop.f32.mrb[39].mxu1 }
 0x5e2   : > { %11748 = vpow2.f32 %v10214_v10 }
 0x5ec   : > { %v11749_v34 = vpop.eup %11748 }
 0x5ed   : > { %v5753_v11 = vadd.f32 1.0, %v11749_v34 }
 0x5ef   : > { %11750 = vrcp.f32 %v5753_v11 }
 0x5f9   : > { %v11751_v37 = vpop.eup %11750 }
 0x5fa   : > { %v14971_v60 = vrot.slane %v11751_v37, %v14968_v7 }
 0x5fc   : > { %v5760_v28 = vmul.f32 %v14971_v60, %v16760_v33  ;;  %v5761_v15 = vmul.f32 %v14971_v60, %v16761_v32  ;;  %v5762_v4 = vmul.f32 %v14971_v60, %v16762_v52  ;;  %v5763_v24 = vmul.f32 %v14971_v60, %v16763_v57 }
 0x5fd   : > { %v5764_v5 = vmul.f32 %v14971_v60, %v16764_v39  ;;  %v5765_v14 = vmul.f32 %v14971_v60, %v16765_v51  ;;  %v5766_v49 = vmul.f32 %v14971_v60, %v16766_v47  ;;  %v5767_v1 = vmul.f32 %v14971_v60, %v16767_v53 }
 0x5fe   : > { %v5792_v44 = vpack.c.bf16 %v5761_v15, %v5760_v28  ;;  %v5793_v3 = vpack.c.bf16 %v5763_v24, %v5762_v4  ;;  %v5768_v59 = vmul.f32 %v14971_v60, %v16768_v45  ;;  %v5769_v43 = vmul.f32 %v14971_v60, %v16769_v20  ;;  %v15059_v15 = vld [vmem:[%s16770_s7] ss:$0 sm:$0xff]  ;;  %s16776_s7 = sld [smem:[#allocation22_spill]] }
 0x5ff   : > { %v5794_v18 = vpack.c.bf16 %v5765_v14, %v5764_v5  ;;  %v5795_v8 = vpack.c.bf16 %v5767_v1, %v5766_v49  ;;  %v5770_v56 = vmul.f32 %v14971_v60, %v14812_v41  ;;  %v5772_v55 = vmul.f32 %v14971_v60, %v14853_v16 }
 0x600   : > { %10959 = vmatprep.mubr.msk.bf16.mxu1 %vm4259_vm0, %v5792_v44  ;;  %v5796_v31 = vpack.c.bf16 %v5769_v43, %v5768_v59  ;;  %v5773_v35 = vmul.f32 %v14971_v60, %v14867_v27  ;;  %v5774_v19 = vmul.f32 %v14971_v60, %v14864_v42  ;;  %v5775_v41 = vmul.f32 %v14971_v60, %v14870_v6 }
 0x601   : > { %10960 = vmatmul.mubr.msk.bf16.vlgmr.msra.gmra.mrb[40].mxu1 %vm4259_vm0, %v5793_v3  ;;  %v5777_v16 = vmul.f32 %v14971_v60, %v14880_v17  ;;  %v5778_v62 = vmul.f32 %v14971_v60, %v14885_v38  ;;  %v5779_v42 = vmul.f32 %v14971_v60, %v14890_v58  ;;  %v5780_v6 = vmul.f32 %v14971_v60, %v14895_v9 }
 0x602   : > { %10963 = vmatprep.mubr.msk.bf16.mxu1 %vm4259_vm0, %v5794_v18  ;;  %10992 = vmatpush3.bf16.msra.mxu1 %v11473_v12  ;;  %v5771_v12 = vmul.f32 %v14971_v60, %v14830_v40  ;;  %v5798_v13 = vpack.c.bf16 %v5773_v35, %v5772_v55  ;;  %v5776_v40 = vmul.f32 %v14971_v60, %v14873_v48 }
 0x603   : > { %11025 = vmatprep.subr.bf16.mxu1 %v16718_v46  ;;  %v5799_v10 = vpack.c.bf16 %v5775_v41, %v5774_v19  ;;  %v5781_v48 = vmul.f32 %v14971_v60, %v14900_v61  ;;  %v5801_v34 = vpack.c.bf16 %v5779_v42, %v5778_v62  ;;  %v5782_v11 = vmul.f32 %v14971_v60, %v14905_v50 }
 0x604   : > { %v5797_v54 = vpack.c.bf16 %v5771_v12, %v5770_v56  ;;  %v5800_v27 = vpack.c.bf16 %v5777_v16, %v5776_v40  ;;  %v5783_v38 = vmul.f32 %v14971_v60, %v14910_v2  ;;  %v5784_v58 = vmul.f32 %v14971_v60, %v14915_v30 }
 0x605   : > { %v5802_v17 = vpack.c.bf16 %v5781_v48, %v5780_v6  ;;  %v5785_v9 = vmul.f32 %v14971_v60, %v14920_v36  ;;  %v5786_v26 = vmul.f32 %v14971_v60, %v14925_v63  ;;  %v5787_v50 = vmul.f32 %v14971_v60, %v14930_v22  ;;  %v15055_v22 = vld [vmem:[%s12269_s30] ss:$0 sm:$0xff] }
 0x606   : > { %v5803_v23 = vpack.c.bf16 %v5783_v38, %v5782_v11  ;;  %v5788_v2 = vmul.f32 %v14971_v60, %v14935_v0  ;;  %v5789_v30 = vmul.f32 %v14971_v60, %v14940_v29  ;;  %v5790_v33 = vmul.f32 %v14971_v60, %v14945_v21 }
 0x607   : > { %v5804_v61 = vpack.c.bf16 %v5785_v9, %v5784_v58  ;;  %v5805_v36 = vpack.c.bf16 %v5787_v50, %v5786_v26  ;;  %v5791_v63 = vmul.f32 %v14971_v60, %v14950_v25 }
 0x608   : > { %v5806_v37 = vpack.c.bf16 %v5789_v30, %v5788_v2 }
 0x609   : > { %10964 = vmatmul.mubr.msk.bf16.gmra.mrb[44].mxu1 %vm4259_vm0, %v5795_v8  ;;  %v5807_v28 = vpack.c.bf16 %v5791_v63, %v5790_v33 }
 0x60a   : > { %10967 = vmatprep.mubr.msk.bf16.mxu1 %vm4259_vm0, %v5796_v31 }
 0x611   : > { %10968 = vmatmul.mubr.msk.bf16.gmra.mrb[48].mxu1 %vm4259_vm0, %v5797_v54 }
 0x612   : > { %10971 = vmatprep.mubr.msk.bf16.mxu1 %vm4259_vm0, %v5798_v13 }
 0x619   : > { %10972 = vmatmul.mubr.msk.bf16.gmra.mrb[52].mxu1 %vm4259_vm0, %v5799_v10 }
 0x61a   : > { %10975 = vmatprep.mubr.msk.bf16.mxu1 %vm4259_vm0, %v5800_v27 }
 0x621   : > { %10976 = vmatmul.mubr.msk.bf16.gmra.mrb[56].mxu1 %vm4259_vm0, %v5801_v34 }
 0x622   : > { %10979 = vmatprep.mubr.msk.bf16.mxu1 %vm4259_vm0, %v5802_v17 }
 0x629   : > { %10980 = vmatmul.mubr.msk.bf16.gmra.mrb[60].mxu1 %vm4259_vm0, %v5803_v23 }
 0x62a   : > { %10983 = vmatprep.mubr.msk.bf16.mxu1 %vm4259_vm0, %v5804_v61 }
 0x631   : > { %10984 = vmatmul.mubr.msk.bf16.gmra.mrb[64].mxu1 %vm4259_vm0, %v5805_v36 }
 0x632   : > { %10987 = vmatprep.mubr.msk.bf16.mxu1 %vm4259_vm0, %v5806_v37 }
 0x639   : > { %10988 = vmatmul.mubr.msk.bf16.gmra.mrb[68].mxu1 %vm4259_vm0, %v5807_v28 }
 0x6d4   : > { %v10961_v0 = vpop.f32.mrb[40].mxu1 }
 0x6d5   : > { %v6042_v29 = vmul.f32 %v10961_v0, %v15055_v22  ;;  %v5906_v32 = vpop.f32.mrb[41].mxu1 }
 0x6d6   : > { %v6040_v52 = vmul.f32 %v15055_v22, %v5906_v32  ;;  %v10962_v4 = vpop.f32.mrb[42].mxu1 }
 0x6d7   : > { %v6043_v57 = vmul.f32 %v10962_v4, %v15055_v22  ;;  %v5909_v21 = vpop.f32.mrb[43].mxu1  ;;  %v6081_v25 = vadd.f32 %v15059_v15, %v6042_v29 }
 0x6d8   : > { %v6041_v24 = vmul.f32 %v15055_v22, %v5909_v21  ;;  %v6079_v39 = vadd.f32 %v15059_v15, %v6040_v52 }
 0x6d9   : > { %v6082_v60 = vadd.f32 %v15059_v15, %v6043_v57 }
 0x6da   : > { %v6080_v5 = vadd.f32 %v15059_v15, %v6041_v24 }
 0x6db   : > { %v6112_v51 = vpack.c.bf16 %v6082_v60, %v6081_v25 }
 0x6dc   : > { %v6111_v14 = vpack.c.bf16 %v6080_v5, %v6079_v39  ;;  %v10965_v44 = vpop.f32.mrb[44].mxu1 }
 0x6dd   : > { %v6046_v3 = vmul.f32 %v10965_v44, %v15055_v22  ;;  %v5922_v18 = vpop.f32.mrb[45].mxu1 }
 0x6de   : > { %v6044_v47 = vmul.f32 %v15055_v22, %v5922_v18  ;;  %v10966_v49 = vpop.f32.mrb[46].mxu1  ;;  %10993 = vmatprep.mubr.msk.bf16.mxu1 %vm6135_vm9, %v6111_v14 }
 0x6df   : > { %v6047_v53 = vmul.f32 %v10966_v49, %v15055_v22  ;;  %v5925_v1 = vpop.f32.mrb[47].mxu1  ;;  %10994 = vmatmul.mubr.msk.bf16.vlgmr.msra.gmra.mrb[72].mxu1 %vm6135_vm9, %v6112_v51  ;;  %v6085_v59 = vadd.f32 %v15059_v15, %v6046_v3 }
 0x6e0   : > { %v6045_v45 = vmul.f32 %v15055_v22, %v5925_v1  ;;  %v6083_v43 = vadd.f32 %v15059_v15, %v6044_v47 }
 0x6e1   : > { %v6086_v20 = vadd.f32 %v15059_v15, %v6047_v53 }
 0x6e2   : > { %v6084_v8 = vadd.f32 %v15059_v15, %v6045_v45 }
 0x6e3   : > { %v6114_v31 = vpack.c.bf16 %v6086_v20, %v6085_v59 }
 0x6e4   : > { %v6113_v56 = vpack.c.bf16 %v6084_v8, %v6083_v43  ;;  %v10969_v12 = vpop.f32.mrb[48].mxu1 }
 0x6e5   : > { %v6050_v55 = vmul.f32 %v10969_v12, %v15055_v22  ;;  %v5938_v35 = vpop.f32.mrb[49].mxu1 }
 0x6e6   : > { %v6048_v54 = vmul.f32 %v15055_v22, %v5938_v35  ;;  %v10970_v13 = vpop.f32.mrb[50].mxu1  ;;  %10997 = vmatprep.mubr.msk.bf16.mxu1 %vm6135_vm9, %v6113_v56 }
 0x6e7   : > { %v6051_v19 = vmul.f32 %v10970_v13, %v15055_v22  ;;  %v5941_v41 = vpop.f32.mrb[51].mxu1  ;;  %10998 = vmatmul.mubr.msk.bf16.gmra.mrb[76].mxu1 %vm6135_vm9, %v6114_v31  ;;  %v6089_v16 = vadd.f32 %v15059_v15, %v6050_v55 }
 0x6e8   : > { %v6049_v40 = vmul.f32 %v15055_v22, %v5941_v41  ;;  %v6087_v27 = vadd.f32 %v15059_v15, %v6048_v54 }
 0x6e9   : > { %v6090_v10 = vadd.f32 %v15059_v15, %v6051_v19 }
 0x6ea   : > { %v6088_v62 = vadd.f32 %v15059_v15, %v6049_v40 }
 0x6eb   : > { %v6116_v42 = vpack.c.bf16 %v6090_v10, %v6089_v16 }
 0x6ec   : > { %v6115_v6 = vpack.c.bf16 %v6088_v62, %v6087_v27  ;;  %v10973_v48 = vpop.f32.mrb[52].mxu1 }
 0x6ed   : > { %v6054_v34 = vmul.f32 %v10973_v48, %v15055_v22  ;;  %v5954_v17 = vpop.f32.mrb[53].mxu1 }
 0x6ee   : > { %v6052_v11 = vmul.f32 %v15055_v22, %v5954_v17  ;;  %v10974_v38 = vpop.f32.mrb[54].mxu1  ;;  %11001 = vmatprep.mubr.msk.bf16.mxu1 %vm6135_vm9, %v6115_v6 }
 0x6ef   : > { %v6055_v58 = vmul.f32 %v10974_v38, %v15055_v22  ;;  %v5957_v9 = vpop.f32.mrb[55].mxu1  ;;  %11002 = vmatmul.mubr.msk.bf16.gmra.mrb[80].mxu1 %vm6135_vm9, %v6116_v42  ;;  %v6093_v61 = vadd.f32 %v15059_v15, %v6054_v34 }
 0x6f0   : > { %v6053_v23 = vmul.f32 %v15055_v22, %v5957_v9  ;;  %v6091_v50 = vadd.f32 %v15059_v15, %v6052_v11 }
 0x6f1   : > { %v6094_v26 = vadd.f32 %v15059_v15, %v6055_v58 }
 0x6f2   : > { %v6092_v2 = vadd.f32 %v15059_v15, %v6053_v23 }
 0x6f3   : > { %v6118_v30 = vpack.c.bf16 %v6094_v26, %v6093_v61 }
 0x6f4   : > { %v6117_v36 = vpack.c.bf16 %v6092_v2, %v6091_v50  ;;  %v10977_v37 = vpop.f32.mrb[56].mxu1  ;;  %v11475_v50 = vld [vmem:[%s16771_s10 + $0x8] sm:$0xff]   ;;  %v15147_v2 = vld [vmem:[%s16772_s1] ss:$0 sm:$0xff] }
 0x6f5   : > { %v6058_v33 = vmul.f32 %v10977_v37, %v15055_v22  ;;  %v5970_v63 = vpop.f32.mrb[57].mxu1 }
 0x6f6   : > { %v6056_v28 = vmul.f32 %v15055_v22, %v5970_v63  ;;  %v10978_v0 = vpop.f32.mrb[58].mxu1  ;;  %11005 = vmatprep.mubr.msk.bf16.mxu1 %vm6135_vm9, %v6117_v36  ;;  %v15150_v36 = vld [vmem:[%s16772_s1 + $0x1] ss:$0 sm:$0xff]  ;;  %v6814_v63 = vld [vmem:[#allocation2 + $0x2] ss:$2 sm:$0xff] }
 0x6f7   : > { %v6059_v29 = vmul.f32 %v10978_v0, %v15055_v22  ;;  %v5973_v32 = vpop.f32.mrb[59].mxu1  ;;  %11006 = vmatmul.mubr.msk.bf16.gmra.mrb[84].mxu1 %vm6135_vm9, %v6118_v30  ;;  %v6097_v4 = vadd.f32 %v15059_v15, %v6058_v33  ;;  %v6777_v30 = vld [vmem:[#allocation2 + $0x1] ss:$2 sm:$0xff]  ;;  %v15158_v0 = vld [vmem:[%s16773_s26] ss:$0 sm:$0xff]  ;;  %s16777_s26 = sld [smem:[#allocation25_spill]] }
 0x6f8   : > { %v6057_v52 = vmul.f32 %v15055_v22, %v5973_v32  ;;  %v6095_v21 = vadd.f32 %v15059_v15, %v6056_v28  ;;  %v6797_v33 = vmul.f32 %v15150_v36, %v6777_v30  ;;  %v15155_v28 = vld [vmem:[%s16772_s1 + $0x2] ss:$0 sm:$0xff] }
 0x6f9   : > { %v6098_v57 = vadd.f32 %v15059_v15, %v6059_v29  ;;  %v6834_v32 = vmul.f32 %v15155_v28, %v6814_v63 }
 0x6fa   : > { %v6096_v24 = vadd.f32 %v15059_v15, %v6057_v52  ;;  %v6851_v52 = vld [vmem:[#allocation2 + $0x3] ss:$2 sm:$0xff] }
 0x6fb   : > { %v6120_v25 = vpack.c.bf16 %v6098_v57, %v6097_v4  ;;  %v15162_v4 = vld [vmem:[%s16772_s1 + $0x3] ss:$0 sm:$0xff] }
 0x6fc   : > { %v6119_v60 = vpack.c.bf16 %v6096_v24, %v6095_v21  ;;  %v10981_v39 = vpop.f32.mrb[60].mxu1  ;;  %v15165_v21 = vld [vmem:[%s16774_s11] ss:$0 sm:$0xff]  ;;  %s16778_s11 = sld [smem:[#allocation24_spill]] }
 0x6fd   : > { %v6062_v5 = vmul.f32 %v10981_v39, %v15055_v22  ;;  %v5986_v51 = vpop.f32.mrb[61].mxu1 }
 0x6fe   : > { %v6060_v14 = vmul.f32 %v15055_v22, %v5986_v51  ;;  %v10982_v44 = vpop.f32.mrb[62].mxu1  ;;  %11009 = vmatprep.mubr.msk.bf16.mxu1 %vm6135_vm9, %v6119_v60  ;;  %v6871_v51 = vmul.f32 %v15162_v4, %v6851_v52 }
 0x6ff   : > { %v6063_v3 = vmul.f32 %v10982_v44, %v15055_v22  ;;  %v5989_v18 = vpop.f32.mrb[63].mxu1  ;;  %11010 = vmatmul.mubr.msk.bf16.gmra.mrb[88].mxu1 %vm6135_vm9, %v6120_v25  ;;  %v6101_v49 = vadd.f32 %v15059_v15, %v6062_v5 }
 0x700   : > { %v6061_v47 = vmul.f32 %v15055_v22, %v5989_v18  ;;  %v6099_v1 = vadd.f32 %v15059_v15, %v6060_v14  ;;  %v6888_v18 = vld [vmem:[#allocation2 + $0x4] ss:$2 sm:$0xff] }
 0x701   : > { %v6102_v53 = vadd.f32 %v15059_v15, %v6063_v3 }
 0x702   : > { %v6100_v45 = vadd.f32 %v15059_v15, %v6061_v47  ;;  %v15175_v47 = vld [vmem:[%s16772_s1 + $0x4] ss:$0 sm:$0xff] }
 0x703   : > { %v6122_v59 = vpack.c.bf16 %v6102_v53, %v6101_v49 }
 0x704   : > { %v6121_v20 = vpack.c.bf16 %v6100_v45, %v6099_v1  ;;  %v10985_v43 = vpop.f32.mrb[64].mxu1 }
 0x705   : > { %v6066_v8 = vmul.f32 %v10985_v43, %v15055_v22  ;;  %v6002_v31 = vpop.f32.mrb[65].mxu1 }
 0x706   : > { %v6064_v56 = vmul.f32 %v15055_v22, %v6002_v31  ;;  %v10986_v12 = vpop.f32.mrb[66].mxu1  ;;  %11013 = vmatprep.mubr.msk.bf16.mxu1 %vm6135_vm9, %v6121_v20 }
 0x707   : > { %v6067_v55 = vmul.f32 %v10986_v12, %v15055_v22  ;;  %v6005_v35 = vpop.f32.mrb[67].mxu1  ;;  %11014 = vmatmul.mubr.msk.bf16.gmra.mrb[92].mxu1 %vm6135_vm9, %v6122_v59  ;;  %v6105_v13 = vadd.f32 %v15059_v15, %v6066_v8  ;;  %v6908_v8 = vmul.f32 %v15175_v47, %v6888_v18  ;;  %v15192_v12 = vld [vmem:[%s16772_s1 + $0x5] ss:$0 sm:$0xff] }
 0x708   : > { %v6065_v54 = vmul.f32 %v15055_v22, %v6005_v35  ;;  %v6103_v41 = vadd.f32 %v15059_v15, %v6064_v56  ;;  %v6924_v56 = vld [vmem:[#allocation2 + $0x18] ss:$2 sm:$0xff] }
 0x709   : > { %v6106_v19 = vadd.f32 %v15059_v15, %v6067_v55 }
 0x70a   : > { %v6104_v40 = vadd.f32 %v15059_v15, %v6065_v54 }
 0x70b   : > { %v6124_v16 = vpack.c.bf16 %v6106_v19, %v6105_v13 }
 0x70c   : > { %v6123_v10 = vpack.c.bf16 %v6104_v40, %v6103_v41  ;;  %v10989_v27 = vpop.f32.mrb[68].mxu1 }
 0x70d   : > { %v6070_v62 = vmul.f32 %v10989_v27, %v15055_v22  ;;  %v6018_v42 = vpop.f32.mrb[69].mxu1 }
 0x70e   : > { %v6068_v6 = vmul.f32 %v15055_v22, %v6018_v42  ;;  %v10990_v48 = vpop.f32.mrb[70].mxu1  ;;  %11017 = vmatprep.mubr.msk.bf16.mxu1 %vm6135_vm9, %v6123_v10  ;;  %v6961_v42 = vld [vmem:[#allocation2 + $0x19] ss:$2 sm:$0xff] }
 0x70f   : > { %v6071_v34 = vmul.f32 %v10990_v48, %v15055_v22  ;;  %v6021_v17 = vpop.f32.mrb[71].mxu1  ;;  %11018 = vmatmul.mubr.msk.bf16.gmra.mrb[96].mxu1 %vm6135_vm9, %v6124_v16  ;;  %v6109_v38 = vadd.f32 %v15059_v15, %v6070_v62  ;;  %v6944_v16 = vmul.f32 %v15192_v12, %v6924_v56 }
 0x710   : > { %v6069_v11 = vmul.f32 %v15055_v22, %v6021_v17  ;;  %v6107_v9 = vadd.f32 %v15059_v15, %v6068_v6  ;;  %v11474_v22 = vld [vmem:[%s16771_s10] sm:$0xff]   ;;  %s12199_s10 = smov [#allocation7]  }
 0x711   : > { %v6110_v58 = vadd.f32 %v15059_v15, %v6071_v34  ;;  %11026 = vmatpush3.bf16.msra.mxu1 %v11474_v22  ;;  %v15203_v6 = vld [vmem:[%s16772_s1 + $0x6] ss:$0 sm:$0xff]  ;;  %v15222_v22 = vld [vmem:[%s16772_s1 + $0x8] ss:$0 sm:$0xff] }
 0x712   : > { %v6108_v23 = vadd.f32 %v15059_v15, %v6069_v11  ;;  %11027 = vmatprep.subr.bf16.mxu1 %v16718_v46  ;;  %v6740_v15 = vld [vmem:[#allocation2] ss:$2 sm:$0xff] }
 0x713   : > { %v6126_v61 = vpack.c.bf16 %v6110_v58, %v6109_v38  ;;  %v6760_v37 = vmul.f32 %v15147_v2, %v6740_v15  ;;  %v6998_v38 = vld [vmem:[#allocation2 + $0x1a] ss:$2 sm:$0xff]  ;;  %v15214_v58 = vld [vmem:[%s16772_s1 + $0x7] ss:$0 sm:$0xff]  ;;  %8218 = vst.msk [vmem:[#allocation2] sm:$0xff] %vm8217_vm10, %v16718_v46 }
 0x714   : > { %v6125_v26 = vpack.c.bf16 %v6108_v23, %v6107_v9  ;;  %v7035_v15 = vld [vmem:[#allocation2 + $0x1b] ss:$2 sm:$0xff]  ;;  %v7018_v63 = vmul.f32 %v15214_v58, %v6998_v38  ;;  %8220 = vst.msk [vmem:[#allocation2 + $0x8] sm:$0xf] %vm8219_vm13, %v16718_v46 }
 0x715   : > { %11028 = vmatpush3.bf16.msra.mxu1 %v11475_v50  ;;  %v6805_v29 = vadd.f32 %v6797_v33, %v6760_v37 }
 0x716   : > { %11021 = vmatprep.mubr.msk.bf16.mxu1 %vm6135_vm9, %v6125_v26  ;;  %11033 = vmatprep.subr.bf16.mxu1 %v16718_v46  ;;  %v6981_v26 = vmul.f32 %v15203_v6, %v6961_v42 }
 0x717   : > { %11022 = vmatmul.mubr.msk.bf16.gmra.mrb[100].mxu1 %vm6135_vm9, %v6126_v61  ;;  %v6842_v5 = vadd.f32 %v6834_v32, %v6805_v29 }
 0x718   : > { %11029 = vmatprep.mubr.msk.bf16.mxu1 %vm12198_vm6, %v16718_v46 }
 0x719   : > { %v6879_v43 = vadd.f32 %v6871_v51, %v6842_v5  ;;  %v7055_v5 = vmul.f32 %v15222_v22, %v7035_v15 }
 0x71b   : > { %v6916_v40 = vadd.f32 %v6908_v8, %v6879_v43 }
 0x71d   : > { %v6952_v61 = vadd.f32 %v6944_v16, %v6916_v40 }
 0x7b2   : > { %v10995_v57 = vpop.f32.mrb[72].mxu1 }
 0x7b3   : > { %v6354_v24 = vmul.f32 %v10995_v57, %v15158_v0  ;;  %v6218_v25 = vpop.f32.mrb[73].mxu1 }
 0x7b4   : > { %v6352_v60 = vmul.f32 %v15158_v0, %v6218_v25  ;;  %v10996_v39 = vpop.f32.mrb[74].mxu1 }
 0x7b5   : > { %v15171_v14 = vadd.f32 %v15165_v21, %v6354_v24  ;;  %v6355_v44 = vmul.f32 %v10996_v39, %v15158_v0  ;;  %v6221_v3 = vpop.f32.mrb[75].mxu1 }
 0x7b6   : > { %v15178_v49 = vadd.f32 %v15165_v21, %v6352_v60  ;;  %v6353_v53 = vmul.f32 %v15158_v0, %v6221_v3  ;;  %v6989_v60 = vadd.f32 %v6981_v26, %v6952_v61  ;;  %v7072_v61 = vld [vmem:[#allocation2 + $0x1c] ss:$2 sm:$0xff] }
 0x7b7   : > { %v10256_v1 = vmul.f32 -1.442695, %v15171_v14  ;;  %v15183_v45 = vadd.f32 %v15165_v21, %v6355_v44  ;;  %8221 = vst.msk [vmem:[#allocation2 + $0x18] sm:$0xff] %vm8217_vm10, %v16718_v46 }
 0x7b8   : > { %v10254_v59 = vmul.f32 -1.442695, %v15178_v49  ;;  %v15187_v20 = vadd.f32 %v15165_v21, %v6353_v53  ;;  %8222 = vst.msk [vmem:[#allocation2 + $0x20] sm:$0xf] %vm8219_vm13, %v16718_v46 }
 0x7b9   : > { %11752 = vpow2.f32 %v10256_v1  ;;  %v10257_v31 = vmul.f32 -1.442695, %v15183_v45 }
 0x7ba   : > { %11754 = vpow2.f32 %v10254_v59  ;;  %v10255_v55 = vmul.f32 -1.442695, %v15187_v20  ;;  %v10999_v35 = vpop.f32.mrb[76].mxu1 }
 0x7bb   : > { %11756 = vpow2.f32 %v10257_v31  ;;  %v6358_v54 = vmul.f32 %v10999_v35, %v15158_v0  ;;  %v6234_v13 = vpop.f32.mrb[77].mxu1 }
 0x7bc   : > { %11758 = vpow2.f32 %v10255_v55  ;;  %v6356_v19 = vmul.f32 %v15158_v0, %v6234_v13  ;;  %v11000_v41 = vpop.f32.mrb[78].mxu1 }
 0x7bd   : > { %v15199_v10 = vadd.f32 %v15165_v21, %v6358_v54  ;;  %v6359_v27 = vmul.f32 %v11000_v41, %v15158_v0  ;;  %v6237_v62 = vpop.f32.mrb[79].mxu1  ;;  %v7026_v54 = vadd.f32 %v7018_v63, %v6989_v60 }
 0x7be   : > { %v15206_v48 = vadd.f32 %v15165_v21, %v6356_v19  ;;  %v6357_v34 = vmul.f32 %v15158_v0, %v6237_v62 }
 0x7bf   : > { %v10260_v17 = vmul.f32 -1.442695, %v15199_v10  ;;  %v15211_v11 = vadd.f32 %v15165_v21, %v6359_v27  ;;  %v7063_v38 = vadd.f32 %v7055_v5, %v7026_v54 }
 0x7c0   : > { %v10258_v9 = vmul.f32 -1.442695, %v15206_v48  ;;  %v15218_v23 = vadd.f32 %v15165_v21, %v6357_v34 }
 0x7c1   : > { %11760 = vpow2.f32 %v10260_v17  ;;  %v10261_v50 = vmul.f32 -1.442695, %v15211_v11 }
 0x7c2   : > { %11762 = vpow2.f32 %v10258_v9  ;;  %v10259_v30 = vmul.f32 -1.442695, %v15218_v23  ;;  %v11003_v37 = vpop.f32.mrb[80].mxu1 }
 0x7c3   : > { %v11753_v33 = vpop.eup %11752  ;;  %11764 = vpow2.f32 %v10261_v50  ;;  %v6362_v29 = vmul.f32 %v11003_v37, %v15158_v0  ;;  %v6250_v32 = vpop.f32.mrb[81].mxu1  ;;  %v15255_v37 = vld [vmem:[%s16772_s1 + $0x9] ss:$0 sm:$0xff] }
 0x7c4   : > { %v11755_v52 = vpop.eup %11754  ;;  %v6521_v57 = vadd.f32 1.0, %v11753_v33  ;;  %11766 = vpow2.f32 %v10259_v30  ;;  %v6360_v24 = vmul.f32 %v15158_v0, %v6250_v32  ;;  %v11004_v25 = vpop.f32.mrb[82].mxu1  ;;  %v7092_v5 = vmul.f32 %v15255_v37, %v7072_v61 }
 0x7c5   : > { %v11757_v39 = vpop.eup %11756  ;;  %v6519_v51 = vadd.f32 1.0, %v11755_v52  ;;  %v15231_v44 = vadd.f32 %v15165_v21, %v6362_v29  ;;  %v6363_v3 = vmul.f32 %v11004_v25, %v15158_v0  ;;  %v6253_v18 = vpop.f32.mrb[83].mxu1 }
 0x7c6   : > { %v11759_v53 = vpop.eup %11758  ;;  %11768 = vrcp.f32 %v6521_v57  ;;  %v6522_v1 = vadd.f32 1.0, %v11757_v39  ;;  %v15235_v59 = vadd.f32 %v15165_v21, %v6360_v24  ;;  %v6361_v43 = vmul.f32 %v15158_v0, %v6253_v18 }
 0x7c7   : > { %11770 = vrcp.f32 %v6519_v51  ;;  %v6520_v8 = vadd.f32 1.0, %v11759_v53  ;;  %v10264_v31 = vmul.f32 -1.442695, %v15231_v44  ;;  %v15240_v56 = vadd.f32 %v15165_v21, %v6363_v3 }
 0x7c8   : > { %11772 = vrcp.f32 %v6522_v1  ;;  %v10262_v55 = vmul.f32 -1.442695, %v15235_v59  ;;  %v15244_v35 = vadd.f32 %v15165_v21, %v6361_v43 }
 0x7c9   : > { %11774 = vrcp.f32 %v6520_v8  ;;  %v10265_v13 = vmul.f32 -1.442695, %v15240_v56 }
 0x7ca   : > { %11776 = vpow2.f32 %v10264_v31  ;;  %v10263_v19 = vmul.f32 -1.442695, %v15244_v35  ;;  %v11007_v41 = vpop.f32.mrb[84].mxu1 }
 0x7cb   : > { %v11761_v40 = vpop.eup %11760  ;;  %11778 = vpow2.f32 %v10262_v55  ;;  %v6366_v16 = vmul.f32 %v11007_v41, %v15158_v0  ;;  %v6266_v27 = vpop.f32.mrb[85].mxu1 }
 0x7cc   : > { %v11763_v62 = vpop.eup %11762  ;;  %v6525_v42 = vadd.f32 1.0, %v11761_v40  ;;  %11780 = vpow2.f32 %v10265_v13  ;;  %v6364_v34 = vmul.f32 %v15158_v0, %v6266_v27  ;;  %v11008_v17 = vpop.f32.mrb[86].mxu1 }
 0x7cd   : > { %v11765_v9 = vpop.eup %11764  ;;  %v6523_v26 = vadd.f32 1.0, %v11763_v62  ;;  %11782 = vpow2.f32 %v10263_v19  ;;  %v15251_v50 = vadd.f32 %v15165_v21, %v6366_v16  ;;  %v6367_v15 = vmul.f32 %v11008_v17, %v15158_v0  ;;  %v6269_v30 = vpop.f32.mrb[87].mxu1  ;;  %v10306_v17 = vld [vmem:[%s16772_s1 + $0x14] ss:$0 sm:$0xff] }
 0x7ce   : > { %v11767_v33 = vpop.eup %11766  ;;  %11784 = vrcp.f32 %v6525_v42  ;;  %v6526_v63 = vadd.f32 1.0, %v11765_v9  ;;  %v15258_v29 = vadd.f32 %v15165_v21, %v6364_v34  ;;  %v6365_v32 = vmul.f32 %v15158_v0, %v6269_v30  ;;  %v10307_v30 = vld [vmem:[%s16772_s1 + $0x15] ss:$0 sm:$0xff] }
 0x7cf   : > { %11786 = vrcp.f32 %v6523_v26  ;;  %v6524_v52 = vadd.f32 1.0, %v11767_v33  ;;  %v10268_v57 = vmul.f32 -1.442695, %v15251_v50  ;;  %v15263_v24 = vadd.f32 %v15165_v21, %v6367_v15  ;;  %v7529_v15 = vld [vmem:[#allocation2 + $0x1b1] ss:$2 sm:$0xff] }
 0x7d0   : > { %v11769_v25 = vpop.eup %11768  ;;  %11788 = vrcp.f32 %v6526_v63  ;;  %v10266_v60 = vmul.f32 -1.442695, %v15258_v29  ;;  %v15267_v39 = vadd.f32 %v15165_v21, %v6365_v32  ;;  %v15280_v16 = vadd.f32 %v7092_v5, %v7063_v38 }
 0x7d1   : > { %v11771_v51 = vpop.eup %11770  ;;  %v6617_v3 = vmul.f32 %v11769_v25, %v15171_v14  ;;  %11790 = vrcp.f32 %v6524_v52  ;;  %v10269_v18 = vmul.f32 -1.442695, %v15263_v24  ;;  %v7492_v14 = vld [vmem:[#allocation2 + $0x1b0] ss:$2 sm:$0xff] }
 0x7d2   : > { %v11773_v53 = vpop.eup %11772  ;;  %v6615_v1 = vmul.f32 %v11771_v51, %v15178_v49  ;;  %11792 = vpow2.f32 %v10268_v57  ;;  %v10267_v43 = vmul.f32 -1.442695, %v15267_v39  ;;  %v11011_v8 = vpop.f32.mrb[88].mxu1  ;;  %v15293_v26 = vmul.f32 %v10306_v17, %v7492_v14  ;;  %v7566_v57 = vld [vmem:[#allocation2 + $0x1b2] ss:$2 sm:$0xff] }
 0x7d3   : > { %v11775_v31 = vpop.eup %11774  ;;  %6710 = vst.msk [vmem:[#allocation2 + $0x4a] sm:$0xff] %vm4259_vm0, %v6617_v3  ;;  %v6618_v55 = vmul.f32 %v11773_v53, %v15183_v45  ;;  %11794 = vpow2.f32 %v10266_v60  ;;  %v6370_v54 = vmul.f32 %v11011_v8, %v15158_v0  ;;  %v6282_v13 = vpop.f32.mrb[89].mxu1  ;;  %v7603_v3 = vld [vmem:[#allocation2 + $0x1b3] ss:$2 sm:$0xff]  ;;  %v10308_v8 = vld [vmem:[%s16772_s1 + $0x16] ss:$0 sm:$0xff] }
 0x7d4   : > { %v11777_v19 = vpop.eup %11776  ;;  %6708 = vst.msk [vmem:[#allocation2 + $0x32] sm:$0xff] %vm4259_vm0, %v6615_v1  ;;  %v6616_v49 = vmul.f32 %v11775_v31, %v15187_v20  ;;  %11796 = vpow2.f32 %v10269_v18  ;;  %v6368_v41 = vmul.f32 %v15158_v0, %v6282_v13  ;;  %v11012_v40 = vpop.f32.mrb[90].mxu1  ;;  %v7640_v31 = vld [vmem:[#allocation2 + $0x1b4] ss:$2 sm:$0xff] }
 0x7d5   : > { %v11779_v27 = vpop.eup %11778  ;;  %6711 = vst.msk [vmem:[#allocation2 + $0x52] sm:$0xff] %vm4259_vm0, %v6618_v55  ;;  %v6529_v45 = vadd.f32 1.0, %v11777_v19  ;;  %11798 = vpow2.f32 %v10267_v43  ;;  %v15284_v62 = vadd.f32 %v15165_v21, %v6370_v54  ;;  %v6371_v42 = vmul.f32 %v11012_v40, %v15158_v0  ;;  %v6285_v34 = vpop.f32.mrb[91].mxu1 }
 0x7d6   : > { %v11781_v20 = vpop.eup %11780  ;;  %6709 = vst.msk [vmem:[#allocation2 + $0x3a] sm:$0xff] %vm4259_vm0, %v6616_v49  ;;  %v6527_v9 = vadd.f32 1.0, %v11779_v27  ;;  %v15290_v38 = vadd.f32 %v15165_v21, %v6368_v41  ;;  %v6369_v61 = vmul.f32 %v15158_v0, %v6285_v34  ;;  %v15306_v43 = vmul.f32 %v10307_v30, %v7529_v15  ;;  %v10309_v49 = vld [vmem:[%s16772_s1 + $0x17] ss:$0 sm:$0xff] }
 0x7d7   : > { %v11783_v33 = vpop.eup %11782  ;;  %11800 = vrcp.f32 %v6529_v45  ;;  %v6530_v63 = vadd.f32 1.0, %v11781_v20  ;;  %v10272_v32 = vmul.f32 -1.442695, %v15284_v62  ;;  %v15298_v52 = vadd.f32 %v15165_v21, %v6371_v42  ;;  %v10310_v42 = vld [vmem:[%s16772_s1 + $0x18] ss:$0 sm:$0xff] }
 0x7d8   : > { %v11785_v25 = vpop.eup %11784  ;;  %11802 = vrcp.f32 %v6527_v9  ;;  %v6528_v60 = vadd.f32 1.0, %v11783_v33  ;;  %v10270_v5 = vmul.f32 -1.442695, %v15290_v38  ;;  %v15302_v51 = vadd.f32 %v15165_v21, %v6369_v61 }
 0x7d9   : > { %v11787_v18 = vpop.eup %11786  ;;  %v6621_v53 = vmul.f32 %v11785_v25, %v15199_v10  ;;  %11804 = vrcp.f32 %v6530_v63  ;;  %v10273_v1 = vmul.f32 -1.442695, %v15298_v52  ;;  %v15311_v19 = vmul.f32 %v10308_v8, %v7566_v57 }
 0x7da   : > { %v11789_v55 = vpop.eup %11788  ;;  %v6619_v54 = vmul.f32 %v11787_v18, %v15206_v48  ;;  %11806 = vrcp.f32 %v6528_v60  ;;  %v10271_v13 = vmul.f32 -1.442695, %v15302_v51  ;;  %v11015_v14 = vpop.f32.mrb[92].mxu1  ;;  %v15317_v45 = vmul.f32 %v10309_v49, %v7603_v3 }
 0x7db   : > { %v11791_v41 = vpop.eup %11790  ;;  %6714 = vst.msk [vmem:[#allocation2 + $0x7a] sm:$0xff] %vm4259_vm0, %v6621_v53  ;;  %v6622_v10 = vmul.f32 %v11789_v55, %v15211_v11  ;;  %11808 = vpow2.f32 %v10272_v32  ;;  %v6374_v40 = vmul.f32 %v11015_v14, %v15158_v0  ;;  %v6298_v27 = vpop.f32.mrb[93].mxu1  ;;  %v15323_v9 = vmul.f32 %v10310_v42, %v7640_v31 }
 0x7dc   : > { %v11793_v48 = vpop.eup %11792  ;;  %6712 = vst.msk [vmem:[#allocation2 + $0x62] sm:$0xff] %vm4259_vm0, %v6619_v54  ;;  %v6620_v34 = vmul.f32 %v11791_v41, %v15218_v23  ;;  %11810 = vpow2.f32 %v10270_v5  ;;  %v6372_v17 = vmul.f32 %v15158_v0, %v6298_v27  ;;  %v11016_v20 = vpop.f32.mrb[94].mxu1 }
 0x7dd   : > { %v11795_v61 = vpop.eup %11794  ;;  %6715 = vst.msk [vmem:[#allocation2 + $0x82] sm:$0xff] %vm4259_vm0, %v6622_v10  ;;  %v6533_v11 = vadd.f32 1.0, %v11793_v48  ;;  %11812 = vpow2.f32 %v10273_v1  ;;  %v15327_v15 = vadd.f32 %v15165_v21, %v6374_v40  ;;  %v6375_v30 = vmul.f32 %v11016_v20, %v15158_v0  ;;  %v6301_v33 = vpop.f32.mrb[95].mxu1  ;;  %v6742_v32 = vld [vmem:[#allocation2 + $0x30] ss:$2 sm:$0xff] }
 0x7de   : > { %v11797_v63 = vpop.eup %11796  ;;  %v6779_v23 = vld [vmem:[#allocation2 + $0x31] ss:$2 sm:$0xff]  ;;  %6713 = vst.msk [vmem:[#allocation2 + $0x6a] sm:$0xff] %vm4259_vm0, %v6620_v34  ;;  %v6531_v57 = vadd.f32 1.0, %v11795_v61  ;;  %11814 = vpow2.f32 %v10271_v13  ;;  %v15332_v25 = vadd.f32 %v15165_v21, %v6372_v17  ;;  %v6373_v60 = vmul.f32 %v15158_v0, %v6301_v33  ;;  %v6816_v1 = vld [vmem:[#allocation2 + $0x32] ss:$2 sm:$0xff] }
 0x7df   : > { %v11799_v5 = vpop.eup %11798  ;;  %11816 = vrcp.f32 %v6533_v11  ;;  %v6534_v3 = vadd.f32 1.0, %v11797_v63  ;;  %v10276_v18 = vmul.f32 -1.442695, %v15327_v15  ;;  %v15337_v53 = vadd.f32 %v15165_v21, %v6375_v30  ;;  %v6853_v41 = vld [vmem:[#allocation2 + $0x33] ss:$2 sm:$0xff] }
 0x7e0   : > { %11818 = vrcp.f32 %v6531_v57  ;;  %v6532_v8 = vadd.f32 1.0, %v11799_v5  ;;  %v10274_v31 = vmul.f32 -1.442695, %v15332_v25  ;;  %v15341_v55 = vadd.f32 %v15165_v21, %v6373_v60 }
 0x7e1   : > { %v11801_v54 = vpop.eup %11800  ;;  %11820 = vrcp.f32 %v6534_v3  ;;  %v10277_v13 = vmul.f32 -1.442695, %v15337_v53  ;;  %v6761_v14 = vmul.f32 %v15147_v2, %v6742_v32  ;;  %v6798_v49 = vmul.f32 %v15150_v36, %v6779_v23 }
 0x7e2   : > { %v11803_v10 = vpop.eup %11802  ;;  %v6625_v40 = vmul.f32 %v11801_v54, %v15231_v44  ;;  %11822 = vrcp.f32 %v6532_v8  ;;  %v10275_v27 = vmul.f32 -1.442695, %v15341_v55  ;;  %v11019_v42 = vpop.f32.mrb[96].mxu1  ;;  %v15349_v48 = vmul.f32 %v15155_v28, %v6816_v1 }
 0x7e3   : > { %v11805_v34 = vpop.eup %11804  ;;  %v6623_v17 = vmul.f32 %v11803_v10, %v15235_v59  ;;  %11824 = vpow2.f32 %v10276_v18  ;;  %v6378_v20 = vmul.f32 %v11019_v42, %v15158_v0  ;;  %v6314_v61 = vpop.f32.mrb[97].mxu1  ;;  %v6806_v11 = vadd.f32 %v6798_v49, %v6761_v14 }
 0x7e4   : > { %v11807_v30 = vpop.eup %11806  ;;  %6718 = vst.msk [vmem:[#allocation2 + $0xaa] sm:$0xff] %vm4259_vm0, %v6625_v40  ;;  %v6626_v44 = vmul.f32 %v11805_v34, %v15240_v56  ;;  %11826 = vpow2.f32 %v10274_v31  ;;  %v6376_v33 = vmul.f32 %v15158_v0, %v6314_v61  ;;  %v11020_v63 = vpop.f32.mrb[98].mxu1  ;;  %v15357_v32 = vmul.f32 %v15162_v4, %v6853_v41 }
 0x7e5   : > { %v11809_v23 = vpop.eup %11808  ;;  %6716 = vst.msk [vmem:[#allocation2 + $0x92] sm:$0xff] %vm4259_vm0, %v6623_v17  ;;  %v6624_v59 = vmul.f32 %v11807_v30, %v15244_v35  ;;  %11828 = vpow2.f32 %v10277_v13  ;;  %v15362_v57 = vadd.f32 %v15165_v21, %v6378_v20  ;;  %v6379_v60 = vmul.f32 %v11020_v63, %v15158_v0  ;;  %v6317_v5 = vpop.f32.mrb[99].mxu1  ;;  %v6744_v56 = vld [vmem:[#allocation2 + $0x60] ss:$2 sm:$0xff]  ;;  %v6781_v31 = vld [vmem:[#allocation2 + $0x61] ss:$2 sm:$0xff] }
 0x7e6   : > { %v11811_v3 = vpop.eup %11810  ;;  %6719 = vst.msk [vmem:[#allocation2 + $0xb2] sm:$0xff] %vm4259_vm0, %v6626_v44  ;;  %v6537_v18 = vadd.f32 1.0, %v11809_v23  ;;  %11830 = vpow2.f32 %v10275_v27  ;;  %v15367_v1 = vadd.f32 %v15165_v21, %v6376_v33  ;;  %v6377_v8 = vmul.f32 %v15158_v0, %v6317_v5  ;;  %v6818_v41 = vld [vmem:[#allocation2 + $0x62] ss:$2 sm:$0xff] }
 0x7e7   : > { %v11813_v35 = vpop.eup %11812  ;;  %6717 = vst.msk [vmem:[#allocation2 + $0x9a] sm:$0xff] %vm4259_vm0, %v6624_v59  ;;  %v6535_v54 = vadd.f32 1.0, %v11811_v3  ;;  %v10280_v13 = vmul.f32 -1.442695, %v15362_v57  ;;  %v15373_v14 = vadd.f32 %v15165_v21, %v6379_v60  ;;  %v6762_v49 = vmul.f32 %v15147_v2, %v6744_v56 }
 0x7e8   : > { %v11815_v10 = vpop.eup %11814  ;;  %11832 = vrcp.f32 %v6537_v18  ;;  %v6538_v40 = vadd.f32 1.0, %v11813_v35  ;;  %v10278_v27 = vmul.f32 -1.442695, %v15367_v1  ;;  %v15378_v42 = vadd.f32 %v15165_v21, %v6377_v8 }
 0x7e9   : > { %v11817_v34 = vpop.eup %11816  ;;  %11834 = vrcp.f32 %v6535_v54  ;;  %v6536_v17 = vadd.f32 1.0, %v11815_v10  ;;  %v10281_v20 = vmul.f32 -1.442695, %v15373_v14  ;;  %v6799_v61 = vmul.f32 %v15150_v36, %v6781_v31 }
 0x7ea   : > { %v11819_v30 = vpop.eup %11818  ;;  %v6629_v44 = vmul.f32 %v11817_v34, %v15251_v50  ;;  %11836 = vrcp.f32 %v6538_v40  ;;  %v10279_v33 = vmul.f32 -1.442695, %v15378_v42  ;;  %v11023_v63 = vpop.f32.mrb[100].mxu1  ;;  %v6836_v23 = vmul.f32 %v15155_v28, %v6818_v41 }
 0x7eb   : > { %v11821_v59 = vpop.eup %11820  ;;  %v6627_v60 = vmul.f32 %v11819_v30, %v15258_v29  ;;  %11838 = vrcp.f32 %v6536_v17  ;;  %v6382_v5 = vmul.f32 %v11023_v63, %v15158_v0  ;;  %v6330_v56 = vpop.f32.mrb[101].mxu1  ;;  %v6807_v3 = vadd.f32 %v6799_v61, %v6762_v49 }
 0x7ec   : > { %v11823_v18 = vpop.eup %11822  ;;  %6722 = vst.msk [vmem:[#allocation2 + $0xda] sm:$0xff] %vm4259_vm0, %v6629_v44  ;;  %v6630_v8 = vmul.f32 %v11821_v59, %v15263_v24  ;;  %11840 = vpow2.f32 %v10280_v13  ;;  %v6380_v50 = vmul.f32 %v15158_v0, %v6330_v56  ;;  %v11024_v31 = vpop.f32.mrb[102].mxu1  ;;  %v6843_v35 = vadd.f32 %v15349_v48, %v6806_v11  ;;  %v6855_v59 = vld [vmem:[#allocation2 + $0x63] ss:$2 sm:$0xff] }
 0x7ed   : > { %v11825_v54 = vpop.eup %11824  ;;  %6720 = vst.msk [vmem:[#allocation2 + $0xc2] sm:$0xff] %vm4259_vm0, %v6627_v60  ;;  %v6628_v29 = vmul.f32 %v11823_v18, %v15267_v39  ;;  %11842 = vpow2.f32 %v10278_v27  ;;  %v15394_v41 = vadd.f32 %v15165_v21, %v6382_v5  ;;  %v6383_v49 = vmul.f32 %v11024_v31, %v15158_v0  ;;  %v6333_v10 = vpop.f32.mrb[103].mxu1 }
 0x7ee   : > { %v11827_v40 = vpop.eup %11826  ;;  %6723 = vst.msk [vmem:[#allocation2 + $0xe2] sm:$0xff] %vm4259_vm0, %v6630_v8  ;;  %v6541_v24 = vadd.f32 1.0, %v11825_v54  ;;  %11844 = vpow2.f32 %v10281_v20  ;;  %v15399_v13 = vadd.f32 %v15165_v21, %v6380_v50  ;;  %v6381_v48 = vmul.f32 %v15158_v0, %v6333_v10  ;;  %v6746_v11 = vld [vmem:[#allocation2 + $0x90] ss:$2 sm:$0xff]  ;;  %v6783_v34 = vld [vmem:[#allocation2 + $0x91] ss:$2 sm:$0xff] }
 0x7ef   : > { %v11829_v39 = vpop.eup %11828  ;;  %6721 = vst.msk [vmem:[#allocation2 + $0xca] sm:$0xff] %vm4259_vm0, %v6628_v29  ;;  %v6539_v27 = vadd.f32 1.0, %v11827_v40  ;;  %11846 = vpow2.f32 %v10279_v33  ;;  %v10284_v17 = vmul.f32 -1.442695, %v15394_v41  ;;  %v15405_v61 = vadd.f32 %v15165_v21, %v6383_v49  ;;  %v6820_v30 = vld [vmem:[#allocation2 + $0x92] ss:$2 sm:$0xff] }
 0x7f0   : > { %v11831_v44 = vpop.eup %11830  ;;  %11848 = vrcp.f32 %v6541_v24  ;;  %v6542_v20 = vadd.f32 1.0, %v11829_v39  ;;  %v10282_v63 = vmul.f32 -1.442695, %v15399_v13  ;;  %v15409_v0 = vadd.f32 %v15165_v21, %v6381_v48  ;;  %v6857_v56 = vld [vmem:[#allocation2 + $0x93] ss:$2 sm:$0xff] }
 0x7f1   : > { %11850 = vrcp.f32 %v6539_v27  ;;  %v6540_v60 = vadd.f32 1.0, %v11831_v44  ;;  %v10285_v5 = vmul.f32 -1.442695, %v15405_v61  ;;  %v6763_v33 = vmul.f32 %v15147_v2, %v6746_v11  ;;  %v6890_v10 = vld [vmem:[#allocation2 + $0x34] ss:$2 sm:$0xff] }
 0x7f2   : > { %v11833_v18 = vpop.eup %11832  ;;  %11852 = vrcp.f32 %v6542_v20  ;;  %v10283_v8 = vmul.f32 -1.442695, %v15409_v0  ;;  %v6800_v50 = vmul.f32 %v15150_v36, %v6783_v34  ;;  %v6837_v31 = vmul.f32 %v15155_v28, %v6820_v30 }
 0x7f3   : > { %v11835_v54 = vpop.eup %11834  ;;  %v6633_v21 = vmul.f32 %v11833_v18, %v15284_v62  ;;  %11854 = vrcp.f32 %v6540_v60  ;;  %v6844_v29 = vadd.f32 %v6836_v23, %v6807_v3  ;;  %v6873_v49 = vmul.f32 %v15162_v4, %v6855_v59  ;;  %v6892_v23 = vld [vmem:[#allocation2 + $0x64] ss:$2 sm:$0xff]  ;;  %v6894_v3 = vld [vmem:[#allocation2 + $0x94] ss:$2 sm:$0xff] }
 0x7f4   : > { %v11837_v40 = vpop.eup %11836  ;;  %v6631_v24 = vmul.f32 %v11835_v54, %v15290_v38  ;;  %11856 = vpow2.f32 %v10284_v17  ;;  %v6808_v48 = vadd.f32 %v6800_v50, %v6763_v33  ;;  %v6874_v11 = vmul.f32 %v15162_v4, %v6857_v56 }
 0x7f5   : > { %v11839_v39 = vpop.eup %11838  ;;  %6726 = vst.msk [vmem:[#allocation2 + $0x10a] sm:$0xff] %vm4259_vm0, %v6633_v21  ;;  %v6634_v34 = vmul.f32 %v11837_v40, %v15298_v52  ;;  %11858 = vpow2.f32 %v10282_v63  ;;  %v6880_v62 = vadd.f32 %v15357_v32, %v6843_v35  ;;  %v6881_v27 = vadd.f32 %v6873_v49, %v6844_v29 }
 0x7f6   : > { %v11841_v30 = vpop.eup %11840  ;;  %6724 = vst.msk [vmem:[#allocation2 + $0xf2] sm:$0xff] %vm4259_vm0, %v6631_v24  ;;  %v6632_v38 = vmul.f32 %v11839_v39, %v15302_v51  ;;  %11860 = vpow2.f32 %v10285_v5  ;;  %v6748_v17 = vld [vmem:[#allocation2 + $0xc0] ss:$2 sm:$0xff]  ;;  %v6785_v44 = vld [vmem:[#allocation2 + $0xc1] ss:$2 sm:$0xff]  ;;  %v6845_v59 = vadd.f32 %v6837_v31, %v6808_v48  ;;  %v6909_v60 = vmul.f32 %v15175_v47, %v6890_v10 }
 0x7f7   : > { %v6822_v20 = vld [vmem:[#allocation2 + $0xc2] ss:$2 sm:$0xff]  ;;  %v11843_v33 = vpop.eup %11842  ;;  %6727 = vst.msk [vmem:[#allocation2 + $0x112] sm:$0xff] %vm4259_vm0, %v6634_v34  ;;  %v6545_v52 = vadd.f32 1.0, %v11841_v30  ;;  %11862 = vpow2.f32 %v10283_v8  ;;  %v6764_v32 = vmul.f32 %v15147_v2, %v6748_v17  ;;  %v6801_v35 = vmul.f32 %v15150_v36, %v6785_v44  ;;  %v6859_v63 = vld [vmem:[#allocation2 + $0xc3] ss:$2 sm:$0xff] }
 0x7f8   : > { %v6896_v56 = vld [vmem:[#allocation2 + $0xc4] ss:$2 sm:$0xff]  ;;  %v11845_v18 = vpop.eup %11844  ;;  %6725 = vst.msk [vmem:[#allocation2 + $0xfa] sm:$0xff] %vm4259_vm0, %v6632_v38  ;;  %v6543_v51 = vadd.f32 1.0, %v11843_v33  ;;  %v6838_v5 = vmul.f32 %v15155_v28, %v6822_v20  ;;  %v6875_v50 = vmul.f32 %v15162_v4, %v6859_v63  ;;  %v6882_v31 = vadd.f32 %v6874_v11, %v6845_v59  ;;  %v6963_v20 = vld [vmem:[#allocation2 + $0x49] ss:$2 sm:$0xff] }
 0x7f9   : > { %v11847_v54 = vpop.eup %11846  ;;  %11864 = vrcp.f32 %v6545_v52  ;;  %v6546_v21 = vadd.f32 1.0, %v11845_v18  ;;  %v6809_v29 = vadd.f32 %v6801_v35, %v6764_v32  ;;  %v6910_v8 = vmul.f32 %v15175_v47, %v6892_v23  ;;  %v6926_v48 = vld [vmem:[#allocation2 + $0x48] ss:$2 sm:$0xff]  ;;  %v6928_v39 = vld [vmem:[#allocation2 + $0x78] ss:$2 sm:$0xff] }
 0x7fa   : > { %v11849_v49 = vpop.eup %11848  ;;  %11866 = vrcp.f32 %v6543_v51  ;;  %v6544_v10 = vadd.f32 1.0, %v11847_v54  ;;  %v6911_v40 = vmul.f32 %v15175_v47, %v6894_v3  ;;  %v6912_v24 = vmul.f32 %v15175_v47, %v6896_v56  ;;  %v6930_v17 = vld [vmem:[#allocation2 + $0xa8] ss:$2 sm:$0xff]  ;;  %v6932_v44 = vld [vmem:[#allocation2 + $0xd8] ss:$2 sm:$0xff] }
 0x7fb   : > { %v11851_v34 = vpop.eup %11850  ;;  %v6637_v30 = vmul.f32 %v11849_v49, %v15327_v15  ;;  %11868 = vrcp.f32 %v6546_v21  ;;  %v6846_v11 = vadd.f32 %v6838_v5, %v6809_v29  ;;  %v6917_v38 = vadd.f32 %v6909_v60, %v6880_v62  ;;  %v6965_v18 = vld [vmem:[#allocation2 + $0x79] ss:$2 sm:$0xff] }
 0x7fc   : > { %v11853_v59 = vpop.eup %11852  ;;  %v6635_v23 = vmul.f32 %v11851_v34, %v15332_v25  ;;  %11870 = vrcp.f32 %v6544_v10  ;;  %v6918_v33 = vadd.f32 %v6910_v8, %v6881_v27  ;;  %v6919_v52 = vadd.f32 %v6911_v40, %v6882_v31 }
 0x7fd   : > { %v11855_v3 = vpop.eup %11854  ;;  %6730 = vst.msk [vmem:[#allocation2 + $0x13a] sm:$0xff] %vm4259_vm0, %v6637_v30  ;;  %v6638_v32 = vmul.f32 %v11853_v59, %v15337_v53  ;;  %v6883_v35 = vadd.f32 %v6875_v50, %v6846_v11  ;;  %v6945_v15 = vmul.f32 %v15192_v12, %v6926_v48  ;;  %v6946_v63 = vmul.f32 %v15192_v12, %v6928_v39 }
 0x7fe   : > { %v11857_v62 = vpop.eup %11856  ;;  %6728 = vst.msk [vmem:[#allocation2 + $0x122] sm:$0xff] %vm4259_vm0, %v6635_v23  ;;  %v6636_v60 = vmul.f32 %v11855_v3, %v15341_v55  ;;  %v6934_v56 = vld [vmem:[#allocation2 + $0x108] ss:$2 sm:$0xff]  ;;  %v6947_v25 = vmul.f32 %v15192_v12, %v6930_v17  ;;  %v6948_v27 = vmul.f32 %v15192_v12, %v6932_v44  ;;  %v6982_v51 = vmul.f32 %v15203_v6, %v6963_v20  ;;  %v6969_v23 = vld [vmem:[#allocation2 + $0xd9] ss:$2 sm:$0xff] }
 0x7ff   : > { %v11859_v5 = vpop.eup %11858  ;;  %6731 = vst.msk [vmem:[#allocation2 + $0x142] sm:$0xff] %vm4259_vm0, %v6638_v32  ;;  %v6549_v53 = vadd.f32 1.0, %v11857_v62  ;;  %v6750_v50 = vld [vmem:[#allocation2 + $0xf0] ss:$2 sm:$0xff]  ;;  %v6787_v31 = vld [vmem:[#allocation2 + $0xf1] ss:$2 sm:$0xff]  ;;  %v6920_v54 = vadd.f32 %v6912_v24, %v6883_v35  ;;  %v15448_v21 = vmul.f32 %v15192_v12, %v6934_v56  ;;  %v6953_v29 = vadd.f32 %v6945_v15, %v6917_v38 }
 0x800   : > { %v11861_v55 = vpop.eup %11860  ;;  %6729 = vst.msk [vmem:[#allocation2 + $0x12a] sm:$0xff] %vm4259_vm0, %v6636_v60  ;;  %v6547_v8 = vadd.f32 1.0, %v11859_v5  ;;  %v6765_v49 = vmul.f32 %v15147_v2, %v6750_v50  ;;  %v6802_v10 = vmul.f32 %v15150_v36, %v6787_v31  ;;  %v6824_v40 = vld [vmem:[#allocation2 + $0xf2] ss:$2 sm:$0xff]  ;;  %v6861_v48 = vld [vmem:[#allocation2 + $0xf3] ss:$2 sm:$0xff]  ;;  %v6954_v39 = vadd.f32 %v6946_v63, %v6918_v33 }
 0x801   : > { %v11863_v34 = vpop.eup %11862  ;;  %11872 = vrcp.f32 %v6549_v53  ;;  %v6550_v30 = vadd.f32 1.0, %v11861_v55  ;;  %v6839_v24 = vmul.f32 %v15155_v28, %v6824_v40  ;;  %v6876_v11 = vmul.f32 %v15162_v4, %v6861_v48  ;;  %v6898_v17 = vld [vmem:[#allocation2 + $0xf4] ss:$2 sm:$0xff]  ;;  %v6967_v38 = vld [vmem:[#allocation2 + $0xa9] ss:$2 sm:$0xff] }
 0x802   : > { %11874 = vrcp.f32 %v6547_v8  ;;  %v6548_v44 = vadd.f32 1.0, %v11863_v34  ;;  %v6810_v20 = vadd.f32 %v6802_v10, %v6765_v49  ;;  %v6913_v59 = vmul.f32 %v15175_v47, %v6898_v17  ;;  %v6971_v3 = vld [vmem:[#allocation2 + $0x109] ss:$2 sm:$0xff]  ;;  %v7000_v5 = vld [vmem:[#allocation2 + $0x4a] ss:$2 sm:$0xff] }
 0x803   : > { %v11865_v32 = vpop.eup %11864  ;;  %11876 = vrcp.f32 %v6550_v30  ;;  %v6955_v35 = vadd.f32 %v6947_v25, %v6919_v52  ;;  %v6956_v33 = vadd.f32 %v6948_v27, %v6920_v54  ;;  %v6983_v15 = vmul.f32 %v15203_v6, %v6965_v18  ;;  %v7002_v52 = vld [vmem:[#allocation2 + $0x7a] ss:$2 sm:$0xff]  ;;  %v7004_v25 = vld [vmem:[#allocation2 + $0xaa] ss:$2 sm:$0xff] }
 0x804   : > { %v11867_v63 = vpop.eup %11866  ;;  %v6641_v62 = vmul.f32 %v11865_v32, %v15362_v57  ;;  %11878 = vrcp.f32 %v6548_v44  ;;  %v6847_v60 = vadd.f32 %v6839_v24, %v6810_v20  ;;  %v6984_v56 = vmul.f32 %v15203_v6, %v6967_v38  ;;  %v7006_v27 = vld [vmem:[#allocation2 + $0xda] ss:$2 sm:$0xff]  ;;  %v7008_v34 = vld [vmem:[#allocation2 + $0x10a] ss:$2 sm:$0xff] }
 0x805   : > { %v11869_v53 = vpop.eup %11868  ;;  %v6639_v50 = vmul.f32 %v11867_v63, %v15367_v1  ;;  %v6985_v31 = vmul.f32 %v15203_v6, %v6969_v23  ;;  %v6986_v55 = vmul.f32 %v15203_v6, %v6971_v3  ;;  %v6990_v8 = vadd.f32 %v6982_v51, %v6953_v29 }
 0x806   : > { %v11871_v18 = vpop.eup %11870  ;;  %6734 = vst.msk [vmem:[#allocation2 + $0x16a] sm:$0xff] %vm4259_vm0, %v6641_v62  ;;  %v6642_v57 = vmul.f32 %v11869_v53, %v15373_v14  ;;  %v6884_v54 = vadd.f32 %v6876_v11, %v6847_v60  ;;  %v6936_v49 = vld [vmem:[#allocation2 + $0x138] ss:$2 sm:$0xff]  ;;  %v6973_v10 = vld [vmem:[#allocation2 + $0x139] ss:$2 sm:$0xff]  ;;  %v6991_v40 = vadd.f32 %v6983_v15, %v6954_v39  ;;  %v6992_v48 = vadd.f32 %v6984_v56, %v6955_v35 }
 0x807   : > { %6732 = vst.msk [vmem:[#allocation2 + $0x152] sm:$0xff] %vm4259_vm0, %v6639_v50  ;;  %v6640_v1 = vmul.f32 %v11871_v18, %v15378_v42  ;;  %v6752_v30 = vld [vmem:[#allocation2 + $0x120] ss:$2 sm:$0xff]  ;;  %v6789_v51 = vld [vmem:[#allocation2 + $0x121] ss:$2 sm:$0xff]  ;;  %v15467_v24 = vmul.f32 %v15192_v12, %v6936_v49  ;;  %v15470_v17 = vmul.f32 %v15203_v6, %v6973_v10  ;;  %v6993_v14 = vadd.f32 %v6985_v31, %v6956_v33 }
 0x808   : > { %v6826_v29 = vld [vmem:[#allocation2 + $0x122] ss:$2 sm:$0xff]  ;;  %6735 = vst.msk [vmem:[#allocation2 + $0x172] sm:$0xff] %vm4259_vm0, %v6642_v57  ;;  %v6766_v39 = vmul.f32 %v15147_v2, %v6752_v30  ;;  %v6803_v11 = vmul.f32 %v15150_v36, %v6789_v51  ;;  %v6863_v44 = vld [vmem:[#allocation2 + $0x123] ss:$2 sm:$0xff]  ;;  %v6921_v20 = vadd.f32 %v6913_v59, %v6884_v54  ;;  %v7019_v32 = vmul.f32 %v15214_v58, %v7000_v5 }
 0x809   : > { %v6840_v38 = vmul.f32 %v15155_v28, %v6826_v29  ;;  %v6900_v42 = vld [vmem:[#allocation2 + $0x124] ss:$2 sm:$0xff]  ;;  %6733 = vst.msk [vmem:[#allocation2 + $0x15a] sm:$0xff] %vm4259_vm0, %v6640_v1  ;;  %v6877_v12 = vmul.f32 %v15162_v4, %v6863_v44  ;;  %v7020_v35 = vmul.f32 %v15214_v58, %v7002_v52  ;;  %v7021_v36 = vmul.f32 %v15214_v58, %v7004_v25  ;;  %v7037_v15 = vld [vmem:[#allocation2 + $0x4b] ss:$2 sm:$0xff] }
 0x80a   : > { %v7010_v23 = vld [vmem:[#allocation2 + $0x13a] ss:$2 sm:$0xff]  ;;  %v6914_v3 = vmul.f32 %v15175_v47, %v6900_v42  ;;  %v6811_v33 = vadd.f32 %v6803_v11, %v6766_v39  ;;  %v6957_v2 = vadd.f32 %v15448_v21, %v6921_v20  ;;  %v7022_v28 = vmul.f32 %v15214_v58, %v7006_v27  ;;  %v7039_v59 = vld [vmem:[#allocation2 + $0x7b] ss:$2 sm:$0xff]  ;;  %v7041_v56 = vld [vmem:[#allocation2 + $0xab] ss:$2 sm:$0xff] }
 0x80b   : > { %v11873_v63 = vpop.eup %11872  ;;  %v7023_v62 = vmul.f32 %v15214_v58, %v7008_v34  ;;  %v15486_v4 = vmul.f32 %v15214_v58, %v7010_v23  ;;  %v7027_v47 = vadd.f32 %v7019_v32, %v6990_v8  ;;  %v7028_v60 = vadd.f32 %v7020_v35, %v6991_v40  ;;  %v7043_v52 = vld [vmem:[#allocation2 + $0xdb] ss:$2 sm:$0xff]  ;;  %v7045_v25 = vld [vmem:[#allocation2 + $0x10b] ss:$2 sm:$0xff]  ;;  %v7076_v39 = vld [vmem:[#allocation2 + $0x7c] ss:$2 sm:$0xff] }
 0x80c   : > { %v11875_v5 = vpop.eup %11874  ;;  %v6645_v53 = vmul.f32 %v11873_v63, %v15394_v41  ;;  %v6848_v50 = vadd.f32 %v6840_v38, %v6811_v33  ;;  %v6994_v21 = vadd.f32 %v6986_v55, %v6957_v2  ;;  %v7029_v31 = vadd.f32 %v7021_v36, %v6992_v48  ;;  %v7047_v27 = vld [vmem:[#allocation2 + $0x13b] ss:$2 sm:$0xff]  ;;  %v12015_v2 = vld [vmem:[%s16772_s1 + $0x2] ss:$0 sm:$0xff] }
 0x80d   : > { %v11877_v18 = vpop.eup %11876  ;;  %v6643_v57 = vmul.f32 %v11875_v5, %v15399_v13  ;;  %v7030_v54 = vadd.f32 %v7022_v28, %v6993_v14  ;;  %v7056_v49 = vmul.f32 %v15222_v22, %v7037_v15  ;;  %v7057_v10 = vmul.f32 %v15222_v22, %v7039_v59  ;;  %v7074_v14 = vld [vmem:[#allocation2 + $0x4c] ss:$2 sm:$0xff]  ;;  %v12012_v42 = vld [vmem:[%s16772_s1 + $0x5] ss:$0 sm:$0xff]  ;;  %v12014_v35 = vld [vmem:[%s16772_s1 + $0x1] ss:$0 sm:$0xff] }
 0x80e   : > { %v11879_v8 = vpop.eup %11878  ;;  %6738 = vst.msk [vmem:[#allocation2 + $0x19a] sm:$0xff] %vm4259_vm0, %v6645_v53  ;;  %v6646_v40 = vmul.f32 %v11877_v18, %v15405_v61  ;;  %v6885_v41 = vadd.f32 %v6877_v12, %v6848_v50  ;;  %v7031_v34 = vadd.f32 %v7023_v62, %v6994_v21  ;;  %v7058_v55 = vmul.f32 %v15222_v22, %v7041_v56  ;;  %v12013_v12 = vld [vmem:[%s16772_s1] ss:$0 sm:$0xff]  ;;  %v12016_v63 = vld [vmem:[%s16772_s1 + $0x3] ss:$0 sm:$0xff] }
 0x80f   : > { %6736 = vst.msk [vmem:[#allocation2 + $0x182] sm:$0xff] %vm4259_vm0, %v6643_v57  ;;  %v6644_v48 = vmul.f32 %v11879_v8, %v15409_v0  ;;  %v6938_v13 = vld [vmem:[#allocation2 + $0x168] ss:$2 sm:$0xff]  ;;  %v6975_v1 = vld [vmem:[#allocation2 + $0x169] ss:$2 sm:$0xff]  ;;  %v7059_v51 = vmul.f32 %v15222_v22, %v7043_v52  ;;  %v7060_v29 = vmul.f32 %v15222_v22, %v7045_v25  ;;  %v15500_v61 = vmul.f32 %v15222_v22, %v7047_v27 }
 0x810   : > { %v7012_v30 = vld [vmem:[#allocation2 + $0x16a] ss:$2 sm:$0xff]  ;;  %6739 = vst.msk [vmem:[#allocation2 + $0x1a2] sm:$0xff] %vm4259_vm0, %v6646_v40  ;;  %v6791_v38 = vld [vmem:[#allocation2 + $0x151] ss:$2 sm:$0xff]  ;;  %v6922_v44 = vadd.f32 %v6914_v3, %v6885_v41  ;;  %v15504_v20 = vmul.f32 %v12012_v42, %v6938_v13  ;;  %v15507_v23 = vmul.f32 %v15203_v6, %v6975_v1  ;;  %v7064_v59 = vadd.f32 %v7056_v49, %v7027_v47 }
 0x811   : > { %v6754_v11 = vld [vmem:[#allocation2 + $0x150] ss:$2 sm:$0xff]  ;;  %v15510_v22 = vmul.f32 %v15214_v58, %v7012_v30  ;;  %6737 = vst.msk [vmem:[#allocation2 + $0x18a] sm:$0xff] %vm4259_vm0, %v6644_v48  ;;  %v6804_v33 = vmul.f32 %v12014_v35, %v6791_v38  ;;  %v6865_v36 = vld [vmem:[#allocation2 + $0x153] ss:$2 sm:$0xff]  ;;  %v7065_v27 = vadd.f32 %v7057_v10, %v7028_v60  ;;  %v7066_v18 = vadd.f32 %v7058_v55, %v7029_v31 }
 0x812   : > { %v6828_v0 = vld [vmem:[#allocation2 + $0x152] ss:$2 sm:$0xff]  ;;  %v6767_v32 = vmul.f32 %v12013_v12, %v6754_v11  ;;  %v7049_v15 = vld [vmem:[#allocation2 + $0x16b] ss:$2 sm:$0xff]  ;;  %v6878_v62 = vmul.f32 %v12016_v63, %v6865_v36  ;;  %v12017_v6 = vld [vmem:[%s16772_s1 + $0x4] ss:$0 sm:$0xff]  ;;  %v6958_v58 = vadd.f32 %v15467_v24, %v6922_v44  ;;  %v7067_v57 = vadd.f32 %v7059_v51, %v7030_v54 }
 0x813   : > { %v6841_v3 = vmul.f32 %v12015_v2, %v6828_v0  ;;  %v6902_v28 = vld [vmem:[#allocation2 + $0x154] ss:$2 sm:$0xff]  ;;  %v12018_v5 = vld [vmem:[%s16772_s1 + $0x8] ss:$0 sm:$0xff]  ;;  %v7068_v49 = vadd.f32 %v7060_v29, %v7031_v34  ;;  %v7093_v41 = vmul.f32 %v15255_v37, %v7074_v14  ;;  %v7094_v24 = vmul.f32 %v15255_v37, %v7076_v39  ;;  %v10296_v31 = vld [vmem:[%s16772_s1 + $0xa] ss:$0 sm:$0xff] }
 0x814   : > { %v6915_v56 = vmul.f32 %v12017_v6, %v6902_v28  ;;  %v15520_v53 = vmul.f32 %v12018_v5, %v7049_v15  ;;  %v7078_v50 = vld [vmem:[#allocation2 + $0xac] ss:$2 sm:$0xff]  ;;  %v7080_v21 = vld [vmem:[#allocation2 + $0xdc] ss:$2 sm:$0xff]  ;;  %v6812_v25 = vadd.f32 %v6804_v33, %v6767_v32  ;;  %v6995_v47 = vadd.f32 %v15470_v17, %v6958_v58  ;;  %v7145_v28 = vld [vmem:[#allocation2 + $0x31] ss:$2 sm:$0xff] }
 0x815   : > { %v7082_v52 = vld [vmem:[#allocation2 + $0x10c] ss:$2 sm:$0xff]  ;;  %v7084_v8 = vld [vmem:[#allocation2 + $0x13c] ss:$2 sm:$0xff]  ;;  %v7095_v13 = vmul.f32 %v15255_v37, %v7078_v50  ;;  %v7096_v1 = vmul.f32 %v15255_v37, %v7080_v21  ;;  %v7101_v34 = vadd.f32 %v7093_v41, %v7064_v59  ;;  %v7102_v39 = vadd.f32 %v7094_v24, %v7065_v27  ;;  %v10297_v15 = vld [vmem:[%s16772_s1 + $0xb] ss:$0 sm:$0xff] }
 0x816   : > { %v7086_v40 = vld [vmem:[#allocation2 + $0x16c] ss:$2 sm:$0xff]  ;;  %v6849_v48 = vadd.f32 %v6841_v3, %v6812_v25  ;;  %v7097_v30 = vmul.f32 %v15255_v37, %v7082_v52  ;;  %v7032_v54 = vadd.f32 %v15486_v4, %v6995_v47  ;;  %v7098_v10 = vmul.f32 %v15255_v37, %v7084_v8  ;;  %v7147_v58 = vld [vmem:[#allocation2 + $0x61] ss:$2 sm:$0xff]  ;;  %v7149_v5 = vld [vmem:[#allocation2 + $0x91] ss:$2 sm:$0xff] }
 0x817   : > { %v7108_v11 = vld [vmem:[#allocation2 + $0x30] ss:$2 sm:$0xff]  ;;  %v7110_v60 = vld [vmem:[#allocation2 + $0x60] ss:$2 sm:$0xff]  ;;  %v15532_v17 = vmul.f32 %v15255_v37, %v7086_v40  ;;  %v7103_v38 = vadd.f32 %v7095_v13, %v7066_v18  ;;  %v7104_v0 = vadd.f32 %v7096_v1, %v7067_v57  ;;  %v7151_v50 = vld [vmem:[#allocation2 + $0xc1] ss:$2 sm:$0xff]  ;;  %v7165_v24 = vmul.f32 %v10297_v15, %v7145_v28 }
 0x818   : > { %v7112_v55 = vld [vmem:[#allocation2 + $0x90] ss:$2 sm:$0xff]  ;;  %v7114_v51 = vld [vmem:[#allocation2 + $0xc0] ss:$2 sm:$0xff]  ;;  %v6886_v14 = vadd.f32 %v6878_v62, %v6849_v48  ;;  %v7069_v12 = vadd.f32 %v15500_v61, %v7032_v54  ;;  %v7105_v32 = vadd.f32 %v7097_v30, %v7068_v49  ;;  %v7128_v35 = vmul.f32 %v10296_v31, %v7108_v11  ;;  %v7153_v25 = vld [vmem:[#allocation2 + $0xf1] ss:$2 sm:$0xff] }
 0x819   : > { %v7116_v29 = vld [vmem:[#allocation2 + $0xf0] ss:$2 sm:$0xff]  ;;  %v7118_v44 = vld [vmem:[#allocation2 + $0x120] ss:$2 sm:$0xff]  ;;  %v7129_v33 = vmul.f32 %v10296_v31, %v7110_v60  ;;  %v7130_v37 = vmul.f32 %v10296_v31, %v7112_v55  ;;  %v7131_v3 = vmul.f32 %v10296_v31, %v7114_v51  ;;  %v7155_v27 = vld [vmem:[#allocation2 + $0x121] ss:$2 sm:$0xff]  ;;  %v7166_v48 = vmul.f32 %v10297_v15, %v7147_v58 }
 0x81a   : > { %v7120_v42 = vld [vmem:[#allocation2 + $0x150] ss:$2 sm:$0xff]  ;;  %v7122_v4 = vld [vmem:[#allocation2 + $0x180] ss:$2 sm:$0xff]  ;;  %v6923_v2 = vadd.f32 %v6915_v56, %v6886_v14  ;;  %v7132_v36 = vmul.f32 %v10296_v31, %v7116_v29  ;;  %v7106_v59 = vadd.f32 %v7098_v10, %v7069_v12  ;;  %v7133_v63 = vmul.f32 %v10296_v31, %v7118_v44  ;;  %v7157_v18 = vld [vmem:[#allocation2 + $0x151] ss:$2 sm:$0xff] }
 0x81b   : > { %v7134_v62 = vmul.f32 %v10296_v31, %v7120_v42  ;;  %v15536_v6 = vmul.f32 %v10296_v31, %v7122_v4  ;;  %v7136_v21 = vadd.f32 %v7128_v35, %v15280_v16  ;;  %v7137_v52 = vadd.f32 %v7129_v33, %v7101_v34  ;;  %v7159_v49 = vld [vmem:[#allocation2 + $0x181] ss:$2 sm:$0xff]  ;;  %v10298_v1 = vld [vmem:[%s16772_s1 + $0xc] ss:$0 sm:$0xff]  ;;  %v7182_v60 = vld [vmem:[#allocation2 + $0x32] ss:$2 sm:$0xff] }
 0x81c   : > { %v6959_v61 = vadd.f32 %v15504_v20, %v6923_v2  ;;  %v7138_v56 = vadd.f32 %v7130_v37, %v7102_v39  ;;  %v7139_v57 = vadd.f32 %v7131_v3, %v7103_v38  ;;  %v7140_v8 = vadd.f32 %v7132_v36, %v7104_v0  ;;  %v7184_v31 = vld [vmem:[#allocation2 + $0x62] ss:$2 sm:$0xff]  ;;  %v7186_v54 = vld [vmem:[#allocation2 + $0x92] ss:$2 sm:$0xff]  ;;  %v7219_v36 = vld [vmem:[#allocation2 + $0x33] ss:$2 sm:$0xff] }
 0x81d   : > { %v7141_v40 = vadd.f32 %v7133_v63, %v7105_v32  ;;  %v7142_v47 = vadd.f32 %v7134_v62, %v7106_v59  ;;  %v7167_v13 = vmul.f32 %v10297_v15, %v7149_v5  ;;  %v7168_v20 = vmul.f32 %v10297_v15, %v7151_v50  ;;  %v7188_v29 = vld [vmem:[#allocation2 + $0xc2] ss:$2 sm:$0xff]  ;;  %v7190_v14 = vld [vmem:[#allocation2 + $0xf2] ss:$2 sm:$0xff]  ;;  %v7221_v28 = vld [vmem:[#allocation2 + $0x63] ss:$2 sm:$0xff] }
 0x81e   : > { %v6996_v41 = vadd.f32 %v15507_v23, %v6959_v61  ;;  %v7169_v30 = vmul.f32 %v10297_v15, %v7153_v25  ;;  %v7170_v11 = vmul.f32 %v10297_v15, %v7155_v27  ;;  %v7171_v16 = vmul.f32 %v10297_v15, %v7157_v18  ;;  %v7192_v39 = vld [vmem:[#allocation2 + $0x122] ss:$2 sm:$0xff]  ;;  %v7194_v42 = vld [vmem:[#allocation2 + $0x152] ss:$2 sm:$0xff]  ;;  %v7223_v5 = vld [vmem:[#allocation2 + $0x93] ss:$2 sm:$0xff] }
 0x81f   : > { %v7172_v34 = vmul.f32 %v10297_v15, %v7159_v49  ;;  %v7173_v55 = vadd.f32 %v7165_v24, %v7136_v21  ;;  %v7174_v51 = vadd.f32 %v7166_v48, %v7137_v52  ;;  %v7175_v23 = vadd.f32 %v7167_v13, %v7138_v56  ;;  %v7196_v12 = vld [vmem:[#allocation2 + $0x182] ss:$2 sm:$0xff]  ;;  %v10299_v15 = vld [vmem:[%s16772_s1 + $0xd] ss:$0 sm:$0xff]  ;;  %v7227_v61 = vld [vmem:[#allocation2 + $0xf3] ss:$2 sm:$0xff] }
 0x820   : > { %v7033_v10 = vadd.f32 %v15510_v22, %v6996_v41  ;;  %v7176_v38 = vadd.f32 %v7168_v20, %v7139_v57  ;;  %v7177_v0 = vadd.f32 %v7169_v30, %v7140_v8  ;;  %v7178_v44 = vadd.f32 %v7170_v11, %v7141_v40  ;;  %v7225_v50 = vld [vmem:[#allocation2 + $0xc3] ss:$2 sm:$0xff]  ;;  %v7231_v27 = vld [vmem:[#allocation2 + $0x153] ss:$2 sm:$0xff]  ;;  %v7256_v48 = vld [vmem:[#allocation2 + $0x34] ss:$2 sm:$0xff] }
 0x821   : > { %v7179_v4 = vadd.f32 %v7171_v16, %v7142_v47  ;;  %v7202_v35 = vmul.f32 %v10298_v1, %v7182_v60  ;;  %v7203_v33 = vmul.f32 %v10298_v1, %v7184_v31  ;;  %v7204_v2 = vmul.f32 %v10298_v1, %v7186_v54  ;;  %v7229_v25 = vld [vmem:[#allocation2 + $0x123] ss:$2 sm:$0xff]  ;;  %v10300_v13 = vld [vmem:[%s16772_s1 + $0xe] ss:$0 sm:$0xff]  ;;  %v7260_v60 = vld [vmem:[#allocation2 + $0x94] ss:$2 sm:$0xff] }
 0x822   : > { %v7070_v32 = vadd.f32 %v15520_v53, %v7033_v10  ;;  %v7205_v22 = vmul.f32 %v10298_v1, %v7188_v29  ;;  %v7206_v37 = vmul.f32 %v10298_v1, %v7190_v14  ;;  %v7207_v3 = vmul.f32 %v10298_v1, %v7192_v39  ;;  %v7233_v18 = vld [vmem:[#allocation2 + $0x183] ss:$2 sm:$0xff]  ;;  %v7258_v16 = vld [vmem:[#allocation2 + $0x64] ss:$2 sm:$0xff]  ;;  %v7268_v14 = vld [vmem:[#allocation2 + $0x154] ss:$2 sm:$0xff] }
 0x823   : > { %v7208_v63 = vmul.f32 %v10298_v1, %v7194_v42  ;;  %v7209_v62 = vmul.f32 %v10298_v1, %v7196_v12  ;;  %v7210_v58 = vadd.f32 %v7202_v35, %v7173_v55  ;;  %v7211_v21 = vadd.f32 %v7203_v33, %v7174_v51  ;;  %v7262_v31 = vld [vmem:[#allocation2 + $0xc4] ss:$2 sm:$0xff]  ;;  %v7264_v51 = vld [vmem:[#allocation2 + $0xf4] ss:$2 sm:$0xff]  ;;  %v10301_v35 = vld [vmem:[%s16772_s1 + $0xf] ss:$0 sm:$0xff] }
 0x824   : > { %v7107_v59 = vadd.f32 %v15532_v17, %v7070_v32  ;;  %v7212_v53 = vadd.f32 %v7204_v2, %v7175_v23  ;;  %v7213_v52 = vadd.f32 %v7205_v22, %v7176_v38  ;;  %v7214_v56 = vadd.f32 %v7206_v37, %v7177_v0  ;;  %v7266_v29 = vld [vmem:[#allocation2 + $0x124] ss:$2 sm:$0xff]  ;;  %8223 = vst.msk [vmem:[#allocation2 + $0x30] sm:$0xff] %vm8217_vm10, %v16718_v46 }
 0x825   : > { %v7215_v8 = vadd.f32 %v7207_v3, %v7178_v44  ;;  %v7216_v40 = vadd.f32 %v7208_v63, %v7179_v4  ;;  %v7239_v47 = vmul.f32 %v10299_v15, %v7219_v36  ;;  %v7240_v17 = vmul.f32 %v10299_v15, %v7221_v28  ;;  %v7270_v44 = vld [vmem:[#allocation2 + $0x184] ss:$2 sm:$0xff]  ;;  %8224 = vst.msk [vmem:[#allocation2 + $0x38] sm:$0xf] %vm8219_vm13, %v16718_v46 }
 0x826   : > { %v7143_v57 = vadd.f32 %v15536_v6, %v7107_v59  ;;  %v7241_v49 = vmul.f32 %v10299_v15, %v7223_v5  ;;  %v7242_v41 = vmul.f32 %v10299_v15, %v7225_v50  ;;  %v7243_v24 = vmul.f32 %v10299_v15, %v7227_v61  ;;  %v7293_v4 = vld [vmem:[#allocation2 + $0x48] ss:$2 sm:$0xff]  ;;  %v7295_v3 = vld [vmem:[#allocation2 + $0x78] ss:$2 sm:$0xff] }
 0x827   : > { %v7244_v20 = vmul.f32 %v10299_v15, %v7229_v25  ;;  %v7245_v30 = vmul.f32 %v10299_v15, %v7231_v27  ;;  %v7246_v11 = vmul.f32 %v10299_v15, %v7233_v18  ;;  %v7247_v54 = vadd.f32 %v7239_v47, %v7210_v58  ;;  %v7297_v36 = vld [vmem:[#allocation2 + $0xa8] ss:$2 sm:$0xff]  ;;  %v7299_v28 = vld [vmem:[#allocation2 + $0xd8] ss:$2 sm:$0xff] }
 0x828   : > { %v7180_v1 = vadd.f32 %v7172_v34, %v7143_v57  ;;  %v7248_v10 = vadd.f32 %v7240_v17, %v7211_v21  ;;  %v7249_v6 = vadd.f32 %v7241_v49, %v7212_v53  ;;  %v7250_v55 = vadd.f32 %v7242_v41, %v7213_v52  ;;  %v7301_v58 = vld [vmem:[#allocation2 + $0x108] ss:$2 sm:$0xff]  ;;  %v7303_v5 = vld [vmem:[#allocation2 + $0x138] ss:$2 sm:$0xff] }
 0x829   : > { %v7251_v23 = vadd.f32 %v7243_v24, %v7214_v56  ;;  %v7252_v38 = vadd.f32 %v7244_v20, %v7215_v8  ;;  %v7253_v0 = vadd.f32 %v7245_v30, %v7216_v40  ;;  %v7276_v34 = vmul.f32 %v10300_v13, %v7256_v48  ;;  %v7305_v50 = vld [vmem:[#allocation2 + $0x168] ss:$2 sm:$0xff]  ;;  %v7307_v56 = vld [vmem:[#allocation2 + $0x198] ss:$2 sm:$0xff]  ;;  %v7330_v8 = vld [vmem:[#allocation2 + $0x49] ss:$2 sm:$0xff] }
 0x82a   : > { %v7217_v39 = vadd.f32 %v7209_v62, %v7180_v1  ;;  %v7277_v42 = vmul.f32 %v10300_v13, %v7258_v16  ;;  %v7278_v12 = vmul.f32 %v10300_v13, %v7260_v60  ;;  %v7279_v32 = vmul.f32 %v10300_v13, %v7262_v31  ;;  %v10302_v40 = vld [vmem:[%s16772_s1 + $0x10] ss:$0 sm:$0xff]  ;;  %v7332_v24 = vld [vmem:[#allocation2 + $0x79] ss:$2 sm:$0xff]  ;;  %v7334_v48 = vld [vmem:[#allocation2 + $0xa9] ss:$2 sm:$0xff] }
 0x82b   : > { %v7280_v2 = vmul.f32 %v10300_v13, %v7264_v51  ;;  %v7281_v22 = vmul.f32 %v10300_v13, %v7266_v29  ;;  %v7282_v37 = vmul.f32 %v10300_v13, %v7268_v14  ;;  %v7283_v15 = vmul.f32 %v10300_v13, %v7270_v44  ;;  %v7336_v13 = vld [vmem:[#allocation2 + $0xd9] ss:$2 sm:$0xff]  ;;  %v7338_v16 = vld [vmem:[#allocation2 + $0x109] ss:$2 sm:$0xff] }
 0x82c   : > { %v7254_v33 = vadd.f32 %v7246_v11, %v7217_v39  ;;  %v7284_v59 = vadd.f32 %v7276_v34, %v7247_v54  ;;  %v7285_v63 = vadd.f32 %v7277_v42, %v7248_v10  ;;  %v7286_v62 = vadd.f32 %v7278_v12, %v7249_v6  ;;  %v7340_v60 = vld [vmem:[#allocation2 + $0x139] ss:$2 sm:$0xff]  ;;  %v7342_v31 = vld [vmem:[#allocation2 + $0x169] ss:$2 sm:$0xff] }
 0x82d   : > { %v7287_v61 = vadd.f32 %v7279_v32, %v7250_v55  ;;  %v7288_v21 = vadd.f32 %v7280_v2, %v7251_v23  ;;  %v7289_v53 = vadd.f32 %v7281_v22, %v7252_v38  ;;  %v7290_v52 = vadd.f32 %v7282_v37, %v7253_v0  ;;  %v7344_v51 = vld [vmem:[#allocation2 + $0x199] ss:$2 sm:$0xff]  ;;  %v7367_v38 = vld [vmem:[#allocation2 + $0x4a] ss:$2 sm:$0xff]  ;;  %v10303_v0 = vld [vmem:[%s16772_s1 + $0x11] ss:$0 sm:$0xff] }
 0x82e   : > { %v7291_v25 = vadd.f32 %v7283_v15, %v7254_v33  ;;  %v7313_v27 = vmul.f32 %v10301_v35, %v7293_v4  ;;  %v7314_v18 = vmul.f32 %v10301_v35, %v7295_v3  ;;  %v7315_v57 = vmul.f32 %v10301_v35, %v7297_v36  ;;  %v7369_v32 = vld [vmem:[#allocation2 + $0x7a] ss:$2 sm:$0xff]  ;;  %v7371_v4 = vld [vmem:[#allocation2 + $0xaa] ss:$2 sm:$0xff] }
 0x82f   : > { %v7316_v47 = vmul.f32 %v10301_v35, %v7299_v28  ;;  %v7317_v17 = vmul.f32 %v10301_v35, %v7301_v58  ;;  %v7318_v49 = vmul.f32 %v10301_v35, %v7303_v5  ;;  %v7319_v41 = vmul.f32 %v10301_v35, %v7305_v50  ;;  %v7375_v3 = vld [vmem:[#allocation2 + $0x10a] ss:$2 sm:$0xff]  ;;  %v7377_v36 = vld [vmem:[#allocation2 + $0x13a] ss:$2 sm:$0xff] }
 0x830   : > { %v7320_v1 = vmul.f32 %v10301_v35, %v7307_v56  ;;  %v7321_v20 = vadd.f32 %v7313_v27, %v7284_v59  ;;  %v7322_v30 = vadd.f32 %v7314_v18, %v7285_v63  ;;  %v7323_v11 = vadd.f32 %v7315_v57, %v7286_v62  ;;  %v7373_v35 = vld [vmem:[#allocation2 + $0xda] ss:$2 sm:$0xff]  ;;  %v7379_v28 = vld [vmem:[#allocation2 + $0x16a] ss:$2 sm:$0xff]  ;;  %v7406_v57 = vld [vmem:[#allocation2 + $0x7b] ss:$2 sm:$0xff] }
 0x831   : > { %v7324_v54 = vadd.f32 %v7316_v47, %v7287_v61  ;;  %v7325_v10 = vadd.f32 %v7317_v17, %v7288_v21  ;;  %v7326_v6 = vadd.f32 %v7318_v49, %v7289_v53  ;;  %v7327_v55 = vadd.f32 %v7319_v41, %v7290_v52  ;;  %v7381_v58 = vld [vmem:[#allocation2 + $0x19a] ss:$2 sm:$0xff]  ;;  %v7404_v53 = vld [vmem:[#allocation2 + $0x4b] ss:$2 sm:$0xff]  ;;  %v10304_v52 = vld [vmem:[%s16772_s1 + $0x12] ss:$0 sm:$0xff] }
 0x832   : > { %v7328_v29 = vadd.f32 %v7320_v1, %v7291_v25  ;;  %v7350_v14 = vmul.f32 %v10302_v40, %v7330_v8  ;;  %v7351_v39 = vmul.f32 %v10302_v40, %v7332_v24  ;;  %v7352_v23 = vmul.f32 %v10302_v40, %v7334_v48  ;;  %v7408_v8 = vld [vmem:[#allocation2 + $0xab] ss:$2 sm:$0xff]  ;;  %v7414_v48 = vld [vmem:[#allocation2 + $0x13b] ss:$2 sm:$0xff] }
 0x833   : > { %v7353_v44 = vmul.f32 %v10302_v40, %v7336_v13  ;;  %v7354_v34 = vmul.f32 %v10302_v40, %v7338_v16  ;;  %v7355_v42 = vmul.f32 %v10302_v40, %v7340_v60  ;;  %v7356_v12 = vmul.f32 %v10302_v40, %v7342_v31  ;;  %v7412_v24 = vld [vmem:[#allocation2 + $0x10b] ss:$2 sm:$0xff]  ;;  %v7418_v16 = vld [vmem:[#allocation2 + $0x19b] ss:$2 sm:$0xff] }
 0x834   : > { %v7357_v33 = vmul.f32 %v10302_v40, %v7344_v51  ;;  %v7358_v2 = vadd.f32 %v7350_v14, %v7321_v20  ;;  %v7359_v22 = vadd.f32 %v7351_v39, %v7322_v30  ;;  %v7360_v37 = vadd.f32 %v7352_v23, %v7323_v11  ;;  %v7410_v40 = vld [vmem:[#allocation2 + $0xdb] ss:$2 sm:$0xff]  ;;  %v7416_v13 = vld [vmem:[#allocation2 + $0x16b] ss:$2 sm:$0xff]  ;;  %v7443_v23 = vld [vmem:[#allocation2 + $0x7c] ss:$2 sm:$0xff] }
 0x835   : > { %v7361_v15 = vadd.f32 %v7353_v44, %v7324_v54  ;;  %v7362_v59 = vadd.f32 %v7354_v34, %v7325_v10  ;;  %v7363_v63 = vadd.f32 %v7355_v42, %v7326_v6  ;;  %v7364_v62 = vadd.f32 %v7356_v12, %v7327_v55  ;;  %v7441_v6 = vld [vmem:[#allocation2 + $0x4c] ss:$2 sm:$0xff]  ;;  %v10305_v55 = vld [vmem:[%s16772_s1 + $0x13] ss:$0 sm:$0xff]  ;;  %8229 = vst.msk [vmem:[#allocation2 + $0x78] sm:$0xff] %vm8217_vm10, %v16718_v46 }
 0x836   : > { %v7365_v5 = vadd.f32 %v7357_v33, %v7328_v29  ;;  %v7387_v50 = vmul.f32 %v10303_v0, %v7367_v38  ;;  %v7388_v61 = vmul.f32 %v10303_v0, %v7369_v32  ;;  %v7389_v21 = vmul.f32 %v10303_v0, %v7371_v4  ;;  %v7445_v38 = vld [vmem:[#allocation2 + $0xac] ss:$2 sm:$0xff]  ;;  %v7451_v4 = vld [vmem:[#allocation2 + $0x13c] ss:$2 sm:$0xff]  ;;  %8225 = vst.msk [vmem:[#allocation2 + $0x48] sm:$0xff] %vm8217_vm10, %v16718_v46 }
 0x837   : > { %v7390_v56 = vmul.f32 %v10303_v0, %v7373_v35  ;;  %v7391_v25 = vmul.f32 %v10303_v0, %v7375_v3  ;;  %v7392_v27 = vmul.f32 %v10303_v0, %v7377_v36  ;;  %v7393_v18 = vmul.f32 %v10303_v0, %v7379_v28  ;;  %v7449_v32 = vld [vmem:[#allocation2 + $0x10c] ss:$2 sm:$0xff]  ;;  %v7455_v3 = vld [vmem:[#allocation2 + $0x19c] ss:$2 sm:$0xff]  ;;  %8233 = vst.msk [vmem:[#allocation2 + $0xa8] sm:$0xff] %vm8217_vm10, %v16718_v46 }
 0x838   : > { %v7394_v47 = vmul.f32 %v10303_v0, %v7381_v58  ;;  %v7395_v17 = vadd.f32 %v7387_v50, %v7358_v2  ;;  %v7396_v49 = vadd.f32 %v7388_v61, %v7359_v22  ;;  %v7397_v41 = vadd.f32 %v7389_v21, %v7360_v37  ;;  %v7447_v0 = vld [vmem:[#allocation2 + $0xdc] ss:$2 sm:$0xff]  ;;  %v7453_v35 = vld [vmem:[#allocation2 + $0x16c] ss:$2 sm:$0xff]  ;;  %8241 = vst.msk [vmem:[#allocation2 + $0x108] sm:$0xff] %vm8217_vm10, %v16718_v46 }
 0x839   : > { %v7398_v1 = vadd.f32 %v7390_v56, %v7361_v15  ;;  %v7399_v20 = vadd.f32 %v7391_v25, %v7362_v59  ;;  %v7400_v30 = vadd.f32 %v7392_v27, %v7363_v63  ;;  %v7401_v11 = vadd.f32 %v7393_v18, %v7364_v62  ;;  %v7478_v63 = vld [vmem:[#allocation2 + $0x60] ss:$2 sm:$0xff]  ;;  %v7480_v61 = vld [vmem:[#allocation2 + $0x90] ss:$2 sm:$0xff]  ;;  %8237 = vst.msk [vmem:[#allocation2 + $0xd8] sm:$0xff] %vm8217_vm10, %v16718_v46 }
 0x83a   : > { %v7402_v60 = vadd.f32 %v7394_v47, %v7365_v5  ;;  %v7424_v31 = vmul.f32 %v10304_v52, %v7404_v53  ;;  %v7425_v54 = vmul.f32 %v10304_v52, %v7406_v57  ;;  %v7426_v10 = vmul.f32 %v10304_v52, %v7408_v8  ;;  %v7482_v21 = vld [vmem:[#allocation2 + $0xc0] ss:$2 sm:$0xff]  ;;  %v7484_v53 = vld [vmem:[#allocation2 + $0xf0] ss:$2 sm:$0xff]  ;;  %8226 = vst.msk [vmem:[#allocation2 + $0x50] sm:$0xf] %vm8219_vm13, %v16718_v46 }
 0x83b   : > { %v7427_v51 = vmul.f32 %v10304_v52, %v7410_v40  ;;  %v7428_v29 = vmul.f32 %v10304_v52, %v7412_v24  ;;  %v7429_v14 = vmul.f32 %v10304_v52, %v7414_v48  ;;  %v7430_v39 = vmul.f32 %v10304_v52, %v7416_v13  ;;  %v7486_v18 = vld [vmem:[#allocation2 + $0x120] ss:$2 sm:$0xff]  ;;  %v7488_v57 = vld [vmem:[#allocation2 + $0x150] ss:$2 sm:$0xff]  ;;  %8230 = vst.msk [vmem:[#allocation2 + $0x80] sm:$0xf] %vm8219_vm13, %v16718_v46 }
 0x83c   : > { %v7431_v44 = vmul.f32 %v10304_v52, %v7418_v16  ;;  %v7432_v34 = vadd.f32 %v7424_v31, %v7395_v17  ;;  %v7433_v42 = vadd.f32 %v7425_v54, %v7396_v49  ;;  %v7434_v12 = vadd.f32 %v7426_v10, %v7397_v41  ;;  %v7490_v8 = vld [vmem:[#allocation2 + $0x180] ss:$2 sm:$0xff]  ;;  %v12019_v24 = vld [vmem:[%s16772_s1 + $0x14] ss:$0 sm:$0xff]  ;;  %v7517_v31 = vld [vmem:[#allocation2 + $0x91] ss:$2 sm:$0xff] }
 0x83d   : > { %v7435_v33 = vadd.f32 %v7427_v51, %v7398_v1  ;;  %v7436_v2 = vadd.f32 %v7428_v29, %v7399_v20  ;;  %v7437_v22 = vadd.f32 %v7429_v14, %v7400_v30  ;;  %v7438_v37 = vadd.f32 %v7430_v39, %v7401_v11  ;;  %v7515_v20 = vld [vmem:[#allocation2 + $0x61] ss:$2 sm:$0xff]  ;;  %v7521_v10 = vld [vmem:[#allocation2 + $0xf1] ss:$2 sm:$0xff]  ;;  %8234 = vst.msk [vmem:[#allocation2 + $0xb0] sm:$0xf] %vm8219_vm13, %v16718_v46 }
 0x83e   : > { %v7439_v36 = vadd.f32 %v7431_v44, %v7402_v60  ;;  %v7461_v28 = vmul.f32 %v10305_v55, %v7441_v6  ;;  %v7462_v15 = vmul.f32 %v10305_v55, %v7443_v23  ;;  %v7463_v59 = vmul.f32 %v10305_v55, %v7445_v38  ;;  %v7519_v54 = vld [vmem:[#allocation2 + $0xc1] ss:$2 sm:$0xff]  ;;  %v7525_v39 = vld [vmem:[#allocation2 + $0x151] ss:$2 sm:$0xff]  ;;  %8238 = vst.msk [vmem:[#allocation2 + $0xe0] sm:$0xf] %vm8219_vm13, %v16718_v46 }
 0x83f   : > { %v7464_v62 = vmul.f32 %v10305_v55, %v7447_v0  ;;  %v7465_v58 = vmul.f32 %v10305_v55, %v7449_v32  ;;  %v7466_v5 = vmul.f32 %v10305_v55, %v7451_v4  ;;  %v7467_v50 = vmul.f32 %v10305_v55, %v7453_v35  ;;  %v7523_v14 = vld [vmem:[#allocation2 + $0x121] ss:$2 sm:$0xff]  ;;  %8242 = vst.msk [vmem:[#allocation2 + $0x110] sm:$0xf] %vm8219_vm13, %v16718_v46 }
 0x840   : > { %v7468_v52 = vmul.f32 %v10305_v55, %v7455_v3  ;;  %v7469_v56 = vadd.f32 %v7461_v28, %v7432_v34  ;;  %v7470_v25 = vadd.f32 %v7462_v15, %v7433_v42  ;;  %v7471_v27 = vadd.f32 %v7463_v59, %v7434_v12  ;;  %v7527_v23 = vld [vmem:[#allocation2 + $0x181] ss:$2 sm:$0xff]  ;;  %v12020_v42 = vld [vmem:[%s16772_s1 + $0x15] ss:$0 sm:$0xff]  ;;  %v7558_v28 = vld [vmem:[#allocation2 + $0xf2] ss:$2 sm:$0xff] }
 0x841   : > { %v7472_v40 = vadd.f32 %v7464_v62, %v7435_v33  ;;  %v7473_v47 = vadd.f32 %v7465_v58, %v7436_v2  ;;  %v7474_v17 = vadd.f32 %v7466_v5, %v7437_v22  ;;  %v7475_v49 = vadd.f32 %v7467_v50, %v7438_v37  ;;  %v7552_v33 = vld [vmem:[#allocation2 + $0x62] ss:$2 sm:$0xff]  ;;  %v7554_v2 = vld [vmem:[#allocation2 + $0x92] ss:$2 sm:$0xff] }
 0x842   : > { %v7476_v41 = vadd.f32 %v7468_v52, %v7439_v36  ;;  %v7498_v48 = vmul.f32 %v12019_v24, %v7478_v63  ;;  %v7499_v13 = vmul.f32 %v12019_v24, %v7480_v61  ;;  %v7500_v1 = vmul.f32 %v12019_v24, %v7482_v21  ;;  %v7556_v36 = vld [vmem:[#allocation2 + $0xc2] ss:$2 sm:$0xff]  ;;  %v7562_v5 = vld [vmem:[#allocation2 + $0x152] ss:$2 sm:$0xff] }
 0x843   : > { %v7501_v30 = vmul.f32 %v12019_v24, %v7484_v53  ;;  %v7502_v11 = vmul.f32 %v12019_v24, %v7486_v18  ;;  %v7503_v16 = vmul.f32 %v12019_v24, %v7488_v57  ;;  %v7504_v60 = vmul.f32 %v12019_v24, %v7490_v8  ;;  %v7560_v15 = vld [vmem:[#allocation2 + $0x122] ss:$2 sm:$0xff]  ;;  %v12021_v52 = vld [vmem:[%s16772_s1 + $0x16] ss:$0 sm:$0xff]  ;;  %v7589_v8 = vld [vmem:[#allocation2 + $0x63] ss:$2 sm:$0xff] }
 0x844   : > { %v7506_v6 = vadd.f32 %v7498_v48, %v7469_v56  ;;  %v7507_v55 = vadd.f32 %v7499_v13, %v7470_v25  ;;  %v7508_v51 = vadd.f32 %v7500_v1, %v7471_v27  ;;  %v7513_v29 = vadd.f32 %v15293_v26, %v7476_v41  ;;  %v7564_v50 = vld [vmem:[#allocation2 + $0x182] ss:$2 sm:$0xff]  ;;  %v7595_v24 = vld [vmem:[#allocation2 + $0xf3] ss:$2 sm:$0xff]  ;;  %v7597_v48 = vld [vmem:[#allocation2 + $0x123] ss:$2 sm:$0xff] }
 0x845   : > { %v7509_v38 = vadd.f32 %v7501_v30, %v7472_v40  ;;  %v7510_v0 = vadd.f32 %v7502_v11, %v7473_v47  ;;  %v7511_v44 = vadd.f32 %v7503_v16, %v7474_v17  ;;  %v7512_v34 = vadd.f32 %v7504_v60, %v7475_v49  ;;  %v7593_v40 = vld [vmem:[#allocation2 + $0xc3] ss:$2 sm:$0xff]  ;;  %v7599_v13 = vld [vmem:[#allocation2 + $0x153] ss:$2 sm:$0xff] }
 0x846   : > { %v7535_v12 = vmul.f32 %v12020_v42, %v7515_v20  ;;  %v7536_v32 = vmul.f32 %v12020_v42, %v7517_v31  ;;  %v7537_v4 = vmul.f32 %v12020_v42, %v7519_v54  ;;  %v7538_v35 = vmul.f32 %v12020_v42, %v7521_v10  ;;  %v7601_v16 = vld [vmem:[#allocation2 + $0x183] ss:$2 sm:$0xff]  ;;  %v12022_v54 = vld [vmem:[%s16772_s1 + $0x17] ss:$0 sm:$0xff] }
 0x847   : > { %v7539_v22 = vmul.f32 %v12020_v42, %v7523_v14  ;;  %v7540_v37 = vmul.f32 %v12020_v42, %v7525_v39  ;;  %v7541_v3 = vmul.f32 %v12020_v42, %v7527_v23  ;;  %v7550_v26 = vadd.f32 %v15306_v43, %v7513_v29  ;;  %v7591_v43 = vld [vmem:[#allocation2 + $0x93] ss:$2 sm:$0xff]  ;;  %v7630_v23 = vld [vmem:[#allocation2 + $0xc4] ss:$2 sm:$0xff] }
 0x848   : > { %v7543_v59 = vadd.f32 %v7535_v12, %v7506_v6  ;;  %v7544_v63 = vadd.f32 %v7536_v32, %v7507_v55  ;;  %v7545_v62 = vadd.f32 %v7537_v4, %v7508_v51  ;;  %v7546_v58 = vadd.f32 %v7538_v35, %v7509_v38  ;;  %v7626_v55 = vld [vmem:[#allocation2 + $0x64] ss:$2 sm:$0xff]  ;;  %v7632_v38 = vld [vmem:[#allocation2 + $0xf4] ss:$2 sm:$0xff]  ;;  %8235 = vst.msk [vmem:[#allocation2 + $0xc0] sm:$0xff] %vm8217_vm10, %v16718_v46 }
 0x849   : > { %v7547_v61 = vadd.f32 %v7539_v22, %v7510_v0  ;;  %v7548_v21 = vadd.f32 %v7540_v37, %v7511_v44  ;;  %v7549_v53 = vadd.f32 %v7541_v3, %v7512_v34  ;;  %v7572_v56 = vmul.f32 %v12021_v52, %v7552_v33  ;;  %v7634_v12 = vld [vmem:[#allocation2 + $0x124] ss:$2 sm:$0xff]  ;;  %v7636_v32 = vld [vmem:[#allocation2 + $0x154] ss:$2 sm:$0xff]  ;;  %8227 = vst.msk [vmem:[#allocation2 + $0x60] sm:$0xff] %vm8217_vm10, %v16718_v46 }
 0x84a   : > { %v7573_v25 = vmul.f32 %v12021_v52, %v7554_v2  ;;  %v7574_v27 = vmul.f32 %v12021_v52, %v7556_v36  ;;  %v7575_v18 = vmul.f32 %v12021_v52, %v7558_v28  ;;  %v7576_v57 = vmul.f32 %v12021_v52, %v7560_v15  ;;  %v7638_v4 = vld [vmem:[#allocation2 + $0x184] ss:$2 sm:$0xff]  ;;  %v12023_v3 = vld [vmem:[%s16772_s1 + $0x18] ss:$0 sm:$0xff]  ;;  %8239 = vst.msk [vmem:[#allocation2 + $0xf0] sm:$0xff] %vm8217_vm10, %v16718_v46  ;;  %s16781_s1 = sld [smem:[#allocation26_spill]] }
 0x84b   : > { %v7577_v47 = vmul.f32 %v12021_v52, %v7562_v5  ;;  %v7578_v17 = vmul.f32 %v12021_v52, %v7564_v50  ;;  %v7580_v49 = vadd.f32 %v7572_v56, %v7543_v59  ;;  %v7587_v41 = vadd.f32 %v15311_v19, %v7550_v26  ;;  %v7628_v19 = vld [vmem:[#allocation2 + $0x94] ss:$2 sm:$0xff]  ;;  %8228 = vst.msk [vmem:[#allocation2 + $0x68] sm:$0xf] %vm8219_vm13, %v16718_v46 }
 0x84c   : > { %v7581_v1 = vadd.f32 %v7573_v25, %v7544_v63  ;;  %v7582_v20 = vadd.f32 %v7574_v27, %v7545_v62  ;;  %v7583_v30 = vadd.f32 %v7575_v18, %v7546_v58  ;;  %v7584_v11 = vadd.f32 %v7576_v57, %v7547_v61  ;;  %v10311_v58 = vld [vmem:[%s16775_s18] ss:$0 sm:$0xff]  ;;  %8231 = vst.msk [vmem:[#allocation2 + $0x90] sm:$0xff] %vm8217_vm10, %v16718_v46  ;;  %s16779_s18 = sld [smem:[#allocation27_spill]] }
 0x84d   : > { %v7585_v60 = vadd.f32 %v7577_v47, %v7548_v21  ;;  %v7586_v31 = vadd.f32 %v7578_v17, %v7549_v53  ;;  %v7609_v10 = vmul.f32 %v12022_v54, %v7589_v8  ;;  %v7610_v6 = vmul.f32 %v12022_v54, %v7591_v43  ;;  %v10312_v25 = vld [vmem:[%s16776_s7] ss:$0 sm:$0xff]  ;;  %s16780_s7 = sld [smem:[#allocation30_spill]]  ;;  %8232 = vst.msk [vmem:[#allocation2 + $0x98] sm:$0xf] %vm8219_vm13, %v16718_v46 }
 0x84e   : > { %v7611_v51 = vmul.f32 %v12022_v54, %v7593_v40  ;;  %v7612_v29 = vmul.f32 %v12022_v54, %v7595_v24  ;;  %v7613_v14 = vmul.f32 %v12022_v54, %v7597_v48  ;;  %v7614_v39 = vmul.f32 %v12022_v54, %v7599_v13  ;;  %8236 = vst.msk [vmem:[#allocation2 + $0xc8] sm:$0xf] %vm8219_vm13, %v16718_v46 }
 0x84f   : > { %v7615_v0 = vmul.f32 %v12022_v54, %v7601_v16  ;;  %v7617_v44 = vadd.f32 %v7609_v10, %v7580_v49  ;;  %v7618_v34 = vadd.f32 %v7610_v6, %v7581_v1  ;;  %v7624_v42 = vadd.f32 %v15317_v45, %v7587_v41  ;;  %8240 = vst.msk [vmem:[#allocation2 + $0xf8] sm:$0xf] %vm8219_vm13, %v16718_v46 }
 0x850   : > { %v7619_v35 = vadd.f32 %v7611_v51, %v7582_v20  ;;  %v7620_v33 = vadd.f32 %v7612_v29, %v7583_v30  ;;  %v7621_v2 = vadd.f32 %v7613_v14, %v7584_v11  ;;  %v7622_v22 = vadd.f32 %v7614_v39, %v7585_v60 }
 0x851   : > { %v7623_v37 = vadd.f32 %v7615_v0, %v7586_v31  ;;  %v7646_v26 = vmul.f32 %v12023_v3, %v7626_v55  ;;  %v7647_v36 = vmul.f32 %v12023_v3, %v7628_v19  ;;  %v7648_v28 = vmul.f32 %v12023_v3, %v7630_v23 }
 0x852   : > { %v7649_v15 = vmul.f32 %v12023_v3, %v7632_v38  ;;  %v7650_v59 = vmul.f32 %v12023_v3, %v7634_v12  ;;  %v7651_v63 = vmul.f32 %v12023_v3, %v7636_v32  ;;  %v7652_v62 = vmul.f32 %v12023_v3, %v7638_v4 }
 0x853   : > { %v7654_v45 = vadd.f32 %v7646_v26, %v7617_v44  ;;  %v7655_v5 = vadd.f32 %v7647_v36, %v7618_v34  ;;  %v7656_v50 = vadd.f32 %v7648_v28, %v7619_v35  ;;  %v7661_v61 = vadd.f32 %v15323_v9, %v7624_v42 }
 0x854   : > { %v7657_v21 = vadd.f32 %v7649_v15, %v7620_v33  ;;  %v7658_v53 = vadd.f32 %v7650_v59, %v7621_v2  ;;  %v7659_v52 = vadd.f32 %v7651_v63, %v7622_v22  ;;  %v7660_v56 = vadd.f32 %v7652_v62, %v7623_v37 }
 0x855   : > { %v7669_v27 = vmul.f32 %v10311_v58, %v7654_v45  ;;  %v7670_v18 = vmul.f32 %v10311_v58, %v7655_v5  ;;  %v7671_v57 = vmul.f32 %v10311_v58, %v7656_v50  ;;  %v7676_v8 = vmul.f32 %v10311_v58, %v7661_v61 }
 0x856   : > { %v7672_v43 = vmul.f32 %v10311_v58, %v7657_v21  ;;  %v7673_v40 = vmul.f32 %v10311_v58, %v7658_v53  ;;  %v7674_v47 = vmul.f32 %v10311_v58, %v7659_v52  ;;  %v7675_v17 = vmul.f32 %v10311_v58, %v7660_v56 }
 0x857   : > { %v15565_v49 = vadd.f32 %v10312_v25, %v7669_v27  ;;  %v15567_v41 = vadd.f32 %v10312_v25, %v7670_v18  ;;  %v15569_v24 = vadd.f32 %v10312_v25, %v7671_v57  ;;  %v15582_v16 = vadd.f32 %v10312_v25, %v7676_v8 }
 0x858   : > { %v15571_v9 = vadd.f32 %v10312_v25, %v7672_v43  ;;  %v15573_v48 = vadd.f32 %v10312_v25, %v7673_v40  ;;  %v15575_v13 = vadd.f32 %v10312_v25, %v7674_v47  ;;  %v15577_v1 = vadd.f32 %v10312_v25, %v7675_v17 }
 0x859   : > { %v10313_v20 = vmul.f32 -1.442695, %v15565_v49  ;;  %v10314_v30 = vmul.f32 -1.442695, %v15567_v41  ;;  %v10315_v11 = vmul.f32 -1.442695, %v15569_v24 }
 0x85a   : > { %v10316_v60 = vmul.f32 -1.442695, %v15571_v9  ;;  %v10317_v31 = vmul.f32 -1.442695, %v15573_v48  ;;  %v10318_v54 = vmul.f32 -1.442695, %v15575_v13 }
 0x85b   : > { %11880 = vpow2.f32 %v10313_v20  ;;  %v10319_v10 = vmul.f32 -1.442695, %v15577_v1  ;;  %v10320_v6 = vmul.f32 -1.442695, %v15582_v16 }
 0x85c   : > { %11882 = vpow2.f32 %v10314_v30 }
 0x85d   : > { %11884 = vpow2.f32 %v10315_v11  ;;  %v7840_v11 = vld [vmem:[%s16777_s26] sm:$0x3]  ;;  %s16783_s26 = sld [smem:[#allocation29_spill]] }
 0x85e   : > { %11886 = vpow2.f32 %v10316_v60  ;;  %v7776_v60 = vld [vmem:[%s16778_s11] sm:$0x1]  ;;  %s16788_s11 = sld [smem:[#allocation36_spill]] }
 0x85f   : > { %11888 = vpow2.f32 %v10317_v31 }
 0x860   : > { %11890 = vpow2.f32 %v10318_v54 }
 0x861   : > { %11892 = vpow2.f32 %v10319_v10 }
 0x862   : > { %11894 = vpow2.f32 %v10320_v6 }
 0x865   : > { %v11881_v55 = vpop.eup %11880 }
 0x866   : > { %v11883_v51 = vpop.eup %11882  ;;  %v7716_v29 = vadd.f32 1.0, %v11881_v55 }
 0x867   : > { %v11885_v14 = vpop.eup %11884  ;;  %v7717_v39 = vadd.f32 1.0, %v11883_v51 }
 0x868   : > { %v11887_v19 = vpop.eup %11886  ;;  %v7718_v23 = vadd.f32 1.0, %v11885_v14  ;;  %11896 = vrcp.f32 %v7716_v29 }
 0x869   : > { %v11889_v38 = vpop.eup %11888  ;;  %v7719_v0 = vadd.f32 1.0, %v11887_v19  ;;  %11898 = vrcp.f32 %v7717_v39 }
 0x86a   : > { %v11891_v44 = vpop.eup %11890  ;;  %v7720_v34 = vadd.f32 1.0, %v11889_v38  ;;  %11900 = vrcp.f32 %v7718_v23  ;;  %v11476_v38 = vld [vmem:[%s16779_s18] sm:$0xff]  }
 0x86b   : > { %v11893_v42 = vpop.eup %11892  ;;  %v7721_v12 = vadd.f32 1.0, %v11891_v44  ;;  %11902 = vrcp.f32 %v7719_v0  ;;  %v11477_v0 = vld [vmem:[%s16779_s18 + $0x8] sm:$0xff]   ;;  %v11478_v44 = vld [vmem:[%s16780_s7] sm:$0xff]  }
 0x86c   : > { %v11895_v32 = vpop.eup %11894  ;;  %v7722_v4 = vadd.f32 1.0, %v11893_v42  ;;  %11904 = vrcp.f32 %v7720_v34  ;;  %v7841_v34 = vld [vmem:[%s16781_s1] sm:$0x1]  ;;  %s16782_s1 = sld [smem:[#allocation28_spill]] }
 0x86d   : > { %v7723_v35 = vadd.f32 1.0, %v11895_v32  ;;  %11906 = vrcp.f32 %v7721_v12 }
 0x86e   : > { %11908 = vrcp.f32 %v7722_v4 }
 0x86f   : > { %11910 = vrcp.f32 %v7723_v35 }
 0x872   : > { %v11897_v33 = vpop.eup %11896 }
 0x873   : > { %v11899_v2 = vpop.eup %11898  ;;  %v15614_v22 = vmul.f32 %v11897_v33, %v15565_v49 }
 0x874   : > { %v11901_v37 = vpop.eup %11900  ;;  %v15617_v3 = vmul.f32 %v11899_v2, %v15567_v41 }
 0x875   : > { %v11903_v26 = vpop.eup %11902  ;;  %v15620_v36 = vmul.f32 %v11901_v37, %v15569_v24  ;;  %v7748_v59 = vsel %vm4259_vm0, %v15614_v22, 0.0 }
 0x876   : > { %v11905_v28 = vpop.eup %11904  ;;  %v15623_v15 = vmul.f32 %v11903_v26, %v15571_v9  ;;  %v7749_v63 = vsel %vm4259_vm0, %v15617_v3, 0.0 }
 0x877   : > { %v11907_v62 = vpop.eup %11906  ;;  %v15630_v58 = vmul.f32 %v11905_v28, %v15573_v48  ;;  %v7750_v45 = vadd.f32 %v7749_v63, %v7748_v59  ;;  %v7751_v5 = vsel %vm4259_vm0, %v15620_v36, 0.0 }
 0x878   : > { %v11909_v50 = vpop.eup %11908  ;;  %v15635_v61 = vmul.f32 %v11907_v62, %v15575_v13  ;;  %v7753_v21 = vsel %vm4259_vm0, %v15623_v15, 0.0 }
 0x879   : > { %v11911_v53 = vpop.eup %11910  ;;  %v7752_v52 = vadd.f32 %v7751_v5, %v7750_v45  ;;  %v15640_v56 = vmul.f32 %v11909_v50, %v15577_v1  ;;  %v7755_v25 = vsel %vm4259_vm0, %v15630_v58, 0.0 }
 0x87a   : > { %v15645_v18 = vmul.f32 %v11911_v53, %v15582_v16  ;;  %v7757_v57 = vsel %vm4259_vm0, %v15635_v61, 0.0  ;;  %v7847_v16 = vsel %vm1475_vm3, %v7840_v11, 0 }
 0x87b   : > { %v7754_v27 = vadd.f32 %v7753_v21, %v7752_v52  ;;  %v7759_v43 = vsel %vm4259_vm0, %v15640_v56, 0.0 }
 0x87c   : > { %v7761_v47 = vsel %vm4259_vm0, %v15645_v18, 0.0 }
 0x87d   : > { %v7756_v8 = vadd.f32 %v7755_v25, %v7754_v27 }
 0x87f   : > { %v7758_v40 = vadd.f32 %v7757_v57, %v7756_v8 }
 0x881   : > { %v7760_v17 = vadd.f32 %v7759_v43, %v7758_v40 }
 0x883   : > { %v7762_v49 = vadd.f32 %v7761_v47, %v7760_v17 }
 0x885   : > { %v7763_v41 = vrot.slane %v7762_v49, 4 }
 0x887   : > { %v7764_v24 = vadd.f32 %v7763_v41, %v7762_v49 }
 0x889   : > { %v7765_v9 = vrot.slane %v7764_v24, 2 }
 0x88b   : > { %v7766_v48 = vadd.f32 %v7765_v9, %v7764_v24 }
 0x88d   : > { %v7767_v13 = vrot.slane %v7766_v48, 1 }
 0x88f   : > { %v7768_v1 = vadd.f32 %v7767_v13, %v7766_v48 }
 0x891   : > { %v7770_v20 = vmul.f32 0.015625, %v7768_v1 }
 0x893   : > { %v7771_v30 = vpack.c.bf16 %v7770_v20, %v7770_v20 }
 0x895   : > { %11030 = vmatmul.mubr.msk.bf16.vlgmr.msra.gmra.mrb[104].mxu1 %vm4259_vm0, %v7771_v30 }
 0x896   : > { %11035 = vmatprep.mubr.msk.bf16.mxu1 %vm12198_vm6, %v16718_v46  ;;  %11034 = vmatpush3.bf16.msra.mxu1 %v7847_v16 }
 0x897   : > { %11039 = vmatprep.subr.bf16.mxu1 %v11476_v38 }
 0x968   : > { %v7826_v31 = vpop.f32.mrb[104].mxu1 }
 0x969   : > { %v7827_v54 = vadd.f32 %v7826_v31, %v7776_v60  ;;  %v11031_v10 = vpop.f32.mrb[105].mxu1 }
 0x96a   : > { %v7829_v6 = vpop.f32.mrb[106].mxu1 }
 0x96b   : > { %v10324_v55 = vmul.f32 -1.442695, %v7827_v54  ;;  %v11032_v51 = vpop.f32.mrb[107].mxu1 }
 0x96d   : > { %11912 = vpow2.f32 %v10324_v55 }
 0x977   : > { %v11913_v29 = vpop.eup %11912 }
 0x978   : > { %v7835_v14 = vadd.f32 1.0, %v11913_v29 }
 0x97a   : > { %11914 = vrcp.f32 %v7835_v14  ;;  %v11480_v14 = vld [vmem:[%s16788_s11] sm:$0xff]  }
 0x984   : > { %v11915_v39 = vpop.eup %11914 }
 0x985   : > { %v7838_v19 = vmul.f32 %v11915_v39, %v7827_v54  ;;  %v11481_v39 = vld [vmem:[%s16788_s11 + $0x8] sm:$0xff]  }
 0x987   : > { %v7839_v23 = vpack.c.bf16 %v7838_v19, %v7838_v19  ;;  %v11482_v19 = vld [vmem:[%s16788_s11 + $0x10] sm:$0xff]   ;;  %s12056_s11 = sshll.u32 %s12199_s10, 4  ;;  %s12057_s11 = int_to_ptr.vmem [resolvable:$false] %s12056_s11 }
 0x988   : > { %s12058_s12 = scalar_lea.vmem %s12057_s11, 32 }
 0x989   : > { %11036 = vmatmul.mubr.msk.bf16.vlgmr.msra.gmra.mrb[108].mxu1 %vm7842_vm11, %v7839_v23  ;;  %v8251_v23 = vld [vmem:[#allocation2] sm:$0xff] }
 0x98a   : > { %11040 = vmatpush3.bf16.msra.mxu1 %v11476_v38 }
 0x98b   : > { %11041 = vmatprep.subr.bf16.mxu1 %v11477_v0 }
 0x98e   : > { %11042 = vmatpush3.bf16.msra.mxu1 %v11477_v0  ;;  %v8280_v0 = vld [vmem:[#allocation2 + $0x1] sm:$0xff] }
 0x98f   : > { %11051 = vmatprep.subr.bf16.mxu1 %v11478_v44 }
 0xa5c   : > { %v7883_v42 = vpop.f32.mrb[108].mxu1 }
 0xa5d   : > { %v7884_v12 = vadd.f32 %v7883_v42, %v7841_v34  ;;  %v11037_v32 = vpop.f32.mrb[109].mxu1 }
 0xa5e   : > { %v7886_v4 = vpop.f32.mrb[110].mxu1 }
 0xa5f   : > { %v10326_v35 = vmul.f32 -1.442695, %v7884_v12  ;;  %v11038_v33 = vpop.f32.mrb[111].mxu1  ;;  %v10342_v12 = vld [vmem:[%s16795_s3] ss:$0 sm:$0xff]  ;;  %s16852_s3 = sld [smem:[#allocation34_spill]] }
 0xa61   : > { %11916 = vpow2.f32 %v10326_v35 }
 0xa6b   : > { %v11917_v2 = vpop.eup %11916 }
 0xa6c   : > { %v7892_v37 = vadd.f32 1.0, %v11917_v2  ;;  %v8309_v2 = vld [vmem:[#allocation2 + $0x2] sm:$0xff] }
 0xa6e   : > { %11918 = vrcp.f32 %v7892_v37 }
 0xa78   : > { %v11919_v26 = vpop.eup %11918 }
 0xa79   : > { %v7898_v28 = vrot.slane %v11919_v26, %v14968_v7 }
 0xa7b   : > { %v7899_v59 = vmul.f32 %v7898_v28, %v15614_v22  ;;  %v7900_v63 = vmul.f32 %v7898_v28, %v15617_v3  ;;  %v7901_v62 = vmul.f32 %v7898_v28, %v15620_v36  ;;  %v7902_v45 = vmul.f32 %v7898_v28, %v15623_v15  ;;  %v11479_v15 = vld [vmem:[%s16780_s7 + $0x8] ss:$0 sps:$4 sm:$0xff]  }
 0xa7c   : > { %v7903_v5 = vmul.f32 %v7898_v28, %v15630_v58  ;;  %v7904_v50 = vmul.f32 %v7898_v28, %v15635_v61  ;;  %v7905_v22 = vmul.f32 %v7898_v28, %v15640_v56  ;;  %v7906_v3 = vmul.f32 %v7898_v28, %v15645_v18  ;;  %v10333_v61 = vld [vmem:[%s16782_s1] ss:$0 sm:$0xff]  ;;  %s16793_s1 = sld [smem:[#allocation33_spill]] }
 0xa7d   : > { %v7907_v21 = vpack.c.bf16 %v7900_v63, %v7899_v59  ;;  %v7908_v53 = vpack.c.bf16 %v7902_v45, %v7901_v62  ;;  %v8064_v58 = vsel %vm5706_vm7, %v11479_v15, 0  ;;  %v10334_v56 = vld [vmem:[%s16783_s26] ss:$0 sm:$0xff]  ;;  %s16794_s26 = sld [smem:[#allocation31_spill]] }
 0xa7e   : > { %v7909_v52 = vpack.c.bf16 %v7904_v50, %v7903_v5  ;;  %v7910_v36 = vpack.c.bf16 %v7906_v3, %v7905_v22  ;;  %v8338_v22 = vld [vmem:[#allocation2 + $0x3] sm:$0xff] }
 0xa7f   : > { %11043 = vmatprep.mubr.msk.bf16.mxu1 %vm4259_vm0, %v7907_v21 }
 0xa80   : > { %11044 = vmatmul.mubr.msk.bf16.vlgmr.msra.gmra.mrb[112].mxu1 %vm4259_vm0, %v7908_v53 }
 0xa81   : > { %11047 = vmatprep.mubr.msk.bf16.mxu1 %vm4259_vm0, %v7909_v52  ;;  %11052 = vmatpush3.bf16.msra.mxu1 %v11478_v44 }
 0xa82   : > { %11359 = vmatprep.subr.msk.bf16.mxu1 %vm5706_vm7, %v11479_v15  ;;  %v15731_v38 = vld [vmem:[%s16793_s1] ss:$0 sm:$0xff]  ;;  %v15734_v44 = vld [vmem:[%s16793_s1 + $0x1] ss:$0 sm:$0xff]  ;;  %v15741_v37 = vld [vmem:[%s16793_s1 + $0x2] ss:$0 sm:$0xff] }
 0xa83   : > { %v10341_v34 = vld [vmem:[%s16794_s26] ss:$0 sm:$0xff]  ;;  %v8264_v32 = vmul.f32 %v15731_v38, %v8251_v23  ;;  %v8293_v4 = vmul.f32 %v15734_v44, %v8280_v0  ;;  %v8322_v21 = vmul.f32 %v15741_v37, %v8309_v2  ;;  %v15752_v3 = vld [vmem:[%s16793_s1 + $0x3] ss:$0 sm:$0xff]  ;;  %s16856_s26 = sld [smem:[#allocation35_spill]] }
 0xa84   : > { %v8281_v23 = vld [vmem:[#allocation2 + $0x19] sm:$0xff] }
 0xa85   : > { %11054 = vmatpush3.bf16.msra.mxu1 %v8064_v58  ;;  %v8301_v50 = vadd.f32 %v8293_v4, %v8264_v32  ;;  %v15781_v32 = vld [vmem:[%s16793_s1 + $0x6] ss:$0 sm:$0xff] }
 0xa86   : > { %11063 = vmatprep.subr.bf16.mxu1 %v16718_v46 }
 0xa88   : > { %11048 = vmatmul.mubr.msk.bf16.gmra.mrb[116].mxu1 %vm4259_vm0, %v7910_v36  ;;  %vm9394_vm0 = vcmask 188416  }
 0xb53   : > { %v11045_v25 = vpop.f32.mrb[112].mxu1 }
 0xb54   : > { %v7973_v27 = vpop.f32.mrb[113].mxu1  ;;  %v8013_v43 = vmul.f32 %v11045_v25, %v10333_v61 }
 0xb55   : > { %v8011_v57 = vmul.f32 %v10333_v61, %v7973_v27  ;;  %v11046_v8 = vpop.f32.mrb[114].mxu1  ;;  %v8330_v27 = vadd.f32 %v8322_v21, %v8301_v50  ;;  %v8438_v50 = vmul.f32 %v15781_v32, %v8281_v23 }
 0xb56   : > { %v8014_v40 = vmul.f32 %v11046_v8, %v10333_v61  ;;  %v7976_v18 = vpop.f32.mrb[115].mxu1  ;;  %v15688_v24 = vadd.f32 %v10334_v56, %v8013_v43 }
 0xb57   : > { %v8012_v47 = vmul.f32 %v10333_v61, %v7976_v18  ;;  %v15684_v49 = vadd.f32 %v10334_v56, %v8011_v57  ;;  %v8351_v57 = vmul.f32 %v15752_v3, %v8338_v22 }
 0xb58   : > { %v15682_v17 = vadd.f32 %v10334_v56, %v8014_v40  ;;  %16787 = vst [vmem:[#allocation76_spill] sm:$0xff] %v15688_v24  ;;  %v15761_v40 = vld [vmem:[%s16793_s1 + $0x4] ss:$0 sm:$0xff] }
 0xb59   : > { %16785 = vst [vmem:[#allocation45_spill] sm:$0xff] %v15684_v49  ;;  %v15686_v41 = vadd.f32 %v10334_v56, %v8012_v47 }
 0xb5a   : > { %16784 = vst [vmem:[#allocation74_spill] sm:$0xff] %v15682_v17  ;;  %v8035_v13 = vpack.c.bf16 %v15682_v17, %v15688_v24 }
 0xb5b   : > { %16786 = vst [vmem:[#allocation64_spill] sm:$0xff] %v15686_v41  ;;  %v8034_v9 = vpack.c.bf16 %v15686_v41, %v15684_v49  ;;  %v11049_v48 = vpop.f32.mrb[116].mxu1 }
 0xb5c   : > { %v7989_v1 = vpop.f32.mrb[117].mxu1  ;;  %v8017_v11 = vmul.f32 %v11049_v48, %v10333_v61 }
 0xb5d   : > { %v8015_v20 = vmul.f32 %v10333_v61, %v7989_v1  ;;  %v11050_v30 = vpop.f32.mrb[118].mxu1  ;;  %11055 = vmatprep.mubr.msk.bf16.mxu1 %vm8050_vm12, %v8034_v9 }
 0xb5e   : > { %v8018_v16 = vmul.f32 %v11050_v30, %v10333_v61  ;;  %v7992_v60 = vpop.f32.mrb[119].mxu1  ;;  %11056 = vmatmul.mubr.msk.bf16.vlgmr.msra.gmra.mrb[120].mxu1 %vm8050_vm12, %v8035_v13  ;;  %v15702_v55 = vadd.f32 %v10334_v56, %v8017_v11  ;;  %v8359_v30 = vadd.f32 %v8351_v57, %v8330_v27  ;;  %v15792_v57 = vld [vmem:[%s16793_s1 + $0x8] ss:$0 sm:$0xff] }
 0xb5f   : > { %v8016_v31 = vmul.f32 %v10333_v61, %v7992_v60  ;;  %v15698_v10 = vadd.f32 %v10334_v56, %v8015_v20  ;;  %11064 = vmatpush3.bf16.msra.mxu1 %v11480_v14 }
 0xb60   : > { %v15696_v54 = vadd.f32 %v10334_v56, %v8018_v16  ;;  %16792 = vst [vmem:[#allocation60_spill] sm:$0xff] %v15702_v55  ;;  %11065 = vmatprep.subr.bf16.mxu1 %v16718_v46 }
 0xb61   : > { %16790 = vst [vmem:[#allocation63_spill] sm:$0xff] %v15698_v10  ;;  %v15700_v6 = vadd.f32 %v10334_v56, %v8016_v31  ;;  %v8367_v56 = vld [vmem:[#allocation2 + $0x4] sm:$0xff]  ;;  %v8252_v31 = vld [vmem:[#allocation2 + $0x18] sm:$0xff] }
 0xb62   : > { %16789 = vst [vmem:[#allocation73_spill] sm:$0xff] %v15696_v54  ;;  %v8037_v29 = vpack.c.bf16 %v15696_v54, %v15702_v55  ;;  %v8380_v11 = vmul.f32 %v15761_v40, %v8367_v56  ;;  %v8265_v2 = vmul.f32 %v15731_v38, %v8252_v31 }
 0xb63   : > { %16791 = vst [vmem:[#allocation48_spill] sm:$0xff] %v15700_v6  ;;  %v8036_v51 = vpack.c.bf16 %v15700_v6, %v15698_v10  ;;  %11066 = vmatpush3.bf16.msra.mxu1 %v11481_v39 }
 0xb64   : > { %11067 = vmatprep.subr.bf16.mxu1 %v16718_v46  ;;  %v8388_v0 = vadd.f32 %v8380_v11, %v8359_v30 }
 0xb65   : > { %11059 = vmatprep.mubr.msk.bf16.mxu1 %vm8050_vm12, %v8036_v51  ;;  %v15772_v51 = vld [vmem:[%s16793_s1 + $0x5] ss:$0 sm:$0xff] }
 0xb66   : > { %11060 = vmatmul.mubr.msk.bf16.gmra.mrb[124].mxu1 %vm8050_vm12, %v8037_v29 }
 0xb67   : > { %11069 = vmatprep.mubr.msk.bf16.mxu1 %vm12198_vm6, %v16718_v46  ;;  %11068 = vmatpush3.bf16.msra.mxu1 %v11482_v19 }
 0xb68   : > { %11073 = vmatprep.subr.bf16.mxu1 %v16718_v46 }
 0xc31   : > { %v11057_v42 = vpop.f32.mrb[120].mxu1 }
 0xc32   : > { %v8140_v35 = vmul.f32 %v11057_v42, %v10341_v34  ;;  %v8100_v33 = vpop.f32.mrb[121].mxu1 }
 0xc33   : > { %v8138_v26 = vmul.f32 %v10341_v34, %v8100_v33  ;;  %v11058_v28 = vpop.f32.mrb[122].mxu1 }
 0xc34   : > { %v15743_v59 = vadd.f32 %v10342_v12, %v8140_v35  ;;  %v8141_v63 = vmul.f32 %v11058_v28, %v10341_v34  ;;  %v8103_v62 = vpop.f32.mrb[123].mxu1 }
 0xc35   : > { %v15745_v45 = vadd.f32 %v10342_v12, %v8138_v26  ;;  %v8139_v5 = vmul.f32 %v10341_v34, %v8103_v62  ;;  %v8294_v26 = vmul.f32 %v15734_v44, %v8281_v23  ;;  %v8310_v62 = vld [vmem:[#allocation2 + $0x1a] sm:$0xff] }
 0xc36   : > { %v10345_v53 = vmul.f32 -1.442695, %v15743_v59  ;;  %v15749_v52 = vadd.f32 %v10342_v12, %v8141_v63 }
 0xc37   : > { %v10343_v36 = vmul.f32 -1.442695, %v15745_v45  ;;  %v15755_v15 = vadd.f32 %v10342_v12, %v8139_v5  ;;  %v8302_v22 = vadd.f32 %v8294_v26, %v8265_v2 }
 0xc38   : > { %11920 = vpow2.f32 %v10345_v53  ;;  %v10346_v58 = vmul.f32 -1.442695, %v15749_v52  ;;  %v15787_v53 = vld [vmem:[%s16793_s1 + $0x7] ss:$0 sm:$0xff] }
 0xc39   : > { %11922 = vpow2.f32 %v10343_v36  ;;  %v10344_v61 = vmul.f32 -1.442695, %v15755_v15  ;;  %v11061_v25 = vpop.f32.mrb[124].mxu1  ;;  %v8323_v36 = vmul.f32 %v15741_v37, %v8310_v62 }
 0xc3a   : > { %11924 = vpow2.f32 %v10346_v58  ;;  %v8144_v8 = vmul.f32 %v11061_v25, %v10341_v34  ;;  %v8116_v43 = vpop.f32.mrb[125].mxu1  ;;  %v8339_v58 = vld [vmem:[#allocation2 + $0x1b] sm:$0xff]  ;;  %v8467_v25 = vmul.f32 %v15787_v53, %v8310_v62  ;;  %v15811_v62 = vld [vmem:[%s16793_s1 + $0x10] ss:$0 sm:$0xff] }
 0xc3b   : > { %11926 = vpow2.f32 %v10344_v61  ;;  %v8142_v18 = vmul.f32 %v10341_v34, %v8116_v43  ;;  %v11062_v47 = vpop.f32.mrb[126].mxu1  ;;  %v8496_v11 = vmul.f32 %v15792_v57, %v8339_v58  ;;  %16797 = vst [vmem:[#allocation75_spill] sm:$0xff] %v15811_v62 }
 0xc3c   : > { %v15763_v9 = vadd.f32 %v10342_v12, %v8144_v8  ;;  %v8145_v48 = vmul.f32 %v11062_v47, %v10341_v34  ;;  %v8119_v13 = vpop.f32.mrb[127].mxu1  ;;  %v8331_v47 = vadd.f32 %v8323_v36, %v8302_v22  ;;  %v8838_v22 = vld [vmem:[#allocation2 + $0x108] sm:$0xff] }
 0xc3d   : > { %v15765_v1 = vadd.f32 %v10342_v12, %v8142_v18  ;;  %v8143_v20 = vmul.f32 %v10341_v34, %v8119_v13  ;;  %v8409_v34 = vmul.f32 %v15772_v51, %v8252_v31  ;;  %v8368_v31 = vld [vmem:[#allocation2 + $0x1c] sm:$0xff]  ;;  %v8867_v36 = vld [vmem:[#allocation2 + $0x109] sm:$0xff] }
 0xc3e   : > { %v10349_v16 = vmul.f32 -1.442695, %v15763_v9  ;;  %v15769_v60 = vadd.f32 %v10342_v12, %v8145_v48  ;;  %v8352_v48 = vmul.f32 %v15752_v3, %v8339_v58 }
 0xc3f   : > { %v10347_v29 = vmul.f32 -1.442695, %v15765_v1  ;;  %v15775_v14 = vadd.f32 %v10342_v12, %v8143_v20  ;;  %v8417_v5 = vadd.f32 %v8409_v34, %v8388_v0 }
 0xc40   : > { %11928 = vpow2.f32 %v10349_v16  ;;  %v10350_v39 = vmul.f32 -1.442695, %v15769_v60  ;;  %v8360_v0 = vadd.f32 %v8352_v48, %v8331_v47  ;;  %v15847_v48 = vld [vmem:[%s16793_s1 + $0x15] ss:$0 sm:$0xff] }
 0xc41   : > { %11930 = vpow2.f32 %v10347_v29  ;;  %v10348_v19 = vmul.f32 -1.442695, %v15775_v14  ;;  %v8446_v61 = vadd.f32 %v8438_v50, %v8417_v5  ;;  %v15797_v29 = vld [vmem:[%s16793_s1 + $0x9] ss:$0 sm:$0xff]  ;;  %v15814_v5 = vld [vmem:[%s16793_s1 + $0x11] ss:$0 sm:$0xff] }
 0xc42   : > { %v11921_v42 = vpop.eup %11920  ;;  %11932 = vpow2.f32 %v10350_v39  ;;  %16798 = vst [vmem:[#allocation66_spill] sm:$0xff] %v15814_v5  ;;  %v8780_v50 = vld [vmem:[#allocation2 + $0xf3] sm:$0xff]  ;;  %16808 = vst [vmem:[#allocation61_spill] sm:$0xff] %v15847_v48 }
 0xc43   : > { %v11923_v4 = vpop.eup %11922  ;;  %v8187_v35 = vadd.f32 1.0, %v11921_v42  ;;  %11934 = vpow2.f32 %v10348_v19  ;;  %v8475_v30 = vadd.f32 %v8467_v25, %v8446_v61  ;;  %v15829_v25 = vld [vmem:[%s16793_s1 + $0x13] ss:$0 sm:$0xff] }
 0xc44   : > { %v11925_v12 = vpop.eup %11924  ;;  %v8185_v33 = vadd.f32 1.0, %v11923_v4  ;;  %v8381_v4 = vmul.f32 %v15761_v40, %v8368_v31  ;;  %16802 = vst [vmem:[#allocation51_spill] sm:$0xff] %v15829_v25 }
 0xc45   : > { %v11927_v28 = vpop.eup %11926  ;;  %11936 = vrcp.f32 %v8187_v35  ;;  %v8188_v63 = vadd.f32 1.0, %v11925_v12  ;;  %v8504_v35 = vadd.f32 %v8496_v11, %v8475_v30  ;;  %v8525_v12 = vmul.f32 %v15797_v29, %v8368_v31 }
 0xc46   : > { %11938 = vrcp.f32 %v8185_v33  ;;  %v8186_v21 = vadd.f32 1.0, %v11927_v28  ;;  %v8693_v33 = vld [vmem:[#allocation2 + $0xf0] sm:$0xff]  ;;  %v15821_v58 = vadd.f32 %v8381_v4, %v8360_v0 }
 0xc47   : > { %11940 = vrcp.f32 %v8188_v63  ;;  %v8722_v28 = vld [vmem:[#allocation2 + $0xf1] sm:$0xff] }
 0xc48   : > { %11942 = vrcp.f32 %v8186_v21  ;;  %v8751_v63 = vld [vmem:[#allocation2 + $0xf2] sm:$0xff]  ;;  %v15856_v31 = vmul.f32 %v15847_v48, %v8722_v28 }
 0xc49   : > { %v8809_v21 = vld [vmem:[#allocation2 + $0xf4] sm:$0xff] }
 0xc4a   : > { %v11929_v27 = vpop.eup %11928  ;;  %v15844_v47 = vmul.f32 %v15829_v25, %v8809_v21  ;;  %16811 = vst [vmem:[#allocation68_spill] sm:$0xff] %v15856_v31 }
 0xc4b   : > { %v11931_v8 = vpop.eup %11930  ;;  %v8191_v43 = vadd.f32 1.0, %v11929_v27  ;;  %v15832_v27 = vld [vmem:[%s16793_s1 + $0x14] ss:$0 sm:$0xff] }
 0xc4c   : > { %v11933_v56 = vpop.eup %11932  ;;  %v8189_v18 = vadd.f32 1.0, %v11931_v8  ;;  %16803 = vst [vmem:[#allocation65_spill] sm:$0xff] %v15832_v27  ;;  %v8896_v8 = vld [vmem:[#allocation2 + $0x10a] sm:$0xff]  ;;  %16807 = vst [vmem:[#allocation72_spill] sm:$0xff] %v15844_v47  ;;  %v15850_v11 = vmul.f32 %v15832_v27, %v8693_v33 }
 0xc4d   : > { %v11935_v13 = vpop.eup %11934  ;;  %11944 = vrcp.f32 %v8191_v43  ;;  %v8192_v20 = vadd.f32 1.0, %v11933_v56  ;;  %v15835_v43 = vmul.f32 %v15811_v62, %v8722_v28  ;;  %v15838_v56 = vmul.f32 %v15814_v5, %v8751_v63 }
 0xc4e   : > { %11946 = vrcp.f32 %v8189_v18  ;;  %v8190_v16 = vadd.f32 1.0, %v11935_v13  ;;  %v8925_v13 = vld [vmem:[#allocation2 + $0x10b] sm:$0xff]  ;;  %16809 = vst [vmem:[#allocation78_spill] sm:$0xff] %v15850_v11 }
 0xc4f   : > { %v11937_v39 = vpop.eup %11936  ;;  %11948 = vrcp.f32 %v8192_v20  ;;  %16804 = vst [vmem:[#allocation67_spill] sm:$0xff] %v15835_v43  ;;  %16805 = vst [vmem:[#allocation53_spill] sm:$0xff] %v15838_v56  ;;  %v8954_v20 = vld [vmem:[#allocation2 + $0x10c] sm:$0xff] }
 0xc50   : > { %v11939_v19 = vpop.eup %11938  ;;  %v8211_v23 = vmul.f32 %v11937_v39, %v15743_v59  ;;  %11950 = vrcp.f32 %v8190_v16  ;;  %v15806_v59 = vld [vmem:[%s16793_s1 + $0xf] ss:$0 sm:$0xff]  ;;  %v15853_v16 = vmul.f32 %v15832_v27, %v8838_v22  ;;  %v15859_v39 = vmul.f32 %v15847_v48, %v8867_v36 }
 0xc51   : > { %v11941_v34 = vpop.eup %11940  ;;  %v8209_v42 = vmul.f32 %v11939_v19, %v15745_v45  ;;  %16796 = vst [vmem:[#allocation50_spill] sm:$0xff] %v15806_v59  ;;  %v15826_v61 = vmul.f32 %v15806_v59, %v8693_v33  ;;  %v15862_v19 = vld [vmem:[%s16793_s1 + $0x16] ss:$0 sm:$0xff] }
 0xc52   : > { %v11943_v2 = vpop.eup %11942  ;;  %v8212_v26 = vmul.f32 %v11941_v34, %v15749_v52  ;;  %8245 = vst.msk [vmem:[#allocation2 + $0x62] sm:$0xff] %vm8217_vm10, %v8211_v23  ;;  %v15818_v52 = vld [vmem:[%s16793_s1 + $0x12] ss:$0 sm:$0xff]  ;;  %16810 = vst [vmem:[#allocation71_spill] sm:$0xff] %v15853_v16  ;;  %v15865_v23 = vld [vmem:[%s16793_s1 + $0x17] ss:$0 sm:$0xff]  ;;  %v15872_v4 = vmul.f32 %v15862_v19, %v8896_v8 }
 0xc53   : > { %v8210_v45 = vmul.f32 %v11943_v2, %v15755_v15  ;;  %8243 = vst.msk [vmem:[#allocation2 + $0x32] sm:$0xff] %vm8217_vm10, %v8209_v42  ;;  %16799 = vst [vmem:[#allocation56_spill] sm:$0xff] %v15818_v52  ;;  %v15823_v15 = vadd.f32 %v8525_v12, %v8504_v35  ;;  %v15841_v18 = vmul.f32 %v15818_v52, %v8780_v50  ;;  %v15878_v12 = vld [vmem:[%s16793_s1 + $0x18] ss:$0 sm:$0xff] }
 0xc54   : > { %8246 = vst.msk [vmem:[#allocation2 + $0x7a] sm:$0xff] %vm8217_vm10, %v8212_v26  ;;  %16801 = vst [vmem:[#allocation69_spill] sm:$0xff] %v15826_v61  ;;  %v15869_v42 = vmul.f32 %v15862_v19, %v8751_v63  ;;  %v15875_v35 = vmul.f32 %v15865_v23, %v8780_v50  ;;  %v15891_v63 = vmul.f32 %v15878_v12, %v8809_v21 }
 0xc55   : > { %8244 = vst.msk [vmem:[#allocation2 + $0x4a] sm:$0xff] %vm8217_vm10, %v8210_v45  ;;  %16800 = vst [vmem:[#allocation79_spill] sm:$0xff] %v15823_v15  ;;  %v15894_v50 = vmul.f32 %v15878_v12, %v8954_v20 }
 0xc56   : > { %16806 = vst [vmem:[#allocation77_spill] sm:$0xff] %v15841_v18  ;;  %16812 = vst [vmem:[#allocation62_spill] sm:$0xff] %v15859_v39 }
 0xc57   : > { %v11945_v30 = vpop.eup %11944  ;;  %16813 = vst [vmem:[#allocation59_spill] sm:$0xff] %v15862_v19  ;;  %16814 = vst [vmem:[#allocation70_spill] sm:$0xff] %v15865_v23 }
 0xc58   : > { %v11947_v0 = vpop.eup %11946  ;;  %v8215_v34 = vmul.f32 %v11945_v30, %v15763_v9  ;;  %16815 = vst [vmem:[#allocation54_spill] sm:$0xff] %v15869_v42  ;;  %16816 = vst [vmem:[#allocation46_spill] sm:$0xff] %v15872_v4  ;;  %v15888_v9 = vmul.f32 %v15865_v23, %v8925_v13 }
 0xc59   : > { %16817 = vst [vmem:[#allocation55_spill] sm:$0xff] %v15875_v35  ;;  %16818 = vst [vmem:[#allocation47_spill] sm:$0xff] %v15878_v12  ;;  %v11949_v33 = vpop.eup %11948  ;;  %v8213_v2 = vmul.f32 %v11947_v0, %v15765_v1  ;;  %v15881_v26 = vld [vmem:[#allocation2 + $0x60] sm:$0xff] }
 0xc5a   : > { %16819 = vst [vmem:[#allocation80_spill] sm:$0xff] %v15881_v26  ;;  %v15883_v28 = vld [vmem:[#allocation2 + $0x61] sm:$0xff]  ;;  %16820 = vst [vmem:[#allocation52_spill] sm:$0xff] %v15888_v9  ;;  %v11951_v22 = vpop.eup %11950  ;;  %v8216_v36 = vmul.f32 %v11949_v33, %v15769_v60  ;;  %v15898_v1 = vld [vmem:[#allocation2 + $0x30] sm:$0xff]  ;;  %v8268_v8 = vmul.f32 %v15731_v38, %v15881_v26 }
 0xc5b   : > { %v15885_v45 = vld [vmem:[#allocation2 + $0x62] sm:$0xff]  ;;  %16821 = vst [vmem:[#allocation57_spill] sm:$0xff] %v15891_v63  ;;  %16822 = vst [vmem:[#allocation49_spill] sm:$0xff] %v15894_v50  ;;  %v15902_v30 = vld [vmem:[#allocation2 + $0x31] sm:$0xff]  ;;  %v8297_v13 = vmul.f32 %v15734_v44, %v15883_v28  ;;  %v8214_v0 = vmul.f32 %v11951_v22, %v15775_v14  ;;  %v8410_v16 = vmul.f32 %v15772_v51, %v15898_v1 }
 0xc5c   : > { %8249 = vst.msk [vmem:[#allocation2 + $0xc2] sm:$0xff] %vm8217_vm10, %v8215_v34  ;;  %v15906_v21 = vld [vmem:[#allocation2 + $0x32] sm:$0xff]  ;;  %v8326_v20 = vmul.f32 %v15741_v37, %v15885_v45  ;;  %8247 = vst.msk [vmem:[#allocation2 + $0x92] sm:$0xff] %vm8217_vm10, %v8213_v2  ;;  %v8266_v34 = vmul.f32 %v15731_v38, %v15898_v1  ;;  %v8295_v54 = vmul.f32 %v15734_v44, %v15902_v30  ;;  %v15920_v6 = vld [vmem:[#allocation2 + $0x7a] sm:$0xff] }
 0xc5d   : > { %v15912_v60 = vld [vmem:[#allocation2 + $0x78] sm:$0xff]  ;;  %v8324_v55 = vmul.f32 %v15741_v37, %v15906_v21  ;;  %8250 = vst.msk [vmem:[#allocation2 + $0xda] sm:$0xff] %vm8217_vm10, %v8216_v36  ;;  %v15925_v14 = vld [vmem:[#allocation2 + $0x48] sm:$0xff]  ;;  %v8305_v17 = vadd.f32 %v8297_v13, %v8268_v8  ;;  %v8327_v24 = vmul.f32 %v15741_v37, %v15920_v6  ;;  %8248 = vst.msk [vmem:[#allocation2 + $0xaa] sm:$0xff] %vm8217_vm10, %v8214_v0 }
 0xc5e   : > { %v15916_v33 = vld [vmem:[#allocation2 + $0x79] sm:$0xff]  ;;  %16823 = vst [vmem:[#allocation81_spill] sm:$0xff] %v15925_v14  ;;  %v8269_v2 = vmul.f32 %v15731_v38, %v15912_v60  ;;  %v15929_v22 = vld [vmem:[#allocation2 + $0x49] sm:$0xff]  ;;  %v8267_v36 = vmul.f32 %v15731_v38, %v15925_v14  ;;  %v8303_v7 = vadd.f32 %v8295_v54, %v8266_v34  ;;  %v8411_v27 = vmul.f32 %v15772_v51, %v15925_v14 }
 0xc5f   : > { %v8298_v10 = vmul.f32 %v15734_v44, %v15916_v33  ;;  %v15933_v41 = vld [vmem:[#allocation2 + $0x4a] sm:$0xff]  ;;  %v8296_v49 = vmul.f32 %v15734_v44, %v15929_v22  ;;  %v15944_v50 = vld [vmem:[#allocation2 + $0x33] sm:$0xff]  ;;  %v8334_v12 = vadd.f32 %v8326_v20, %v8305_v17  ;;  %v15950_v9 = vld [vmem:[#allocation2 + $0x7b] sm:$0xff] }
 0xc60   : > { %v8325_v46 = vmul.f32 %v15741_v37, %v15933_v41  ;;  %v15946_v8 = vld [vmem:[#allocation2 + $0x4b] sm:$0xff]  ;;  %v15948_v13 = vld [vmem:[#allocation2 + $0x63] sm:$0xff]  ;;  %v8353_v0 = vmul.f32 %v15752_v3, %v15944_v50  ;;  %v15956_v54 = vld [vmem:[#allocation2 + $0x34] sm:$0xff]  ;;  %v8332_v4 = vadd.f32 %v8324_v55, %v8303_v7  ;;  %v8356_v17 = vmul.f32 %v15752_v3, %v15950_v9 }
 0xc61   : > { %v8306_v63 = vadd.f32 %v8298_v10, %v8269_v2  ;;  %v8354_v35 = vmul.f32 %v15752_v3, %v15946_v8  ;;  %v15958_v34 = vld [vmem:[#allocation2 + $0x4c] sm:$0xff]  ;;  %v8304_v23 = vadd.f32 %v8296_v49, %v8267_v36  ;;  %v8355_v42 = vmul.f32 %v15752_v3, %v15948_v13  ;;  %v15964_v10 = vld [vmem:[#allocation2 + $0x64] sm:$0xff]  ;;  %v15966_v20 = vld [vmem:[#allocation2 + $0x7c] sm:$0xff] }
 0xc62   : > { %v8382_v19 = vmul.f32 %v15761_v40, %v15956_v54  ;;  %v8383_v39 = vmul.f32 %v15761_v40, %v15958_v34  ;;  %v8384_v7 = vmul.f32 %v15761_v40, %v15964_v10  ;;  %v8361_v55 = vadd.f32 %v8353_v0, %v8332_v4 }
 0xc63   : > { %v8335_v2 = vadd.f32 %v8327_v24, %v8306_v63  ;;  %v8333_v49 = vadd.f32 %v8325_v46, %v8304_v23  ;;  %v8363_v36 = vadd.f32 %v8355_v42, %v8334_v12  ;;  %v8385_v31 = vmul.f32 %v15761_v40, %v15966_v20  ;;  %v15976_v48 = vld [vmem:[#allocation2 + $0x90] sm:$0xff]  ;;  %v16018_v15 = vld [vmem:[#allocation2 + $0xc0] sm:$0xff] }
 0xc64   : > { %v15978_v11 = vld [vmem:[#allocation2 + $0x91] sm:$0xff]  ;;  %v8412_v46 = vmul.f32 %v15772_v51, %v15881_v26  ;;  %v8270_v23 = vmul.f32 %v15731_v38, %v15976_v48  ;;  %v16000_v47 = vld [vmem:[#allocation2 + $0xa9] sm:$0xff]  ;;  %v8390_v56 = vadd.f32 %v8382_v19, %v8361_v55  ;;  %16824 = vst [vmem:[#allocation82_spill] sm:$0xff] %v16018_v15  ;;  %v8416_v26 = vmul.f32 %v15772_v51, %v16018_v15 }
 0xc65   : > { %v15980_v24 = vld [vmem:[#allocation2 + $0x92] sm:$0xff]  ;;  %v8364_v63 = vadd.f32 %v8356_v17, %v8335_v2  ;;  %v8299_v42 = vmul.f32 %v15734_v44, %v15978_v11  ;;  %v8362_v0 = vadd.f32 %v8354_v35, %v8333_v49  ;;  %v15998_v2 = vld [vmem:[#allocation2 + $0xa8] sm:$0xff]  ;;  %v8392_v5 = vadd.f32 %v8384_v7, %v8363_v36 }
 0xc66   : > { %v8328_v4 = vmul.f32 %v15741_v37, %v15980_v24  ;;  %v15994_v12 = vld [vmem:[#allocation2 + $0x93] sm:$0xff]  ;;  %v16002_v25 = vld [vmem:[#allocation2 + $0xaa] sm:$0xff]  ;;  %v8271_v43 = vmul.f32 %v15731_v38, %v15998_v2  ;;  %v8300_v35 = vmul.f32 %v15734_v44, %v16000_v47  ;;  %v8419_v14 = vadd.f32 %v8411_v27, %v8390_v56 }
 0xc67   : > { %v15996_v17 = vld [vmem:[#allocation2 + $0x94] sm:$0xff]  ;;  %v8357_v18 = vmul.f32 %v15752_v3, %v15994_v12  ;;  %v8307_v49 = vadd.f32 %v8299_v42, %v8270_v23  ;;  %v8329_v62 = vmul.f32 %v15741_v37, %v16002_v25  ;;  %v16014_v61 = vld [vmem:[#allocation2 + $0xab] sm:$0xff]  ;;  %v8391_v38 = vadd.f32 %v8383_v39, %v8362_v0 }
 0xc68   : > { %v8386_v52 = vmul.f32 %v15761_v40, %v15996_v17  ;;  %v16016_v59 = vld [vmem:[#allocation2 + $0xac] sm:$0xff]  ;;  %v8358_v19 = vmul.f32 %v15752_v3, %v16014_v61  ;;  %v8393_v55 = vadd.f32 %v8385_v31, %v8364_v63  ;;  %v8308_v36 = vadd.f32 %v8300_v35, %v8271_v43  ;;  %v16033_v63 = vld [vmem:[#allocation2 + $0xc1] sm:$0xff] }
 0xc69   : > { %v8387_v7 = vmul.f32 %v15761_v40, %v16016_v59  ;;  %v8336_v44 = vadd.f32 %v8328_v4, %v8307_v49  ;;  %v8413_v23 = vmul.f32 %v15772_v51, %v15912_v60  ;;  %v8414_v37 = vmul.f32 %v15772_v51, %v15976_v48 }
 0xc6a   : > { %v8415_v42 = vmul.f32 %v15772_v51, %v15998_v2  ;;  %v8418_v3 = vadd.f32 %v8410_v16, %v15821_v58  ;;  %v8337_v40 = vadd.f32 %v8329_v62, %v8308_v36  ;;  %v8420_v31 = vadd.f32 %v8412_v46, %v8391_v38 }
 0xc6b   : > { %v8365_v39 = vadd.f32 %v8357_v18, %v8336_v44  ;;  %v8421_v43 = vadd.f32 %v8413_v23, %v8392_v5  ;;  %v8422_v4 = vadd.f32 %v8414_v37, %v8393_v55  ;;  %v8439_v0 = vmul.f32 %v15781_v32, %v15902_v30 }
 0xc6c   : > { %v8440_v35 = vmul.f32 %v15781_v32, %v15929_v22  ;;  %v8441_v49 = vmul.f32 %v15781_v32, %v15883_v28  ;;  %v8366_v51 = vadd.f32 %v8358_v19, %v8337_v40  ;;  %v8442_v62 = vmul.f32 %v15781_v32, %v15916_v33  ;;  %v16049_v19 = vld [vmem:[#allocation2 + $0xc2] sm:$0xff] }
 0xc6d   : > { %v8394_v15 = vadd.f32 %v8386_v52, %v8365_v39  ;;  %v8443_v5 = vmul.f32 %v15781_v32, %v15978_v11  ;;  %v8444_v58 = vmul.f32 %v15781_v32, %v16000_v47  ;;  %v8445_v27 = vmul.f32 %v15781_v32, %v16033_v63 }
 0xc6e   : > { %v8447_v56 = vadd.f32 %v8439_v0, %v8418_v3  ;;  %v8448_v18 = vadd.f32 %v8440_v35, %v8419_v14  ;;  %v8395_v16 = vadd.f32 %v8387_v7, %v8366_v51  ;;  %v8449_v38 = vadd.f32 %v8441_v49, %v8420_v31 }
 0xc6f   : > { %v8423_v46 = vadd.f32 %v8415_v42, %v8394_v15  ;;  %v8450_v55 = vadd.f32 %v8442_v62, %v8421_v43  ;;  %v8451_v52 = vadd.f32 %v8443_v5, %v8422_v4  ;;  %v8468_v36 = vmul.f32 %v15787_v53, %v15906_v21 }
 0xc70   : > { %v8469_v44 = vmul.f32 %v15787_v53, %v15933_v41  ;;  %v8470_v23 = vmul.f32 %v15787_v53, %v15885_v45  ;;  %v8424_v37 = vadd.f32 %v8416_v26, %v8395_v16  ;;  %v8471_v14 = vmul.f32 %v15787_v53, %v15920_v6  ;;  %v16065_v26 = vld [vmem:[#allocation2 + $0xc3] sm:$0xff] }
 0xc71   : > { %v8452_v32 = vadd.f32 %v8444_v58, %v8423_v46  ;;  %v8472_v15 = vmul.f32 %v15787_v53, %v15980_v24  ;;  %v8473_v7 = vmul.f32 %v15787_v53, %v16002_v25  ;;  %v8474_v42 = vmul.f32 %v15787_v53, %v16049_v19  ;;  %v16081_v46 = vld [vmem:[#allocation2 + $0xc4] sm:$0xff] }
 0xc72   : > { %v8476_v3 = vadd.f32 %v8468_v36, %v8447_v56  ;;  %v8477_v40 = vadd.f32 %v8469_v44, %v8448_v18  ;;  %v8453_v39 = vadd.f32 %v8445_v27, %v8424_v37  ;;  %v8478_v31 = vadd.f32 %v8470_v23, %v8449_v38  ;;  %v10361_v44 = vld [vmem:[%s16793_s1 + $0xa] ss:$0 sm:$0xff] }
 0xc73   : > { %v8479_v43 = vadd.f32 %v8471_v14, %v8450_v55  ;;  %v8480_v4 = vadd.f32 %v8472_v15, %v8451_v52  ;;  %v8481_v0 = vadd.f32 %v8473_v7, %v8452_v32  ;;  %v8497_v35 = vmul.f32 %v15792_v57, %v15944_v50 }
 0xc74   : > { %v8498_v49 = vmul.f32 %v15792_v57, %v15946_v8  ;;  %v8499_v51 = vmul.f32 %v15792_v57, %v15948_v13  ;;  %v8482_v53 = vadd.f32 %v8474_v42, %v8453_v39  ;;  %v8500_v62 = vmul.f32 %v15792_v57, %v15950_v9 }
 0xc75   : > { %v8501_v5 = vmul.f32 %v15792_v57, %v15994_v12  ;;  %v8502_v58 = vmul.f32 %v15792_v57, %v16014_v61  ;;  %v8503_v27 = vmul.f32 %v15792_v57, %v16065_v26  ;;  %v8505_v56 = vadd.f32 %v8497_v35, %v8476_v3 }
 0xc76   : > { %v8506_v18 = vadd.f32 %v8498_v49, %v8477_v40  ;;  %v8507_v16 = vadd.f32 %v8499_v51, %v8478_v31  ;;  %v8508_v38 = vadd.f32 %v8500_v62, %v8479_v43  ;;  %v8526_v36 = vmul.f32 %v15797_v29, %v15956_v54  ;;  %v16098_v31 = vld [vmem:[#allocation2 + $0xd8] sm:$0xff]  ;;  %v16826_v49 = vld [vmem:[#allocation81_spill] sm:$0xff] }
 0xc77   : > { %v8509_v55 = vadd.f32 %v8501_v5, %v8480_v4  ;;  %v8510_v52 = vadd.f32 %v8502_v58, %v8481_v0  ;;  %v8511_v23 = vadd.f32 %v8503_v27, %v8482_v53  ;;  %v8527_v37 = vmul.f32 %v15797_v29, %v15958_v34  ;;  %16825 = vst [vmem:[#allocation83_spill] sm:$0xff] %v16098_v31  ;;  %v16827_v53 = vld [vmem:[#allocation80_spill] sm:$0xff]  ;;  %v10362_v27 = vld [vmem:[%s16793_s1 + $0xb] ss:$0 sm:$0xff] }
 0xc78   : > { %v8528_v32 = vmul.f32 %v15797_v29, %v15964_v10  ;;  %v8529_v57 = vmul.f32 %v15797_v29, %v15966_v20  ;;  %v8530_v14 = vmul.f32 %v15797_v29, %v15996_v17  ;;  %v8531_v15 = vmul.f32 %v15797_v29, %v16016_v59 }
 0xc79   : > { %v8532_v7 = vmul.f32 %v15797_v29, %v16081_v46  ;;  %v8534_v42 = vadd.f32 %v8526_v36, %v8505_v56  ;;  %v8535_v3 = vadd.f32 %v8527_v37, %v8506_v18  ;;  %v8554_v43 = vmul.f32 %v10361_v44, %v15898_v1  ;;  %v16828_v56 = vld [vmem:[#allocation82_spill] sm:$0xff] }
 0xc7a   : > { %v8536_v40 = vadd.f32 %v8528_v32, %v8507_v16  ;;  %v8537_v39 = vadd.f32 %v8529_v57, %v8508_v38  ;;  %v8538_v4 = vadd.f32 %v8530_v14, %v8509_v55  ;;  %v8539_v0 = vadd.f32 %v8531_v15, %v8510_v52  ;;  %v16829_v38 = vld [vmem:[#allocation79_spill] sm:$0xff] }
 0xc7b   : > { %v8540_v35 = vadd.f32 %v8532_v7, %v8511_v23  ;;  %v8555_v51 = vmul.f32 %v10361_v44, %v16826_v49  ;;  %v8556_v62 = vmul.f32 %v10361_v44, %v16827_v53  ;;  %v8557_v5 = vmul.f32 %v10361_v44, %v15912_v60  ;;  %v16110_v32 = vld [vmem:[#allocation2 + $0xd9] sm:$0xff] }
 0xc7c   : > { %v8558_v58 = vmul.f32 %v10361_v44, %v15976_v48  ;;  %v8559_v29 = vmul.f32 %v10361_v44, %v15998_v2  ;;  %v8560_v18 = vmul.f32 %v10361_v44, %v16828_v56  ;;  %v8561_v16 = vmul.f32 %v10361_v44, %v16098_v31 }
 0xc7d   : > { %v8562_v1 = vadd.f32 %v8554_v43, %v16829_v38  ;;  %v8563_v55 = vadd.f32 %v8555_v51, %v8534_v42  ;;  %v8564_v52 = vadd.f32 %v8556_v62, %v8535_v3  ;;  %v8565_v36 = vadd.f32 %v8557_v5, %v8536_v40  ;;  %v10363_v3 = vld [vmem:[%s16793_s1 + $0xc] ss:$0 sm:$0xff]  ;;  %v16121_v62 = vld [vmem:[#allocation2 + $0xda] sm:$0xff] }
 0xc7e   : > { %v8566_v23 = vadd.f32 %v8558_v58, %v8537_v39  ;;  %v8567_v37 = vadd.f32 %v8559_v29, %v8538_v4  ;;  %v8568_v57 = vadd.f32 %v8560_v18, %v8539_v0  ;;  %v8569_v14 = vadd.f32 %v8561_v16, %v8540_v35 }
 0xc7f   : > { %v8583_v15 = vmul.f32 %v10362_v27, %v15902_v30  ;;  %v8584_v7 = vmul.f32 %v10362_v27, %v15929_v22  ;;  %v8585_v56 = vmul.f32 %v10362_v27, %v15883_v28  ;;  %v8586_v44 = vmul.f32 %v10362_v27, %v15916_v33 }
 0xc80   : > { %v8587_v31 = vmul.f32 %v10362_v27, %v15978_v11  ;;  %v8588_v42 = vmul.f32 %v10362_v27, %v16000_v47  ;;  %v8589_v40 = vmul.f32 %v10362_v27, %v16033_v63  ;;  %v8590_v39 = vmul.f32 %v10362_v27, %v16110_v32 }
 0xc81   : > { %v8591_v43 = vadd.f32 %v8583_v15, %v8562_v1  ;;  %v8592_v4 = vadd.f32 %v8584_v7, %v8563_v55  ;;  %v8593_v0 = vadd.f32 %v8585_v56, %v8564_v52  ;;  %v8594_v30 = vadd.f32 %v8586_v44, %v8565_v36  ;;  %v10364_v56 = vld [vmem:[%s16793_s1 + $0xd] ss:$0 sm:$0xff] }
 0xc82   : > { %v8595_v35 = vadd.f32 %v8587_v31, %v8566_v23  ;;  %v8596_v51 = vadd.f32 %v8588_v42, %v8567_v37  ;;  %v8597_v5 = vadd.f32 %v8589_v40, %v8568_v57  ;;  %v8598_v58 = vadd.f32 %v8590_v39, %v8569_v14  ;;  %v16132_v14 = vld [vmem:[#allocation2 + $0xdb] sm:$0xff] }
 0xc83   : > { %v8612_v29 = vmul.f32 %v10363_v3, %v15906_v21  ;;  %v8613_v18 = vmul.f32 %v10363_v3, %v15933_v41  ;;  %v8614_v16 = vmul.f32 %v10363_v3, %v15885_v45  ;;  %v8615_v38 = vmul.f32 %v10363_v3, %v15920_v6 }
 0xc84   : > { %v8616_v27 = vmul.f32 %v10363_v3, %v15980_v24  ;;  %v8617_v1 = vmul.f32 %v10363_v3, %v16002_v25  ;;  %v8618_v31 = vmul.f32 %v10363_v3, %v16049_v19  ;;  %v8619_v55 = vmul.f32 %v10363_v3, %v16121_v62 }
 0xc85   : > { %v8620_v52 = vadd.f32 %v8612_v29, %v8591_v43  ;;  %v8621_v36 = vadd.f32 %v8613_v18, %v8592_v4  ;;  %v8622_v23 = vadd.f32 %v8614_v16, %v8593_v0  ;;  %v8623_v21 = vadd.f32 %v8615_v38, %v8594_v30  ;;  %v10365_v4 = vld [vmem:[%s16793_s1 + $0xe] ss:$0 sm:$0xff]  ;;  %v16143_v18 = vld [vmem:[#allocation2 + $0xdc] sm:$0xff]  ;;  %s16862_s1 = sld [smem:[#allocation40_spill]] }
 0xc86   : > { %v8624_v37 = vadd.f32 %v8616_v27, %v8595_v35  ;;  %v8625_v57 = vadd.f32 %v8617_v1, %v8596_v51  ;;  %v8626_v15 = vadd.f32 %v8618_v31, %v8597_v5  ;;  %v8627_v7 = vadd.f32 %v8619_v55, %v8598_v58 }
 0xc87   : > { %v8641_v44 = vmul.f32 %v10364_v56, %v15944_v50  ;;  %v8642_v42 = vmul.f32 %v10364_v56, %v15946_v8  ;;  %v8643_v40 = vmul.f32 %v10364_v56, %v15948_v13  ;;  %v8644_v39 = vmul.f32 %v10364_v56, %v15950_v9 }
 0xc88   : > { %v8645_v3 = vmul.f32 %v10364_v56, %v15994_v12  ;;  %v8646_v43 = vmul.f32 %v10364_v56, %v16014_v61  ;;  %v8647_v0 = vmul.f32 %v10364_v56, %v16065_v26  ;;  %v8648_v30 = vmul.f32 %v10364_v56, %v16132_v14 }
 0xc89   : > { %v8649_v35 = vadd.f32 %v8641_v44, %v8620_v52  ;;  %v8650_v51 = vadd.f32 %v8642_v42, %v8621_v36  ;;  %v8651_v5 = vadd.f32 %v8643_v40, %v8622_v23  ;;  %v8652_v58 = vadd.f32 %v8644_v39, %v8623_v21  ;;  %v16830_v40 = vld [vmem:[#allocation50_spill] sm:$0xff] }
 0xc8a   : > { %v8653_v50 = vadd.f32 %v8645_v3, %v8624_v37  ;;  %v8654_v29 = vadd.f32 %v8646_v43, %v8625_v57  ;;  %v8655_v16 = vadd.f32 %v8647_v0, %v8626_v15  ;;  %v8656_v38 = vadd.f32 %v8648_v30, %v8627_v7  ;;  %v16831_v30 = vld [vmem:[#allocation82_spill] sm:$0xff] }
 0xc8b   : > { %v8670_v27 = vmul.f32 %v10365_v4, %v15956_v54  ;;  %v8671_v1 = vmul.f32 %v10365_v4, %v15958_v34  ;;  %v8672_v31 = vmul.f32 %v10365_v4, %v15964_v10  ;;  %v8673_v55 = vmul.f32 %v10365_v4, %v15966_v20 }
 0xc8c   : > { %v8674_v56 = vmul.f32 %v10365_v4, %v15996_v17  ;;  %v8675_v52 = vmul.f32 %v10365_v4, %v16016_v59  ;;  %v8676_v36 = vmul.f32 %v10365_v4, %v16081_v46  ;;  %v8677_v23 = vmul.f32 %v10365_v4, %v16143_v18 }
 0xc8d   : > { %v8678_v21 = vadd.f32 %v8670_v27, %v8649_v35  ;;  %v8679_v37 = vadd.f32 %v8671_v1, %v8650_v51  ;;  %v8680_v57 = vadd.f32 %v8672_v31, %v8651_v5  ;;  %v8681_v15 = vadd.f32 %v8673_v55, %v8652_v58  ;;  %v16832_v51 = vld [vmem:[#allocation83_spill] sm:$0xff] }
 0xc8e   : > { %v8682_v7 = vadd.f32 %v8674_v56, %v8653_v50  ;;  %v8683_v54 = vadd.f32 %v8675_v52, %v8654_v29  ;;  %v8684_v44 = vadd.f32 %v8676_v36, %v8655_v16  ;;  %v8685_v42 = vadd.f32 %v8677_v23, %v8656_v38  ;;  %v16833_v50 = vld [vmem:[#allocation69_spill] sm:$0xff]  ;;  %v16834_v55 = vld [vmem:[#allocation75_spill] sm:$0xff] }
 0xc8f   : > { %v8699_v39 = vmul.f32 %v16830_v40, %v16826_v49  ;;  %v8700_v3 = vmul.f32 %v16830_v40, %v16827_v53  ;;  %v8701_v43 = vmul.f32 %v16830_v40, %v15912_v60  ;;  %v8702_v4 = vmul.f32 %v16830_v40, %v15976_v48 }
 0xc90   : > { %v8703_v0 = vmul.f32 %v16830_v40, %v15998_v2  ;;  %v8704_v35 = vmul.f32 %v16830_v40, %v16831_v30  ;;  %v8705_v5 = vmul.f32 %v16830_v40, %v16832_v51  ;;  %v8714_v29 = vadd.f32 %v16833_v50, %v8685_v42 }
 0xc91   : > { %v8707_v58 = vadd.f32 %v8699_v39, %v8678_v21  ;;  %v8708_v49 = vadd.f32 %v8700_v3, %v8679_v37  ;;  %v8709_v16 = vadd.f32 %v8701_v43, %v8680_v57  ;;  %v8710_v38 = vadd.f32 %v8702_v4, %v8681_v15  ;;  %v16836_v43 = vld [vmem:[#allocation66_spill] sm:$0xff] }
 0xc92   : > { %v8711_v27 = vadd.f32 %v8703_v0, %v8682_v7  ;;  %v8712_v1 = vadd.f32 %v8704_v35, %v8683_v54  ;;  %v8713_v31 = vadd.f32 %v8705_v5, %v8684_v44  ;;  %v8728_v56 = vmul.f32 %v16834_v55, %v15929_v22  ;;  %v16835_v54 = vld [vmem:[#allocation67_spill] sm:$0xff] }
 0xc93   : > { %v8729_v52 = vmul.f32 %v16834_v55, %v15883_v28  ;;  %v8730_v36 = vmul.f32 %v16834_v55, %v15916_v33  ;;  %v8731_v23 = vmul.f32 %v16834_v55, %v15978_v11  ;;  %v8732_v21 = vmul.f32 %v16834_v55, %v16000_v47 }
 0xc94   : > { %v8733_v37 = vmul.f32 %v16834_v55, %v16033_v63  ;;  %v8734_v57 = vmul.f32 %v16834_v55, %v16110_v32  ;;  %v8736_v15 = vadd.f32 %v8728_v56, %v8707_v58  ;;  %v8743_v44 = vadd.f32 %v16835_v54, %v8714_v29  ;;  %v16837_v29 = vld [vmem:[#allocation53_spill] sm:$0xff] }
 0xc95   : > { %v8737_v22 = vadd.f32 %v8729_v52, %v8708_v49  ;;  %v8738_v7 = vadd.f32 %v8730_v36, %v8709_v16  ;;  %v8739_v42 = vadd.f32 %v8731_v23, %v8710_v38  ;;  %v8740_v40 = vadd.f32 %v8732_v21, %v8711_v27  ;;  %v16838_v52 = vld [vmem:[#allocation56_spill] sm:$0xff] }
 0xc96   : > { %v8741_v39 = vadd.f32 %v8733_v37, %v8712_v1  ;;  %v8742_v3 = vadd.f32 %v8734_v57, %v8713_v31  ;;  %v8757_v4 = vmul.f32 %v16836_v43, %v15933_v41  ;;  %v8758_v0 = vmul.f32 %v16836_v43, %v15885_v45 }
 0xc97   : > { %v8759_v35 = vmul.f32 %v16836_v43, %v15920_v6  ;;  %v8760_v5 = vmul.f32 %v16836_v43, %v15980_v24  ;;  %v8761_v58 = vmul.f32 %v16836_v43, %v16002_v25  ;;  %v8762_v49 = vmul.f32 %v16836_v43, %v16049_v19 }
 0xc98   : > { %v8763_v50 = vmul.f32 %v16836_v43, %v16121_v62  ;;  %v8772_v41 = vadd.f32 %v16837_v29, %v8743_v44  ;;  %v8765_v16 = vadd.f32 %v8757_v4, %v8736_v15  ;;  %v8766_v38 = vadd.f32 %v8758_v0, %v8737_v22  ;;  %v16840_v4 = vld [vmem:[#allocation51_spill] sm:$0xff] }
 0xc99   : > { %v8767_v27 = vadd.f32 %v8759_v35, %v8738_v7  ;;  %v8768_v1 = vadd.f32 %v8760_v5, %v8739_v42  ;;  %v8769_v31 = vadd.f32 %v8761_v58, %v8740_v40  ;;  %v8770_v55 = vadd.f32 %v8762_v49, %v8741_v39 }
 0xc9a   : > { %v8771_v56 = vadd.f32 %v8763_v50, %v8742_v3  ;;  %v8786_v36 = vmul.f32 %v16838_v52, %v15946_v8  ;;  %v8787_v23 = vmul.f32 %v16838_v52, %v15948_v13  ;;  %v8788_v21 = vmul.f32 %v16838_v52, %v15950_v9  ;;  %v16839_v8 = vld [vmem:[#allocation77_spill] sm:$0xff] }
 0xc9b   : > { %v8789_v37 = vmul.f32 %v16838_v52, %v15994_v12  ;;  %v8790_v57 = vmul.f32 %v16838_v52, %v16014_v61  ;;  %v8791_v15 = vmul.f32 %v16838_v52, %v16065_v26  ;;  %v8792_v22 = vmul.f32 %v16838_v52, %v16132_v14  ;;  %v16842_v52 = vld [vmem:[#allocation65_spill] sm:$0xff] }
 0xc9c   : > { %v8794_v7 = vadd.f32 %v8786_v36, %v8765_v16  ;;  %v8801_v54 = vadd.f32 %v16839_v8, %v8772_v41  ;;  %v8795_v44 = vadd.f32 %v8787_v23, %v8766_v38  ;;  %v8796_v42 = vadd.f32 %v8788_v21, %v8767_v27  ;;  %v16841_v16 = vld [vmem:[#allocation72_spill] sm:$0xff] }
 0xc9d   : > { %v8797_v40 = vadd.f32 %v8789_v37, %v8768_v1  ;;  %v8798_v39 = vadd.f32 %v8790_v57, %v8769_v31  ;;  %v8799_v3 = vadd.f32 %v8791_v15, %v8770_v55  ;;  %v8800_v43 = vadd.f32 %v8792_v22, %v8771_v56  ;;  %v16843_v22 = vld [vmem:[#allocation71_spill] sm:$0xff] }
 0xc9e   : > { %v8815_v0 = vmul.f32 %v16840_v4, %v15958_v34  ;;  %v8816_v35 = vmul.f32 %v16840_v4, %v15964_v10  ;;  %v8817_v5 = vmul.f32 %v16840_v4, %v15966_v20  ;;  %v8818_v58 = vmul.f32 %v16840_v4, %v15996_v17 }
 0xc9f   : > { %v8819_v49 = vmul.f32 %v16840_v4, %v16016_v59  ;;  %v8820_v50 = vmul.f32 %v16840_v4, %v16081_v46  ;;  %v8821_v29 = vmul.f32 %v16840_v4, %v16143_v18  ;;  %v8830_v38 = vadd.f32 %v16841_v16, %v8801_v54 }
 0xca0   : > { %v8823_v41 = vadd.f32 %v8815_v0, %v8794_v7  ;;  %v8824_v34 = vadd.f32 %v8816_v35, %v8795_v44  ;;  %v8825_v27 = vadd.f32 %v8817_v5, %v8796_v42  ;;  %v8826_v1 = vadd.f32 %v8818_v58, %v8797_v40  ;;  %v16844_v44 = vld [vmem:[#allocation78_spill] sm:$0xff]  ;;  %v16846_v35 = vld [vmem:[#allocation68_spill] sm:$0xff] }
 0xca1   : > { %v8827_v31 = vadd.f32 %v8819_v49, %v8798_v39  ;;  %v8828_v55 = vadd.f32 %v8820_v50, %v8799_v3  ;;  %v8829_v56 = vadd.f32 %v8821_v29, %v8800_v43  ;;  %v8844_v36 = vmul.f32 %v16842_v52, %v16827_v53  ;;  %v16847_v58 = vld [vmem:[#allocation62_spill] sm:$0xff] }
 0xca2   : > { %v8845_v23 = vmul.f32 %v16842_v52, %v15912_v60  ;;  %v8846_v21 = vmul.f32 %v16842_v52, %v15976_v48  ;;  %v8847_v37 = vmul.f32 %v16842_v52, %v15998_v2  ;;  %v8848_v57 = vmul.f32 %v16842_v52, %v16831_v30  ;;  %v16845_v48 = vld [vmem:[#allocation61_spill] sm:$0xff] }
 0xca3   : > { %v8849_v15 = vmul.f32 %v16842_v52, %v16832_v51  ;;  %v8859_v7 = vadd.f32 %v16843_v22, %v8830_v38  ;;  %v8852_v8 = vadd.f32 %v8844_v36, %v8823_v41  ;;  %v8858_v42 = vadd.f32 %v16844_v44, %v8829_v56  ;;  %v16850_v56 = vld [vmem:[#allocation46_spill] sm:$0xff]  ;;  %v16853_v22 = vld [vmem:[#allocation55_spill] sm:$0xff] }
 0xca4   : > { %v8853_v54 = vadd.f32 %v8845_v23, %v8824_v34  ;;  %v8854_v53 = vadd.f32 %v8846_v21, %v8825_v27  ;;  %v8855_v60 = vadd.f32 %v8847_v37, %v8826_v1  ;;  %v8856_v40 = vadd.f32 %v8848_v57, %v8827_v31  ;;  %v16849_v27 = vld [vmem:[#allocation54_spill] sm:$0xff] }
 0xca5   : > { %v8857_v39 = vadd.f32 %v8849_v15, %v8828_v55  ;;  %v8873_v3 = vmul.f32 %v16845_v48, %v15883_v28  ;;  %v8874_v2 = vmul.f32 %v16845_v48, %v15916_v33  ;;  %v8875_v30 = vmul.f32 %v16845_v48, %v15978_v11  ;;  %v16848_v11 = vld [vmem:[#allocation59_spill] sm:$0xff] }
 0xca6   : > { %v8876_v51 = vmul.f32 %v16845_v48, %v16000_v47  ;;  %v8877_v43 = vmul.f32 %v16845_v48, %v16033_v63  ;;  %v8878_v4 = vmul.f32 %v16845_v48, %v16110_v32  ;;  %v8887_v5 = vadd.f32 %v16846_v35, %v8858_v42  ;;  %v16855_v42 = vld [vmem:[#allocation47_spill] sm:$0xff]  ;;  %v16857_v48 = vld [vmem:[#allocation57_spill] sm:$0xff] }
 0xca7   : > { %v8881_v0 = vadd.f32 %v8873_v3, %v8852_v8  ;;  %v8888_v28 = vadd.f32 %v16847_v58, %v8859_v7  ;;  %v8882_v49 = vadd.f32 %v8874_v2, %v8853_v54  ;;  %v8883_v50 = vadd.f32 %v8875_v30, %v8854_v53  ;;  %v10376_v2 = vld [vmem:[%s16852_s3] ss:$0 sm:$0xff]  ;;  %s16859_s3 = sld [smem:[#allocation38_spill]] }
 0xca8   : > { %v8884_v33 = vadd.f32 %v8876_v51, %v8855_v60  ;;  %v8885_v29 = vadd.f32 %v8877_v43, %v8856_v40  ;;  %v8886_v41 = vadd.f32 %v8878_v4, %v8857_v39  ;;  %v8902_v34 = vmul.f32 %v16848_v11, %v15885_v45  ;;  %v16858_v43 = vld [vmem:[#allocation49_spill] sm:$0xff] }
 0xca9   : > { %v8903_v47 = vmul.f32 %v16848_v11, %v15920_v6  ;;  %v8904_v63 = vmul.f32 %v16848_v11, %v15980_v24  ;;  %v8905_v32 = vmul.f32 %v16848_v11, %v16002_v25  ;;  %v8906_v16 = vmul.f32 %v16848_v11, %v16049_v19  ;;  %v16851_v24 = vld [vmem:[#allocation70_spill] sm:$0xff] }
 0xcaa   : > { %v8907_v38 = vmul.f32 %v16848_v11, %v16121_v62  ;;  %v8916_v1 = vadd.f32 %v16849_v27, %v8887_v5  ;;  %v8910_v31 = vadd.f32 %v8902_v34, %v8881_v0  ;;  %v8917_v52 = vadd.f32 %v16850_v56, %v8888_v28  ;;  %v10377_v5 = vld [vmem:[%s16856_s26] ss:$0 sm:$0xff]  ;;  %s16860_s26 = sld [smem:[#allocation37_spill]] }
 0xcab   : > { %v8911_v55 = vadd.f32 %v8903_v47, %v8882_v49  ;;  %v8912_v45 = vadd.f32 %v8904_v63, %v8883_v50  ;;  %v8913_v6 = vadd.f32 %v8905_v32, %v8884_v33  ;;  %v8914_v36 = vadd.f32 %v8906_v16, %v8885_v29 }
 0xcac   : > { %v8915_v23 = vadd.f32 %v8907_v38, %v8886_v41  ;;  %v8931_v21 = vmul.f32 %v16851_v24, %v15948_v13  ;;  %v8932_v25 = vmul.f32 %v16851_v24, %v15950_v9  ;;  %v8933_v19 = vmul.f32 %v16851_v24, %v15994_v12  ;;  %v16854_v13 = vld [vmem:[#allocation52_spill] sm:$0xff] }
 0xcad   : > { %v8934_v62 = vmul.f32 %v16851_v24, %v16014_v61  ;;  %v8935_v37 = vmul.f32 %v16851_v24, %v16065_v26  ;;  %v8936_v57 = vmul.f32 %v16851_v24, %v16132_v14  ;;  %v8945_v7 = vadd.f32 %v16853_v22, %v8916_v1 }
 0xcae   : > { %v8939_v15 = vadd.f32 %v8931_v21, %v8910_v31  ;;  %v8946_v8 = vadd.f32 %v16854_v13, %v8917_v52  ;;  %v8940_v54 = vadd.f32 %v8932_v25, %v8911_v55  ;;  %v8941_v9 = vadd.f32 %v8933_v19, %v8912_v45 }
 0xcaf   : > { %v8942_v53 = vadd.f32 %v8934_v62, %v8913_v6  ;;  %v8943_v44 = vadd.f32 %v8935_v37, %v8914_v36  ;;  %v8944_v12 = vadd.f32 %v8936_v57, %v8915_v23  ;;  %v8960_v61 = vmul.f32 %v16855_v42, %v15964_v10 }
 0xcb0   : > { %v8961_v26 = vmul.f32 %v16855_v42, %v15966_v20  ;;  %v8962_v14 = vmul.f32 %v16855_v42, %v15996_v17  ;;  %v8963_v60 = vmul.f32 %v16855_v42, %v16016_v59  ;;  %v8964_v40 = vmul.f32 %v16855_v42, %v16081_v46 }
 0xcb1   : > { %v8965_v39 = vmul.f32 %v16855_v42, %v16143_v18  ;;  %v8974_v3 = vadd.f32 %v16857_v48, %v8945_v7  ;;  %v8968_v10 = vadd.f32 %v8960_v61, %v8939_v15  ;;  %v8975_v20 = vadd.f32 %v16858_v43, %v8946_v8 }
 0xcb2   : > { %v8969_v30 = vadd.f32 %v8961_v26, %v8940_v54  ;;  %v8970_v51 = vadd.f32 %v8962_v14, %v8941_v9  ;;  %v8971_v4 = vadd.f32 %v8963_v60, %v8942_v53  ;;  %v8972_v0 = vadd.f32 %v8964_v40, %v8943_v44 }
 0xcb3   : > { %v8973_v17 = vadd.f32 %v8965_v39, %v8944_v12  ;;  %v8989_v35 = vmul.f32 %v10376_v2, %v8974_v3  ;;  %v8983_v59 = vmul.f32 %v10376_v2, %v8968_v10  ;;  %v8990_v46 = vmul.f32 %v10376_v2, %v8975_v20 }
 0xcb4   : > { %v8984_v58 = vmul.f32 %v10376_v2, %v8969_v30  ;;  %v8985_v28 = vmul.f32 %v10376_v2, %v8970_v51  ;;  %v8986_v49 = vmul.f32 %v10376_v2, %v8971_v4  ;;  %v8987_v50 = vmul.f32 %v10376_v2, %v8972_v0 }
 0xcb5   : > { %v8988_v18 = vmul.f32 %v10376_v2, %v8973_v17  ;;  %v16300_v33 = vadd.f32 %v10377_v5, %v8989_v35  ;;  %v8998_v29 = vadd.f32 %v10377_v5, %v8983_v59  ;;  %v9005_v16 = vadd.f32 %v10377_v5, %v8990_v46 }
 0xcb6   : > { %v8999_v41 = vadd.f32 %v10377_v5, %v8984_v58  ;;  %v9000_v11 = vadd.f32 %v10377_v5, %v8985_v28  ;;  %v9001_v34 = vadd.f32 %v10377_v5, %v8986_v49  ;;  %v9002_v47 = vadd.f32 %v10377_v5, %v8987_v50 }
 0xcb7   : > { %v9003_v63 = vadd.f32 %v10377_v5, %v8988_v18  ;;  %v10384_v32 = vmul.f32 -1.442695, %v16300_v33  ;;  %v10378_v38 = vmul.f32 -1.442695, %v8998_v29  ;;  %v10385_v56 = vmul.f32 -1.442695, %v9005_v16 }
 0xcb8   : > { %v10379_v27 = vmul.f32 -1.442695, %v8999_v41  ;;  %v10380_v1 = vmul.f32 -1.442695, %v9000_v11  ;;  %v10381_v31 = vmul.f32 -1.442695, %v9001_v34 }
 0xcb9   : > { %11952 = vpow2.f32 %v10384_v32  ;;  %v10382_v55 = vmul.f32 -1.442695, %v9002_v47  ;;  %v10383_v45 = vmul.f32 -1.442695, %v9003_v63  ;;  %v16861_v32 = vmov 0.0  }
 0xcba   : > { %11954 = vpow2.f32 %v10378_v38 }
 0xcbb   : > { %11956 = vpow2.f32 %v10379_v27  ;;  %v9091_v27 = vld [vmem:[%s16860_s26] sm:$0x1]  ;;  %s16384_s26 = sand.u32 1, %s12142_s23  }
 0xcbc   : > { %11958 = vpow2.f32 %v10380_v1  ;;  %s9463_s8 = scalar_lea.sflag [#allocation8], %s16384_s26 }
 0xcbd   : > { %11960 = vpow2.f32 %v10381_v31 }
 0xcbe   : > { %11962 = vpow2.f32 %v10382_v55 }
 0xcbf   : > { %11964 = vpow2.f32 %v10383_v45 }
 0xcc0   : > { %11966 = vpow2.f32 %v10385_v56 }
 0xcc3   : > { %v11953_v52 = vpop.eup %11952 }
 0xcc4   : > { %v11955_v6 = vpop.eup %11954  ;;  %v9036_v36 = vadd.f32 1.0, %v11953_v52 }
 0xcc5   : > { %v11957_v23 = vpop.eup %11956  ;;  %v9030_v24 = vadd.f32 1.0, %v11955_v6 }
 0xcc6   : > { %v11959_v21 = vpop.eup %11958  ;;  %v9031_v25 = vadd.f32 1.0, %v11957_v23  ;;  %11968 = vrcp.f32 %v9036_v36 }
 0xcc7   : > { %v11961_v19 = vpop.eup %11960  ;;  %v9032_v62 = vadd.f32 1.0, %v11959_v21  ;;  %11970 = vrcp.f32 %v9030_v24 }
 0xcc8   : > { %v11963_v37 = vpop.eup %11962  ;;  %v9033_v57 = vadd.f32 1.0, %v11961_v19  ;;  %11972 = vrcp.f32 %v9031_v25  ;;  %v11483_v25 = vld [vmem:[%s16862_s1] sm:$0xff]   ;;  %v11484_v19 = vld [vmem:[%s16862_s1 + $0x8] sm:$0xff]  }
 0xcc9   : > { %v11965_v15 = vpop.eup %11964  ;;  %v9034_v22 = vadd.f32 1.0, %v11963_v37  ;;  %11974 = vrcp.f32 %v9032_v62  ;;  %v11485_v62 = vld [vmem:[%s16862_s1 + $0x10] sm:$0xff]   ;;  %v9162_v37 = vld [vmem:[%s16863_s5] sm:$0x1]  ;;  %s16865_s5 = sld [smem:[#allocation41_spill]] }
 0xcca   : > { %v11967_v7 = vpop.eup %11966  ;;  %v9035_v13 = vadd.f32 1.0, %v11965_v15  ;;  %11976 = vrcp.f32 %v9033_v57 }
 0xccb   : > { %v9037_v8 = vadd.f32 1.0, %v11967_v7  ;;  %11978 = vrcp.f32 %v9034_v22 }
 0xccc   : > { %11980 = vrcp.f32 %v9035_v13 }
 0xccd   : > { %11982 = vrcp.f32 %v9037_v8 }
 0xcd0   : > { %v11969_v54 = vpop.eup %11968 }
 0xcd1   : > { %v11971_v9 = vpop.eup %11970  ;;  %v16324_v4 = vmul.f32 %v11969_v54, %v16300_v33 }
 0xcd2   : > { %v11973_v53 = vpop.eup %11972  ;;  %v16303_v44 = vmul.f32 %v11971_v9, %v8998_v29 }
 0xcd3   : > { %v11975_v12 = vpop.eup %11974  ;;  %v16305_v42 = vmul.f32 %v11973_v53, %v8999_v41  ;;  %v9073_v58 = vsel %vm8217_vm10, %v16324_v4, 0.0 }
 0xcd4   : > { %v11977_v61 = vpop.eup %11976  ;;  %v16307_v26 = vmul.f32 %v11975_v12, %v9000_v11  ;;  %v9062_v40 = vsel %vm8217_vm10, %v16303_v44, 0.0  ;;  %v16864_v12 = vld [vmem:[#allocation58_spill] sm:$0xff] }
 0xcd5   : > { %v11979_v14 = vpop.eup %11978  ;;  %v16309_v60 = vmul.f32 %v11977_v61, %v9001_v34  ;;  %v9063_v39 = vsel %vm8217_vm10, %v16305_v42, 0.0 }
 0xcd6   : > { %v11981_v48 = vpop.eup %11980  ;;  %v9064_v3 = vadd.f32 %v9063_v39, %v9062_v40  ;;  %v9065_v2 = vsel %vm8217_vm10, %v16307_v26, 0.0  ;;  %v16317_v10 = vmul.f32 %v11979_v14, %v9002_v47 }
 0xcd7   : > { %v9067_v30 = vsel %vm8217_vm10, %v16309_v60, 0.0  ;;  %v11983_v51 = vpop.eup %11982  ;;  %v16321_v20 = vmul.f32 %v11981_v48, %v9003_v63 }
 0xcd8   : > { %v9066_v43 = vadd.f32 %v9065_v2, %v9064_v3  ;;  %v16326_v17 = vmul.f32 %v11983_v51, %v9005_v16  ;;  %v9069_v35 = vsel %vm8217_vm10, %v16317_v10, 0.0  ;;  %v9161_v16 = vld [vmem:[%s16859_s3] sm:$0x7]  ;;  %s16866_s3 = sld [smem:[#allocation42_spill]] }
 0xcd9   : > { %v9071_v59 = vsel %vm8217_vm10, %v16321_v20, 0.0  ;;  %v9169_v38 = vsel %vm9167_vm14, %v9161_v16, 0 }
 0xcda   : > { %v9068_v0 = vadd.f32 %v9067_v30, %v9066_v43  ;;  %v9075_v46 = vsel %vm8217_vm10, %v16326_v17, 0.0 }
 0xcdc   : > { %v9070_v5 = vadd.f32 %v9069_v35, %v9068_v0  ;;  %v10400_v0 = vld [vmem:[%s16865_s5] ss:$0 sm:$0xff]  ;;  %s1309_s5 = scalar_lea.vmem [#allocation7], %s16384_s26 }
 0xcdd   : > { %s9488_s7 = sshll.u32 %s1309_s5, 4  ;;  %s9489_s7 = int_to_ptr.vmem [resolvable:$true] %s9488_s7 }
 0xcde   : > { %v9072_v28 = vadd.f32 %v9071_v59, %v9070_v5  ;;  %s12052_s9 = scalar_lea.vmem %s9489_s7, 16  ;;  %p12059_p0 = scmp.lt.s32.totalorder %s9489_s7, %s12057_s11 }
 0xcdf   : > { %p12053_p6 = scmp.ne.s32.totalorder %s9489_s7, %s12052_s9  ;;  %p12060_p3 = scmp.lt.s32.totalorder %s12058_s12, %s12052_s9 }
 0xce0   : > { %v9074_v49 = vadd.f32 %v9073_v58, %v9072_v28 }
 0xce1   : > { %p12054_p10 = pnand %p12053_p6, %p16875_p9  ;;  %p12061_p4 = por %p12060_p3, %p12059_p0 }
 0xce2   : > { %v9076_v50 = vadd.f32 %v9075_v46, %v9074_v49 }
 0xce3   : > { %p12055_p12 = pneg %p12054_p10 }
 0xce4   : > { %v9077_v18 = vrot.slane %v9076_v50, 4 }
 0xce5   : > { %p12062_p7 = pnand %p12061_p4, %p12055_p12 }
 0xce6   : > { %v9078_v33 = vadd.f32 %v9077_v18, %v9076_v50 }
 0xce8   : > { %v9079_v29 = vrot.slane %v9078_v33, 2 }
 0xcea   : > { %v9080_v41 = vadd.f32 %v9079_v29, %v9078_v33  ;;  %v16867_v33 = vld [vmem:[#allocation45_spill] sm:$0xff] }
 0xcec   : > { %v9081_v11 = vrot.slane %v9080_v41, 1 }
 0xcee   : > { %v9082_v34 = vadd.f32 %v9081_v11, %v9080_v41 }
 0xcf0   : > { %v9083_v47 = vmul.f32 0.015625, %v9082_v34  ;;  %v16868_v34 = vld [vmem:[#allocation76_spill] sm:$0xff] }
 0xcf2   : > { %v9084_v63 = vpack.c.bf16 %v9083_v47, %v9083_v47 }
 0xcf4   : > { %11070 = vmatmul.mubr.msk.bf16.vlgmr.msra.gmra.mrb[128].mxu1 %vm8217_vm10, %v9084_v63  ;;  %v16869_v63 = vld [vmem:[#allocation64_spill] sm:$0xff] }
 0xcf5   : > { %11075 = vmatprep.mubr.msk.bf16.mxu1 %vm12198_vm6, %v16861_v32  ;;  %11074 = vmatpush3.bf16.msra.mxu1 %v9169_v38 }
 0xcf6   : > { %11079 = vmatprep.subr.bf16.mxu1 %v11483_v25 }
 0xdc7   : > { %v9147_v1 = vpop.f32.mrb[128].mxu1 }
 0xdc8   : > { %v9148_v31 = vadd.f32 %v9147_v1, %v9091_v27  ;;  %v11071_v55 = vpop.f32.mrb[129].mxu1 }
 0xdc9   : > { %v9150_v45 = vpop.f32.mrb[130].mxu1 }
 0xdca   : > { %v10390_v56 = vmul.f32 -1.442695, %v9148_v31  ;;  %v11072_v52 = vpop.f32.mrb[131].mxu1 }
 0xdcc   : > { %11984 = vpow2.f32 %v10390_v56 }
 0xdd6   : > { %v11985_v6 = vpop.eup %11984 }
 0xdd7   : > { %v9156_v36 = vadd.f32 1.0, %v11985_v6 }
 0xdd9   : > { %11986 = vrcp.f32 %v9156_v36 }
 0xde3   : > { %v11987_v23 = vpop.eup %11986 }
 0xde4   : > { %v9159_v24 = vmul.f32 %v11987_v23, %v9148_v31  ;;  %v16870_v31 = vld [vmem:[#allocation74_spill] sm:$0xff] }
 0xde6   : > { %v9160_v21 = vpack.c.bf16 %v9159_v24, %v9159_v24 }
 0xde8   : > { %11076 = vmatmul.mubr.msk.bf16.vlgmr.msra.gmra.mrb[132].mxu1 %vm9163_vm15, %v9160_v21 }
 0xde9   : > { %11080 = vmatpush3.bf16.msra.mxu1 %v11483_v25 }
 0xdea   : > { %11081 = vmatprep.subr.bf16.mxu1 %v11484_v19 }
 0xded   : > { %11082 = vmatpush3.bf16.msra.mxu1 %v11484_v19 }
 0xdee   : > { %11083 = vmatprep.subr.bf16.mxu1 %v11485_v62 }
 0xdf1   : > { %11084 = vmatpush3.bf16.msra.mxu1 %v11485_v62 }
 0xdf2   : > { %11093 = vmatprep.subr.bf16.mxu1 %v16861_v32 }
 0xebb   : > { %v9205_v57 = vpop.f32.mrb[132].mxu1 }
 0xebc   : > { %v9206_v15 = vadd.f32 %v9205_v57, %v9162_v37  ;;  %v11077_v22 = vpop.f32.mrb[133].mxu1  ;;  %v16871_v57 = vld [vmem:[#allocation63_spill] sm:$0xff] }
 0xebd   : > { %v9208_v7 = vpop.f32.mrb[134].mxu1 }
 0xebe   : > { %v10392_v13 = vmul.f32 -1.442695, %v9206_v15  ;;  %v11078_v8 = vpop.f32.mrb[135].mxu1 }
 0xebf   : > { %v16872_v8 = vld [vmem:[#allocation60_spill] sm:$0xff] }
 0xec0   : > { %11988 = vpow2.f32 %v10392_v13 }
 0xeca   : > { %v11989_v54 = vpop.eup %11988 }
 0xecb   : > { %v9214_v9 = vadd.f32 1.0, %v11989_v54 }
 0xecd   : > { %11990 = vrcp.f32 %v9214_v9 }
 0xed7   : > { %v11991_v53 = vpop.eup %11990 }
 0xed8   : > { %v9220_v61 = vrot.slane %v11991_v53, %v16864_v12  ;;  %v16873_v53 = vld [vmem:[#allocation48_spill] sm:$0xff] }
 0xeda   : > { %v9221_v14 = vmul.f32 %v9220_v61, %v16303_v44  ;;  %v9222_v40 = vmul.f32 %v9220_v61, %v16305_v42  ;;  %v9223_v39 = vmul.f32 %v9220_v61, %v16307_v26  ;;  %v9224_v48 = vmul.f32 %v9220_v61, %v16309_v60  ;;  %v11486_v60 = vld [vmem:[%s12409_s27] sm:$0xff]  }
 0xedb   : > { %v9225_v3 = vmul.f32 %v9220_v61, %v16317_v10  ;;  %v9226_v2 = vmul.f32 %v9220_v61, %v16321_v20  ;;  %v9227_v44 = vmul.f32 %v9220_v61, %v16324_v4  ;;  %v9228_v42 = vmul.f32 %v9220_v61, %v16326_v17  ;;  %v11487_v10 = vld [vmem:[%s12409_s27 + $0x8] ss:$0 sps:$4 sm:$0xff]   ;;  %v10401_v4 = vld [vmem:[%s16866_s3] ss:$0 sm:$0xff]  ;;  %s10405_s3 = sshll.u32 %s12447_s0, 4 }
 0xedc   : > { %v9229_v30 = vpack.c.bf16 %v9222_v40, %v9221_v14  ;;  %v9230_v51 = vpack.c.bf16 %v9224_v48, %v9223_v39  ;;  %v9414_v20 = vsel %vm5706_vm7, %v11487_v10, 0  ;;  %v16874_v14 = vld [vmem:[#allocation73_spill] sm:$0xff]  ;;  %s16392_s1 = scalar_lea.hbm %s12424_s20, %s10405_s3 }
 0xedd   : > { %v9231_v43 = vpack.c.bf16 %v9226_v2, %v9225_v3  ;;  %v9232_v26 = vpack.c.bf16 %v9228_v42, %v9227_v44 }
 0xede   : > { %11085 = vmatprep.mubr.msk.bf16.mxu1 %vm8217_vm10, %v9229_v30 }
 0xedf   : > { %11086 = vmatmul.mubr.msk.bf16.vlgmr.msra.gmra.mrb[136].mxu1 %vm8217_vm10, %v9230_v51 }
 0xee0   : > { %11089 = vmatprep.mubr.msk.bf16.mxu1 %vm8217_vm10, %v9231_v43  ;;  %11094 = vmatpush3.bf16.msra.mxu1 %v11486_v60 }
 0xee1   : > { %11095 = vmatprep.subr.bf16.mxu1 %v16861_v32 }
 0xee4   : > { %11096 = vmatpush3.bf16.msra.mxu1 %v9414_v20 }
 0xee7   : > { %11090 = vmatmul.mubr.msk.bf16.gmra.mrb[140].mxu1 %vm8217_vm10, %v9232_v26 }
 0xee8   : > { %11097 = vmatprep.mubr.msk.bf16.mxu1 %vm12198_vm6, %v16861_v32 }
 0xfb2   : > { %v11087_v35 = vpop.f32.mrb[136].mxu1 }
 0xfb3   : > { %v9343_v5 = vmul.f32 %v11087_v35, %v10400_v0  ;;  %v9303_v59 = vpop.f32.mrb[137].mxu1 }
 0xfb4   : > { %v9341_v17 = vmul.f32 %v10400_v0, %v9303_v59  ;;  %v11088_v58 = vpop.f32.mrb[138].mxu1 }
 0xfb5   : > { %v9344_v28 = vmul.f32 %v11088_v58, %v10400_v0  ;;  %v9306_v46 = vpop.f32.mrb[139].mxu1  ;;  %v9358_v49 = vadd.f32 %v10401_v4, %v9343_v5 }
 0xfb6   : > { %v9356_v50 = vadd.f32 %v10401_v4, %v9341_v17  ;;  %v9342_v18 = vmul.f32 %v10400_v0, %v9306_v46 }
 0xfb7   : > { %v9359_v41 = vadd.f32 %v10401_v4, %v9344_v28  ;;  %v9366_v47 = vadd.f32 %v9358_v49, %v16868_v34 }
 0xfb8   : > { %v9364_v29 = vadd.f32 %v9356_v50, %v16867_v33  ;;  %v9357_v11 = vadd.f32 %v10401_v4, %v9342_v18 }
 0xfb9   : > { %v9367_v55 = vadd.f32 %v9359_v41, %v16870_v31  ;;  %v9375_v24 = vsel %vm8050_vm12, %v9366_v47, 0.0 }
 0xfba   : > { %v9365_v32 = vadd.f32 %v9357_v11, %v16869_v63  ;;  %v11091_v16 = vpop.f32.mrb[140].mxu1  ;;  %v9372_v1 = vsel %vm8050_vm12, %v9364_v29, 0.0 }
 0xfbb   : > { %v9347_v38 = vmul.f32 %v11091_v16, %v10400_v0  ;;  %v9319_v27 = vpop.f32.mrb[141].mxu1  ;;  %v9377_v37 = vsel %vm8050_vm12, %v9367_v55, 0.0 }
 0xfbc   : > { %v9373_v45 = vsel %vm8050_vm12, %v9365_v32, 0.0  ;;  %v9345_v56 = vmul.f32 %v10400_v0, %v9319_v27  ;;  %v11092_v52 = vpop.f32.mrb[142].mxu1 }
 0xfbd   : > { %v9374_v6 = vadd.f32 %v9373_v45, %v9372_v1  ;;  %v9348_v36 = vmul.f32 %v11092_v52, %v10400_v0  ;;  %v9322_v23 = vpop.f32.mrb[143].mxu1  ;;  %v9362_v21 = vadd.f32 %v10401_v4, %v9347_v38 }
 0xfbe   : > { %v9360_v25 = vadd.f32 %v10401_v4, %v9345_v56  ;;  %v9346_v19 = vmul.f32 %v10400_v0, %v9322_v23 }
 0xfbf   : > { %v9376_v62 = vadd.f32 %v9375_v24, %v9374_v6  ;;  %v9363_v22 = vadd.f32 %v10401_v4, %v9348_v36  ;;  %v9370_v54 = vadd.f32 %v9362_v21, %v16872_v8 }
 0xfc0   : > { %v9368_v15 = vadd.f32 %v9360_v25, %v16871_v57  ;;  %v9361_v7 = vadd.f32 %v10401_v4, %v9346_v19 }
 0xfc1   : > { %v9378_v13 = vadd.f32 %v9377_v37, %v9376_v62  ;;  %v9371_v40 = vadd.f32 %v9363_v22, %v16874_v14  ;;  %v9383_v3 = vsel %vm8050_vm12, %v9370_v54, 0.0 }
 0xfc2   : > { %v9379_v9 = vsel %vm8050_vm12, %v9368_v15, 0.0  ;;  %v9369_v12 = vadd.f32 %v9361_v7, %v16873_v53 }
 0xfc3   : > { %v9380_v61 = vadd.f32 %v9379_v9, %v9378_v13  ;;  %v9385_v30 = vsel %vm8050_vm12, %v9371_v40, 0.0 }
 0xfc4   : > { %v9381_v39 = vsel %vm8050_vm12, %v9369_v12, 0.0 }
 0xfc5   : > { %v9382_v48 = vadd.f32 %v9381_v39, %v9380_v61 }
 0xfc7   : > { %v9384_v2 = vadd.f32 %v9383_v3, %v9382_v48 }
 0xfc9   : > { %v9386_v51 = vadd.f32 %v9385_v30, %v9384_v2 }
 0xfcb   : > { %v9387_v43 = vrot.slane %v9386_v51, 4 }
 0xfcd   : > { %v9388_v44 = vadd.f32 %v9387_v43, %v9386_v51 }
 0xfcf   : > { %v9389_v42 = vrot.slane %v9388_v44, 2 }
 0xfd1   : > { %v9390_v26 = vadd.f32 %v9389_v42, %v9388_v44 }
 0xfd3   : > { %v9391_v60 = vrot.slane %v9390_v26, 1 }
 0xfd5   : > { %v9392_v10 = vadd.f32 %v9391_v60, %v9390_v26 }
 0xfd7   : > { %v9393_v20 = vmul.f32 0.015625, %v9392_v10 }
 0xfd9   : > { %v9396_v0 = vpack.c.bf16 %v9393_v20, %v9393_v20  ;;  %9395 = vst.msk [vmem:[%s1309_s5] sm:$0x1] %vm9394_vm0, %v9393_v20 }
 0xfdb   : > { %11098 = vmatmul.mubr.msk.bf16.vlgmr.msra.gmra.mrb[144].mxu1 %vm8050_vm12, %v9396_v0 }
 0xfdc   : > { %12065 = shalt.err (!%p12062_p7)
}
 0xfdd   : > { %s12066_s5 = scalar_lea.hbm %s16392_s1, 16  ;;  %s12070_s10 = scalar_lea.hbm %s12424_s20, 32 }
 0xfde   : > { %p12067_p8 = scmp.ne.s32.totalorder %s16392_s1, %s12066_s5  ;;  %p12071_p1 = scmp.lt.u32.totalorder %s16392_s1, %s12424_s20 }
 0xfdf   : > { %p12072_p2 = scmp.lt.u32.totalorder %s12070_s10, %s12066_s5  ;;  %p12074_p6 = scmp.lt.u32.totalorder %s12066_s5, %s16392_s1 }
 0xfe0   : > { %p12068_p11 = pnand %p12067_p8, %p16875_p9 }
 0xfe1   : > { %p12073_p5 = por %p12072_p2, %p12071_p1 }
 0xfe2   : > { %p12069_p13 = pneg %p12068_p11 }
 0xfe3   : > { %p12075_p10 = por %p12074_p6, %p12073_p5 }
 0xfe5   : > { %p12076_p12 = pnand %p12075_p10, %p12069_p13 }
 0xfe7   : > { %12079 = shalt.err (!%p12076_p12)
}
 0xfe8   : > { %11366 = dma.vmem_to_hbm [thread:$0]  (%p16875_p9), %s9489_s7, 16, %s16392_s1, %s9463_s8   ;;  %v9400_v35 = vld [vmem:[%s12414_s4] sm:$0x1]  ;;  %vm9456_vm1 = vcmask 73728  }
 0xfe9   : > { %s1303_s9 = scalar_lea.vmem [#allocation6], %s16384_s26  ;;  %s16413_s11 = scalar_lea.hbm %s12419_s6, %s10405_s3 }
 0xfea   : > { %s9475_s12 = sshll.u32 %s1303_s9, 4  ;;  %s9459_s8 = scalar_lea.sflag [#allocation5], %s16384_s26  ;;  %s16415_s12 = int_to_ptr.vmem [resolvable:$true] %s9475_s12 }
 0xfeb   : > { %s12080_s7 = scalar_lea.vmem %s16415_s12, 16  ;;  %s12200_s1 = smov [#allocation6]  }
 0xfec   : > { %p12081_p0 = scmp.ne.s32.totalorder %s16415_s12, %s12080_s7  ;;  %s12084_s5 = sshll.u32 %s12200_s1, 4  ;;  %s12085_s5 = int_to_ptr.vmem [resolvable:$false] %s12084_s5 }
 0xfed   : > { %s12086_s0 = scalar_lea.vmem %s12085_s5, 32  ;;  %p12087_p7 = scmp.lt.s32.totalorder %s16415_s12, %s12085_s5 }
 0xfee   : > { %p12082_p3 = pnand %p12081_p0, %p16875_p9  ;;  %p12088_p8 = scmp.lt.s32.totalorder %s12086_s0, %s12080_s7 }
 0xff0   : > { %p12083_p4 = pneg %p12082_p3  ;;  %p12089_p11 = por %p12088_p8, %p12087_p7 }
 0xff2   : > { %p12090_p13 = pnand %p12089_p11, %p12083_p4 }
0x10ae   : > { %v9450_v5 = vpop.f32.mrb[144].mxu1 }
0x10af   : > { %v9451_v4 = vadd.f32 %v9450_v5, %v9400_v35  ;;  %v11099_v59 = vpop.f32.mrb[145].mxu1 }
0x10b0   : > { %v9453_v17 = vpop.f32.mrb[146].mxu1 }
0x10b1   : > { %v11100_v58 = vpop.f32.mrb[147].mxu1  ;;  %9457 = vst.msk [vmem:[%s1303_s9] sm:$0x1] %vm9456_vm1, %v9451_v4 }
0x10b2   : > { %12093 = shalt.err (!%p12090_p13)
}
0x10b3   : > { %s12094_s26 = scalar_lea.hbm %s16413_s11, 16  ;;  %s12098_s3 = scalar_lea.hbm %s12419_s6, 32 }
0x10b4   : > { %p12095_p1 = scmp.ne.s32.totalorder %s16413_s11, %s12094_s26  ;;  %p12099_p6 = scmp.lt.u32.totalorder %s16413_s11, %s12419_s6 }
0x10b5   : > { %p12100_p10 = scmp.lt.u32.totalorder %s12098_s3, %s12094_s26  ;;  %p12102_p0 = scmp.lt.u32.totalorder %s12094_s26, %s16413_s11 }
0x10b6   : > { %p12096_p2 = pnand %p12095_p1, %p16875_p9 }
0x10b7   : > { %p12101_p12 = por %p12100_p10, %p12099_p6 }
0x10b8   : > { %p12097_p5 = pneg %p12096_p2 }
0x10b9   : > { %p12103_p3 = por %p12102_p0, %p12101_p12 }
0x10bb   : > { %p12104_p4 = pnand %p12103_p3, %p12097_p5 }
0x10bd   : > { %12107 = shalt.err (!%p12104_p4)
}
0x10be   : > { %11365 = dma.vmem_to_hbm [thread:$0]  (%p16875_p9), %s16415_s12, 16, %s16413_s11, %s9459_s8  }
0x10bf PF: > { %p11382_p7 = scmp.ge.s32.totalorder %s12150_s28, 2  ;;  %s9500_s10 = sand.u32 1, %s12138_s22  }
0x10c0   : > { %p16876_p8 = scmp.ne.s32.totalorder %s16595_s16, 0  ;;  %s9501_s9 = scalar_lea.sflag [#allocation5], %s9500_s10 }
0x10c2   : > { %p11374_p11 = pnand %p11382_p7, %p16876_p8 }
0x10c4   : > { %12129 = dma.done.wait (!%p11374_p11), %s9501_s9, 16  }
0x10c5   : > { %12131 = vsyncadd (!%p11374_p11), %s9501_s9, 4294967280  ;;  %s9509_s7 = scalar_lea.sflag [#allocation8], %s9500_s10 }
0x10c6   : > { %12133 = dma.done.wait (!%p11374_p11), %s9509_s7, 16  }
0x10c7   : > { %12135 = vsyncadd (!%p11374_p11), %s9509_s7, 4294967280  ;;  %s16877_s15 = sld [smem:[#allocation43_spill]]  ;;  %s16878_s26 = sld [smem:[#allocation44_spill]] }
0x10c8   : > { %p102_p9 = scmp.ge.s32.totalorder %s12451_s2, 4   ;;  %s16879_s22 = smov %s12142_s23 }
0x10c9   : > { %s16881_s28 = smov %s12451_s2 }
0x10ca   :  { %104 = sbr.rel (!%p102_p9) target bundleno = 95 (0x5f), region = 489 }
0x10cd   : > { %s16880_s23 = smov %s16877_s15 }
0x10d1   :  { %9513 = vsyncpa [#allocation4], 1 }
0x10d2   :  { %9515 = vsyncpa [#allocation4 + $0x1], 1 }
0x10d3   :  { %9516 = vsyncpa [#allocation5], 1 }
0x10d4   :  { %9518 = vsyncpa [#allocation5 + $0x1], 1 }
0x10d5   :  { %9519 = vsyncpa [#allocation8], 1 }
0x10d6   :  { %9521 = vsyncpa [#allocation8 + $0x1], 1 }

</bundles_post_ra>
